<compile_context>
chip_gen: v7x
topology: tpu7x:2x2x1
jax: 0.10.0
libtpu: 0.0.40
codegen_flags: <defaults>
</compile_context>

<pallas_src>
import functools
import math

import jax
import jax.numpy as jnp
from jax.experimental import pallas as pl
from jax.experimental.pallas import tpu as pltpu


LAYER_IDS = [2, 7, 12, 21, 30]          # torchvision vgg16.features tap points


def build_vgg16_cfg():
    cfg = [64, 64, "M", 128, 128, "M", 256, 256, 256, "M",
           512, 512, 512, "M", 512, 512, 512, "M"]
    layers = []
    c_in = 3
    for v in cfg:
        if v == "M":
            layers.append(("pool",))
        else:
            layers.append(("conv", c_in, v))
            layers.append(("relu",))
            c_in = v
    return layers


VGG16_FEATURES = build_vgg16_cfg()      # 31 entries, indices 0..30


# ---------------------------- Pallas kernels ----------------------------

def _conv_kernel(xp_ref, w_ref, b_ref, o_ref, *scratch,
                 wp, m, tci, apply_relu, use_stage, multi_k):
    """One (batch, Cout-tile, Cin-tile) step of a 3x3 same-pad conv.

    xp_ref : (1, P, TCI)            bf16 spatially padded input, P flat rows
    w_ref  : (1, 9*TCI, TCO) bf16   [stage path: K-packed taps]     or
             (9, TCI, TCO)   bf16   [fallback path: per-tap weights]
    b_ref  : (1, TCO)        f32
    o_ref  : (1, M, TCO)     bf16   flat output, M = H*(W+2)
    scratch: [acc (M,TCO) f32 if multi_k] + [stage (M,9*TCI) bf16 if use_stage]
    """
    si = 0
    acc_ref = None
    if multi_k:
        acc_ref = scratch[si]
        si += 1
    stage_ref = scratch[si] if use_stage else None

    if use_stage:
        # In-kernel im2col: 9 shifted bf16 slices -> lane-aligned stage buffer,
        # then a single K=9*tci MXU dot (accumulation stays inside the MXU).
        for t in range(9):
            shift = (t // 3) * wp + (t % 3)
            stage_ref[:, t * tci:(t + 1) * tci] = xp_ref[0, pl.ds(shift, m), :]
        contrib = jnp.dot(stage_ref[...], w_ref[0],
                          preferred_element_type=jnp.float32)
    else:
        # Small-Cin fallback: 9 shifted dots (K = tci each).
        contrib = None
        for t in range(9):
            shift = (t // 3) * wp + (t % 3)
            part = jnp.dot(xp_ref[0, pl.ds(shift, m), :], w_ref[t],
                           preferred_element_type=jnp.float32)
            contrib = part if contrib is None else contrib + part

    if multi_k:
        k = pl.program_id(2)

        @pl.when(k == 0)
        def _first():
            acc_ref[...] = contrib

        @pl.when(k != 0)
        def _accum():
            acc_ref[...] = acc_ref[...] + contrib

        @pl.when(k == pl.num_programs(2) - 1)
        def _finalize():
            y = acc_ref[...] + b_ref[...]
            if apply_relu:
                y = jnp.maximum(y, 0.0)
            o_ref[0] = y.astype(o_ref.dtype)
    else:
        y = contrib + b_ref[...]
        if apply_relu:
            y = jnp.maximum(y, 0.0)
        o_ref[0] = y.astype(o_ref.dtype)


def _pool_kernel(x_ref, o_ref, *, clamp_zero):
    """2x2 max pool, whole-block.  x_ref: (1, TH, W//2, 2C) -> o_ref: (1, TH//2, W//2, C).

    W-pairing comes from the wrapper's free (..,W,C)->(..,W//2,2C) reshape;
    H-pairing via a free leading-dim split + one jnp.maximum."""
    c = o_ref.shape[-1]
    th = x_ref.shape[1]
    wo = x_ref.shape[2]
    x = x_ref[0].reshape(th // 2, 2, wo, 2 * c)          # free leading-dim split
    hx = jnp.maximum(x[:, 0], x[:, 1])                   # H-pair max
    r = jnp.maximum(hx[..., :c], hx[..., c:])            # W-pair max
    if clamp_zero:                                       # fused ReLU (commutes with max)
        r = jnp.maximum(r, 0.0)
    o_ref[0] = r


def _abs_mean_kernel(x_ref, o_ref, acc_ref, *, inv_d):
    """Chunked per-sample mean(|x[0]-x[1]|).  x_ref block: (2, N, TR, L)."""
    @pl.when(pl.program_id(0) == 0)
    def _init():
        acc_ref[...] = jnp.zeros_like(acc_ref)

    a = x_ref[0].astype(jnp.float32)                     # (N, TR, L)
    b = x_ref[1].astype(jnp.float32)
    d = jnp.abs(a - b)
    s = jnp.sum(jnp.sum(d, axis=-1), axis=-1)            # (N,)
    acc_ref[...] += s[:, None]

    @pl.when(pl.program_id(0) == pl.num_programs(0) - 1)
    def _finalize():
        o_ref[...] = acc_ref[...] * inv_d


# ---------------------------- wrappers ----------------------------

def conv3x3(x, w_oihw, b, *, apply_relu, relu_input=False):
    """VGG conv: 3x3, stride 1, pad 1.  x: (B,H,W,Cin).  Returns (B,H,W,Cout) bf16.

    relu_input applies a pending ReLU from the previous (tapped) conv; it fuses
    with the pad + bf16 cast in XLA, so no extra memory pass."""
    B, H, W, Cin = x.shape
    Cout = w_oihw.shape[0]
    wp = W + 2
    p_rows = (H + 3) * wp       # 1 top pad + 2 bottom pad/slack rows, flattened
    m = H * wp                  # flat output rows (incl. 2 junk cols per image row)

    xr = jnp.maximum(x, 0) if relu_input else x
    xp = jnp.pad(xr.astype(jnp.bfloat16), ((0, 0), (1, 2), (1, 1), (0, 0)))
    xp = xp.reshape(B, p_rows, Cin)                      # bf16 slab in HBM

    use_stage = (Cin % 128 == 0)
    if use_stage:
        tci = 256 if Cin % 256 == 0 else 128
    else:
        tci = Cin
    if Cout % 256 == 0:
        tco = 256
    elif Cout % 128 == 0:
        tco = 128
    else:
        tco = Cout
    n_ci, n_co = Cin // tci, Cout // tco
    multi_k = n_ci > 1

    w9 = jnp.transpose(w_oihw, (2, 3, 1, 0)).reshape(9, Cin, Cout)
    w9 = w9.astype(jnp.bfloat16)
    b2 = b.reshape(1, Cout).astype(jnp.float32)

    if use_stage:
        # Pack taps along K so each Cin-tile block is (9*tci, Cout): rows ordered
        # (tap, ci) to match the in-kernel stage buffer column ordering.
        w_pk = (w9.reshape(9, n_ci, tci, Cout).transpose(1, 0, 2, 3)
                  .reshape(n_ci, 9 * tci, Cout))
        w_spec = pl.BlockSpec((1, 9 * tci, tco), lambda n, j, k: (k, 0, j))
    else:
        w_pk = w9
        w_spec = pl.BlockSpec((9, tci, tco), lambda n, j, k: (0, k, j))

    scratch = []
    if multi_k:
        scratch.append(pltpu.VMEM((m, tco), jnp.float32))
    if use_stage:
        scratch.append(pltpu.VMEM((m, 9 * tci), jnp.bfloat16))

    out_flat = pl.pallas_call(
        functools.partial(_conv_kernel, wp=wp, m=m, tci=tci,
                          apply_relu=apply_relu, use_stage=use_stage,
                          multi_k=multi_k),
        out_shape=jax.ShapeDtypeStruct((B, m, Cout), jnp.bfloat16),
        grid=(B, n_co, n_ci),
        in_specs=[
            pl.BlockSpec((1, p_rows, tci), lambda n, j, k: (n, 0, k)),
            w_spec,
            pl.BlockSpec((1, tco), lambda n, j, k: (0, j)),
        ],
        out_specs=pl.BlockSpec((1, m, tco), lambda n, j, k: (n, 0, j)),
        scratch_shapes=scratch,
        compiler_params=pltpu.CompilerParams(
            dimension_semantics=("parallel", "parallel", "arbitrary")),
    )(xp, w_pk, b2)

    # Drop the 2 junk columns per row produced by the flat-shift formulation.
    # TODO(synk): keep the flat padded layout between same-resolution convs
    #             (zero junk cols in the epilogue) to save this pass + re-pad.
    return out_flat.reshape(B, H, wp, Cout)[:, :, :W, :]


def _largest_even_divisor(n, cap):
    for t in range(min(n, cap), 1, -1):
        if n % t == 0 and t % 2 == 0:
            return t
    return n


def maxpool2x2(x, *, clamp_zero=False):
    B, H, W, C = x.shape
    assert H % 2 == 0 and W % 2 == 0
    ho, wo = H // 2, W // 2
    xr = x.reshape(B, H, wo, 2 * C)          # free reshape: pairs W-neighbours
    th = _largest_even_divisor(H, 16)
    return pl.pallas_call(
        functools.partial(_pool_kernel, clamp_zero=clamp_zero),
        out_shape=jax.ShapeDtypeStruct((B, ho, wo, C), x.dtype),
        grid=(B, H // th),
        in_specs=[pl.BlockSpec((1, th, wo, 2 * C), lambda n, r: (n, r, 0, 0))],
        out_specs=pl.BlockSpec((1, th // 2, wo, C), lambda n, r: (n, r, 0, 0)),
        compiler_params=pltpu.CompilerParams(
            dimension_semantics=("parallel", "parallel")),
    )(xr)


def _factor_rows_lanes(d_tot):
    """Split a per-sample feature length into (rows, lane) tiles that fill vregs."""
    for lane in (4096, 2048, 1024, 512, 256, 128):       # prefer rows % 8 == 0
        if d_tot % lane == 0 and (d_tot // lane) % 8 == 0:
            return d_tot // lane, lane
    for lane in (128, 256, 512, 1024, 2048, 4096):       # else maximize rows
        if d_tot % lane == 0:
            return d_tot // lane, lane
    return 1, d_tot


def per_sample_abs_mean_pair(x):
    """x has batch 2N (I1-half then I2-half). Returns (N,) mean|x[:N] - x[N:]|."""
    two_n = x.shape[0]
    n = two_n // 2
    d_tot = math.prod(x.shape[1:])
    rows, lane = _factor_rows_lanes(d_tot)
    tr = rows
    if rows > 512:
        for t in (512, 256, 128, 64, 32, 16, 8):
            if rows % t == 0:
                tr = t
                break
    n_r = rows // tr
    x4 = x.reshape(2, n, rows, lane)
    out = pl.pallas_call(
        functools.partial(_abs_mean_kernel, inv_d=1.0 / d_tot),
        out_shape=jax.ShapeDtypeStruct((n, 1), jnp.float32),
        grid=(n_r,),
        in_specs=[pl.BlockSpec((2, n, tr, lane), lambda r: (0, 0, r, 0))],
        out_specs=pl.BlockSpec((n, 1), lambda r: (0, 0)),
        scratch_shapes=[pltpu.VMEM((n, 1), jnp.float32)],
        compiler_params=pltpu.CompilerParams(dimension_semantics=("arbitrary",)),
    )(x4)
    return out[:, 0]


# ---------------------------- model ----------------------------

def init_vgg_params(levels, key):
    layer_ids = LAYER_IDS[:levels]
    id_max = layer_ids[-1] + 1
    params = {}
    for i in range(id_max):
        spec = VGG16_FEATURES[i]
        if spec[0] != "conv":
            continue
        _, cin, cout = spec
        kw, kb = jax.random.split(jax.random.fold_in(key, i))
        w = jax.random.normal(kw, (cout, cin, 3, 3), jnp.float32) / math.sqrt(9 * cin)
        b = 0.01 * jax.random.normal(kb, (cout,), jnp.float32)
        params[i] = (w, b)
    return params


def vgg_features(x_nhwc, params, levels):
    """_netVGGFeatures.main: run features[0..id_max); taps are the *pre-ReLU*
    conv outputs (and the raw pool output for layer 30), as in the module.
    ReLUs are never materialised: they are fused into the conv epilogue, the
    following max-pool, or the next conv's wrapper-side cast."""
    layer_ids = LAYER_IDS[:levels]
    id_max = layer_ids[-1] + 1
    feats = []
    z = x_nhwc
    pending_relu = False        # z is a tapped conv output whose ReLU is still due
    for i in range(id_max):
        kind = VGG16_FEATURES[i][0]
        if kind == "conv":
            w, b = params[i]
            tapped = i in layer_ids
            fuse_own_relu = (not tapped) and (i + 1 < id_max)
            z = conv3x3(z, w, b, apply_relu=fuse_own_relu, relu_input=pending_relu)
            pending_relu = False
            if tapped:
                feats.append(z)                       # pre-ReLU tap
                pending_relu = (i + 1 < id_max)       # its ReLU is applied downstream
        elif kind == "relu":
            # Either already fused into the conv epilogue, or deferred to the
            # next consumer (conv relu_input / pool clamp_zero).  ReLUs are
            # never tap points for the valid layer_ids.
            pass
        else:  # pool
            z = maxpool2x2(z, clamp_zero=pending_relu)
            pending_relu = False
            if i in layer_ids:
                feats.append(z)
    return feats


def vgg_distance(I1, I2, params, levels):
    """_VGGDistance.forward.  I1, I2: NCHW float32.  Returns per-sample loss (N,)."""
    x = jnp.concatenate([I1, I2], axis=0)            # (2N,C,H,W): one feature pass
    x_nhwc = jnp.transpose(x, (0, 2, 3, 1))          # NCHW -> NHWC (glue)
    feats = vgg_features(x_nhwc, params, levels)
    loss = per_sample_abs_mean_pair(x)               # pixel term on raw f32 inputs
    for f in feats:
        loss = loss + per_sample_abs_mean_pair(f)
    return loss


# ---------------------------- pure-JAX reference ----------------------------

def _vgg_features_ref(x_nhwc, params, levels):
    layer_ids = LAYER_IDS[:levels]
    id_max = layer_ids[-1] + 1
    feats = []
    z = x_nhwc
    for i in range(id_max):
        kind = VGG16_FEATURES[i][0]
        if kind == "conv":
            w, b = params[i]
            w_hwio = jnp.transpose(w, (2, 3, 1, 0))
            z = jax.lax.conv_general_dilated(
                z, w_hwio, (1, 1), ((1, 1), (1, 1)),
                dimension_numbers=("NHWC", "HWIO", "NHWC")) + b.reshape(1, 1, 1, -1)
        elif kind == "relu":
            z = jnp.maximum(z, 0.0)
        else:
            z = jax.lax.reduce_window(z, -jnp.inf, jax.lax.max,
                                      (1, 2, 2, 1), (1, 2, 2, 1), "VALID")
        if i in layer_ids:
            feats.append(z)
    return feats


def vgg_distance_ref(I1, I2, params, levels):
    b_sz = I1.shape[0]
    x1 = jnp.transpose(I1, (0, 2, 3, 1))
    x2 = jnp.transpose(I2, (0, 2, 3, 1))
    f1 = _vgg_features_ref(x1, params, levels)
    f2 = _vgg_features_ref(x2, params, levels)
    loss = jnp.mean(jnp.abs(I1 - I2).reshape(b_sz, -1), axis=1)
    for i in range(levels):
        loss = loss + jnp.mean(jnp.abs(f1[i] - f2[i]).reshape(b_sz, -1), axis=1)
    return loss


# ---------------------------- main ----------------------------

if __name__ == "__main__":
    LEVELS = 3                      # taps at features[2], [7], [12]
    N, C, H, W = 2, 3, 16, 16

    key = jax.random.PRNGKey(0)
    k1, k2 = jax.random.split(key)
    I1 = jax.random.normal(k1, (N, C, H, W), jnp.float32)
    I2 = jax.random.normal(k2, (N, C, H, W), jnp.float32)

    params = init_vgg_params(LEVELS, jax.random.PRNGKey(0))

    fwd = jax.jit(functools.partial(vgg_distance, params=params, levels=LEVELS))
    loss = jax.block_until_ready(fwd(I1, I2))

    ref = jax.block_until_ready(vgg_distance_ref(I1, I2, params, LEVELS))

    assert loss.shape == (N,)
    assert bool(jnp.all(jnp.isfinite(loss)))
    # bf16 MXU path + bf16 activations vs f32 reference -> loose tolerance
    assert bool(jnp.allclose(loss, ref, rtol=5e-2, atol=5e-2)), (loss, ref)

    print("KERNEL_OK")
</pallas_src>

<mosaic_0001>
module attributes {stable_mosaic.version = 11 : i64} {
  func.func @_abs_mean_kernel(%arg0: i32, %arg1: memref<2x2x6x128xf32, #tpu.memory_space<vmem>>, %arg2: memref<2x1xf32, #tpu.memory_space<vmem>>, %arg3: memref<2x1xf32, #tpu.memory_space<vmem>>) attributes {dimension_semantics = [#tpu.dimension_semantics<arbitrary>], iteration_bounds = array<i64: 1>, scalar_prefetch = 0 : i64, scratch_operands = 1 : i64, tpu.core_type = #tpu.core_type<tc>, window_params = [{transform_indices = @transform_0, window_bounds = array<i64: 2, 2, 6, 128>}, {pipeline_mode = #tpu.pipeline_mode<synchronous>, transform_indices = @transform_1, window_bounds = array<i64: 2, 1>}]} {
    %c0_i32 = arith.constant 0 : i32
    %0 = arith.cmpi eq, %arg0, %c0_i32 : i32
    %1 = arith.extui %0 : i1 to i32
    %c0_i32_0 = arith.constant 0 : i32
    %2 = arith.cmpi ne, %1, %c0_i32_0 : i32
    scf.if %2 {
      %cst_14 = arith.constant 0.000000e+00 : f32
      %18 = vector.broadcast %cst_14 : f32 to vector<2x1xf32>
      %c0_15 = arith.constant 0 : index
      %c0_16 = arith.constant 0 : index
      %19 = vector.load %arg3[%c0_15, %c0_16] : memref<2x1xf32, #tpu.memory_space<vmem>>, vector<2x1xf32>
      tpu.vector_store %arg3[%c0_15, %c0_16], %18 {strides = array<i32>} : memref<2x1xf32, #tpu.memory_space<vmem>>, vector<2x1xf32>,
    } else {
    }
    %c0 = arith.constant 0 : index
    %c0_1 = arith.constant 0 : index
    %c0_2 = arith.constant 0 : index
    %c0_3 = arith.constant 0 : index
    %3 = vector.load %arg1[%c0, %c0_1, %c0_2, %c0_3] : memref<2x2x6x128xf32, #tpu.memory_space<vmem>>, vector<1x2x6x128xf32>
    %4 = vector.shape_cast %3 : vector<1x2x6x128xf32> to vector<2x6x128xf32>
    %c1 = arith.constant 1 : index
    %c0_4 = arith.constant 0 : index
    %c0_5 = arith.constant 0 : index
    %c0_6 = arith.constant 0 : index
    %5 = vector.load %arg1[%c1, %c0_4, %c0_5, %c0_6] : memref<2x2x6x128xf32, #tpu.memory_space<vmem>>, vector<1x2x6x128xf32>
    %6 = vector.shape_cast %5 : vector<1x2x6x128xf32> to vector<2x6x128xf32>
    %7 = arith.subf %4, %6 : vector<2x6x128xf32>
    %8 = math.absf %7 : vector<2x6x128xf32>
    %cst = arith.constant dense<0.000000e+00> : vector<2x6xf32>
    %9 = vector.multi_reduction <add>, %8, %cst [2] : vector<2x6x128xf32> to vector<2x6xf32>
    %cst_7 = arith.constant dense<0.000000e+00> : vector<2xf32>
    %10 = vector.multi_reduction <add>, %9, %cst_7 [1] : vector<2x6xf32> to vector<2xf32>
    %c0_8 = arith.constant 0 : index
    %c0_9 = arith.constant 0 : index
    %11 = vector.load %arg3[%c0_8, %c0_9] : memref<2x1xf32, #tpu.memory_space<vmem>>, vector<2x1xf32>
    %12 = vector.shape_cast %10 : vector<2xf32> to vector<2x1xf32>
    %13 = arith.addf %11, %12 : vector<2x1xf32>
    %c0_10 = arith.constant 0 : index
    %c0_11 = arith.constant 0 : index
    %14 = vector.load %arg3[%c0_10, %c0_11] : memref<2x1xf32, #tpu.memory_space<vmem>>, vector<2x1xf32>
    tpu.vector_store %arg3[%c0_10, %c0_11], %13 {strides = array<i32>} : memref<2x1xf32, #tpu.memory_space<vmem>>, vector<2x1xf32>,
    %c0_i32_12 = arith.constant 0 : i32
    %15 = arith.cmpi eq, %arg0, %c0_i32_12 : i32
    %16 = arith.extui %15 : i1 to i32
    %c0_i32_13 = arith.constant 0 : i32
    %17 = arith.cmpi ne, %16, %c0_i32_13 : i32
    scf.if %17 {
      %c0_14 = arith.constant 0 : index
      %c0_15 = arith.constant 0 : index
      %18 = vector.load %arg3[%c0_14, %c0_15] : memref<2x1xf32, #tpu.memory_space<vmem>>, vector<2x1xf32>
      %cst_16 = arith.constant 0.00130208337 : f32
      %19 = vector.broadcast %cst_16 : f32 to vector<2x1xf32>
      %20 = arith.mulf %18, %19 : vector<2x1xf32>
      %c0_17 = arith.constant 0 : index
      %c0_18 = arith.constant 0 : index
      %21 = vector.load %arg2[%c0_17, %c0_18] : memref<2x1xf32, #tpu.memory_space<vmem>>, vector<2x1xf32>
      tpu.vector_store %arg2[%c0_17, %c0_18], %20 {strides = array<i32>} : memref<2x1xf32, #tpu.memory_space<vmem>>, vector<2x1xf32>,
    } else {
    }
    return
  }
  func.func @transform_0(%arg0: i32) -> (i32, i32, i32, i32) {
    %c0_i32 = arith.constant 0 : i32
    %c0_i32_0 = arith.constant 0 : i32
    %c0_i32_1 = arith.constant 0 : i32
    %c0_i32_2 = arith.constant 0 : i32
    return %c0_i32, %c0_i32_0, %arg0, %c0_i32_1 : i32, i32, i32, i32
  }
  func.func @transform_1(%arg0: i32) -> (i32, i32) {
    %c0_i32 = arith.constant 0 : i32
    %c0_i32_0 = arith.constant 0 : i32
    %c0_i32_1 = arith.constant 0 : i32
    return %c0_i32, %c0_i32_0 : i32, i32
  }
}

module attributes {stable_mosaic.version = 11 : i64} {
  func.func @_conv_kernel(%arg0: i32, %arg1: i32, %arg2: i32, %arg3: memref<1x342x3xbf16, #tpu.memory_space<vmem>>, %arg4: memref<9x3x64xbf16, #tpu.memory_space<vmem>>, %arg5: memref<1x64xf32, #tpu.memory_space<vmem>>, %arg6: memref<1x288x64xbf16, #tpu.memory_space<vmem>>) attributes {dimension_semantics = [#tpu.dimension_semantics<parallel>, #tpu.dimension_semantics<parallel>, #tpu.dimension_semantics<arbitrary>], iteration_bounds = array<i64: 4, 1, 1>, scalar_prefetch = 0 : i64, scratch_operands = 0 : i64, tpu.core_type = #tpu.core_type<tc>, window_params = [{transform_indices = @transform_0, window_bounds = array<i64: 1, 342, 3>}, {transform_indices = @transform_1, window_bounds = array<i64: 9, 3, 64>}, {transform_indices = @transform_2, window_bounds = array<i64: 1, 64>}, {transform_indices = @transform_3, window_bounds = array<i64: 1, 288, 64>}]} {
    %c0 = arith.constant 0 : index
    %c0_0 = arith.constant 0 : index
    %c0_1 = arith.constant 0 : index
    %0 = vector.load %arg3[%c0, %c0_0, %c0_1] : memref<1x342x3xbf16, #tpu.memory_space<vmem>>, vector<1x288x3xbf16>
    %1 = vector.shape_cast %0 : vector<1x288x3xbf16> to vector<288x3xbf16>
    %c0_2 = arith.constant 0 : index
    %c0_3 = arith.constant 0 : index
    %c0_4 = arith.constant 0 : index
    %2 = vector.load %arg4[%c0_2, %c0_3, %c0_4] : memref<9x3x64xbf16, #tpu.memory_space<vmem>>, vector<1x3x64xbf16>
    %3 = vector.shape_cast %2 : vector<1x3x64xbf16> to vector<3x64xbf16>
    %cst = arith.constant dense<0.000000e+00> : vector<288x64xf32>
    %4 = tpu.matmul %1, %3, %cst {dimension_numbers = #tpu.dot_dimension_numbers<[1], [0], [0], [1], [0, 0, 1, 1], [], []>} : vector<288x3xbf16>, vector<3x64xbf16>, vector<288x64xf32> -> vector<288x64xf32>
    %c0_5 = arith.constant 0 : index
    %c1 = arith.constant 1 : index
    %c0_6 = arith.constant 0 : index
    %5 = vector.load %arg3[%c0_5, %c1, %c0_6] : memref<1x342x3xbf16, #tpu.memory_space<vmem>>, vector<1x288x3xbf16>
    %6 = vector.shape_cast %5 : vector<1x288x3xbf16> to vector<288x3xbf16>
    %c1_7 = arith.constant 1 : index
    %c0_8 = arith.constant 0 : index
    %c0_9 = arith.constant 0 : index
    %7 = vector.load %arg4[%c1_7, %c0_8, %c0_9] : memref<9x3x64xbf16, #tpu.memory_space<vmem>>, vector<1x3x64xbf16>
    %8 = vector.shape_cast %7 : vector<1x3x64xbf16> to vector<3x64xbf16>
    %cst_10 = arith.constant dense<0.000000e+00> : vector<288x64xf32>
    %9 = tpu.matmul %6, %8, %cst_10 {dimension_numbers = #tpu.dot_dimension_numbers<[1], [0], [0], [1], [0, 0, 1, 1], [], []>} : vector<288x3xbf16>, vector<3x64xbf16>, vector<288x64xf32> -> vector<288x64xf32>
    %10 = arith.addf %4, %9 : vector<288x64xf32>
    %c0_11 = arith.constant 0 : index
    %c2 = arith.constant 2 : index
    %c0_12 = arith.constant 0 : index
    %11 = vector.load %arg3[%c0_11, %c2, %c0_12] : memref<1x342x3xbf16, #tpu.memory_space<vmem>>, vector<1x288x3xbf16>
    %12 = vector.shape_cast %11 : vector<1x288x3xbf16> to vector<288x3xbf16>
    %c2_13 = arith.constant 2 : index
    %c0_14 = arith.constant 0 : index
    %c0_15 = arith.constant 0 : index
    %13 = vector.load %arg4[%c2_13, %c0_14, %c0_15] : memref<9x3x64xbf16, #tpu.memory_space<vmem>>, vector<1x3x64xbf16>
    %14 = vector.shape_cast %13 : vector<1x3x64xbf16> to vector<3x64xbf16>
    %cst_16 = arith.constant dense<0.000000e+00> : vector<288x64xf32>
    %15 = tpu.matmul %12, %14, %cst_16 {dimension_numbers = #tpu.dot_dimension_numbers<[1], [0], [0], [1], [0, 0, 1, 1], [], []>} : vector<288x3xbf16>, vector<3x64xbf16>, vector<288x64xf32> -> vector<288x64xf32>
    %16 = arith.addf %10, %15 : vector<288x64xf32>
    %c0_17 = arith.constant 0 : index
    %c18 = arith.constant 18 : index
    %c0_18 = arith.constant 0 : index
    %17 = vector.load %arg3[%c0_17, %c18, %c0_18] : memref<1x342x3xbf16, #tpu.memory_space<vmem>>, vector<1x288x3xbf16>
    %18 = vector.shape_cast %17 : vector<1x288x3xbf16> to vector<288x3xbf16>
    %c3 = arith.constant 3 : index
    %c0_19 = arith.constant 0 : index
    %c0_20 = arith.constant 0 : index
    %19 = vector.load %arg4[%c3, %c0_19, %c0_20] : memref<9x3x64xbf16, #tpu.memory_space<vmem>>, vector<1x3x64xbf16>
    %20 = vector.shape_cast %19 : vector<1x3x64xbf16> to vector<3x64xbf16>
    %cst_21 = arith.constant dense<0.000000e+00> : vector<288x64xf32>
    %21 = tpu.matmul %18, %20, %cst_21 {dimension_numbers = #tpu.dot_dimension_numbers<[1], [0], [0], [1], [0, 0, 1, 1], [], []>} : vector<288x3xbf16>, vector<3x64xbf16>, vector<288x64xf32> -> vector<288x64xf32>
    %22 = arith.addf %16, %21 : vector<288x64xf32>
    %c0_22 = arith.constant 0 : index
    %c19 = arith.constant 19 : index
    %c0_23 = arith.constant 0 : index
    %23 = vector.load %arg3[%c0_22, %c19, %c0_23] : memref<1x342x3xbf16, #tpu.memory_space<vmem>>, vector<1x288x3xbf16>
    %24 = vector.shape_cast %23 : vector<1x288x3xbf16> to vector<288x3xbf16>
    %c4 = arith.constant 4 : index
    %c0_24 = arith.constant 0 : index
    %c0_25 = arith.constant 0 : index
    %25 = vector.load %arg4[%c4, %c0_24, %c0_25] : memref<9x3x64xbf16, #tpu.memory_space<vmem>>, vector<1x3x64xbf16>
    %26 = vector.shape_cast %25 : vector<1x3x64xbf16> to vector<3x64xbf16>
    %cst_26 = arith.constant dense<0.000000e+00> : vector<288x64xf32>
    %27 = tpu.matmul %24, %26, %cst_26 {dimension_numbers = #tpu.dot_dimension_numbers<[1], [0], [0], [1], [0, 0, 1, 1], [], []>} : vector<288x3xbf16>, vector<3x64xbf16>, vector<288x64xf32> -> vector<288x64xf32>
    %28 = arith.addf %22, %27 : vector<288x64xf32>
    %c0_27 = arith.constant 0 : index
    %c20 = arith.constant 20 : index
    %c0_28 = arith.constant 0 : index
    %29 = vector.load %arg3[%c0_27, %c20, %c0_28] : memref<1x342x3xbf16, #tpu.memory_space<vmem>>, vector<1x288x3xbf16>
    %30 = vector.shape_cast %29 : vector<1x288x3xbf16> to vector<288x3xbf16>
    %c5 = arith.constant 5 : index
    %c0_29 = arith.constant 0 : index
    %c0_30 = arith.constant 0 : index
    %31 = vector.load %arg4[%c5, %c0_29, %c0_30] : memref<9x3x64xbf16, #tpu.memory_space<vmem>>, vector<1x3x64xbf16>
    %32 = vector.shape_cast %31 : vector<1x3x64xbf16> to vector<3x64xbf16>
    %cst_31 = arith.constant dense<0.000000e+00> : vector<288x64xf32>
    %33 = tpu.matmul %30, %32, %cst_31 {dimension_numbers = #tpu.dot_dimension_numbers<[1], [0], [0], [1], [0, 0, 1, 1], [], []>} : vector<288x3xbf16>, vector<3x64xbf16>, vector<288x64xf32> -> vector<288x64xf32>
    %34 = arith.addf %28, %33 : vector<288x64xf32>
    %c0_32 = arith.constant 0 : index
    %c36 = arith.constant 36 : index
    %c0_33 = arith.constant 0 : index
    %35 = vector.load %arg3[%c0_32, %c36, %c0_33] : memref<1x342x3xbf16, #tpu.memory_space<vmem>>, vector<1x288x3xbf16>
    %36 = vector.shape_cast %35 : vector<1x288x3xbf16> to vector<288x3xbf16>
    %c6 = arith.constant 6 : index
    %c0_34 = arith.constant 0 : index
    %c0_35 = arith.constant 0 : index
    %37 = vector.load %arg4[%c6, %c0_34, %c0_35] : memref<9x3x64xbf16, #tpu.memory_space<vmem>>, vector<1x3x64xbf16>
    %38 = vector.shape_cast %37 : vector<1x3x64xbf16> to vector<3x64xbf16>
    %cst_36 = arith.constant dense<0.000000e+00> : vector<288x64xf32>
    %39 = tpu.matmul %36, %38, %cst_36 {dimension_numbers = #tpu.dot_dimension_numbers<[1], [0], [0], [1], [0, 0, 1, 1], [], []>} : vector<288x3xbf16>, vector<3x64xbf16>, vector<288x64xf32> -> vector<288x64xf32>
    %40 = arith.addf %34, %39 : vector<288x64xf32>
    %c0_37 = arith.constant 0 : index
    %c37 = arith.constant 37 : index
    %c0_38 = arith.constant 0 : index
    %41 = vector.load %arg3[%c0_37, %c37, %c0_38] : memref<1x342x3xbf16, #tpu.memory_space<vmem>>, vector<1x288x3xbf16>
    %42 = vector.shape_cast %41 : vector<1x288x3xbf16> to vector<288x3xbf16>
    %c7 = arith.constant 7 : index
    %c0_39 = arith.constant 0 : index
    %c0_40 = arith.constant 0 : index
    %43 = vector.load %arg4[%c7, %c0_39, %c0_40] : memref<9x3x64xbf16, #tpu.memory_space<vmem>>, vector<1x3x64xbf16>
    %44 = vector.shape_cast %43 : vector<1x3x64xbf16> to vector<3x64xbf16>
    %cst_41 = arith.constant dense<0.000000e+00> : vector<288x64xf32>
    %45 = tpu.matmul %42, %44, %cst_41 {dimension_numbers = #tpu.dot_dimension_numbers<[1], [0], [0], [1], [0, 0, 1, 1], [], []>} : vector<288x3xbf16>, vector<3x64xbf16>, vector<288x64xf32> -> vector<288x64xf32>
    %46 = arith.addf %40, %45 : vector<288x64xf32>
    %c0_42 = arith.constant 0 : index
    %c38 = arith.constant 38 : index
    %c0_43 = arith.constant 0 : index
    %47 = vector.load %arg3[%c0_42, %c38, %c0_43] : memref<1x342x3xbf16, #tpu.memory_space<vmem>>, vector<1x288x3xbf16>
    %48 = vector.shape_cast %47 : vector<1x288x3xbf16> to vector<288x3xbf16>
    %c8 = arith.constant 8 : index
    %c0_44 = arith.constant 0 : index
    %c0_45 = arith.constant 0 : index
    %49 = vector.load %arg4[%c8, %c0_44, %c0_45] : memref<9x3x64xbf16, #tpu.memory_space<vmem>>, vector<1x3x64xbf16>
    %50 = vector.shape_cast %49 : vector<1x3x64xbf16> to vector<3x64xbf16>
    %cst_46 = arith.constant dense<0.000000e+00> : vector<288x64xf32>
    %51 = tpu.matmul %48, %50, %cst_46 {dimension_numbers = #tpu.dot_dimension_numbers<[1], [0], [0], [1], [0, 0, 1, 1], [], []>} : vector<288x3xbf16>, vector<3x64xbf16>, vector<288x64xf32> -> vector<288x64xf32>
    %52 = arith.addf %46, %51 : vector<288x64xf32>
    %c0_47 = arith.constant 0 : index
    %c0_48 = arith.constant 0 : index
    %53 = vector.load %arg5[%c0_47, %c0_48] : memref<1x64xf32, #tpu.memory_space<vmem>>, vector<1x64xf32>
    %54 = vector.broadcast %53 : vector<1x64xf32> to vector<288x64xf32>
    %55 = arith.addf %52, %54 : vector<288x64xf32>
    %cst_49 = arith.constant 0.000000e+00 : f32
    %56 = vector.broadcast %cst_49 : f32 to vector<288x64xf32>
    %57 = arith.maximumf %55, %56 : vector<288x64xf32>
    %58 = arith.truncf %57 : vector<288x64xf32> to vector<288x64xbf16>
    %c0_50 = arith.constant 0 : index
    %c0_51 = arith.constant 0 : index
    %c0_52 = arith.constant 0 : index
    %59 = vector.load %arg6[%c0_50, %c0_51, %c0_52] : memref<1x288x64xbf16, #tpu.memory_space<vmem>>, vector<1x288x64xbf16>
    %60 = vector.shape_cast %59 : vector<1x288x64xbf16> to vector<288x64xbf16>
    %61 = vector.shape_cast %58 : vector<288x64xbf16> to vector<1x288x64xbf16>
    tpu.vector_store %arg6[%c0_50, %c0_51, %c0_52], %61 {strides = array<i32>} : memref<1x288x64xbf16, #tpu.memory_space<vmem>>, vector<1x288x64xbf16>,
    return
  }
  func.func @transform_0(%arg0: i32, %arg1: i32, %arg2: i32) -> (i32, i32, i32) {
    %c0_i32 = arith.constant 0 : i32
    %c0_i32_0 = arith.constant 0 : i32
    return %arg0, %c0_i32, %arg2 : i32, i32, i32
  }
  func.func @transform_1(%arg0: i32, %arg1: i32, %arg2: i32) -> (i32, i32, i32) {
    %c0_i32 = arith.constant 0 : i32
    %c0_i32_0 = arith.constant 0 : i32
    return %c0_i32, %arg2, %arg1 : i32, i32, i32
  }
  func.func @transform_2(%arg0: i32, %arg1: i32, %arg2: i32) -> (i32, i32) {
    %c0_i32 = arith.constant 0 : i32
    %c0_i32_0 = arith.constant 0 : i32
    return %c0_i32, %arg1 : i32, i32
  }
  func.func @transform_3(%arg0: i32, %arg1: i32, %arg2: i32) -> (i32, i32, i32) {
    %c0_i32 = arith.constant 0 : i32
    %c0_i32_0 = arith.constant 0 : i32
    return %arg0, %c0_i32, %arg1 : i32, i32, i32
  }
}

module attributes {stable_mosaic.version = 11 : i64} {
  func.func @_conv_kernel(%arg0: i32, %arg1: i32, %arg2: i32, %arg3: memref<1x342x64xbf16, #tpu.memory_space<vmem>>, %arg4: memref<9x64x64xbf16, #tpu.memory_space<vmem>>, %arg5: memref<1x64xf32, #tpu.memory_space<vmem>>, %arg6: memref<1x288x64xbf16, #tpu.memory_space<vmem>>) attributes {dimension_semantics = [#tpu.dimension_semantics<parallel>, #tpu.dimension_semantics<parallel>, #tpu.dimension_semantics<arbitrary>], iteration_bounds = array<i64: 4, 1, 1>, scalar_prefetch = 0 : i64, scratch_operands = 0 : i64, tpu.core_type = #tpu.core_type<tc>, window_params = [{transform_indices = @transform_0, window_bounds = array<i64: 1, 342, 64>}, {transform_indices = @transform_1, window_bounds = array<i64: 9, 64, 64>}, {transform_indices = @transform_2, window_bounds = array<i64: 1, 64>}, {transform_indices = @transform_3, window_bounds = array<i64: 1, 288, 64>}]} {
    %c0 = arith.constant 0 : index
    %c0_0 = arith.constant 0 : index
    %c0_1 = arith.constant 0 : index
    %0 = vector.load %arg3[%c0, %c0_0, %c0_1] : memref<1x342x64xbf16, #tpu.memory_space<vmem>>, vector<1x288x64xbf16>
    %1 = vector.shape_cast %0 : vector<1x288x64xbf16> to vector<288x64xbf16>
    %c0_2 = arith.constant 0 : index
    %c0_3 = arith.constant 0 : index
    %c0_4 = arith.constant 0 : index
    %2 = vector.load %arg4[%c0_2, %c0_3, %c0_4] : memref<9x64x64xbf16, #tpu.memory_space<vmem>>, vector<1x64x64xbf16>
    %3 = vector.shape_cast %2 : vector<1x64x64xbf16> to vector<64x64xbf16>
    %cst = arith.constant dense<0.000000e+00> : vector<288x64xf32>
    %4 = tpu.matmul %1, %3, %cst {dimension_numbers = #tpu.dot_dimension_numbers<[1], [0], [0], [1], [0, 0, 1, 1], [], []>} : vector<288x64xbf16>, vector<64x64xbf16>, vector<288x64xf32> -> vector<288x64xf32>
    %c0_5 = arith.constant 0 : index
    %c1 = arith.constant 1 : index
    %c0_6 = arith.constant 0 : index
    %5 = vector.load %arg3[%c0_5, %c1, %c0_6] : memref<1x342x64xbf16, #tpu.memory_space<vmem>>, vector<1x288x64xbf16>
    %6 = vector.shape_cast %5 : vector<1x288x64xbf16> to vector<288x64xbf16>
    %c1_7 = arith.constant 1 : index
    %c0_8 = arith.constant 0 : index
    %c0_9 = arith.constant 0 : index
    %7 = vector.load %arg4[%c1_7, %c0_8, %c0_9] : memref<9x64x64xbf16, #tpu.memory_space<vmem>>, vector<1x64x64xbf16>
    %8 = vector.shape_cast %7 : vector<1x64x64xbf16> to vector<64x64xbf16>
    %cst_10 = arith.constant dense<0.000000e+00> : vector<288x64xf32>
    %9 = tpu.matmul %6, %8, %cst_10 {dimension_numbers = #tpu.dot_dimension_numbers<[1], [0], [0], [1], [0, 0, 1, 1], [], []>} : vector<288x64xbf16>, vector<64x64xbf16>, vector<288x64xf32> -> vector<288x64xf32>
    %10 = arith.addf %4, %9 : vector<288x64xf32>
    %c0_11 = arith.constant 0 : index
    %c2 = arith.constant 2 : index
    %c0_12 = arith.constant 0 : index
    %11 = vector.load %arg3[%c0_11, %c2, %c0_12] : memref<1x342x64xbf16, #tpu.memory_space<vmem>>, vector<1x288x64xbf16>
    %12 = vector.shape_cast %11 : vector<1x288x64xbf16> to vector<288x64xbf16>
    %c2_13 = arith.constant 2 : index
    %c0_14 = arith.constant 0 : index
    %c0_15 = arith.constant 0 : index
    %13 = vector.load %arg4[%c2_13, %c0_14, %c0_15] : memref<9x64x64xbf16, #tpu.memory_space<vmem>>, vector<1x64x64xbf16>
    %14 = vector.shape_cast %13 : vector<1x64x64xbf16> to vector<64x64xbf16>
    %cst_16 = arith.constant dense<0.000000e+00> : vector<288x64xf32>
    %15 = tpu.matmul %12, %14, %cst_16 {dimension_numbers = #tpu.dot_dimension_numbers<[1], [0], [0], [1], [0, 0, 1, 1], [], []>} : vector<288x64xbf16>, vector<64x64xbf16>, vector<288x64xf32> -> vector<288x64xf32>
    %16 = arith.addf %10, %15 : vector<288x64xf32>
    %c0_17 = arith.constant 0 : index
    %c18 = arith.constant 18 : index
    %c0_18 = arith.constant 0 : index
    %17 = vector.load %arg3[%c0_17, %c18, %c0_18] : memref<1x342x64xbf16, #tpu.memory_space<vmem>>, vector<1x288x64xbf16>
    %18 = vector.shape_cast %17 : vector<1x288x64xbf16> to vector<288x64xbf16>
    %c3 = arith.constant 3 : index
    %c0_19 = arith.constant 0 : index
    %c0_20 = arith.constant 0 : index
    %19 = vector.load %arg4[%c3, %c0_19, %c0_20] : memref<9x64x64xbf16, #tpu.memory_space<vmem>>, vector<1x64x64xbf16>
    %20 = vector.shape_cast %19 : vector<1x64x64xbf16> to vector<64x64xbf16>
    %cst_21 = arith.constant dense<0.000000e+00> : vector<288x64xf32>
    %21 = tpu.matmul %18, %20, %cst_21 {dimension_numbers = #tpu.dot_dimension_numbers<[1], [0], [0], [1], [0, 0, 1, 1], [], []>} : vector<288x64xbf16>, vector<64x64xbf16>, vector<288x64xf32> -> vector<288x64xf32>
    %22 = arith.addf %16, %21 : vector<288x64xf32>
    %c0_22 = arith.constant 0 : index
    %c19 = arith.constant 19 : index
    %c0_23 = arith.constant 0 : index
    %23 = vector.load %arg3[%c0_22, %c19, %c0_23] : memref<1x342x64xbf16, #tpu.memory_space<vmem>>, vector<1x288x64xbf16>
    %24 = vector.shape_cast %23 : vector<1x288x64xbf16> to vector<288x64xbf16>
    %c4 = arith.constant 4 : index
    %c0_24 = arith.constant 0 : index
    %c0_25 = arith.constant 0 : index
    %25 = vector.load %arg4[%c4, %c0_24, %c0_25] : memref<9x64x64xbf16, #tpu.memory_space<vmem>>, vector<1x64x64xbf16>
    %26 = vector.shape_cast %25 : vector<1x64x64xbf16> to vector<64x64xbf16>
    %cst_26 = arith.constant dense<0.000000e+00> : vector<288x64xf32>
    %27 = tpu.matmul %24, %26, %cst_26 {dimension_numbers = #tpu.dot_dimension_numbers<[1], [0], [0], [1], [0, 0, 1, 1], [], []>} : vector<288x64xbf16>, vector<64x64xbf16>, vector<288x64xf32> -> vector<288x64xf32>
    %28 = arith.addf %22, %27 : vector<288x64xf32>
    %c0_27 = arith.constant 0 : index
    %c20 = arith.constant 20 : index
    %c0_28 = arith.constant 0 : index
    %29 = vector.load %arg3[%c0_27, %c20, %c0_28] : memref<1x342x64xbf16, #tpu.memory_space<vmem>>, vector<1x288x64xbf16>
    %30 = vector.shape_cast %29 : vector<1x288x64xbf16> to vector<288x64xbf16>
    %c5 = arith.constant 5 : index
    %c0_29 = arith.constant 0 : index
    %c0_30 = arith.constant 0 : index
    %31 = vector.load %arg4[%c5, %c0_29, %c0_30] : memref<9x64x64xbf16, #tpu.memory_space<vmem>>, vector<1x64x64xbf16>
    %32 = vector.shape_cast %31 : vector<1x64x64xbf16> to vector<64x64xbf16>
    %cst_31 = arith.constant dense<0.000000e+00> : vector<288x64xf32>
    %33 = tpu.matmul %30, %32, %cst_31 {dimension_numbers = #tpu.dot_dimension_numbers<[1], [0], [0], [1], [0, 0, 1, 1], [], []>} : vector<288x64xbf16>, vector<64x64xbf16>, vector<288x64xf32> -> vector<288x64xf32>
    %34 = arith.addf %28, %33 : vector<288x64xf32>
    %c0_32 = arith.constant 0 : index
    %c36 = arith.constant 36 : index
    %c0_33 = arith.constant 0 : index
    %35 = vector.load %arg3[%c0_32, %c36, %c0_33] : memref<1x342x64xbf16, #tpu.memory_space<vmem>>, vector<1x288x64xbf16>
    %36 = vector.shape_cast %35 : vector<1x288x64xbf16> to vector<288x64xbf16>
    %c6 = arith.constant 6 : index
    %c0_34 = arith.constant 0 : index
    %c0_35 = arith.constant 0 : index
    %37 = vector.load %arg4[%c6, %c0_34, %c0_35] : memref<9x64x64xbf16, #tpu.memory_space<vmem>>, vector<1x64x64xbf16>
    %38 = vector.shape_cast %37 : vector<1x64x64xbf16> to vector<64x64xbf16>
    %cst_36 = arith.constant dense<0.000000e+00> : vector<288x64xf32>
    %39 = tpu.matmul %36, %38, %cst_36 {dimension_numbers = #tpu.dot_dimension_numbers<[1], [0], [0], [1], [0, 0, 1, 1], [], []>} : vector<288x64xbf16>, vector<64x64xbf16>, vector<288x64xf32> -> vector<288x64xf32>
    %40 = arith.addf %34, %39 : vector<288x64xf32>
    %c0_37 = arith.constant 0 : index
    %c37 = arith.constant 37 : index
    %c0_38 = arith.constant 0 : index
    %41 = vector.load %arg3[%c0_37, %c37, %c0_38] : memref<1x342x64xbf16, #tpu.memory_space<vmem>>, vector<1x288x64xbf16>
    %42 = vector.shape_cast %41 : vector<1x288x64xbf16> to vector<288x64xbf16>
    %c7 = arith.constant 7 : index
    %c0_39 = arith.constant 0 : index
    %c0_40 = arith.constant 0 : index
    %43 = vector.load %arg4[%c7, %c0_39, %c0_40] : memref<9x64x64xbf16, #tpu.memory_space<vmem>>, vector<1x64x64xbf16>
    %44 = vector.shape_cast %43 : vector<1x64x64xbf16> to vector<64x64xbf16>
    %cst_41 = arith.constant dense<0.000000e+00> : vector<288x64xf32>
    %45 = tpu.matmul %42, %44, %cst_41 {dimension_numbers = #tpu.dot_dimension_numbers<[1], [0], [0], [1], [0, 0, 1, 1], [], []>} : vector<288x64xbf16>, vector<64x64xbf16>, vector<288x64xf32> -> vector<288x64xf32>
    %46 = arith.addf %40, %45 : vector<288x64xf32>
    %c0_42 = arith.constant 0 : index
    %c38 = arith.constant 38 : index
    %c0_43 = arith.constant 0 : index
    %47 = vector.load %arg3[%c0_42, %c38, %c0_43] : memref<1x342x64xbf16, #tpu.memory_space<vmem>>, vector<1x288x64xbf16>
    %48 = vector.shape_cast %47 : vector<1x288x64xbf16> to vector<288x64xbf16>
    %c8 = arith.constant 8 : index
    %c0_44 = arith.constant 0 : index
    %c0_45 = arith.constant 0 : index
    %49 = vector.load %arg4[%c8, %c0_44, %c0_45] : memref<9x64x64xbf16, #tpu.memory_space<vmem>>, vector<1x64x64xbf16>
    %50 = vector.shape_cast %49 : vector<1x64x64xbf16> to vector<64x64xbf16>
    %cst_46 = arith.constant dense<0.000000e+00> : vector<288x64xf32>
    %51 = tpu.matmul %48, %50, %cst_46 {dimension_numbers = #tpu.dot_dimension_numbers<[1], [0], [0], [1], [0, 0, 1, 1], [], []>} : vector<288x64xbf16>, vector<64x64xbf16>, vector<288x64xf32> -> vector<288x64xf32>
    %52 = arith.addf %46, %51 : vector<288x64xf32>
    %c0_47 = arith.constant 0 : index
    %c0_48 = arith.constant 0 : index
    %53 = vector.load %arg5[%c0_47, %c0_48] : memref<1x64xf32, #tpu.memory_space<vmem>>, vector<1x64xf32>
    %54 = vector.broadcast %53 : vector<1x64xf32> to vector<288x64xf32>
    %55 = arith.addf %52, %54 : vector<288x64xf32>
    %56 = arith.truncf %55 : vector<288x64xf32> to vector<288x64xbf16>
    %c0_49 = arith.constant 0 : index
    %c0_50 = arith.constant 0 : index
    %c0_51 = arith.constant 0 : index
    %57 = vector.load %arg6[%c0_49, %c0_50, %c0_51] : memref<1x288x64xbf16, #tpu.memory_space<vmem>>, vector<1x288x64xbf16>
    %58 = vector.shape_cast %57 : vector<1x288x64xbf16> to vector<288x64xbf16>
    %59 = vector.shape_cast %56 : vector<288x64xbf16> to vector<1x288x64xbf16>
    tpu.vector_store %arg6[%c0_49, %c0_50, %c0_51], %59 {strides = array<i32>} : memref<1x288x64xbf16, #tpu.memory_space<vmem>>, vector<1x288x64xbf16>,
    return
  }
  func.func @transform_0(%arg0: i32, %arg1: i32, %arg2: i32) -> (i32, i32, i32) {
    %c0_i32 = arith.constant 0 : i32
    %c0_i32_0 = arith.constant 0 : i32
    return %arg0, %c0_i32, %arg2 : i32, i32, i32
  }
  func.func @transform_1(%arg0: i32, %arg1: i32, %arg2: i32) -> (i32, i32, i32) {
    %c0_i32 = arith.constant 0 : i32
    %c0_i32_0 = arith.constant 0 : i32
    return %c0_i32, %arg2, %arg1 : i32, i32, i32
  }
  func.func @transform_2(%arg0: i32, %arg1: i32, %arg2: i32) -> (i32, i32) {
    %c0_i32 = arith.constant 0 : i32
    %c0_i32_0 = arith.constant 0 : i32
    return %c0_i32, %arg1 : i32, i32
  }
  func.func @transform_3(%arg0: i32, %arg1: i32, %arg2: i32) -> (i32, i32, i32) {
    %c0_i32 = arith.constant 0 : i32
    %c0_i32_0 = arith.constant 0 : i32
    return %arg0, %c0_i32, %arg1 : i32, i32, i32
  }
}

module attributes {stable_mosaic.version = 11 : i64} {
  func.func @_abs_mean_kernel(%arg0: i32, %arg1: memref<2x2x8x2048xbf16, #tpu.memory_space<vmem>>, %arg2: memref<2x1xf32, #tpu.memory_space<vmem>>, %arg3: memref<2x1xf32, #tpu.memory_space<vmem>>) attributes {dimension_semantics = [#tpu.dimension_semantics<arbitrary>], iteration_bounds = array<i64: 1>, scalar_prefetch = 0 : i64, scratch_operands = 1 : i64, tpu.core_type = #tpu.core_type<tc>, window_params = [{transform_indices = @transform_0, window_bounds = array<i64: 2, 2, 8, 2048>}, {pipeline_mode = #tpu.pipeline_mode<synchronous>, transform_indices = @transform_1, window_bounds = array<i64: 2, 1>}]} {
    %c0_i32 = arith.constant 0 : i32
    %0 = arith.cmpi eq, %arg0, %c0_i32 : i32
    %1 = arith.extui %0 : i1 to i32
    %c0_i32_0 = arith.constant 0 : i32
    %2 = arith.cmpi ne, %1, %c0_i32_0 : i32
    scf.if %2 {
      %cst_14 = arith.constant 0.000000e+00 : f32
      %20 = vector.broadcast %cst_14 : f32 to vector<2x1xf32>
      %c0_15 = arith.constant 0 : index
      %c0_16 = arith.constant 0 : index
      %21 = vector.load %arg3[%c0_15, %c0_16] : memref<2x1xf32, #tpu.memory_space<vmem>>, vector<2x1xf32>
      tpu.vector_store %arg3[%c0_15, %c0_16], %20 {strides = array<i32>} : memref<2x1xf32, #tpu.memory_space<vmem>>, vector<2x1xf32>,
    } else {
    }
    %c0 = arith.constant 0 : index
    %c0_1 = arith.constant 0 : index
    %c0_2 = arith.constant 0 : index
    %c0_3 = arith.constant 0 : index
    %3 = vector.load %arg1[%c0, %c0_1, %c0_2, %c0_3] : memref<2x2x8x2048xbf16, #tpu.memory_space<vmem>>, vector<1x2x8x2048xbf16>
    %4 = vector.shape_cast %3 : vector<1x2x8x2048xbf16> to vector<2x8x2048xbf16>
    %5 = arith.extf %4 : vector<2x8x2048xbf16> to vector<2x8x2048xf32>
    %c1 = arith.constant 1 : index
    %c0_4 = arith.constant 0 : index
    %c0_5 = arith.constant 0 : index
    %c0_6 = arith.constant 0 : index
    %6 = vector.load %arg1[%c1, %c0_4, %c0_5, %c0_6] : memref<2x2x8x2048xbf16, #tpu.memory_space<vmem>>, vector<1x2x8x2048xbf16>
    %7 = vector.shape_cast %6 : vector<1x2x8x2048xbf16> to vector<2x8x2048xbf16>
    %8 = arith.extf %7 : vector<2x8x2048xbf16> to vector<2x8x2048xf32>
    %9 = arith.subf %5, %8 : vector<2x8x2048xf32>
    %10 = math.absf %9 : vector<2x8x2048xf32>
    %cst = arith.constant dense<0.000000e+00> : vector<2x8xf32>
    %11 = vector.multi_reduction <add>, %10, %cst [2] : vector<2x8x2048xf32> to vector<2x8xf32>
    %cst_7 = arith.constant dense<0.000000e+00> : vector<2xf32>
    %12 = vector.multi_reduction <add>, %11, %cst_7 [1] : vector<2x8xf32> to vector<2xf32>
    %c0_8 = arith.constant 0 : index
    %c0_9 = arith.constant 0 : index
    %13 = vector.load %arg3[%c0_8, %c0_9] : memref<2x1xf32, #tpu.memory_space<vmem>>, vector<2x1xf32>
    %14 = vector.shape_cast %12 : vector<2xf32> to vector<2x1xf32>
    %15 = arith.addf %13, %14 : vector<2x1xf32>
    %c0_10 = arith.constant 0 : index
    %c0_11 = arith.constant 0 : index
    %16 = vector.load %arg3[%c0_10, %c0_11] : memref<2x1xf32, #tpu.memory_space<vmem>>, vector<2x1xf32>
    tpu.vector_store %arg3[%c0_10, %c0_11], %15 {strides = array<i32>} : memref<2x1xf32, #tpu.memory_space<vmem>>, vector<2x1xf32>,
    %c0_i32_12 = arith.constant 0 : i32
    %17 = arith.cmpi eq, %arg0, %c0_i32_12 : i32
    %18 = arith.extui %17 : i1 to i32
    %c0_i32_13 = arith.constant 0 : i32
    %19 = arith.cmpi ne, %18, %c0_i32_13 : i32
    scf.if %19 {
      %c0_14 = arith.constant 0 : index
      %c0_15 = arith.constant 0 : index
      %20 = vector.load %arg3[%c0_14, %c0_15] : memref<2x1xf32, #tpu.memory_space<vmem>>, vector<2x1xf32>
      %cst_16 = arith.constant 6.10351563E-5 : f32
      %21 = vector.broadcast %cst_16 : f32 to vector<2x1xf32>
      %22 = arith.mulf %20, %21 : vector<2x1xf32>
      %c0_17 = arith.constant 0 : index
      %c0_18 = arith.constant 0 : index
      %23 = vector.load %arg2[%c0_17, %c0_18] : memref<2x1xf32, #tpu.memory_space<vmem>>, vector<2x1xf32>
      tpu.vector_store %arg2[%c0_17, %c0_18], %22 {strides = array<i32>} : memref<2x1xf32, #tpu.memory_space<vmem>>, vector<2x1xf32>,
    } else {
    }
    return
  }
  func.func @transform_0(%arg0: i32) -> (i32, i32, i32, i32) {
    %c0_i32 = arith.constant 0 : i32
    %c0_i32_0 = arith.constant 0 : i32
    %c0_i32_1 = arith.constant 0 : i32
    %c0_i32_2 = arith.constant 0 : i32
    return %c0_i32, %c0_i32_0, %arg0, %c0_i32_1 : i32, i32, i32, i32
  }
  func.func @transform_1(%arg0: i32) -> (i32, i32) {
    %c0_i32 = arith.constant 0 : i32
    %c0_i32_0 = arith.constant 0 : i32
    %c0_i32_1 = arith.constant 0 : i32
    return %c0_i32, %c0_i32_0 : i32, i32
  }
}

module attributes {stable_mosaic.version = 11 : i64} {
  func.func @_pool_kernel(%arg0: i32, %arg1: i32, %arg2: memref<1x16x8x128xbf16, #tpu.memory_space<vmem>>, %arg3: memref<1x8x8x64xbf16, #tpu.memory_space<vmem>>) attributes {dimension_semantics = [#tpu.dimension_semantics<parallel>, #tpu.dimension_semantics<parallel>], iteration_bounds = array<i64: 4, 1>, scalar_prefetch = 0 : i64, scratch_operands = 0 : i64, tpu.core_type = #tpu.core_type<tc>, window_params = [{transform_indices = @transform_0, window_bounds = array<i64: 1, 16, 8, 128>}, {transform_indices = @transform_1, window_bounds = array<i64: 1, 8, 8, 64>}]} {
    %c0 = arith.constant 0 : index
    %c0_0 = arith.constant 0 : index
    %c0_1 = arith.constant 0 : index
    %c0_2 = arith.constant 0 : index
    %0 = vector.load %arg2[%c0, %c0_0, %c0_1, %c0_2] : memref<1x16x8x128xbf16, #tpu.memory_space<vmem>>, vector<1x16x8x128xbf16>
    %1 = vector.shape_cast %0 : vector<1x16x8x128xbf16> to vector<16x8x128xbf16>
    %2 = vector.shape_cast %1 : vector<16x8x128xbf16> to vector<8x2x8x128xbf16>
    %3 = vector.extract_strided_slice %2 {offsets = [0, 0, 0, 0], sizes = [8, 1, 8, 128], strides = [1, 1, 1, 1]} : vector<8x2x8x128xbf16> to vector<8x1x8x128xbf16>
    %4 = vector.shape_cast %3 : vector<8x1x8x128xbf16> to vector<8x8x128xbf16>
    %5 = vector.extract_strided_slice %2 {offsets = [0, 1, 0, 0], sizes = [8, 1, 8, 128], strides = [1, 1, 1, 1]} : vector<8x2x8x128xbf16> to vector<8x1x8x128xbf16>
    %6 = vector.shape_cast %5 : vector<8x1x8x128xbf16> to vector<8x8x128xbf16>
    %7 = arith.maximumf %4, %6 : vector<8x8x128xbf16>
    %8 = vector.extract_strided_slice %7 {offsets = [0, 0, 0], sizes = [8, 8, 64], strides = [1, 1, 1]} : vector<8x8x128xbf16> to vector<8x8x64xbf16>
    %9 = vector.extract_strided_slice %7 {offsets = [0, 0, 64], sizes = [8, 8, 64], strides = [1, 1, 1]} : vector<8x8x128xbf16> to vector<8x8x64xbf16>
    %10 = arith.maximumf %8, %9 : vector<8x8x64xbf16>
    %cst = arith.constant 0.000000e+00 : bf16
    %11 = vector.broadcast %cst : bf16 to vector<8x8x64xbf16>
    %12 = arith.maximumf %10, %11 : vector<8x8x64xbf16>
    %c0_3 = arith.constant 0 : index
    %c0_4 = arith.constant 0 : index
    %c0_5 = arith.constant 0 : index
    %c0_6 = arith.constant 0 : index
    %13 = vector.load %arg3[%c0_3, %c0_4, %c0_5, %c0_6] : memref<1x8x8x64xbf16, #tpu.memory_space<vmem>>, vector<1x8x8x64xbf16>
    %14 = vector.shape_cast %13 : vector<1x8x8x64xbf16> to vector<8x8x64xbf16>
    %15 = vector.shape_cast %12 : vector<8x8x64xbf16> to vector<1x8x8x64xbf16>
    tpu.vector_store %arg3[%c0_3, %c0_4, %c0_5, %c0_6], %15 {strides = array<i32>} : memref<1x8x8x64xbf16, #tpu.memory_space<vmem>>, vector<1x8x8x64xbf16>,
    return
  }
  func.func @transform_0(%arg0: i32, %arg1: i32) -> (i32, i32, i32, i32) {
    %c0_i32 = arith.constant 0 : i32
    %c0_i32_0 = arith.constant 0 : i32
    %c0_i32_1 = arith.constant 0 : i32
    return %arg0, %arg1, %c0_i32, %c0_i32_0 : i32, i32, i32, i32
  }
  func.func @transform_1(%arg0: i32, %arg1: i32) -> (i32, i32, i32, i32) {
    %c0_i32 = arith.constant 0 : i32
    %c0_i32_0 = arith.constant 0 : i32
    %c0_i32_1 = arith.constant 0 : i32
    return %arg0, %arg1, %c0_i32, %c0_i32_0 : i32, i32, i32, i32
  }
}

module attributes {stable_mosaic.version = 11 : i64} {
  func.func @_conv_kernel(%arg0: i32, %arg1: i32, %arg2: i32, %arg3: memref<1x110x64xbf16, #tpu.memory_space<vmem>>, %arg4: memref<9x64x128xbf16, #tpu.memory_space<vmem>>, %arg5: memref<1x128xf32, #tpu.memory_space<vmem>>, %arg6: memref<1x80x128xbf16, #tpu.memory_space<vmem>>) attributes {dimension_semantics = [#tpu.dimension_semantics<parallel>, #tpu.dimension_semantics<parallel>, #tpu.dimension_semantics<arbitrary>], iteration_bounds = array<i64: 4, 1, 1>, scalar_prefetch = 0 : i64, scratch_operands = 0 : i64, tpu.core_type = #tpu.core_type<tc>, window_params = [{transform_indices = @transform_0, window_bounds = array<i64: 1, 110, 64>}, {transform_indices = @transform_1, window_bounds = array<i64: 9, 64, 128>}, {transform_indices = @transform_2, window_bounds = array<i64: 1, 128>}, {transform_indices = @transform_3, window_bounds = array<i64: 1, 80, 128>}]} {
    %c0 = arith.constant 0 : index
    %c0_0 = arith.constant 0 : index
    %c0_1 = arith.constant 0 : index
    %0 = vector.load %arg3[%c0, %c0_0, %c0_1] : memref<1x110x64xbf16, #tpu.memory_space<vmem>>, vector<1x80x64xbf16>
    %1 = vector.shape_cast %0 : vector<1x80x64xbf16> to vector<80x64xbf16>
    %c0_2 = arith.constant 0 : index
    %c0_3 = arith.constant 0 : index
    %c0_4 = arith.constant 0 : index
    %2 = vector.load %arg4[%c0_2, %c0_3, %c0_4] : memref<9x64x128xbf16, #tpu.memory_space<vmem>>, vector<1x64x128xbf16>
    %3 = vector.shape_cast %2 : vector<1x64x128xbf16> to vector<64x128xbf16>
    %cst = arith.constant dense<0.000000e+00> : vector<80x128xf32>
    %4 = tpu.matmul %1, %3, %cst {dimension_numbers = #tpu.dot_dimension_numbers<[1], [0], [0], [1], [0, 0, 1, 1], [], []>} : vector<80x64xbf16>, vector<64x128xbf16>, vector<80x128xf32> -> vector<80x128xf32>
    %c0_5 = arith.constant 0 : index
    %c1 = arith.constant 1 : index
    %c0_6 = arith.constant 0 : index
    %5 = vector.load %arg3[%c0_5, %c1, %c0_6] : memref<1x110x64xbf16, #tpu.memory_space<vmem>>, vector<1x80x64xbf16>
    %6 = vector.shape_cast %5 : vector<1x80x64xbf16> to vector<80x64xbf16>
    %c1_7 = arith.constant 1 : index
    %c0_8 = arith.constant 0 : index
    %c0_9 = arith.constant 0 : index
    %7 = vector.load %arg4[%c1_7, %c0_8, %c0_9] : memref<9x64x128xbf16, #tpu.memory_space<vmem>>, vector<1x64x128xbf16>
    %8 = vector.shape_cast %7 : vector<1x64x128xbf16> to vector<64x128xbf16>
    %cst_10 = arith.constant dense<0.000000e+00> : vector<80x128xf32>
    %9 = tpu.matmul %6, %8, %cst_10 {dimension_numbers = #tpu.dot_dimension_numbers<[1], [0], [0], [1], [0, 0, 1, 1], [], []>} : vector<80x64xbf16>, vector<64x128xbf16>, vector<80x128xf32> -> vector<80x128xf32>
    %10 = arith.addf %4, %9 : vector<80x128xf32>
    %c0_11 = arith.constant 0 : index
    %c2 = arith.constant 2 : index
    %c0_12 = arith.constant 0 : index
    %11 = vector.load %arg3[%c0_11, %c2, %c0_12] : memref<1x110x64xbf16, #tpu.memory_space<vmem>>, vector<1x80x64xbf16>
    %12 = vector.shape_cast %11 : vector<1x80x64xbf16> to vector<80x64xbf16>
    %c2_13 = arith.constant 2 : index
    %c0_14 = arith.constant 0 : index
    %c0_15 = arith.constant 0 : index
    %13 = vector.load %arg4[%c2_13, %c0_14, %c0_15] : memref<9x64x128xbf16, #tpu.memory_space<vmem>>, vector<1x64x128xbf16>
    %14 = vector.shape_cast %13 : vector<1x64x128xbf16> to vector<64x128xbf16>
    %cst_16 = arith.constant dense<0.000000e+00> : vector<80x128xf32>
    %15 = tpu.matmul %12, %14, %cst_16 {dimension_numbers = #tpu.dot_dimension_numbers<[1], [0], [0], [1], [0, 0, 1, 1], [], []>} : vector<80x64xbf16>, vector<64x128xbf16>, vector<80x128xf32> -> vector<80x128xf32>
    %16 = arith.addf %10, %15 : vector<80x128xf32>
    %c0_17 = arith.constant 0 : index
    %c10 = arith.constant 10 : index
    %c0_18 = arith.constant 0 : index
    %17 = vector.load %arg3[%c0_17, %c10, %c0_18] : memref<1x110x64xbf16, #tpu.memory_space<vmem>>, vector<1x80x64xbf16>
    %18 = vector.shape_cast %17 : vector<1x80x64xbf16> to vector<80x64xbf16>
    %c3 = arith.constant 3 : index
    %c0_19 = arith.constant 0 : index
    %c0_20 = arith.constant 0 : index
    %19 = vector.load %arg4[%c3, %c0_19, %c0_20] : memref<9x64x128xbf16, #tpu.memory_space<vmem>>, vector<1x64x128xbf16>
    %20 = vector.shape_cast %19 : vector<1x64x128xbf16> to vector<64x128xbf16>
    %cst_21 = arith.constant dense<0.000000e+00> : vector<80x128xf32>
    %21 = tpu.matmul %18, %20, %cst_21 {dimension_numbers = #tpu.dot_dimension_numbers<[1], [0], [0], [1], [0, 0, 1, 1], [], []>} : vector<80x64xbf16>, vector<64x128xbf16>, vector<80x128xf32> -> vector<80x128xf32>
    %22 = arith.addf %16, %21 : vector<80x128xf32>
    %c0_22 = arith.constant 0 : index
    %c11 = arith.constant 11 : index
    %c0_23 = arith.constant 0 : index
    %23 = vector.load %arg3[%c0_22, %c11, %c0_23] : memref<1x110x64xbf16, #tpu.memory_space<vmem>>, vector<1x80x64xbf16>
    %24 = vector.shape_cast %23 : vector<1x80x64xbf16> to vector<80x64xbf16>
    %c4 = arith.constant 4 : index
    %c0_24 = arith.constant 0 : index
    %c0_25 = arith.constant 0 : index
    %25 = vector.load %arg4[%c4, %c0_24, %c0_25] : memref<9x64x128xbf16, #tpu.memory_space<vmem>>, vector<1x64x128xbf16>
    %26 = vector.shape_cast %25 : vector<1x64x128xbf16> to vector<64x128xbf16>
    %cst_26 = arith.constant dense<0.000000e+00> : vector<80x128xf32>
    %27 = tpu.matmul %24, %26, %cst_26 {dimension_numbers = #tpu.dot_dimension_numbers<[1], [0], [0], [1], [0, 0, 1, 1], [], []>} : vector<80x64xbf16>, vector<64x128xbf16>, vector<80x128xf32> -> vector<80x128xf32>
    %28 = arith.addf %22, %27 : vector<80x128xf32>
    %c0_27 = arith.constant 0 : index
    %c12 = arith.constant 12 : index
    %c0_28 = arith.constant 0 : index
    %29 = vector.load %arg3[%c0_27, %c12, %c0_28] : memref<1x110x64xbf16, #tpu.memory_space<vmem>>, vector<1x80x64xbf16>
    %30 = vector.shape_cast %29 : vector<1x80x64xbf16> to vector<80x64xbf16>
    %c5 = arith.constant 5 : index
    %c0_29 = arith.constant 0 : index
    %c0_30 = arith.constant 0 : index
    %31 = vector.load %arg4[%c5, %c0_29, %c0_30] : memref<9x64x128xbf16, #tpu.memory_space<vmem>>, vector<1x64x128xbf16>
    %32 = vector.shape_cast %31 : vector<1x64x128xbf16> to vector<64x128xbf16>
    %cst_31 = arith.constant dense<0.000000e+00> : vector<80x128xf32>
    %33 = tpu.matmul %30, %32, %cst_31 {dimension_numbers = #tpu.dot_dimension_numbers<[1], [0], [0], [1], [0, 0, 1, 1], [], []>} : vector<80x64xbf16>, vector<64x128xbf16>, vector<80x128xf32> -> vector<80x128xf32>
    %34 = arith.addf %28, %33 : vector<80x128xf32>
    %c0_32 = arith.constant 0 : index
    %c20 = arith.constant 20 : index
    %c0_33 = arith.constant 0 : index
    %35 = vector.load %arg3[%c0_32, %c20, %c0_33] : memref<1x110x64xbf16, #tpu.memory_space<vmem>>, vector<1x80x64xbf16>
    %36 = vector.shape_cast %35 : vector<1x80x64xbf16> to vector<80x64xbf16>
    %c6 = arith.constant 6 : index
    %c0_34 = arith.constant 0 : index
    %c0_35 = arith.constant 0 : index
    %37 = vector.load %arg4[%c6, %c0_34, %c0_35] : memref<9x64x128xbf16, #tpu.memory_space<vmem>>, vector<1x64x128xbf16>
    %38 = vector.shape_cast %37 : vector<1x64x128xbf16> to vector<64x128xbf16>
    %cst_36 = arith.constant dense<0.000000e+00> : vector<80x128xf32>
    %39 = tpu.matmul %36, %38, %cst_36 {dimension_numbers = #tpu.dot_dimension_numbers<[1], [0], [0], [1], [0, 0, 1, 1], [], []>} : vector<80x64xbf16>, vector<64x128xbf16>, vector<80x128xf32> -> vector<80x128xf32>
    %40 = arith.addf %34, %39 : vector<80x128xf32>
    %c0_37 = arith.constant 0 : index
    %c21 = arith.constant 21 : index
    %c0_38 = arith.constant 0 : index
    %41 = vector.load %arg3[%c0_37, %c21, %c0_38] : memref<1x110x64xbf16, #tpu.memory_space<vmem>>, vector<1x80x64xbf16>
    %42 = vector.shape_cast %41 : vector<1x80x64xbf16> to vector<80x64xbf16>
    %c7 = arith.constant 7 : index
    %c0_39 = arith.constant 0 : index
    %c0_40 = arith.constant 0 : index
    %43 = vector.load %arg4[%c7, %c0_39, %c0_40] : memref<9x64x128xbf16, #tpu.memory_space<vmem>>, vector<1x64x128xbf16>
    %44 = vector.shape_cast %43 : vector<1x64x128xbf16> to vector<64x128xbf16>
    %cst_41 = arith.constant dense<0.000000e+00> : vector<80x128xf32>
    %45 = tpu.matmul %42, %44, %cst_41 {dimension_numbers = #tpu.dot_dimension_numbers<[1], [0], [0], [1], [0, 0, 1, 1], [], []>} : vector<80x64xbf16>, vector<64x128xbf16>, vector<80x128xf32> -> vector<80x128xf32>
    %46 = arith.addf %40, %45 : vector<80x128xf32>
    %c0_42 = arith.constant 0 : index
    %c22 = arith.constant 22 : index
    %c0_43 = arith.constant 0 : index
    %47 = vector.load %arg3[%c0_42, %c22, %c0_43] : memref<1x110x64xbf16, #tpu.memory_space<vmem>>, vector<1x80x64xbf16>
    %48 = vector.shape_cast %47 : vector<1x80x64xbf16> to vector<80x64xbf16>
    %c8 = arith.constant 8 : index
    %c0_44 = arith.constant 0 : index
    %c0_45 = arith.constant 0 : index
    %49 = vector.load %arg4[%c8, %c0_44, %c0_45] : memref<9x64x128xbf16, #tpu.memory_space<vmem>>, vector<1x64x128xbf16>
    %50 = vector.shape_cast %49 : vector<1x64x128xbf16> to vector<64x128xbf16>
    %cst_46 = arith.constant dense<0.000000e+00> : vector<80x128xf32>
    %51 = tpu.matmul %48, %50, %cst_46 {dimension_numbers = #tpu.dot_dimension_numbers<[1], [0], [0], [1], [0, 0, 1, 1], [], []>} : vector<80x64xbf16>, vector<64x128xbf16>, vector<80x128xf32> -> vector<80x128xf32>
    %52 = arith.addf %46, %51 : vector<80x128xf32>
    %c0_47 = arith.constant 0 : index
    %c0_48 = arith.constant 0 : index
    %53 = vector.load %arg5[%c0_47, %c0_48] : memref<1x128xf32, #tpu.memory_space<vmem>>, vector<1x128xf32>
    %54 = vector.broadcast %53 : vector<1x128xf32> to vector<80x128xf32>
    %55 = arith.addf %52, %54 : vector<80x128xf32>
    %cst_49 = arith.constant 0.000000e+00 : f32
    %56 = vector.broadcast %cst_49 : f32 to vector<80x128xf32>
    %57 = arith.maximumf %55, %56 : vector<80x128xf32>
    %58 = arith.truncf %57 : vector<80x128xf32> to vector<80x128xbf16>
    %c0_50 = arith.constant 0 : index
    %c0_51 = arith.constant 0 : index
    %c0_52 = arith.constant 0 : index
    %59 = vector.load %arg6[%c0_50, %c0_51, %c0_52] : memref<1x80x128xbf16, #tpu.memory_space<vmem>>, vector<1x80x128xbf16>
    %60 = vector.shape_cast %59 : vector<1x80x128xbf16> to vector<80x128xbf16>
    %61 = vector.shape_cast %58 : vector<80x128xbf16> to vector<1x80x128xbf16>
    tpu.vector_store %arg6[%c0_50, %c0_51, %c0_52], %61 {strides = array<i32>} : memref<1x80x128xbf16, #tpu.memory_space<vmem>>, vector<1x80x128xbf16>,
    return
  }
  func.func @transform_0(%arg0: i32, %arg1: i32, %arg2: i32) -> (i32, i32, i32) {
    %c0_i32 = arith.constant 0 : i32
    %c0_i32_0 = arith.constant 0 : i32
    return %arg0, %c0_i32, %arg2 : i32, i32, i32
  }
  func.func @transform_1(%arg0: i32, %arg1: i32, %arg2: i32) -> (i32, i32, i32) {
    %c0_i32 = arith.constant 0 : i32
    %c0_i32_0 = arith.constant 0 : i32
    return %c0_i32, %arg2, %arg1 : i32, i32, i32
  }
  func.func @transform_2(%arg0: i32, %arg1: i32, %arg2: i32) -> (i32, i32) {
    %c0_i32 = arith.constant 0 : i32
    %c0_i32_0 = arith.constant 0 : i32
    return %c0_i32, %arg1 : i32, i32
  }
  func.func @transform_3(%arg0: i32, %arg1: i32, %arg2: i32) -> (i32, i32, i32) {
    %c0_i32 = arith.constant 0 : i32
    %c0_i32_0 = arith.constant 0 : i32
    return %arg0, %c0_i32, %arg1 : i32, i32, i32
  }
}

module attributes {stable_mosaic.version = 11 : i64} {
  func.func @_conv_kernel(%arg0: i32, %arg1: i32, %arg2: i32, %arg3: memref<1x110x128xbf16, #tpu.memory_space<vmem>>, %arg4: memref<1x1152x128xbf16, #tpu.memory_space<vmem>>, %arg5: memref<1x128xf32, #tpu.memory_space<vmem>>, %arg6: memref<1x80x128xbf16, #tpu.memory_space<vmem>>, %arg7: memref<80x1152xbf16, #tpu.memory_space<vmem>>) attributes {dimension_semantics = [#tpu.dimension_semantics<parallel>, #tpu.dimension_semantics<parallel>, #tpu.dimension_semantics<arbitrary>], iteration_bounds = array<i64: 4, 1, 1>, scalar_prefetch = 0 : i64, scratch_operands = 1 : i64, tpu.core_type = #tpu.core_type<tc>, window_params = [{transform_indices = @transform_0, window_bounds = array<i64: 1, 110, 128>}, {transform_indices = @transform_1, window_bounds = array<i64: 1, 1152, 128>}, {transform_indices = @transform_2, window_bounds = array<i64: 1, 128>}, {transform_indices = @transform_3, window_bounds = array<i64: 1, 80, 128>}]} {
    %c0 = arith.constant 0 : index
    %c0_0 = arith.constant 0 : index
    %c0_1 = arith.constant 0 : index
    %0 = vector.load %arg3[%c0, %c0_0, %c0_1] : memref<1x110x128xbf16, #tpu.memory_space<vmem>>, vector<1x80x128xbf16>
    %1 = vector.shape_cast %0 : vector<1x80x128xbf16> to vector<80x128xbf16>
    %c0_2 = arith.constant 0 : index
    %c0_3 = arith.constant 0 : index
    %2 = vector.load %arg7[%c0_2, %c0_3] : memref<80x1152xbf16, #tpu.memory_space<vmem>>, vector<80x128xbf16>
    tpu.vector_store %arg7[%c0_2, %c0_3], %1 {strides = array<i32>} : memref<80x1152xbf16, #tpu.memory_space<vmem>>, vector<80x128xbf16>,
    %c0_4 = arith.constant 0 : index
    %c1 = arith.constant 1 : index
    %c0_5 = arith.constant 0 : index
    %3 = vector.load %arg3[%c0_4, %c1, %c0_5] : memref<1x110x128xbf16, #tpu.memory_space<vmem>>, vector<1x80x128xbf16>
    %4 = vector.shape_cast %3 : vector<1x80x128xbf16> to vector<80x128xbf16>
    %c0_6 = arith.constant 0 : index
    %c128 = arith.constant 128 : index
    %5 = vector.load %arg7[%c0_6, %c128] : memref<80x1152xbf16, #tpu.memory_space<vmem>>, vector<80x128xbf16>
    tpu.vector_store %arg7[%c0_6, %c128], %4 {strides = array<i32>} : memref<80x1152xbf16, #tpu.memory_space<vmem>>, vector<80x128xbf16>,
    %c0_7 = arith.constant 0 : index
    %c2 = arith.constant 2 : index
    %c0_8 = arith.constant 0 : index
    %6 = vector.load %arg3[%c0_7, %c2, %c0_8] : memref<1x110x128xbf16, #tpu.memory_space<vmem>>, vector<1x80x128xbf16>
    %7 = vector.shape_cast %6 : vector<1x80x128xbf16> to vector<80x128xbf16>
    %c0_9 = arith.constant 0 : index
    %c256 = arith.constant 256 : index
    %8 = vector.load %arg7[%c0_9, %c256] : memref<80x1152xbf16, #tpu.memory_space<vmem>>, vector<80x128xbf16>
    tpu.vector_store %arg7[%c0_9, %c256], %7 {strides = array<i32>} : memref<80x1152xbf16, #tpu.memory_space<vmem>>, vector<80x128xbf16>,
    %c0_10 = arith.constant 0 : index
    %c10 = arith.constant 10 : index
    %c0_11 = arith.constant 0 : index
    %9 = vector.load %arg3[%c0_10, %c10, %c0_11] : memref<1x110x128xbf16, #tpu.memory_space<vmem>>, vector<1x80x128xbf16>
    %10 = vector.shape_cast %9 : vector<1x80x128xbf16> to vector<80x128xbf16>
    %c0_12 = arith.constant 0 : index
    %c384 = arith.constant 384 : index
    %11 = vector.load %arg7[%c0_12, %c384] : memref<80x1152xbf16, #tpu.memory_space<vmem>>, vector<80x128xbf16>
    tpu.vector_store %arg7[%c0_12, %c384], %10 {strides = array<i32>} : memref<80x1152xbf16, #tpu.memory_space<vmem>>, vector<80x128xbf16>,
    %c0_13 = arith.constant 0 : index
    %c11 = arith.constant 11 : index
    %c0_14 = arith.constant 0 : index
    %12 = vector.load %arg3[%c0_13, %c11, %c0_14] : memref<1x110x128xbf16, #tpu.memory_space<vmem>>, vector<1x80x128xbf16>
    %13 = vector.shape_cast %12 : vector<1x80x128xbf16> to vector<80x128xbf16>
    %c0_15 = arith.constant 0 : index
    %c512 = arith.constant 512 : index
    %14 = vector.load %arg7[%c0_15, %c512] : memref<80x1152xbf16, #tpu.memory_space<vmem>>, vector<80x128xbf16>
    tpu.vector_store %arg7[%c0_15, %c512], %13 {strides = array<i32>} : memref<80x1152xbf16, #tpu.memory_space<vmem>>, vector<80x128xbf16>,
    %c0_16 = arith.constant 0 : index
    %c12 = arith.constant 12 : index
    %c0_17 = arith.constant 0 : index
    %15 = vector.load %arg3[%c0_16, %c12, %c0_17] : memref<1x110x128xbf16, #tpu.memory_space<vmem>>, vector<1x80x128xbf16>
    %16 = vector.shape_cast %15 : vector<1x80x128xbf16> to vector<80x128xbf16>
    %c0_18 = arith.constant 0 : index
    %c640 = arith.constant 640 : index
    %17 = vector.load %arg7[%c0_18, %c640] : memref<80x1152xbf16, #tpu.memory_space<vmem>>, vector<80x128xbf16>
    tpu.vector_store %arg7[%c0_18, %c640], %16 {strides = array<i32>} : memref<80x1152xbf16, #tpu.memory_space<vmem>>, vector<80x128xbf16>,
    %c0_19 = arith.constant 0 : index
    %c20 = arith.constant 20 : index
    %c0_20 = arith.constant 0 : index
    %18 = vector.load %arg3[%c0_19, %c20, %c0_20] : memref<1x110x128xbf16, #tpu.memory_space<vmem>>, vector<1x80x128xbf16>
    %19 = vector.shape_cast %18 : vector<1x80x128xbf16> to vector<80x128xbf16>
    %c0_21 = arith.constant 0 : index
    %c768 = arith.constant 768 : index
    %20 = vector.load %arg7[%c0_21, %c768] : memref<80x1152xbf16, #tpu.memory_space<vmem>>, vector<80x128xbf16>
    tpu.vector_store %arg7[%c0_21, %c768], %19 {strides = array<i32>} : memref<80x1152xbf16, #tpu.memory_space<vmem>>, vector<80x128xbf16>,
    %c0_22 = arith.constant 0 : index
    %c21 = arith.constant 21 : index
    %c0_23 = arith.constant 0 : index
    %21 = vector.load %arg3[%c0_22, %c21, %c0_23] : memref<1x110x128xbf16, #tpu.memory_space<vmem>>, vector<1x80x128xbf16>
    %22 = vector.shape_cast %21 : vector<1x80x128xbf16> to vector<80x128xbf16>
    %c0_24 = arith.constant 0 : index
    %c896 = arith.constant 896 : index
    %23 = vector.load %arg7[%c0_24, %c896] : memref<80x1152xbf16, #tpu.memory_space<vmem>>, vector<80x128xbf16>
    tpu.vector_store %arg7[%c0_24, %c896], %22 {strides = array<i32>} : memref<80x1152xbf16, #tpu.memory_space<vmem>>, vector<80x128xbf16>,
    %c0_25 = arith.constant 0 : index
    %c22 = arith.constant 22 : index
    %c0_26 = arith.constant 0 : index
    %24 = vector.load %arg3[%c0_25, %c22, %c0_26] : memref<1x110x128xbf16, #tpu.memory_space<vmem>>, vector<1x80x128xbf16>
    %25 = vector.shape_cast %24 : vector<1x80x128xbf16> to vector<80x128xbf16>
    %c0_27 = arith.constant 0 : index
    %c1024 = arith.constant 1024 : index
    %26 = vector.load %arg7[%c0_27, %c1024] : memref<80x1152xbf16, #tpu.memory_space<vmem>>, vector<80x128xbf16>
    tpu.vector_store %arg7[%c0_27, %c1024], %25 {strides = array<i32>} : memref<80x1152xbf16, #tpu.memory_space<vmem>>, vector<80x128xbf16>,
    %c0_28 = arith.constant 0 : index
    %c0_29 = arith.constant 0 : index
    %27 = vector.load %arg7[%c0_28, %c0_29] : memref<80x1152xbf16, #tpu.memory_space<vmem>>, vector<80x1152xbf16>
    %c0_30 = arith.constant 0 : index
    %c0_31 = arith.constant 0 : index
    %c0_32 = arith.constant 0 : index
    %28 = vector.load %arg4[%c0_30, %c0_31, %c0_32] : memref<1x1152x128xbf16, #tpu.memory_space<vmem>>, vector<1x1152x128xbf16>
    %29 = vector.shape_cast %28 : vector<1x1152x128xbf16> to vector<1152x128xbf16>
    %cst = arith.constant dense<0.000000e+00> : vector<80x128xf32>
    %30 = tpu.matmul %27, %29, %cst {dimension_numbers = #tpu.dot_dimension_numbers<[1], [0], [0], [1], [0, 0, 1, 1], [], []>} : vector<80x1152xbf16>, vector<1152x128xbf16>, vector<80x128xf32> -> vector<80x128xf32>
    %c0_33 = arith.constant 0 : index
    %c0_34 = arith.constant 0 : index
    %31 = vector.load %arg5[%c0_33, %c0_34] : memref<1x128xf32, #tpu.memory_space<vmem>>, vector<1x128xf32>
    %32 = vector.broadcast %31 : vector<1x128xf32> to vector<80x128xf32>
    %33 = arith.addf %30, %32 : vector<80x128xf32>
    %34 = arith.truncf %33 : vector<80x128xf32> to vector<80x128xbf16>
    %c0_35 = arith.constant 0 : index
    %c0_36 = arith.constant 0 : index
    %c0_37 = arith.constant 0 : index
    %35 = vector.load %arg6[%c0_35, %c0_36, %c0_37] : memref<1x80x128xbf16, #tpu.memory_space<vmem>>, vector<1x80x128xbf16>
    %36 = vector.shape_cast %35 : vector<1x80x128xbf16> to vector<80x128xbf16>
    %37 = vector.shape_cast %34 : vector<80x128xbf16> to vector<1x80x128xbf16>
    tpu.vector_store %arg6[%c0_35, %c0_36, %c0_37], %37 {strides = array<i32>} : memref<1x80x128xbf16, #tpu.memory_space<vmem>>, vector<1x80x128xbf16>,
    return
  }
  func.func @transform_0(%arg0: i32, %arg1: i32, %arg2: i32) -> (i32, i32, i32) {
    %c0_i32 = arith.constant 0 : i32
    %c0_i32_0 = arith.constant 0 : i32
    return %arg0, %c0_i32, %arg2 : i32, i32, i32
  }
  func.func @transform_1(%arg0: i32, %arg1: i32, %arg2: i32) -> (i32, i32, i32) {
    %c0_i32 = arith.constant 0 : i32
    %c0_i32_0 = arith.constant 0 : i32
    return %arg2, %c0_i32, %arg1 : i32, i32, i32
  }
  func.func @transform_2(%arg0: i32, %arg1: i32, %arg2: i32) -> (i32, i32) {
    %c0_i32 = arith.constant 0 : i32
    %c0_i32_0 = arith.constant 0 : i32
    return %c0_i32, %arg1 : i32, i32
  }
  func.func @transform_3(%arg0: i32, %arg1: i32, %arg2: i32) -> (i32, i32, i32) {
    %c0_i32 = arith.constant 0 : i32
    %c0_i32_0 = arith.constant 0 : i32
    return %arg0, %c0_i32, %arg1 : i32, i32, i32
  }
}

module attributes {stable_mosaic.version = 11 : i64} {
  func.func @_abs_mean_kernel(%arg0: i32, %arg1: memref<2x2x8x1024xbf16, #tpu.memory_space<vmem>>, %arg2: memref<2x1xf32, #tpu.memory_space<vmem>>, %arg3: memref<2x1xf32, #tpu.memory_space<vmem>>) attributes {dimension_semantics = [#tpu.dimension_semantics<arbitrary>], iteration_bounds = array<i64: 1>, scalar_prefetch = 0 : i64, scratch_operands = 1 : i64, tpu.core_type = #tpu.core_type<tc>, window_params = [{transform_indices = @transform_0, window_bounds = array<i64: 2, 2, 8, 1024>}, {pipeline_mode = #tpu.pipeline_mode<synchronous>, transform_indices = @transform_1, window_bounds = array<i64: 2, 1>}]} {
    %c0_i32 = arith.constant 0 : i32
    %0 = arith.cmpi eq, %arg0, %c0_i32 : i32
    %1 = arith.extui %0 : i1 to i32
    %c0_i32_0 = arith.constant 0 : i32
    %2 = arith.cmpi ne, %1, %c0_i32_0 : i32
    scf.if %2 {
      %cst_14 = arith.constant 0.000000e+00 : f32
      %20 = vector.broadcast %cst_14 : f32 to vector<2x1xf32>
      %c0_15 = arith.constant 0 : index
      %c0_16 = arith.constant 0 : index
      %21 = vector.load %arg3[%c0_15, %c0_16] : memref<2x1xf32, #tpu.memory_space<vmem>>, vector<2x1xf32>
      tpu.vector_store %arg3[%c0_15, %c0_16], %20 {strides = array<i32>} : memref<2x1xf32, #tpu.memory_space<vmem>>, vector<2x1xf32>,
    } else {
    }
    %c0 = arith.constant 0 : index
    %c0_1 = arith.constant 0 : index
    %c0_2 = arith.constant 0 : index
    %c0_3 = arith.constant 0 : index
    %3 = vector.load %arg1[%c0, %c0_1, %c0_2, %c0_3] : memref<2x2x8x1024xbf16, #tpu.memory_space<vmem>>, vector<1x2x8x1024xbf16>
    %4 = vector.shape_cast %3 : vector<1x2x8x1024xbf16> to vector<2x8x1024xbf16>
    %5 = arith.extf %4 : vector<2x8x1024xbf16> to vector<2x8x1024xf32>
    %c1 = arith.constant 1 : index
    %c0_4 = arith.constant 0 : index
    %c0_5 = arith.constant 0 : index
    %c0_6 = arith.constant 0 : index
    %6 = vector.load %arg1[%c1, %c0_4, %c0_5, %c0_6] : memref<2x2x8x1024xbf16, #tpu.memory_space<vmem>>, vector<1x2x8x1024xbf16>
    %7 = vector.shape_cast %6 : vector<1x2x8x1024xbf16> to vector<2x8x1024xbf16>
    %8 = arith.extf %7 : vector<2x8x1024xbf16> to vector<2x8x1024xf32>
    %9 = arith.subf %5, %8 : vector<2x8x1024xf32>
    %10 = math.absf %9 : vector<2x8x1024xf32>
    %cst = arith.constant dense<0.000000e+00> : vector<2x8xf32>
    %11 = vector.multi_reduction <add>, %10, %cst [2] : vector<2x8x1024xf32> to vector<2x8xf32>
    %cst_7 = arith.constant dense<0.000000e+00> : vector<2xf32>
    %12 = vector.multi_reduction <add>, %11, %cst_7 [1] : vector<2x8xf32> to vector<2xf32>
    %c0_8 = arith.constant 0 : index
    %c0_9 = arith.constant 0 : index
    %13 = vector.load %arg3[%c0_8, %c0_9] : memref<2x1xf32, #tpu.memory_space<vmem>>, vector<2x1xf32>
    %14 = vector.shape_cast %12 : vector<2xf32> to vector<2x1xf32>
    %15 = arith.addf %13, %14 : vector<2x1xf32>
    %c0_10 = arith.constant 0 : index
    %c0_11 = arith.constant 0 : index
    %16 = vector.load %arg3[%c0_10, %c0_11] : memref<2x1xf32, #tpu.memory_space<vmem>>, vector<2x1xf32>
    tpu.vector_store %arg3[%c0_10, %c0_11], %15 {strides = array<i32>} : memref<2x1xf32, #tpu.memory_space<vmem>>, vector<2x1xf32>,
    %c0_i32_12 = arith.constant 0 : i32
    %17 = arith.cmpi eq, %arg0, %c0_i32_12 : i32
    %18 = arith.extui %17 : i1 to i32
    %c0_i32_13 = arith.constant 0 : i32
    %19 = arith.cmpi ne, %18, %c0_i32_13 : i32
    scf.if %19 {
      %c0_14 = arith.constant 0 : index
      %c0_15 = arith.constant 0 : index
      %20 = vector.load %arg3[%c0_14, %c0_15] : memref<2x1xf32, #tpu.memory_space<vmem>>, vector<2x1xf32>
      %cst_16 = arith.constant 1.22070313E-4 : f32
      %21 = vector.broadcast %cst_16 : f32 to vector<2x1xf32>
      %22 = arith.mulf %20, %21 : vector<2x1xf32>
      %c0_17 = arith.constant 0 : index
      %c0_18 = arith.constant 0 : index
      %23 = vector.load %arg2[%c0_17, %c0_18] : memref<2x1xf32, #tpu.memory_space<vmem>>, vector<2x1xf32>
      tpu.vector_store %arg2[%c0_17, %c0_18], %22 {strides = array<i32>} : memref<2x1xf32, #tpu.memory_space<vmem>>, vector<2x1xf32>,
    } else {
    }
    return
  }
  func.func @transform_0(%arg0: i32) -> (i32, i32, i32, i32) {
    %c0_i32 = arith.constant 0 : i32
    %c0_i32_0 = arith.constant 0 : i32
    %c0_i32_1 = arith.constant 0 : i32
    %c0_i32_2 = arith.constant 0 : i32
    return %c0_i32, %c0_i32_0, %arg0, %c0_i32_1 : i32, i32, i32, i32
  }
  func.func @transform_1(%arg0: i32) -> (i32, i32) {
    %c0_i32 = arith.constant 0 : i32
    %c0_i32_0 = arith.constant 0 : i32
    %c0_i32_1 = arith.constant 0 : i32
    return %c0_i32, %c0_i32_0 : i32, i32
  }
}

module attributes {stable_mosaic.version = 11 : i64} {
  func.func @_pool_kernel(%arg0: i32, %arg1: i32, %arg2: memref<1x8x4x256xbf16, #tpu.memory_space<vmem>>, %arg3: memref<1x4x4x128xbf16, #tpu.memory_space<vmem>>) attributes {dimension_semantics = [#tpu.dimension_semantics<parallel>, #tpu.dimension_semantics<parallel>], iteration_bounds = array<i64: 4, 1>, scalar_prefetch = 0 : i64, scratch_operands = 0 : i64, tpu.core_type = #tpu.core_type<tc>, window_params = [{transform_indices = @transform_0, window_bounds = array<i64: 1, 8, 4, 256>}, {transform_indices = @transform_1, window_bounds = array<i64: 1, 4, 4, 128>}]} {
    %c0 = arith.constant 0 : index
    %c0_0 = arith.constant 0 : index
    %c0_1 = arith.constant 0 : index
    %c0_2 = arith.constant 0 : index
    %0 = vector.load %arg2[%c0, %c0_0, %c0_1, %c0_2] : memref<1x8x4x256xbf16, #tpu.memory_space<vmem>>, vector<1x8x4x256xbf16>
    %1 = vector.shape_cast %0 : vector<1x8x4x256xbf16> to vector<8x4x256xbf16>
    %2 = vector.shape_cast %1 : vector<8x4x256xbf16> to vector<4x2x4x256xbf16>
    %3 = vector.extract_strided_slice %2 {offsets = [0, 0, 0, 0], sizes = [4, 1, 4, 256], strides = [1, 1, 1, 1]} : vector<4x2x4x256xbf16> to vector<4x1x4x256xbf16>
    %4 = vector.shape_cast %3 : vector<4x1x4x256xbf16> to vector<4x4x256xbf16>
    %5 = vector.extract_strided_slice %2 {offsets = [0, 1, 0, 0], sizes = [4, 1, 4, 256], strides = [1, 1, 1, 1]} : vector<4x2x4x256xbf16> to vector<4x1x4x256xbf16>
    %6 = vector.shape_cast %5 : vector<4x1x4x256xbf16> to vector<4x4x256xbf16>
    %7 = arith.maximumf %4, %6 : vector<4x4x256xbf16>
    %8 = vector.extract_strided_slice %7 {offsets = [0, 0, 0], sizes = [4, 4, 128], strides = [1, 1, 1]} : vector<4x4x256xbf16> to vector<4x4x128xbf16>
    %9 = vector.extract_strided_slice %7 {offsets = [0, 0, 128], sizes = [4, 4, 128], strides = [1, 1, 1]} : vector<4x4x256xbf16> to vector<4x4x128xbf16>
    %10 = arith.maximumf %8, %9 : vector<4x4x128xbf16>
    %cst = arith.constant 0.000000e+00 : bf16
    %11 = vector.broadcast %cst : bf16 to vector<4x4x128xbf16>
    %12 = arith.maximumf %10, %11 : vector<4x4x128xbf16>
    %c0_3 = arith.constant 0 : index
    %c0_4 = arith.constant 0 : index
    %c0_5 = arith.constant 0 : index
    %c0_6 = arith.constant 0 : index
    %13 = vector.load %arg3[%c0_3, %c0_4, %c0_5, %c0_6] : memref<1x4x4x128xbf16, #tpu.memory_space<vmem>>, vector<1x4x4x128xbf16>
    %14 = vector.shape_cast %13 : vector<1x4x4x128xbf16> to vector<4x4x128xbf16>
    %15 = vector.shape_cast %12 : vector<4x4x128xbf16> to vector<1x4x4x128xbf16>
    tpu.vector_store %arg3[%c0_3, %c0_4, %c0_5, %c0_6], %15 {strides = array<i32>} : memref<1x4x4x128xbf16, #tpu.memory_space<vmem>>, vector<1x4x4x128xbf16>,
    return
  }
  func.func @transform_0(%arg0: i32, %arg1: i32) -> (i32, i32, i32, i32) {
    %c0_i32 = arith.constant 0 : i32
    %c0_i32_0 = arith.constant 0 : i32
    %c0_i32_1 = arith.constant 0 : i32
    return %arg0, %arg1, %c0_i32, %c0_i32_0 : i32, i32, i32, i32
  }
  func.func @transform_1(%arg0: i32, %arg1: i32) -> (i32, i32, i32, i32) {
    %c0_i32 = arith.constant 0 : i32
    %c0_i32_0 = arith.constant 0 : i32
    %c0_i32_1 = arith.constant 0 : i32
    return %arg0, %arg1, %c0_i32, %c0_i32_0 : i32, i32, i32, i32
  }
}

module attributes {stable_mosaic.version = 11 : i64} {
  func.func @_conv_kernel(%arg0: i32, %arg1: i32, %arg2: i32, %arg3: memref<1x42x128xbf16, #tpu.memory_space<vmem>>, %arg4: memref<1x1152x256xbf16, #tpu.memory_space<vmem>>, %arg5: memref<1x256xf32, #tpu.memory_space<vmem>>, %arg6: memref<1x24x256xbf16, #tpu.memory_space<vmem>>, %arg7: memref<24x1152xbf16, #tpu.memory_space<vmem>>) attributes {dimension_semantics = [#tpu.dimension_semantics<parallel>, #tpu.dimension_semantics<parallel>, #tpu.dimension_semantics<arbitrary>], iteration_bounds = array<i64: 4, 1, 1>, scalar_prefetch = 0 : i64, scratch_operands = 1 : i64, tpu.core_type = #tpu.core_type<tc>, window_params = [{transform_indices = @transform_0, window_bounds = array<i64: 1, 42, 128>}, {transform_indices = @transform_1, window_bounds = array<i64: 1, 1152, 256>}, {transform_indices = @transform_2, window_bounds = array<i64: 1, 256>}, {transform_indices = @transform_3, window_bounds = array<i64: 1, 24, 256>}]} {
    %c0 = arith.constant 0 : index
    %c0_0 = arith.constant 0 : index
    %c0_1 = arith.constant 0 : index
    %0 = vector.load %arg3[%c0, %c0_0, %c0_1] : memref<1x42x128xbf16, #tpu.memory_space<vmem>>, vector<1x24x128xbf16>
    %1 = vector.shape_cast %0 : vector<1x24x128xbf16> to vector<24x128xbf16>
    %c0_2 = arith.constant 0 : index
    %c0_3 = arith.constant 0 : index
    %2 = vector.load %arg7[%c0_2, %c0_3] : memref<24x1152xbf16, #tpu.memory_space<vmem>>, vector<24x128xbf16>
    tpu.vector_store %arg7[%c0_2, %c0_3], %1 {strides = array<i32>} : memref<24x1152xbf16, #tpu.memory_space<vmem>>, vector<24x128xbf16>,
    %c0_4 = arith.constant 0 : index
    %c1 = arith.constant 1 : index
    %c0_5 = arith.constant 0 : index
    %3 = vector.load %arg3[%c0_4, %c1, %c0_5] : memref<1x42x128xbf16, #tpu.memory_space<vmem>>, vector<1x24x128xbf16>
    %4 = vector.shape_cast %3 : vector<1x24x128xbf16> to vector<24x128xbf16>
    %c0_6 = arith.constant 0 : index
    %c128 = arith.constant 128 : index
    %5 = vector.load %arg7[%c0_6, %c128] : memref<24x1152xbf16, #tpu.memory_space<vmem>>, vector<24x128xbf16>
    tpu.vector_store %arg7[%c0_6, %c128], %4 {strides = array<i32>} : memref<24x1152xbf16, #tpu.memory_space<vmem>>, vector<24x128xbf16>,
    %c0_7 = arith.constant 0 : index
    %c2 = arith.constant 2 : index
    %c0_8 = arith.constant 0 : index
    %6 = vector.load %arg3[%c0_7, %c2, %c0_8] : memref<1x42x128xbf16, #tpu.memory_space<vmem>>, vector<1x24x128xbf16>
    %7 = vector.shape_cast %6 : vector<1x24x128xbf16> to vector<24x128xbf16>
    %c0_9 = arith.constant 0 : index
    %c256 = arith.constant 256 : index
    %8 = vector.load %arg7[%c0_9, %c256] : memref<24x1152xbf16, #tpu.memory_space<vmem>>, vector<24x128xbf16>
    tpu.vector_store %arg7[%c0_9, %c256], %7 {strides = array<i32>} : memref<24x1152xbf16, #tpu.memory_space<vmem>>, vector<24x128xbf16>,
    %c0_10 = arith.constant 0 : index
    %c6 = arith.constant 6 : index
    %c0_11 = arith.constant 0 : index
    %9 = vector.load %arg3[%c0_10, %c6, %c0_11] : memref<1x42x128xbf16, #tpu.memory_space<vmem>>, vector<1x24x128xbf16>
    %10 = vector.shape_cast %9 : vector<1x24x128xbf16> to vector<24x128xbf16>
    %c0_12 = arith.constant 0 : index
    %c384 = arith.constant 384 : index
    %11 = vector.load %arg7[%c0_12, %c384] : memref<24x1152xbf16, #tpu.memory_space<vmem>>, vector<24x128xbf16>
    tpu.vector_store %arg7[%c0_12, %c384], %10 {strides = array<i32>} : memref<24x1152xbf16, #tpu.memory_space<vmem>>, vector<24x128xbf16>,
    %c0_13 = arith.constant 0 : index
    %c7 = arith.constant 7 : index
    %c0_14 = arith.constant 0 : index
    %12 = vector.load %arg3[%c0_13, %c7, %c0_14] : memref<1x42x128xbf16, #tpu.memory_space<vmem>>, vector<1x24x128xbf16>
    %13 = vector.shape_cast %12 : vector<1x24x128xbf16> to vector<24x128xbf16>
    %c0_15 = arith.constant 0 : index
    %c512 = arith.constant 512 : index
    %14 = vector.load %arg7[%c0_15, %c512] : memref<24x1152xbf16, #tpu.memory_space<vmem>>, vector<24x128xbf16>
    tpu.vector_store %arg7[%c0_15, %c512], %13 {strides = array<i32>} : memref<24x1152xbf16, #tpu.memory_space<vmem>>, vector<24x128xbf16>,
    %c0_16 = arith.constant 0 : index
    %c8 = arith.constant 8 : index
    %c0_17 = arith.constant 0 : index
    %15 = vector.load %arg3[%c0_16, %c8, %c0_17] : memref<1x42x128xbf16, #tpu.memory_space<vmem>>, vector<1x24x128xbf16>
    %16 = vector.shape_cast %15 : vector<1x24x128xbf16> to vector<24x128xbf16>
    %c0_18 = arith.constant 0 : index
    %c640 = arith.constant 640 : index
    %17 = vector.load %arg7[%c0_18, %c640] : memref<24x1152xbf16, #tpu.memory_space<vmem>>, vector<24x128xbf16>
    tpu.vector_store %arg7[%c0_18, %c640], %16 {strides = array<i32>} : memref<24x1152xbf16, #tpu.memory_space<vmem>>, vector<24x128xbf16>,
    %c0_19 = arith.constant 0 : index
    %c12 = arith.constant 12 : index
    %c0_20 = arith.constant 0 : index
    %18 = vector.load %arg3[%c0_19, %c12, %c0_20] : memref<1x42x128xbf16, #tpu.memory_space<vmem>>, vector<1x24x128xbf16>
    %19 = vector.shape_cast %18 : vector<1x24x128xbf16> to vector<24x128xbf16>
    %c0_21 = arith.constant 0 : index
    %c768 = arith.constant 768 : index
    %20 = vector.load %arg7[%c0_21, %c768] : memref<24x1152xbf16, #tpu.memory_space<vmem>>, vector<24x128xbf16>
    tpu.vector_store %arg7[%c0_21, %c768], %19 {strides = array<i32>} : memref<24x1152xbf16, #tpu.memory_space<vmem>>, vector<24x128xbf16>,
    %c0_22 = arith.constant 0 : index
    %c13 = arith.constant 13 : index
    %c0_23 = arith.constant 0 : index
    %21 = vector.load %arg3[%c0_22, %c13, %c0_23] : memref<1x42x128xbf16, #tpu.memory_space<vmem>>, vector<1x24x128xbf16>
    %22 = vector.shape_cast %21 : vector<1x24x128xbf16> to vector<24x128xbf16>
    %c0_24 = arith.constant 0 : index
    %c896 = arith.constant 896 : index
    %23 = vector.load %arg7[%c0_24, %c896] : memref<24x1152xbf16, #tpu.memory_space<vmem>>, vector<24x128xbf16>
    tpu.vector_store %arg7[%c0_24, %c896], %22 {strides = array<i32>} : memref<24x1152xbf16, #tpu.memory_space<vmem>>, vector<24x128xbf16>,
    %c0_25 = arith.constant 0 : index
    %c14 = arith.constant 14 : index
    %c0_26 = arith.constant 0 : index
    %24 = vector.load %arg3[%c0_25, %c14, %c0_26] : memref<1x42x128xbf16, #tpu.memory_space<vmem>>, vector<1x24x128xbf16>
    %25 = vector.shape_cast %24 : vector<1x24x128xbf16> to vector<24x128xbf16>
    %c0_27 = arith.constant 0 : index
    %c1024 = arith.constant 1024 : index
    %26 = vector.load %arg7[%c0_27, %c1024] : memref<24x1152xbf16, #tpu.memory_space<vmem>>, vector<24x128xbf16>
    tpu.vector_store %arg7[%c0_27, %c1024], %25 {strides = array<i32>} : memref<24x1152xbf16, #tpu.memory_space<vmem>>, vector<24x128xbf16>,
    %c0_28 = arith.constant 0 : index
    %c0_29 = arith.constant 0 : index
    %27 = vector.load %arg7[%c0_28, %c0_29] : memref<24x1152xbf16, #tpu.memory_space<vmem>>, vector<24x1152xbf16>
    %c0_30 = arith.constant 0 : index
    %c0_31 = arith.constant 0 : index
    %c0_32 = arith.constant 0 : index
    %28 = vector.load %arg4[%c0_30, %c0_31, %c0_32] : memref<1x1152x256xbf16, #tpu.memory_space<vmem>>, vector<1x1152x256xbf16>
    %29 = vector.shape_cast %28 : vector<1x1152x256xbf16> to vector<1152x256xbf16>
    %cst = arith.constant dense<0.000000e+00> : vector<24x256xf32>
    %30 = tpu.matmul %27, %29, %cst {dimension_numbers = #tpu.dot_dimension_numbers<[1], [0], [0], [1], [0, 0, 1, 1], [], []>} : vector<24x1152xbf16>, vector<1152x256xbf16>, vector<24x256xf32> -> vector<24x256xf32>
    %c0_33 = arith.constant 0 : index
    %c0_34 = arith.constant 0 : index
    %31 = vector.load %arg5[%c0_33, %c0_34] : memref<1x256xf32, #tpu.memory_space<vmem>>, vector<1x256xf32>
    %32 = vector.broadcast %31 : vector<1x256xf32> to vector<24x256xf32>
    %33 = arith.addf %30, %32 : vector<24x256xf32>
    %cst_35 = arith.constant 0.000000e+00 : f32
    %34 = vector.broadcast %cst_35 : f32 to vector<24x256xf32>
    %35 = arith.maximumf %33, %34 : vector<24x256xf32>
    %36 = arith.truncf %35 : vector<24x256xf32> to vector<24x256xbf16>
    %c0_36 = arith.constant 0 : index
    %c0_37 = arith.constant 0 : index
    %c0_38 = arith.constant 0 : index
    %37 = vector.load %arg6[%c0_36, %c0_37, %c0_38] : memref<1x24x256xbf16, #tpu.memory_space<vmem>>, vector<1x24x256xbf16>
    %38 = vector.shape_cast %37 : vector<1x24x256xbf16> to vector<24x256xbf16>
    %39 = vector.shape_cast %36 : vector<24x256xbf16> to vector<1x24x256xbf16>
    tpu.vector_store %arg6[%c0_36, %c0_37, %c0_38], %39 {strides = array<i32>} : memref<1x24x256xbf16, #tpu.memory_space<vmem>>, vector<1x24x256xbf16>,
    return
  }
  func.func @transform_0(%arg0: i32, %arg1: i32, %arg2: i32) -> (i32, i32, i32) {
    %c0_i32 = arith.constant 0 : i32
    %c0_i32_0 = arith.constant 0 : i32
    return %arg0, %c0_i32, %arg2 : i32, i32, i32
  }
  func.func @transform_1(%arg0: i32, %arg1: i32, %arg2: i32) -> (i32, i32, i32) {
    %c0_i32 = arith.constant 0 : i32
    %c0_i32_0 = arith.constant 0 : i32
    return %arg2, %c0_i32, %arg1 : i32, i32, i32
  }
  func.func @transform_2(%arg0: i32, %arg1: i32, %arg2: i32) -> (i32, i32) {
    %c0_i32 = arith.constant 0 : i32
    %c0_i32_0 = arith.constant 0 : i32
    return %c0_i32, %arg1 : i32, i32
  }
  func.func @transform_3(%arg0: i32, %arg1: i32, %arg2: i32) -> (i32, i32, i32) {
    %c0_i32 = arith.constant 0 : i32
    %c0_i32_0 = arith.constant 0 : i32
    return %arg0, %c0_i32, %arg1 : i32, i32, i32
  }
}

module attributes {stable_mosaic.version = 11 : i64} {
  func.func @_conv_kernel(%arg0: i32, %arg1: i32, %arg2: i32, %arg3: memref<1x42x256xbf16, #tpu.memory_space<vmem>>, %arg4: memref<1x2304x256xbf16, #tpu.memory_space<vmem>>, %arg5: memref<1x256xf32, #tpu.memory_space<vmem>>, %arg6: memref<1x24x256xbf16, #tpu.memory_space<vmem>>, %arg7: memref<24x2304xbf16, #tpu.memory_space<vmem>>) attributes {dimension_semantics = [#tpu.dimension_semantics<parallel>, #tpu.dimension_semantics<parallel>, #tpu.dimension_semantics<arbitrary>], iteration_bounds = array<i64: 4, 1, 1>, scalar_prefetch = 0 : i64, scratch_operands = 1 : i64, tpu.core_type = #tpu.core_type<tc>, window_params = [{transform_indices = @transform_0, window_bounds = array<i64: 1, 42, 256>}, {transform_indices = @transform_1, window_bounds = array<i64: 1, 2304, 256>}, {transform_indices = @transform_2, window_bounds = array<i64: 1, 256>}, {transform_indices = @transform_3, window_bounds = array<i64: 1, 24, 256>}]} {
    %c0 = arith.constant 0 : index
    %c0_0 = arith.constant 0 : index
    %c0_1 = arith.constant 0 : index
    %0 = vector.load %arg3[%c0, %c0_0, %c0_1] : memref<1x42x256xbf16, #tpu.memory_space<vmem>>, vector<1x24x256xbf16>
    %1 = vector.shape_cast %0 : vector<1x24x256xbf16> to vector<24x256xbf16>
    %c0_2 = arith.constant 0 : index
    %c0_3 = arith.constant 0 : index
    %2 = vector.load %arg7[%c0_2, %c0_3] : memref<24x2304xbf16, #tpu.memory_space<vmem>>, vector<24x256xbf16>
    tpu.vector_store %arg7[%c0_2, %c0_3], %1 {strides = array<i32>} : memref<24x2304xbf16, #tpu.memory_space<vmem>>, vector<24x256xbf16>,
    %c0_4 = arith.constant 0 : index
    %c1 = arith.constant 1 : index
    %c0_5 = arith.constant 0 : index
    %3 = vector.load %arg3[%c0_4, %c1, %c0_5] : memref<1x42x256xbf16, #tpu.memory_space<vmem>>, vector<1x24x256xbf16>
    %4 = vector.shape_cast %3 : vector<1x24x256xbf16> to vector<24x256xbf16>
    %c0_6 = arith.constant 0 : index
    %c256 = arith.constant 256 : index
    %5 = vector.load %arg7[%c0_6, %c256] : memref<24x2304xbf16, #tpu.memory_space<vmem>>, vector<24x256xbf16>
    tpu.vector_store %arg7[%c0_6, %c256], %4 {strides = array<i32>} : memref<24x2304xbf16, #tpu.memory_space<vmem>>, vector<24x256xbf16>,
    %c0_7 = arith.constant 0 : index
    %c2 = arith.constant 2 : index
    %c0_8 = arith.constant 0 : index
    %6 = vector.load %arg3[%c0_7, %c2, %c0_8] : memref<1x42x256xbf16, #tpu.memory_space<vmem>>, vector<1x24x256xbf16>
    %7 = vector.shape_cast %6 : vector<1x24x256xbf16> to vector<24x256xbf16>
    %c0_9 = arith.constant 0 : index
    %c512 = arith.constant 512 : index
    %8 = vector.load %arg7[%c0_9, %c512] : memref<24x2304xbf16, #tpu.memory_space<vmem>>, vector<24x256xbf16>
    tpu.vector_store %arg7[%c0_9, %c512], %7 {strides = array<i32>} : memref<24x2304xbf16, #tpu.memory_space<vmem>>, vector<24x256xbf16>,
    %c0_10 = arith.constant 0 : index
    %c6 = arith.constant 6 : index
    %c0_11 = arith.constant 0 : index
    %9 = vector.load %arg3[%c0_10, %c6, %c0_11] : memref<1x42x256xbf16, #tpu.memory_space<vmem>>, vector<1x24x256xbf16>
    %10 = vector.shape_cast %9 : vector<1x24x256xbf16> to vector<24x256xbf16>
    %c0_12 = arith.constant 0 : index
    %c768 = arith.constant 768 : index
    %11 = vector.load %arg7[%c0_12, %c768] : memref<24x2304xbf16, #tpu.memory_space<vmem>>, vector<24x256xbf16>
    tpu.vector_store %arg7[%c0_12, %c768], %10 {strides = array<i32>} : memref<24x2304xbf16, #tpu.memory_space<vmem>>, vector<24x256xbf16>,
    %c0_13 = arith.constant 0 : index
    %c7 = arith.constant 7 : index
    %c0_14 = arith.constant 0 : index
    %12 = vector.load %arg3[%c0_13, %c7, %c0_14] : memref<1x42x256xbf16, #tpu.memory_space<vmem>>, vector<1x24x256xbf16>
    %13 = vector.shape_cast %12 : vector<1x24x256xbf16> to vector<24x256xbf16>
    %c0_15 = arith.constant 0 : index
    %c1024 = arith.constant 1024 : index
    %14 = vector.load %arg7[%c0_15, %c1024] : memref<24x2304xbf16, #tpu.memory_space<vmem>>, vector<24x256xbf16>
    tpu.vector_store %arg7[%c0_15, %c1024], %13 {strides = array<i32>} : memref<24x2304xbf16, #tpu.memory_space<vmem>>, vector<24x256xbf16>,
    %c0_16 = arith.constant 0 : index
    %c8 = arith.constant 8 : index
    %c0_17 = arith.constant 0 : index
    %15 = vector.load %arg3[%c0_16, %c8, %c0_17] : memref<1x42x256xbf16, #tpu.memory_space<vmem>>, vector<1x24x256xbf16>
    %16 = vector.shape_cast %15 : vector<1x24x256xbf16> to vector<24x256xbf16>
    %c0_18 = arith.constant 0 : index
    %c1280 = arith.constant 1280 : index
    %17 = vector.load %arg7[%c0_18, %c1280] : memref<24x2304xbf16, #tpu.memory_space<vmem>>, vector<24x256xbf16>
    tpu.vector_store %arg7[%c0_18, %c1280], %16 {strides = array<i32>} : memref<24x2304xbf16, #tpu.memory_space<vmem>>, vector<24x256xbf16>,
    %c0_19 = arith.constant 0 : index
    %c12 = arith.constant 12 : index
    %c0_20 = arith.constant 0 : index
    %18 = vector.load %arg3[%c0_19, %c12, %c0_20] : memref<1x42x256xbf16, #tpu.memory_space<vmem>>, vector<1x24x256xbf16>
    %19 = vector.shape_cast %18 : vector<1x24x256xbf16> to vector<24x256xbf16>
    %c0_21 = arith.constant 0 : index
    %c1536 = arith.constant 1536 : index
    %20 = vector.load %arg7[%c0_21, %c1536] : memref<24x2304xbf16, #tpu.memory_space<vmem>>, vector<24x256xbf16>
    tpu.vector_store %arg7[%c0_21, %c1536], %19 {strides = array<i32>} : memref<24x2304xbf16, #tpu.memory_space<vmem>>, vector<24x256xbf16>,
    %c0_22 = arith.constant 0 : index
    %c13 = arith.constant 13 : index
    %c0_23 = arith.constant 0 : index
    %21 = vector.load %arg3[%c0_22, %c13, %c0_23] : memref<1x42x256xbf16, #tpu.memory_space<vmem>>, vector<1x24x256xbf16>
    %22 = vector.shape_cast %21 : vector<1x24x256xbf16> to vector<24x256xbf16>
    %c0_24 = arith.constant 0 : index
    %c1792 = arith.constant 1792 : index
    %23 = vector.load %arg7[%c0_24, %c1792] : memref<24x2304xbf16, #tpu.memory_space<vmem>>, vector<24x256xbf16>
    tpu.vector_store %arg7[%c0_24, %c1792], %22 {strides = array<i32>} : memref<24x2304xbf16, #tpu.memory_space<vmem>>, vector<24x256xbf16>,
    %c0_25 = arith.constant 0 : index
    %c14 = arith.constant 14 : index
    %c0_26 = arith.constant 0 : index
    %24 = vector.load %arg3[%c0_25, %c14, %c0_26] : memref<1x42x256xbf16, #tpu.memory_space<vmem>>, vector<1x24x256xbf16>
    %25 = vector.shape_cast %24 : vector<1x24x256xbf16> to vector<24x256xbf16>
    %c0_27 = arith.constant 0 : index
    %c2048 = arith.constant 2048 : index
    %26 = vector.load %arg7[%c0_27, %c2048] : memref<24x2304xbf16, #tpu.memory_space<vmem>>, vector<24x256xbf16>
    tpu.vector_store %arg7[%c0_27, %c2048], %25 {strides = array<i32>} : memref<24x2304xbf16, #tpu.memory_space<vmem>>, vector<24x256xbf16>,
    %c0_28 = arith.constant 0 : index
    %c0_29 = arith.constant 0 : index
    %27 = vector.load %arg7[%c0_28, %c0_29] : memref<24x2304xbf16, #tpu.memory_space<vmem>>, vector<24x2304xbf16>
    %c0_30 = arith.constant 0 : index
    %c0_31 = arith.constant 0 : index
    %c0_32 = arith.constant 0 : index
    %28 = vector.load %arg4[%c0_30, %c0_31, %c0_32] : memref<1x2304x256xbf16, #tpu.memory_space<vmem>>, vector<1x2304x256xbf16>
    %29 = vector.shape_cast %28 : vector<1x2304x256xbf16> to vector<2304x256xbf16>
    %cst = arith.constant dense<0.000000e+00> : vector<24x256xf32>
    %30 = tpu.matmul %27, %29, %cst {dimension_numbers = #tpu.dot_dimension_numbers<[1], [0], [0], [1], [0, 0, 1, 1], [], []>} : vector<24x2304xbf16>, vector<2304x256xbf16>, vector<24x256xf32> -> vector<24x256xf32>
    %c0_33 = arith.constant 0 : index
    %c0_34 = arith.constant 0 : index
    %31 = vector.load %arg5[%c0_33, %c0_34] : memref<1x256xf32, #tpu.memory_space<vmem>>, vector<1x256xf32>
    %32 = vector.broadcast %31 : vector<1x256xf32> to vector<24x256xf32>
    %33 = arith.addf %30, %32 : vector<24x256xf32>
    %34 = arith.truncf %33 : vector<24x256xf32> to vector<24x256xbf16>
    %c0_35 = arith.constant 0 : index
    %c0_36 = arith.constant 0 : index
    %c0_37 = arith.constant 0 : index
    %35 = vector.load %arg6[%c0_35, %c0_36, %c0_37] : memref<1x24x256xbf16, #tpu.memory_space<vmem>>, vector<1x24x256xbf16>
    %36 = vector.shape_cast %35 : vector<1x24x256xbf16> to vector<24x256xbf16>
    %37 = vector.shape_cast %34 : vector<24x256xbf16> to vector<1x24x256xbf16>
    tpu.vector_store %arg6[%c0_35, %c0_36, %c0_37], %37 {strides = array<i32>} : memref<1x24x256xbf16, #tpu.memory_space<vmem>>, vector<1x24x256xbf16>,
    return
  }
  func.func @transform_0(%arg0: i32, %arg1: i32, %arg2: i32) -> (i32, i32, i32) {
    %c0_i32 = arith.constant 0 : i32
    %c0_i32_0 = arith.constant 0 : i32
    return %arg0, %c0_i32, %arg2 : i32, i32, i32
  }
  func.func @transform_1(%arg0: i32, %arg1: i32, %arg2: i32) -> (i32, i32, i32) {
    %c0_i32 = arith.constant 0 : i32
    %c0_i32_0 = arith.constant 0 : i32
    return %arg2, %c0_i32, %arg1 : i32, i32, i32
  }
  func.func @transform_2(%arg0: i32, %arg1: i32, %arg2: i32) -> (i32, i32) {
    %c0_i32 = arith.constant 0 : i32
    %c0_i32_0 = arith.constant 0 : i32
    return %c0_i32, %arg1 : i32, i32
  }
  func.func @transform_3(%arg0: i32, %arg1: i32, %arg2: i32) -> (i32, i32, i32) {
    %c0_i32 = arith.constant 0 : i32
    %c0_i32_0 = arith.constant 0 : i32
    return %arg0, %c0_i32, %arg1 : i32, i32, i32
  }
}

module attributes {stable_mosaic.version = 11 : i64} {
  func.func @_abs_mean_kernel(%arg0: i32, %arg1: memref<2x2x8x512xbf16, #tpu.memory_space<vmem>>, %arg2: memref<2x1xf32, #tpu.memory_space<vmem>>, %arg3: memref<2x1xf32, #tpu.memory_space<vmem>>) attributes {dimension_semantics = [#tpu.dimension_semantics<arbitrary>], iteration_bounds = array<i64: 1>, scalar_prefetch = 0 : i64, scratch_operands = 1 : i64, tpu.core_type = #tpu.core_type<tc>, window_params = [{transform_indices = @transform_0, window_bounds = array<i64: 2, 2, 8, 512>}, {pipeline_mode = #tpu.pipeline_mode<synchronous>, transform_indices = @transform_1, window_bounds = array<i64: 2, 1>}]} {
    %c0_i32 = arith.constant 0 : i32
    %0 = arith.cmpi eq, %arg0, %c0_i32 : i32
    %1 = arith.extui %0 : i1 to i32
    %c0_i32_0 = arith.constant 0 : i32
    %2 = arith.cmpi ne, %1, %c0_i32_0 : i32
    scf.if %2 {
      %cst_14 = arith.constant 0.000000e+00 : f32
      %20 = vector.broadcast %cst_14 : f32 to vector<2x1xf32>
      %c0_15 = arith.constant 0 : index
      %c0_16 = arith.constant 0 : index
      %21 = vector.load %arg3[%c0_15, %c0_16] : memref<2x1xf32, #tpu.memory_space<vmem>>, vector<2x1xf32>
      tpu.vector_store %arg3[%c0_15, %c0_16], %20 {strides = array<i32>} : memref<2x1xf32, #tpu.memory_space<vmem>>, vector<2x1xf32>,
    } else {
    }
    %c0 = arith.constant 0 : index
    %c0_1 = arith.constant 0 : index
    %c0_2 = arith.constant 0 : index
    %c0_3 = arith.constant 0 : index
    %3 = vector.load %arg1[%c0, %c0_1, %c0_2, %c0_3] : memref<2x2x8x512xbf16, #tpu.memory_space<vmem>>, vector<1x2x8x512xbf16>
    %4 = vector.shape_cast %3 : vector<1x2x8x512xbf16> to vector<2x8x512xbf16>
    %5 = arith.extf %4 : vector<2x8x512xbf16> to vector<2x8x512xf32>
    %c1 = arith.constant 1 : index
    %c0_4 = arith.constant 0 : index
    %c0_5 = arith.constant 0 : index
    %c0_6 = arith.constant 0 : index
    %6 = vector.load %arg1[%c1, %c0_4, %c0_5, %c0_6] : memref<2x2x8x512xbf16, #tpu.memory_space<vmem>>, vector<1x2x8x512xbf16>
    %7 = vector.shape_cast %6 : vector<1x2x8x512xbf16> to vector<2x8x512xbf16>
    %8 = arith.extf %7 : vector<2x8x512xbf16> to vector<2x8x512xf32>
    %9 = arith.subf %5, %8 : vector<2x8x512xf32>
    %10 = math.absf %9 : vector<2x8x512xf32>
    %cst = arith.constant dense<0.000000e+00> : vector<2x8xf32>
    %11 = vector.multi_reduction <add>, %10, %cst [2] : vector<2x8x512xf32> to vector<2x8xf32>
    %cst_7 = arith.constant dense<0.000000e+00> : vector<2xf32>
    %12 = vector.multi_reduction <add>, %11, %cst_7 [1] : vector<2x8xf32> to vector<2xf32>
    %c0_8 = arith.constant 0 : index
    %c0_9 = arith.constant 0 : index
    %13 = vector.load %arg3[%c0_8, %c0_9] : memref<2x1xf32, #tpu.memory_space<vmem>>, vector<2x1xf32>
    %14 = vector.shape_cast %12 : vector<2xf32> to vector<2x1xf32>
    %15 = arith.addf %13, %14 : vector<2x1xf32>
    %c0_10 = arith.constant 0 : index
    %c0_11 = arith.constant 0 : index
    %16 = vector.load %arg3[%c0_10, %c0_11] : memref<2x1xf32, #tpu.memory_space<vmem>>, vector<2x1xf32>
    tpu.vector_store %arg3[%c0_10, %c0_11], %15 {strides = array<i32>} : memref<2x1xf32, #tpu.memory_space<vmem>>, vector<2x1xf32>,
    %c0_i32_12 = arith.constant 0 : i32
    %17 = arith.cmpi eq, %arg0, %c0_i32_12 : i32
    %18 = arith.extui %17 : i1 to i32
    %c0_i32_13 = arith.constant 0 : i32
    %19 = arith.cmpi ne, %18, %c0_i32_13 : i32
    scf.if %19 {
      %c0_14 = arith.constant 0 : index
      %c0_15 = arith.constant 0 : index
      %20 = vector.load %arg3[%c0_14, %c0_15] : memref<2x1xf32, #tpu.memory_space<vmem>>, vector<2x1xf32>
      %cst_16 = arith.constant 2.44140625E-4 : f32
      %21 = vector.broadcast %cst_16 : f32 to vector<2x1xf32>
      %22 = arith.mulf %20, %21 : vector<2x1xf32>
      %c0_17 = arith.constant 0 : index
      %c0_18 = arith.constant 0 : index
      %23 = vector.load %arg2[%c0_17, %c0_18] : memref<2x1xf32, #tpu.memory_space<vmem>>, vector<2x1xf32>
      tpu.vector_store %arg2[%c0_17, %c0_18], %22 {strides = array<i32>} : memref<2x1xf32, #tpu.memory_space<vmem>>, vector<2x1xf32>,
    } else {
    }
    return
  }
  func.func @transform_0(%arg0: i32) -> (i32, i32, i32, i32) {
    %c0_i32 = arith.constant 0 : i32
    %c0_i32_0 = arith.constant 0 : i32
    %c0_i32_1 = arith.constant 0 : i32
    %c0_i32_2 = arith.constant 0 : i32
    return %c0_i32, %c0_i32_0, %arg0, %c0_i32_1 : i32, i32, i32, i32
  }
  func.func @transform_1(%arg0: i32) -> (i32, i32) {
    %c0_i32 = arith.constant 0 : i32
    %c0_i32_0 = arith.constant 0 : i32
    %c0_i32_1 = arith.constant 0 : i32
    return %c0_i32, %c0_i32_0 : i32, i32
  }
}

</mosaic_0001>

<bundles_post_ra>
// kernel: vgg_distance.20
= control target key start
LH: loop header
LB: loop body
LE: loop exit
PB: predicated region body
PF: predicated region fallthrough
CT: control target
= control target key end

     0   :  { %vm23_vm0 = vcmask 1045504   ;;  %vm12_vm1 = vcmask 1024   ;;  %v66_v10 = vmov 0.0   ;;  %v32_v11 = vlaneseq  ;;  %s95_s0 = inlined_call_operand.vmem [shape: f32[2,2,6,128], index: 0, kind: input, shape index: {}]   ;;  %s96_s1 = inlined_call_operand.vmem [shape: f32[2,1], index: 1, kind: output, shape index: {}]  }
   0x1   :  { %v14_v0 = vld [vmem:[%s95_s0] sm:$0x3f]  ;;  %v63_v1 = vld [vmem:[%s95_s0 + $0x10] sm:$0x3f]  ;;  %v15_v2 = vld [vmem:[%s95_s0 + $0x8] sm:$0x3f] }
   0x2   :  { %v19_v3 = vsub.f32 %v14_v0, %v63_v1  ;;  %v64_v4 = vld [vmem:[%s95_s0 + $0x18] sm:$0x3f]  ;;  %13 = vst.msk [vmem:[#allocation2] sm:$0x3] %vm12_vm1, %v66_v10  ;;  %v33_v12 = vand.u32 127, %v32_v11  ;;  %v35_v13 = vshrl.u32 %v32_v11, 7 }
   0x3   :  { %v20_v5 = vsub.f32 %v15_v2, %v64_v4  ;;  %vm42_vm2 = vcmask 1041409   ;;  %vm45_vm3 = vcmask 41984  }
   0x4   :  { %v21_v6 = vand.u32 2147483647, %v19_v3  ;;  %v36_v15 = vsub.s32 %v33_v12, %v35_v13 }
   0x5   :  { %v22_v7 = vand.u32 2147483647, %v20_v5 }
   0x6   :  { %v24_v8 = vsel %vm23_vm0, %v21_v6, 0.0 }
   0x7   :  { %25 = vadd.xlane.f32.xlu0 %v24_v8  ;;  %v27_v9 = vsel %vm23_vm0, %v22_v7, 0.0 }
   0x9   :  { %v49_v21 = vld [vmem:[#allocation2] sm:$0x3] }
   0xb   :  { %28 = vadd.xlane.f32.xlu0 %v27_v9 }
  0x94   :  { %v26_v14 = vpop.xlane.xlu0 %25 }
  0x95   :  { %v37_v17 = vrot.slane %v26_v14, %v36_v15 }
  0x98   :  { %v29_v16 = vpop.xlane.xlu0 %28 }
  0x99   :  { %v41_v18 = vrot.slane %v29_v16, %v36_v15 }
  0x9b   :  { %v43_v19 = vsel %vm42_vm2, %v41_v18, %v37_v17 }
  0x9c   :  { %v46_v20 = vsel %vm45_vm3, %v43_v19, 0.0 }
  0x9d   :  { %47 = vadd.xlane.f32.xlu1 %v46_v20 }
 0x12a   :  { %v48_v22 = vpop.xlane.xlu1 %47 }
 0x12b   :  { %v50_v23 = vadd.f32 %v49_v21, %v48_v22 }
 0x12d   :  { %52 = vst.msk [vmem:[#allocation2] sm:$0x3] %vm12_vm1, %v50_v23 }
 0x134   :  { %v56_v24 = vld [vmem:[#allocation2] sm:$0x3] }
 0x135   :  { %v57_v25 = vmul.f32 0.0013020834, %v56_v24 }
 0x137   :  { %58 = vst.msk [vmem:[%s96_s1] sm:$0x3] %vm12_vm1, %v57_v25 }

// kernel: vgg_distance.12
= control target key start
LH: loop header
LB: loop body
LE: loop exit
PB: predicated region body
PF: predicated region fallthrough
CT: control target
= control target key end

     0   :  { %8 = vsyncpa [#allocation3], 0  ;;  %s6452_s0 = inlined_call_operand.vmem [shape: bf16[4,342,3], index: 0, kind: input, shape index: {}]   ;;  %s6453_s1 = inlined_call_operand.hbm [shape: bf16[9,3,64], index: 1, kind: input, shape index: {}]   ;;  %s6454_s2 = inlined_call_operand.hbm [shape: f32[1,64], index: 2, kind: input, shape index: {}]   ;;  %s6455_s3 = inlined_call_operand.vmem [shape: bf16[4,288,64], index: 3, kind: output, shape index: {}]  }
   0x1   :  { %9 = vsyncpa [#allocation5], 0  ;;  %s5428_s12 = smov 0   ;;  %s5430_s13 = smov 0  }
   0x2   :  { %s5432_s14 = smov 0  }
   0x3 LB: > { %s4080_s15 = sadd.s32 4294967295, %s5401_s14   ;;  %s34_s16 = sadd.s32 1, %s5397_s13  ;;  %s5401_s14 = sphi %s5432_s14, %s15_s14   ;;  %s5397_s13 = sphi %s5430_s13, %s6465_s13   ;;  %s5393_s12 = sphi %s5428_s12, %s6464_s12  }
   0x4   : > { %p36_p0 = scmp.ge.s32.totalorder %s34_s16, 4  ;;  %p4082_p1 = scmp.ge.s32.totalorder %s5401_s14, 1 }
   0x5   : > { %p149_p2 = scmp.lt.s32.totalorder %s5401_s14, 5  ;;  %p5453_p4 = scmp.eq.s32.totalorder %s4080_s15, 0 }
   0x6   : > { %s6467_s16 = smov (%p36_p0, %s34_s16), 0  ;;  %s5403_s19 = smov [#allocation2]  }
   0x7   : > { %p5449_p3 = pnand %p4082_p1, %p149_p2  ;;  %s164_s20 = sshll.u32 %s5403_s19, 4  ;;  %s165_s20 = int_to_ptr.vmem [resolvable:$true] %s164_s20 }
   0x8   : > { %s6460_s18 = scalar_select %p5453_p4, 1, 0 }
   0x9   : > { %s6459_s17 = scalar_select %p5449_p3, 1, 0 }
   0xa   : > { %p5203_p5 = pneg %p5449_p3  ;;  %s5404_s22 = smov [#allocation4]  }
   0xb   : > { %s180_s23 = sshll.u32 %s5404_s22, 4  ;;  %s5315_s26 = scalar_lea.hbm %s6453_s1, 288  ;;  %s5465_s23 = int_to_ptr.vmem [resolvable:$true] %s180_s23 }
   0xc   : > { %p5461_p6 = pnand %p5453_p4, %p5203_p5  ;;  %p5316_p7 = scmp.ne.s32.totalorder %s6453_s1, %s5315_s26 }
   0xd   : > { %p5322_p11 = scmp.lt.u32.totalorder %s5315_s26, %s6453_s1 }
   0xe   : > { %p5317_p8 = pneg %p5461_p6 }
  0x10   : > { %p5318_p9 = pnand %p5317_p8, %p5316_p7 }
  0x12   : > { %p5319_p10 = pneg %p5318_p9 }
  0x14   : > { %p5324_p12 = pnand %p5322_p11, %p5319_p10 }
  0x16   : > { %5327 = shalt.err (!%p5324_p12)
}
  0x17   : > { %s5328_s4 = scalar_lea.vmem %s165_s20, 288  ;;  %p5336_p2 = scmp.lt.s32.totalorder %s165_s20, %s165_s20 }
  0x18   : > { %p5329_p13 = scmp.ne.s32.totalorder %s165_s20, %s5328_s4  ;;  %p5337_p5 = scmp.lt.s32.totalorder %s5328_s4, %s5328_s4 }
  0x1a   : > { %p5331_p0 = pnand %p5329_p13, %p5317_p8  ;;  %p5338_p4 = por %p5337_p5, %p5336_p2 }
  0x1c   : > { %p5332_p1 = pneg %p5331_p0 }
  0x1e   : > { %p5339_p3 = pnand %p5338_p4, %p5332_p1 }
  0x20   : > { %5342 = shalt.err (!%p5339_p3)
}
  0x21   : > { %s5405_s5 = smov 32   ;;  %s5406_s6 = smov 2  }
  0x22   : > { %5206 = dma.hbm_to_vmem [thread:$0]  (!%p5461_p6), %s6453_s1, 288, %s165_s20, [#allocation3], %s5405_s5, %s5405_s5, %s5406_s6  }
  0x23   : > { %s5343_s11 = scalar_lea.hbm %s6454_s2, 16 }
  0x24   : > { %p5344_p7 = scmp.ne.s32.totalorder %s6454_s2, %s5343_s11  ;;  %p5350_p9 = scmp.lt.u32.totalorder %s5343_s11, %s6454_s2 }
  0x26   : > { %p5346_p3 = pnand %p5344_p7, %p5317_p8 }
  0x28   : > { %p5347_p4 = pneg %p5346_p3 }
  0x2a   : > { %p5352_p10 = pnand %p5350_p9, %p5347_p4 }
  0x2c   : > { %5355 = shalt.err (!%p5352_p10)
}
  0x2d   : > { %s5356_s20 = scalar_lea.vmem %s5465_s23, 16  ;;  %s5363_s25 = scalar_lea.vmem %s5465_s23, 32 }
  0x2e   : > { %p5357_p11 = scmp.ne.s32.totalorder %s5465_s23, %s5356_s20  ;;  %p5364_p0 = scmp.lt.s32.totalorder %s5465_s23, %s5465_s23 }
  0x2f   : > { %p5365_p1 = scmp.lt.s32.totalorder %s5363_s25, %s5356_s20 }
  0x30   : > { %p5359_p12 = pnand %p5357_p11, %p5317_p8 }
  0x31   : > { %p5366_p2 = por %p5365_p1, %p5364_p0 }
  0x32   : > { %p5360_p13 = pneg %p5359_p12 }
  0x34   : > { %p5367_p5 = pnand %p5366_p2, %p5360_p13 }
  0x36   : > { %5370 = shalt.err (!%p5367_p5)
}
  0x37   : > { %5209 = dma.hbm_to_vmem [thread:$0]  (!%p5461_p6), %s6454_s2, 16, %s5465_s23, [#allocation5]  }
  0x38   : > { %p6462_p7 = scmp.ne.s32.totalorder %s6459_s17, 0 }
  0x39   : > { %p6463_p8 = scmp.ne.s32.totalorder (!%p6462_p7), %s6460_s18, 0 }
  0x3a   : > { %204 = sbr.rel (%p6462_p7) target bundleno = 631 (0x277), region = 32 }
  0x41   : > { %5384 = dma.done.wait (%p6463_p8), [#allocation3], 288  }
  0x42   : > { %5386 = vsyncadd (%p6463_p8), [#allocation3], 4294967008 }
  0x43   : > { %5388 = dma.done.wait (%p6463_p8), [#allocation5], 16  }
  0x44   : > { %5390 = vsyncadd (%p6463_p8), [#allocation5], 4294967280  ;;  %vm592_vm0 = vcmask 1040384   ;;  %p238_p3 = scmp.lt.s32.totalorder %s5393_s12, 3  ;;  %vm593_vm1 = vcmask 1041408   ;;  %v5407_v0 = vmov 65535  }
  0x45   : > { %v594_v1 = vsel %vm592_vm0, 4294967295, %v5407_v0  ;;  %vm388_vm2 = vsmask.f32 7424  ;;  %v1747_v3 = vld [vmem:[#allocation2 + $0x8] sm:$0x3]  ;;  %vm537_vm4 = vcmask 23552  }
  0x46   : > { %s6469_s12 = smov (!%p238_p3, %s5393_s12), 3  ;;  %v5530_v2 = vsel %vm593_vm1, %v594_v1, 0  ;;  %v294_v4 = vld [vmem:[#allocation2 + $0x2] sm:$0x3]  ;;  %vm1751_vm3 = vsmask.f32 6400 }
  0x47   : > { %s5193_s17 = smul.u32 172, %s6469_s12  ;;  %v5539_v6 = vand.u32 %v1747_v3, %v5530_v2  ;;  %v597_v7 = vand.u32 %v5530_v2, %v294_v4  ;;  %v2194_v19 = vld [vmem:[#allocation2 + $0xa] sm:$0x3]  ;;  %v291_v46 = vld [vmem:[#allocation2] sm:$0x3]  ;;  %vm2198_vm5 = vcmask 1045504  }
  0x48   : > { %v2291_v26 = vand.u32 %v2194_v19, %v5530_v2  ;;  %v813_v50 = vand.u32 %v5530_v2, %v291_v46  ;;  %vm998_vm6 = vcmask 1046528   ;;  %vm2951_vm7 = vsmask.f32 5376  ;;  %s5194_s18 = smul.u32 144, %s6469_s12 }
  0x49   : > { %s5535_s28 = scalar_lea.vmem %s6452_s0, %s5193_s17  ;;  %4713 = vmatprep.subr.bf16.mxu0 %v5539_v6  ;;  %4561 = vmatprep.subr.bf16.mxu1 %v597_v7  ;;  %vm3398_vm8 = vcmask 1044480   ;;  %vm3929_vm9 = vcmask 519168  }
  0x4a   : > { %v255_v5 = vld [vmem:[%s5535_s28] sm:$0xf]  ;;  %v5543_v8 = vld [vmem:[%s5535_s28 + $0x4] sm:$0xf]  ;;  %v5549_v10 = vld [vmem:[%s5535_s28 + $0x8] sm:$0xff]   ;;  %4714 = vmatpush3.bf16.msra.mxu0 %v5539_v6  ;;  %4562 = vmatpush3.bf16.msra.mxu1 %v597_v7  ;;  %s6325_s4 = scalar_lea.vmem %s6455_s3, %s5194_s18 }
  0x4b   : > { %v5546_v9 = vcombine.low %v255_v5, %v5543_v8  ;;  %v1306_v11 = vld [vmem:[%s5535_s28 + $0x8] sm:$0xe]  ;;  %v5553_v12 = vld [vmem:[%s5535_s28 + $0xc] sm:$0xf]  ;;  %v5560_v14 = vld [vmem:[%s5535_s28 + $0x10] sm:$0xff]   ;;  %v397_v17 = vshll.u32 %v5549_v10, 16  ;;  %4751 = vmatprep.subr.bf16.mxu0 %v2291_v26  ;;  %4599 = vmatprep.subr.bf16.mxu1 %v813_v50 }
  0x4c   : > { %v5557_v13 = vcombine.low %v1306_v11, %v5553_v12  ;;  %v401_v18 = vshrl.u32 %v5549_v10, 16  ;;  %v1761_v22 = vshrl.u32 %v5560_v14, 16  ;;  %v1764_v23 = vshll.u32 %v5560_v14, 16  ;;  %v5573_v27 = vld [vmem:[%s5535_s28 + $0x10] sm:$0xff]   ;;  %v5576_v28 = vld [vmem:[%s5535_s28 + $0x18] sm:$0xff]   ;;  %v5586_v42 = vld [vmem:[%s5535_s28 + $0x20] sm:$0xff]  }
  0x4d   : > { %v390_v15 = vshrl.u32 %v5546_v9, 16  ;;  %v392_v16 = vshll.u32 %v5546_v9, 16  ;;  %v399_v25 = vrot.slane %v397_v17, 1  ;;  %v405_v35 = vshll.u32 %v5573_v27, 16  ;;  %v5582_v40 = vld [vmem:[%s5535_s28 + $0x18] sm:$0xff]   ;;  %v5598_v55 = vld [vmem:[%s5535_s28 + $0x20] sm:$0xff]  }
  0x4e   : > { %v1753_v20 = vshrl.u32 %v5557_v13, 16  ;;  %v1756_v21 = vshll.u32 %v5557_v13, 16  ;;  %v1763_v31 = vrot.slane %v1761_v22, 1  ;;  %v1766_v32 = vrot.slane %v1764_v23, 2  ;;  %v5601_v56 = vld [vmem:[%s5535_s28 + $0x28] sm:$0xff]   ;;  %v5617_v17 = vld [vmem:[%s5535_s28 + $0x30] sm:$0xff]  }
  0x4f   : > { %v394_v24 = vrot.slane %v392_v16, 1  ;;  %v403_v34 = vor.u32 %v401_v18, %v399_v25  ;;  %v1770_v36 = vshrl.u32 %v5576_v28, 16  ;;  %v1773_v39 = vshll.u32 %v5576_v28, 16  ;;  %v5611_v5 = vld [vmem:[%s5535_s28 + $0x28] sm:$0xff]  }
  0x50   : > { %v1755_v29 = vrot.slane %v1753_v20, 1  ;;  %v1758_v30 = vrot.slane %v1756_v21, 2  ;;  %v1767_v38 = vor.u32 %v1766_v32, %v1763_v31  ;;  %v409_v41 = vshrl.u32 %v5573_v27, 16  ;;  %v5630_v31 = vld [vmem:[%s5535_s28 + $0x38] sm:$0xff]  }
  0x51   : > { %v395_v33 = vor.u32 %v394_v24, %v390_v15  ;;  %v407_v44 = vrot.slane %v405_v35, 1  ;;  %v1772_v45 = vrot.slane %v1770_v36, 1  ;;  %v1775_v48 = vrot.slane %v1773_v39, 2  ;;  %v5624_v24 = vld [vmem:[%s5535_s28 + $0x30] sm:$0xff]  }
  0x52   : > { %v1759_v37 = vor.u32 %v1758_v30, %v1755_v29  ;;  %v413_v49 = vshll.u32 %v5582_v40, 16  ;;  %v1779_v53 = vshrl.u32 %v5586_v42, 16  ;;  %v1782_v54 = vshll.u32 %v5586_v42, 16 }
  0x53   : > { %v400_v43 = vsel %vm388_vm2, %v395_v33, %v399_v25  ;;  %v408_v51 = vsel %vm388_vm2, %v403_v34, %v407_v44  ;;  %v411_v52 = vor.u32 %v409_v41, %v407_v44  ;;  %v1776_v57 = vor.u32 %v1775_v48, %v1772_v45  ;;  %v5634_v34 = vld [vmem:[%s5535_s28 + $0x38] sm:$0xff]   ;;  %v5641_v41 = vld [vmem:[%s5535_s28 + $0x40] sm:$0xff]  }
  0x54   : > { %4563 = vmatprep.mubr.msk.bf16.mxu1 %vm537_vm4, %v400_v43  ;;  %v1768_v47 = vsel %vm1751_vm3, %v1759_v37, %v1767_v38  ;;  %v415_v58 = vrot.slane %v413_v49, 1  ;;  %v417_v59 = vshrl.u32 %v5582_v40, 16  ;;  %v1781_v60 = vrot.slane %v1779_v53, 1 }
  0x55   : > { %4715 = vmatprep.mubr.msk.bf16.mxu0 %vm537_vm4, %v1768_v47  ;;  %4564 = vmatmul.mubr.msk.bf16.vlgmr.msra.gmra.mrb[0].mxu1 %vm537_vm4, %v408_v51  ;;  %v1784_v61 = vrot.slane %v1782_v54, 2  ;;  %v421_v62 = vshll.u32 %v5598_v55, 16  ;;  %v1788_v63 = vshrl.u32 %v5601_v56, 16  ;;  %v1777_v0 = vsel %vm1751_vm3, %v1767_v38, %v1776_v57 }
  0x56   : > { %4600 = vmatpush3.bf16.msra.mxu1 %v813_v50  ;;  %v416_v1 = vsel %vm388_vm2, %v411_v52, %v415_v58  ;;  %v419_v3 = vor.u32 %v417_v59, %v415_v58  ;;  %v1791_v4 = vshll.u32 %v5601_v56, 16  ;;  %4716 = vmatmul.mubr.msk.bf16.vlgmr.msra.gmra.mrb[0].mxu0 %vm537_vm4, %v1777_v0  ;;  %v425_v16 = vshrl.u32 %v5598_v55, 16  ;;  %v5650_v50 = vld [vmem:[%s5535_s28 + $0x40] sm:$0xff]  }
  0x57   : > { %4567 = vmatprep.mubr.msk.bf16.mxu1 %vm537_vm4, %v416_v1  ;;  %v1785_v7 = vor.u32 %v1784_v61, %v1781_v60  ;;  %v423_v11 = vrot.slane %v421_v62, 1  ;;  %v1790_v15 = vrot.slane %v1788_v63, 1  ;;  %4752 = vmatpush3.bf16.msra.mxu0 %v2291_v26  ;;  %v429_v19 = vshll.u32 %v5611_v5, 16  ;;  %v5655_v60 = vld [vmem:[%s5535_s28 + $0x48] sm:$0xff]  }
  0x58   : > { %v1793_v18 = vrot.slane %v1791_v4, 2  ;;  %v1797_v23 = vshrl.u32 %v5617_v17, 16  ;;  %v1800_v26 = vshll.u32 %v5617_v17, 16  ;;  %v433_v30 = vshrl.u32 %v5611_v5, 16  ;;  %v5662_v1 = vld [vmem:[%s5535_s28 + $0x48] sm:$0xff]  }
  0x59   : > { %v1786_v20 = vsel %vm1751_vm3, %v1776_v57, %v1785_v7  ;;  %v424_v21 = vsel %vm388_vm2, %v419_v3, %v423_v11  ;;  %v427_v22 = vor.u32 %v425_v16, %v423_v11  ;;  %v431_v29 = vrot.slane %v429_v19, 1  ;;  %v5665_v3 = vld [vmem:[%s5535_s28 + $0x50] sm:$0xff]  }
  0x5a   : > { %4719 = vmatprep.mubr.msk.bf16.mxu0 %vm537_vm4, %v1786_v20  ;;  %v1794_v25 = vor.u32 %v1793_v18, %v1790_v15  ;;  %v1799_v32 = vrot.slane %v1797_v23, 1  ;;  %v437_v33 = vshll.u32 %v5624_v24, 16  ;;  %v441_v35 = vshrl.u32 %v5624_v24, 16  ;;  %v5673_v20 = vld [vmem:[%s5535_s28 + $0x50] sm:$0xff]  }
  0x5b   : > { %v432_v37 = vsel %vm388_vm2, %v427_v22, %v431_v29  ;;  %v1802_v38 = vrot.slane %v1800_v26, 2  ;;  %v435_v39 = vor.u32 %v433_v30, %v431_v29  ;;  %v1806_v44 = vshrl.u32 %v5630_v31, 16  ;;  %v5680_v29 = vld [vmem:[%s5535_s28 + $0x58] sm:$0xff]  }
  0x5c   : > { %v1795_v36 = vsel %vm1751_vm3, %v1785_v7, %v1794_v25  ;;  %v439_v43 = vrot.slane %v437_v33, 1  ;;  %v1809_v45 = vshll.u32 %v5630_v31, 16  ;;  %v445_v46 = vshll.u32 %v5634_v34, 16 }
  0x5d   : > { %4568 = vmatmul.mubr.msk.bf16.gmra.mrb[4].mxu1 %vm537_vm4, %v424_v21  ;;  %v1803_v47 = vor.u32 %v1802_v38, %v1799_v32  ;;  %v1815_v48 = vshrl.u32 %v5641_v41, 16  ;;  %v1818_v49 = vshll.u32 %v5641_v41, 16  ;;  %v1808_v51 = vrot.slane %v1806_v44, 1  ;;  %v5685_v38 = vld [vmem:[%s5535_s28 + $0x58] sm:$0xff]  }
  0x5e   : > { %4571 = vmatprep.mubr.msk.bf16.mxu1 %vm537_vm4, %v432_v37  ;;  %4720 = vmatmul.mubr.msk.bf16.gmra.mrb[4].mxu0 %vm537_vm4, %v1795_v36  ;;  %v1811_v52 = vrot.slane %v1809_v45, 2  ;;  %v443_v53 = vor.u32 %v441_v35, %v439_v43  ;;  %v447_v57 = vrot.slane %v445_v46, 1  ;;  %v440_v61 = vsel %vm388_vm2, %v435_v39, %v439_v43  ;;  %v2544_v46 = vld [vmem:[#allocation2 + $0xc] sm:$0x3] }
  0x5f   : > { %v1804_v54 = vsel %vm1751_vm3, %v1794_v25, %v1803_v47  ;;  %v1817_v58 = vrot.slane %v1815_v48, 1  ;;  %v1820_v59 = vrot.slane %v1818_v49, 2  ;;  %v449_v63 = vshrl.u32 %v5634_v34, 16 }
  0x60   : > { %4723 = vmatprep.mubr.msk.bf16.mxu0 %vm537_vm4, %v1804_v54  ;;  %v1812_v62 = vor.u32 %v1811_v52, %v1808_v51  ;;  %v453_v0 = vshll.u32 %v5650_v50, 16  ;;  %v448_v4 = vsel %vm388_vm2, %v443_v53, %v447_v57  ;;  %v1824_v11 = vshrl.u32 %v5655_v60, 16  ;;  %v2192_v51 = vld [vmem:[%s5535_s28 + $0x8] sm:$0xc] }
  0x61   : > { %v1821_v7 = vor.u32 %v1820_v59, %v1817_v58  ;;  %v457_v15 = vshrl.u32 %v5650_v50, 16  ;;  %v1827_v18 = vshll.u32 %v5655_v60, 16  ;;  %v461_v19 = vshll.u32 %v5662_v1, 16 }
  0x62   : > { %v455_v16 = vrot.slane %v453_v0, 1  ;;  %v1813_v21 = vsel %vm1751_vm3, %v1803_v47, %v1812_v62  ;;  %v1826_v22 = vrot.slane %v1824_v11, 1  ;;  %v1833_v23 = vshrl.u32 %v5665_v3, 16 }
  0x63   : > { %v1836_v25 = vshll.u32 %v5665_v3, 16  ;;  %v1822_v26 = vsel %vm1751_vm3, %v1812_v62, %v1821_v7  ;;  %v451_v30 = vor.u32 %v449_v63, %v447_v57  ;;  %v1829_v32 = vrot.slane %v1827_v18, 2  ;;  %v5704_v63 = vld [vmem:[%s5535_s28 + $0x60] sm:$0xff]   ;;  %v5711_v18 = vld [vmem:[%s5535_s28 + $0x68] sm:$0xff]  }
  0x64   : > { %v459_v33 = vor.u32 %v457_v15, %v455_v16  ;;  %v463_v35 = vrot.slane %v461_v19, 1  ;;  %v1835_v36 = vrot.slane %v1833_v23, 1  ;;  %v469_v39 = vshll.u32 %v5673_v20, 16 }
  0x65   : > { %4572 = vmatmul.mubr.msk.bf16.gmra.mrb[8].mxu1 %vm537_vm4, %v440_v61  ;;  %v1838_v37 = vrot.slane %v1836_v25, 2  ;;  %v1830_v43 = vor.u32 %v1829_v32, %v1826_v22  ;;  %v1842_v44 = vshrl.u32 %v5680_v29, 16  ;;  %v1845_v45 = vshll.u32 %v5680_v29, 16 }
  0x66   : > { %4575 = vmatprep.mubr.msk.bf16.mxu1 %vm537_vm4, %v448_v4  ;;  %4724 = vmatmul.mubr.msk.bf16.gmra.mrb[8].mxu0 %vm537_vm4, %v1813_v21  ;;  %v456_v47 = vsel %vm388_vm2, %v451_v30, %v455_v16  ;;  %v465_v49 = vshrl.u32 %v5662_v1, 16  ;;  %v464_v52 = vsel %vm388_vm2, %v459_v33, %v463_v35  ;;  %v473_v53 = vshrl.u32 %v5673_v20, 16 }
  0x67   : > { %4727 = vmatprep.mubr.msk.bf16.mxu0 %vm537_vm4, %v1822_v26  ;;  %v1839_v48 = vor.u32 %v1838_v37, %v1835_v36  ;;  %v477_v54 = vshll.u32 %v5685_v38, 16  ;;  %v5699_v57 = vand.u32 %v2544_v46, %v5530_v2  ;;  %v1831_v58 = vsel %vm1751_vm3, %v1821_v7, %v1830_v43  ;;  %v5733_v37 = vld [vmem:[%s5535_s28 + $0x78] sm:$0xff]  }
  0x68   : > { %v471_v59 = vrot.slane %v469_v39, 1  ;;  %v1844_v61 = vrot.slane %v1842_v44, 1  ;;  %v1847_v62 = vrot.slane %v1845_v45, 2  ;;  %v467_v4 = vor.u32 %v465_v49, %v463_v35  ;;  %v5728_v35 = vld [vmem:[%s5535_s28 + $0x70] sm:$0xff]   ;;  %v994_v44 = vld [vmem:[#allocation2 + $0x4] sm:$0x3] }
  0x69   : > { %v1840_v0 = vsel %vm1751_vm3, %v1830_v43, %v1839_v48  ;;  %v4221_v11 = vcombine.low %v2192_v51, %v5553_v12  ;;  %4789 = vmatprep.subr.bf16.mxu0 %v5699_v57  ;;  %v479_v16 = vrot.slane %v477_v54, 1  ;;  %v485_v19 = vshll.u32 %v5704_v63, 16 }
  0x6a   : > { %v475_v15 = vor.u32 %v473_v53, %v471_v59  ;;  %v5715_v7 = vor.u32 %v1847_v62, %v1844_v61  ;;  %v472_v21 = vsel %vm388_vm2, %v467_v4, %v471_v59  ;;  %v2200_v12 = vrot.slane %v5560_v14, 2 }
  0x6b   : > { %v2199_v22 = vrot.slane %v4221_v11, 2  ;;  %v481_v23 = vshrl.u32 %v5685_v38, 16  ;;  %v489_v26 = vshrl.u32 %v5704_v63, 16  ;;  %v493_v30 = vshll.u32 %v5711_v18, 16  ;;  %v2947_v11 = vld [vmem:[#allocation2 + $0xe] sm:$0x3] }
  0x6c   : > { %v480_v25 = vsel %vm388_vm2, %v475_v15, %v479_v16  ;;  %v1849_v32 = vsel %vm1751_vm3, %v1839_v48, %v5715_v7  ;;  %v487_v33 = vrot.slane %v485_v19, 1  ;;  %v2202_v45 = vrot.slane %v5576_v28, 2 }
  0x6d   : > { %4576 = vmatmul.mubr.msk.bf16.gmra.mrb[12].mxu1 %vm537_vm4, %v456_v47  ;;  %v2201_v14 = vsel %vm2198_vm5, %v2199_v22, %v2200_v12  ;;  %v483_v36 = vor.u32 %v481_v23, %v479_v16  ;;  %v495_v43 = vrot.slane %v493_v30, 1  ;;  %v2204_v46 = vrot.slane %v5586_v42, 2 }
  0x6e   : > { %4579 = vmatprep.mubr.msk.bf16.mxu1 %vm537_vm4, %v464_v52  ;;  %4728 = vmatmul.mubr.msk.bf16.gmra.mrb[12].mxu0 %vm537_vm4, %v1831_v58  ;;  %v491_v39 = vor.u32 %v489_v26, %v487_v33  ;;  %v501_v47 = vshll.u32 %v5728_v35, 16  ;;  %v497_v49 = vshrl.u32 %v5711_v18, 16  ;;  %v509_v51 = vshll.u32 %v5733_v37, 16  ;;  %v5752_v58 = vld [vmem:[%s5535_s28 + $0x80] sm:$0xff]  }
  0x6f   : > { %4731 = vmatprep.mubr.msk.bf16.mxu0 %vm537_vm4, %v1840_v0  ;;  %v488_v48 = vsel %vm388_vm2, %v483_v36, %v487_v33  ;;  %v5744_v52 = vand.u32 %v994_v44, %v5530_v2  ;;  %v505_v54 = vshrl.u32 %v5728_v35, 16  ;;  %v2203_v28 = vsel %vm2198_vm5, %v2200_v12, %v2202_v45  ;;  %v5757_v0 = vld [vmem:[%s5535_s28 + $0x88] sm:$0xff]   ;;  %v5775_v26 = vld [vmem:[%s5535_s28 + $0x90] ss:$0 sps:$4 sm:$0x11]  }
  0x70   : > { %v496_v53 = vsel %vm388_vm2, %v491_v39, %v495_v43  ;;  %v503_v42 = vrot.slane %v501_v47, 1  ;;  %v2205_v59 = vsel %vm2198_vm5, %v2202_v45, %v2204_v46  ;;  %v499_v61 = vor.u32 %v497_v49, %v495_v43 }
  0x71   : > { %4637 = vmatprep.subr.bf16.mxu1 %v5744_v52  ;;  %v511_v62 = vrot.slane %v509_v51, 1  ;;  %v5761_v15 = vand.u32 %v2947_v11, %v5530_v2  ;;  %v2206_v16 = vrot.slane %v5601_v56, 2  ;;  %v517_v19 = vshll.u32 %v5752_v58, 16 }
  0x72   : > { %v507_v4 = vor.u32 %v505_v54, %v503_v42  ;;  %v2208_v22 = vrot.slane %v5617_v17, 2  ;;  %v513_v12 = vshrl.u32 %v5733_v37, 16  ;;  %v2210_v36 = vrot.slane %v5630_v31, 2 }
  0x73   : > { %v2207_v56 = vsel %vm2198_vm5, %v2204_v46, %v2206_v16  ;;  %v519_v30 = vrot.slane %v517_v19, 1  ;;  %v2212_v43 = vrot.slane %v5641_v41, 2  ;;  %v529_v44 = vshrl.u32 %v5757_v0, 16 }
  0x74   : > { %v512_v23 = vsel %vm388_vm2, %v507_v4, %v511_v62  ;;  %v2209_v17 = vsel %vm2198_vm5, %v2206_v16, %v2208_v22  ;;  %v533_v45 = vshll.u32 %v5775_v26, 16  ;;  %v2211_v47 = vsel %vm2198_vm5, %v2208_v22, %v2210_v36  ;;  %v5841_v22 = vld [vmem:[%s5535_s28 + $0x80] sm:$0xff]  }
  0x75   : > { %4580 = vmatmul.mubr.msk.bf16.gmra.mrb[16].mxu1 %vm537_vm4, %v472_v21  ;;  %v504_v21 = vsel %vm388_vm2, %v499_v61, %v503_v42  ;;  %v2214_v41 = vrot.slane %v5655_v60, 2  ;;  %v5804_v42 = vld [vmem:[%s5535_s28 + $0x60] sm:$0xff]  }
  0x76   : > { %4583 = vmatprep.mubr.msk.bf16.mxu1 %vm537_vm4, %v480_v25  ;;  %4732 = vmatmul.mubr.msk.bf16.gmra.mrb[16].mxu0 %vm537_vm4, %v1849_v32  ;;  %v521_v25 = vshrl.u32 %v5752_v58, 16  ;;  %v515_v32 = vor.u32 %v513_v12, %v511_v62  ;;  %v535_v49 = vrot.slane %v533_v45, 1  ;;  %v1344_v60 = vld [vmem:[#allocation2 + $0x6] sm:$0x3]  ;;  %v5817_v62 = vld [vmem:[%s5535_s28 + $0x68] sm:$0xff]   ;;  %v5880_v45 = vld [vmem:[%s5535_s28 + $0x18] sm:$0xff]  }
  0x77   : > { %4753 = vmatprep.mubr.msk.bf16.mxu0 %vm537_vm4, %v2201_v14  ;;  %v2215_v54 = vsel %vm2198_vm5, %v2212_v43, %v2214_v41  ;;  %v5811_v61 = vand.u32 %v1344_v60, %v5530_v2  ;;  %v2222_v11 = vrot.slane %v5817_v62, 2 }
  0x78   : > { %v523_v33 = vor.u32 %v521_v25, %v519_v30  ;;  %v520_v39 = vsel %vm388_vm2, %v515_v32, %v519_v30  ;;  %v5857_v30 = vld [vmem:[%s5535_s28 + $0x90] sm:$0xff]  }
  0x79   : > { %v2232_v32 = vrot.slane %v5857_v30, 2 }
  0x7d   : > { %4584 = vmatmul.mubr.msk.bf16.gmra.mrb[20].mxu1 %vm537_vm4, %v488_v48  ;;  %v2213_v48 = vsel %vm2198_vm5, %v2210_v36, %v2212_v43 }
  0x7e   : > { %4587 = vmatprep.mubr.msk.bf16.mxu1 %vm537_vm4, %v496_v53  ;;  %4754 = vmatmul.mubr.msk.bf16.vlgmr.msra.gmra.mrb[0].mxu0 %vm537_vm4, %v2203_v28  ;;  %v2216_v53 = vrot.slane %v5665_v3, 2  ;;  %v2220_v3 = vrot.slane %v5804_v42, 2 }
  0x7f   : > { %4790 = vmatpush3.bf16.msra.mxu0 %v5699_v57  ;;  %4757 = vmatprep.mubr.msk.bf16.mxu0 %vm537_vm4, %v2205_v59  ;;  %v525_v57 = vshll.u32 %v5757_v0, 16  ;;  %v2218_v59 = vrot.slane %v5680_v29, 2  ;;  %v5824_v29 = vld [vmem:[%s5535_s28 + $0x70] sm:$0xff]  }
  0x80   : > { %4827 = vmatprep.subr.bf16.mxu0 %v5761_v15  ;;  %v2217_v28 = vsel %vm2198_vm5, %v2214_v41, %v2216_v53  ;;  %v2224_v16 = vrot.slane %v5824_v29, 2  ;;  %v2223_v19 = vsel %vm2198_vm5, %v2220_v3, %v2222_v11 }
  0x81   : > { %v527_v14 = vrot.slane %v525_v57, 1  ;;  %v2221_v4 = vsel %vm2198_vm5, %v2218_v59, %v2220_v3  ;;  %v5851_v57 = vld [vmem:[%s5535_s28 + $0x88] sm:$0xff]  }
  0x83   : > { %v528_v46 = vsel %vm388_vm2, %v523_v33, %v527_v14  ;;  %v531_v31 = vor.u32 %v529_v44, %v527_v14  ;;  %v2506_v33 = vld [vmem:[%s5535_s28 + $0x10] sm:$0xc]  ;;  %v5865_v14 = vld [vmem:[%s5535_s28 + $0x14] sm:$0xf] }
  0x84   : > { %v5877_v44 = vcombine.low %v2506_v33, %v5865_v14 }
  0x85   : > { %4588 = vmatmul.mubr.msk.bf16.gmra.mrb[24].mxu1 %vm537_vm4, %v504_v21  ;;  %v536_v51 = vsel %vm388_vm2, %v531_v31, %v535_v49  ;;  %v2225_v21 = vsel %vm2198_vm5, %v2222_v11, %v2224_v16  ;;  %v5891_v49 = vld [vmem:[%s5535_s28 + $0x20] sm:$0xff]  }
  0x86   : > { %4591 = vmatprep.mubr.msk.bf16.mxu1 %vm537_vm4, %v512_v23  ;;  %4758 = vmatmul.mubr.msk.bf16.gmra.mrb[4].mxu0 %vm537_vm4, %v2207_v56  ;;  %v2228_v23 = vrot.slane %v5841_v22, 2 }
  0x87   : > { %4761 = vmatprep.mubr.msk.bf16.mxu0 %vm537_vm4, %v2209_v17  ;;  %v2230_v17 = vrot.slane %v5851_v57, 2 }
  0x89   : > { %v2231_v36 = vsel %vm2198_vm5, %v2228_v23, %v2230_v17  ;;  %v2233_v43 = vsel %vm2198_vm5, %v2230_v17, %v2232_v32 }
  0x8d   : > { %4592 = vmatmul.mubr.msk.bf16.gmra.mrb[28].mxu1 %vm537_vm4, %v520_v39  ;;  %v5871_v39 = vld [vmem:[%s5535_s28 + $0x98] ss:$0 sps:$4 sm:$0x33]  }
  0x8e   : > { %4595 = vmatprep.mubr.msk.bf16.mxu1 %vm537_vm4, %v528_v46  ;;  %4762 = vmatmul.mubr.msk.bf16.gmra.mrb[8].mxu0 %vm537_vm4, %v2211_v47  ;;  %v2234_v46 = vrot.slane %v5871_v39, 2  ;;  %v2638_v47 = vrot.slane %v5877_v44, 2 }
  0x8f   : > { %4765 = vmatprep.mubr.msk.bf16.mxu0 %vm537_vm4, %v2213_v48  ;;  %v2639_v48 = vrot.slane %v5880_v45, 2 }
  0x90   : > { %v2235_v31 = vsel %vm2198_vm5, %v2232_v32, %v2234_v46  ;;  %v5946_v32 = vld [vmem:[%s5535_s28 + $0x50] sm:$0xff]   ;;  %v1000_v46 = vrot.slane %v5549_v10, 1 }
  0x91   : > { %v2640_v41 = vsel %vm2198_vm5, %v2638_v47, %v2639_v48 }
  0x95   : > { %4596 = vmatmul.mubr.msk.bf16.gmra.mrb[32].mxu1 %vm537_vm4, %v536_v51  ;;  %v5897_v51 = vld [vmem:[%s5535_s28 + $0x28] sm:$0xff]  }
  0x96   : > { %4601 = vmatprep.mubr.msk.bf16.mxu1 %vm537_vm4, %v5546_v9  ;;  %4766 = vmatmul.mubr.msk.bf16.gmra.mrb[12].mxu0 %vm537_vm4, %v2215_v54  ;;  %v2219_v9 = vsel %vm2198_vm5, %v2216_v53, %v2218_v59  ;;  %v2641_v53 = vrot.slane %v5891_v49, 2  ;;  %v2643_v54 = vrot.slane %v5897_v51, 2  ;;  %v5907_v59 = vld [vmem:[%s5535_s28 + $0x30] sm:$0xff]  }
  0x97   : > { %4769 = vmatprep.mubr.msk.bf16.mxu0 %vm537_vm4, %v2217_v28  ;;  %v3394_v28 = vld [vmem:[#allocation2 + $0x10] sm:$0x3]  ;;  %v2645_v11 = vrot.slane %v5907_v59, 2 }
  0x98   : > { %v2642_v60 = vsel %vm2198_vm5, %v2639_v48, %v2641_v53  ;;  %v2644_v3 = vsel %vm2198_vm5, %v2641_v53, %v2643_v54  ;;  %v1002_v53 = vrot.slane %v5573_v27, 1 }
  0x9d   : > { %4602 = vmatmul.mubr.msk.bf16.vlgmr.msra.gmra.mrb[0].mxu1 %vm537_vm4, %v5549_v10 }
  0x9e   : > { %4605 = vmatprep.mubr.msk.bf16.mxu1 %vm537_vm4, %v5573_v27  ;;  %4638 = vmatpush3.bf16.msra.mxu1 %v5744_v52  ;;  %v5835_v52 = vld [vmem:[%s5535_s28 + $0x78] sm:$0xff]  }
  0x9f   : > { %4675 = vmatprep.subr.bf16.mxu1 %v5811_v61  ;;  %4770 = vmatmul.mubr.msk.bf16.gmra.mrb[16].mxu0 %vm537_vm4, %v2219_v9  ;;  %v2226_v12 = vrot.slane %v5835_v52, 2  ;;  %v5913_v9 = vld [vmem:[%s5535_s28 + $0x38] sm:$0xff]  }
  0xa0   : > { %4773 = vmatprep.mubr.msk.bf16.mxu0 %vm537_vm4, %v2221_v4  ;;  %v5916_v4 = vand.u32 %v3394_v28, %v5530_v2  ;;  %v5928_v2 = vld [vmem:[%s5535_s28 + $0x40] sm:$0xff]   ;;  %v1004_v28 = vrot.slane %v5582_v40, 1 }
  0xa1   : > { %v2227_v25 = vsel %vm2198_vm5, %v2224_v16, %v2226_v12  ;;  %v2229_v56 = vsel %vm2198_vm5, %v2226_v12, %v2228_v23  ;;  %v2647_v16 = vrot.slane %v5913_v9, 2  ;;  %v992_v12 = vld [vmem:[%s5535_s28] sm:$0xe]  ;;  %v2649_v23 = vrot.slane %v5928_v2, 2 }
  0xa3   : > { %v2650_v17 = vsel %vm2198_vm5, %v2647_v16, %v2649_v23 }
  0xa5   : > { %4606 = vmatmul.mubr.msk.bf16.gmra.mrb[4].mxu1 %vm537_vm4, %v5582_v40 }
  0xa6   : > { %4609 = vmatprep.mubr.msk.bf16.mxu1 %vm537_vm4, %v5598_v55 }
  0xa7   : > { %4774 = vmatmul.mubr.msk.bf16.gmra.mrb[20].mxu0 %vm537_vm4, %v2223_v19  ;;  %v2646_v19 = vsel %vm2198_vm5, %v2643_v54, %v2645_v11  ;;  %v5970_v54 = vld [vmem:[%s5535_s28 + $0x68] sm:$0xff]  }
  0xa8   : > { %4777 = vmatprep.mubr.msk.bf16.mxu0 %vm537_vm4, %v2225_v21  ;;  %v5934_v21 = vld [vmem:[%s5535_s28 + $0x48] sm:$0xff]  }
  0xad   : > { %4610 = vmatmul.mubr.msk.bf16.gmra.mrb[8].mxu1 %vm537_vm4, %v5611_v5 }
  0xae   : > { %4613 = vmatprep.mubr.msk.bf16.mxu1 %vm537_vm4, %v5624_v24 }
  0xaf   : > { %4778 = vmatmul.mubr.msk.bf16.gmra.mrb[24].mxu0 %vm537_vm4, %v2227_v25  ;;  %v2651_v25 = vrot.slane %v5934_v21, 2 }
  0xb0   : > { %4781 = vmatprep.mubr.msk.bf16.mxu0 %vm537_vm4, %v2229_v56  ;;  %v4146_v56 = vcombine.low %v992_v12, %v5543_v8  ;;  %v2653_v8 = vrot.slane %v5946_v32, 2  ;;  %v5989_v12 = vld [vmem:[%s5535_s28 + $0x78] sm:$0xff]  }
  0xb1   : > { %v2652_v33 = vsel %vm2198_vm5, %v2649_v23, %v2651_v25  ;;  %v1008_v23 = vrot.slane %v5611_v5, 1  ;;  %v6002_v5 = vld [vmem:[%s5535_s28 + $0x80] sm:$0xff]  }
  0xb5   : > { %4614 = vmatmul.mubr.msk.bf16.gmra.mrb[12].mxu1 %vm537_vm4, %v5634_v34 }
  0xb6   : > { %4617 = vmatprep.mubr.msk.bf16.mxu1 %vm537_vm4, %v5650_v50 }
  0xb7   : > { %4782 = vmatmul.mubr.msk.bf16.gmra.mrb[28].mxu0 %vm537_vm4, %v2231_v36  ;;  %v5952_v36 = vld [vmem:[%s5535_s28 + $0x58] sm:$0xff]  }
  0xb8   : > { %4785 = vmatprep.mubr.msk.bf16.mxu0 %vm537_vm4, %v2233_v43  ;;  %v999_v43 = vrot.slane %v4146_v56, 1  ;;  %v2655_v47 = vrot.slane %v5952_v36, 2 }
  0xba   : > { %v1001_v48 = vsel %vm998_vm6, %v999_v43, %v1000_v46  ;;  %v2656_v10 = vsel %vm2198_vm5, %v2653_v8, %v2655_v47  ;;  %v1010_v43 = vrot.slane %v5624_v24, 1 }
  0xbd   : > { %4618 = vmatmul.mubr.msk.bf16.gmra.mrb[16].mxu1 %vm537_vm4, %v5662_v1 }
  0xbe   : > { %4621 = vmatprep.mubr.msk.bf16.mxu1 %vm537_vm4, %v5673_v20 }
  0xbf   : > { %4786 = vmatmul.mubr.msk.bf16.gmra.mrb[32].mxu0 %vm537_vm4, %v2235_v31  ;;  %v2654_v31 = vsel %vm2198_vm5, %v2651_v25, %v2653_v8  ;;  %v1012_v8 = vrot.slane %v5634_v34, 1  ;;  %v6024_v34 = vld [vmem:[%s5535_s28 + $0x98] sm:$0xff]  }
  0xc0   : > { %4791 = vmatprep.mubr.msk.bf16.mxu0 %vm537_vm4, %v2640_v41  ;;  %v5964_v41 = vld [vmem:[%s5535_s28 + $0x60] sm:$0xff]  }
  0xc5   : > { %4622 = vmatmul.mubr.msk.bf16.gmra.mrb[20].mxu1 %vm537_vm4, %v5685_v38 }
  0xc6   : > { %4625 = vmatprep.mubr.msk.bf16.mxu1 %vm537_vm4, %v5704_v63 }
  0xc7   : > { %4792 = vmatmul.mubr.msk.bf16.vlgmr.msra.gmra.mrb[0].mxu0 %vm537_vm4, %v2642_v60  ;;  %v2657_v60 = vrot.slane %v5964_v41, 2 }
  0xc8   : > { %4828 = vmatpush3.bf16.msra.mxu0 %v5761_v15  ;;  %4795 = vmatprep.mubr.msk.bf16.mxu0 %vm537_vm4, %v2644_v3  ;;  %v2648_v15 = vsel %vm2198_vm5, %v2645_v11, %v2647_v16  ;;  %v1003_v3 = vsel %vm998_vm6, %v1000_v46, %v1002_v53  ;;  %v2659_v11 = vrot.slane %v5970_v54, 2  ;;  %v1005_v16 = vsel %vm998_vm6, %v1002_v53, %v1004_v28  ;;  %v6008_v46 = vld [vmem:[%s5535_s28 + $0x88] sm:$0xff]  }
  0xc9   : > { %4865 = vmatprep.subr.bf16.mxu0 %v5916_v4  ;;  %v2658_v27 = vsel %vm2198_vm5, %v2655_v47, %v2657_v60  ;;  %v2665_v47 = vrot.slane %v6002_v5, 2  ;;  %v1014_v53 = vrot.slane %v5650_v50, 1  ;;  %v2671_v50 = vrot.slane %v6024_v34, 2 }
  0xca   : > { %v2660_v40 = vsel %vm2198_vm5, %v2657_v60, %v2659_v11 }
  0xcd   : > { %4626 = vmatmul.mubr.msk.bf16.gmra.mrb[24].mxu1 %vm537_vm4, %v5711_v18 }
  0xce   : > { %4629 = vmatprep.mubr.msk.bf16.mxu1 %vm537_vm4, %v5728_v35 }
  0xcf   : > { %4796 = vmatmul.mubr.msk.bf16.gmra.mrb[4].mxu0 %vm537_vm4, %v2646_v19  ;;  %v5982_v19 = vld [vmem:[%s5535_s28 + $0x70] sm:$0xff]  }
  0xd0   : > { %4799 = vmatprep.mubr.msk.bf16.mxu0 %vm537_vm4, %v2648_v15  ;;  %v1006_v15 = vrot.slane %v5598_v55, 1  ;;  %v2661_v25 = vrot.slane %v5982_v19, 2 }
  0xd2   : > { %v1007_v56 = vsel %vm998_vm6, %v1004_v28, %v1006_v15  ;;  %v1009_v55 = vsel %vm998_vm6, %v1006_v15, %v1008_v23  ;;  %v6021_v28 = vld [vmem:[%s5535_s28 + $0x90] sm:$0xff]   ;;  %v2961_v15 = vshrl.u32 %v5880_v45, 16 }
  0xd5   : > { %4630 = vmatmul.mubr.msk.bf16.gmra.mrb[28].mxu1 %vm537_vm4, %v5733_v37 }
  0xd6   : > { %4633 = vmatprep.mubr.msk.bf16.mxu1 %vm537_vm4, %v5752_v58 }
  0xd7   : > { %4800 = vmatmul.mubr.msk.bf16.gmra.mrb[8].mxu0 %vm537_vm4, %v2650_v17  ;;  %v2663_v17 = vrot.slane %v5989_v12, 2 }
  0xd8   : > { %4803 = vmatprep.mubr.msk.bf16.mxu0 %vm537_vm4, %v2652_v33 }
  0xd9   : > { %v2664_v33 = vsel %vm2198_vm5, %v2661_v25, %v2663_v17  ;;  %v2666_v24 = vsel %vm2198_vm5, %v2663_v17, %v2665_v47  ;;  %v1018_v17 = vrot.slane %v5673_v20, 1  ;;  %v2973_v20 = vshll.u32 %v5891_v49, 16 }
  0xdd   : > { %4634 = vmatmul.mubr.msk.bf16.gmra.mrb[32].mxu1 %vm537_vm4, %v5757_v0 }
  0xde   : > { %4639 = vmatprep.mubr.msk.bf16.mxu1 %vm537_vm4, %v1001_v48  ;;  %v1011_v48 = vsel %vm998_vm6, %v1008_v23, %v1010_v43  ;;  %v2964_v23 = vshll.u32 %v5880_v45, 16 }
  0xdf   : > { %4804 = vmatmul.mubr.msk.bf16.gmra.mrb[12].mxu0 %vm537_vm4, %v2654_v31  ;;  %v2667_v31 = vrot.slane %v6008_v46, 2 }
  0xe0   : > { %4807 = vmatprep.mubr.msk.bf16.mxu0 %vm537_vm4, %v2656_v10  ;;  %v1013_v10 = vsel %vm998_vm6, %v1010_v43, %v1012_v8  ;;  %v2966_v43 = vrot.slane %v2964_v23, 3 }
  0xe1   : > { %v2668_v60 = vsel %vm2198_vm5, %v2665_v47, %v2667_v31 }
  0xe5   : > { %4640 = vmatmul.mubr.msk.bf16.vlgmr.msra.gmra.mrb[0].mxu1 %vm537_vm4, %v1003_v3  ;;  %v1016_v3 = vrot.slane %v5662_v1, 1 }
  0xe6   : > { %4643 = vmatprep.mubr.msk.bf16.mxu1 %vm537_vm4, %v1005_v16  ;;  %4676 = vmatpush3.bf16.msra.mxu1 %v5811_v61  ;;  %v2662_v61 = vsel %vm2198_vm5, %v2659_v11, %v2661_v25  ;;  %v1015_v11 = vsel %vm998_vm6, %v1012_v8, %v1014_v53  ;;  %v2669_v16 = vrot.slane %v6021_v28, 2  ;;  %v1020_v8 = vrot.slane %v5685_v38, 1 }
  0xe7   : > { %4903 = vmatprep.subr.bf16.mxu1 %v5539_v6  ;;  %4808 = vmatmul.mubr.msk.bf16.gmra.mrb[16].mxu0 %vm537_vm4, %v2658_v27  ;;  %v2953_v27 = vshrl.u32 %v5877_v44, 16  ;;  %v1017_v1 = vsel %vm998_vm6, %v1014_v53, %v1016_v3  ;;  %v1019_v47 = vsel %vm998_vm6, %v1016_v3, %v1018_v17  ;;  %v2979_v53 = vshrl.u32 %v5897_v51, 16 }
  0xe8   : > { %4811 = vmatprep.mubr.msk.bf16.mxu0 %vm537_vm4, %v2660_v40  ;;  %v2956_v40 = vshll.u32 %v5877_v44, 16  ;;  %v2670_v25 = vsel %vm2198_vm5, %v2667_v31, %v2669_v16  ;;  %v2963_v44 = vrot.slane %v2961_v15, 2  ;;  %v2970_v31 = vshrl.u32 %v5891_v49, 16 }
  0xe9   : > { %v2975_v3 = vrot.slane %v2973_v20, 3  ;;  %v2981_v15 = vrot.slane %v2979_v53, 2  ;;  %v1028_v20 = vrot.slane %v5733_v37, 1  ;;  %v3009_v53 = vshll.u32 %v5928_v2, 16 }
  0xed   : > { %4644 = vmatmul.mubr.msk.bf16.gmra.mrb[4].mxu1 %vm537_vm4, %v1007_v56  ;;  %v2672_v56 = vsel %vm2198_vm5, %v2669_v16, %v2671_v50  ;;  %v2972_v16 = vrot.slane %v2970_v31, 2 }
  0xee   : > { %4647 = vmatprep.mubr.msk.bf16.mxu1 %vm537_vm4, %v1009_v55  ;;  %v5301_v55 = vld [vmem:[%s5535_s28 + $0xa0] ss:$0 sps:$4 sm:$0x33]  }
  0xef   : > { %4812 = vmatmul.mubr.msk.bf16.gmra.mrb[20].mxu0 %vm537_vm4, %v2662_v61  ;;  %v2955_v61 = vrot.slane %v2953_v27, 2 }
  0xf0   : > { %4815 = vmatprep.mubr.msk.bf16.mxu0 %vm537_vm4, %v2664_v33  ;;  %v2958_v33 = vrot.slane %v2956_v40, 3  ;;  %v1022_v40 = vrot.slane %v5704_v63, 1  ;;  %v3000_v63 = vshll.u32 %v5913_v9, 16 }
  0xf2   : > { %v3002_v31 = vrot.slane %v3000_v63, 3 }
  0xf5   : > { %4648 = vmatmul.mubr.msk.bf16.gmra.mrb[8].mxu1 %vm537_vm4, %v1011_v48  ;;  %v2673_v48 = vrot.slane %v5301_v55, 2 }
  0xf6   : > { %4651 = vmatprep.mubr.msk.bf16.mxu1 %vm537_vm4, %v1013_v10  ;;  %v2959_v10 = vor.u32 %v2958_v33, %v2955_v61  ;;  %v2997_v61 = vshrl.u32 %v5913_v9, 16 }
  0xf7   : > { %4816 = vmatmul.mubr.msk.bf16.gmra.mrb[24].mxu0 %vm537_vm4, %v2666_v24  ;;  %v2967_v24 = vor.u32 %v2966_v43, %v2963_v44  ;;  %v2674_v38 = vsel %vm2198_vm5, %v2671_v50, %v2673_v48  ;;  %v2991_v50 = vshll.u32 %v5907_v59, 16  ;;  %v1026_v48 = vrot.slane %v5728_v35, 1 }
  0xf8   : > { %4819 = vmatprep.mubr.msk.bf16.mxu0 %vm537_vm4, %v2668_v60  ;;  %v2982_v60 = vshll.u32 %v5897_v51, 16  ;;  %v3015_v35 = vshrl.u32 %v5934_v21, 16 }
  0xf9   : > { %v2968_v27 = vsel %vm2951_vm7, %v2959_v10, %v2967_v24  ;;  %v2993_v43 = vrot.slane %v2991_v50, 3  ;;  %v1029_v37 = vsel %vm998_vm6, %v1026_v48, %v1028_v20  ;;  %v3027_v50 = vshll.u32 %v5946_v32, 16 }
  0xfa   : > { %v2984_v23 = vrot.slane %v2982_v60, 3 }
  0xfc   : > { %v2985_v55 = vor.u32 %v2984_v23, %v2981_v15  ;;  %v3017_v15 = vrot.slane %v3015_v35, 2 }
  0xfd   : > { %4652 = vmatmul.mubr.msk.bf16.gmra.mrb[12].mxu1 %vm537_vm4, %v1015_v11  ;;  %v1021_v11 = vsel %vm998_vm6, %v1018_v17, %v1020_v8  ;;  %v1023_v17 = vsel %vm998_vm6, %v1020_v8, %v1022_v40  ;;  %v2999_v8 = vrot.slane %v2997_v61, 2  ;;  %v3033_v61 = vshrl.u32 %v5952_v36, 16 }
  0xfe   : > { %4655 = vmatprep.mubr.msk.bf16.mxu1 %vm537_vm4, %v1017_v1  ;;  %v1024_v1 = vrot.slane %v5711_v18, 1 }
  0xff   : > { %4820 = vmatmul.mubr.msk.bf16.gmra.mrb[28].mxu0 %vm537_vm4, %v2670_v25  ;;  %v2976_v25 = vor.u32 %v2975_v3, %v2972_v16  ;;  %v3011_v3 = vrot.slane %v3009_v53, 3  ;;  %v3045_v53 = vshll.u32 %v5964_v41, 16 }
 0x100   : > { %4823 = vmatprep.mubr.msk.bf16.mxu0 %vm537_vm4, %v2672_v56  ;;  %v2988_v56 = vshrl.u32 %v5907_v59, 16  ;;  %v1025_v33 = vsel %vm998_vm6, %v1022_v40, %v1024_v1  ;;  %v1027_v60 = vsel %vm998_vm6, %v1024_v1, %v1026_v48  ;;  %v1030_v40 = vrot.slane %v5752_v58, 1 }
 0x101   : > { %v2977_v18 = vsel %vm2951_vm7, %v2967_v24, %v2976_v25  ;;  %v3006_v24 = vshrl.u32 %v5928_v2, 16  ;;  %v1032_v1 = vrot.slane %v5757_v0, 1  ;;  %v3036_v58 = vshll.u32 %v5952_v36, 16 }
 0x102   : > { %v2990_v44 = vrot.slane %v2988_v56, 2  ;;  %v3024_v56 = vshrl.u32 %v5946_v32, 16 }
 0x103   : > { %v3008_v16 = vrot.slane %v3006_v24, 2  ;;  %v1033_v63 = vsel %vm998_vm6, %v1030_v40, %v1032_v1  ;;  %v3038_v48 = vrot.slane %v3036_v58, 3  ;;  %v3042_v24 = vshrl.u32 %v5964_v41, 16 }
 0x104   : > { %v2994_v10 = vor.u32 %v2993_v43, %v2990_v44  ;;  %v1034_v43 = vrot.slane %v5775_v26, 1  ;;  %v3072_v58 = vshll.u32 %v5989_v12, 16 }
 0x105   : > { %4656 = vmatmul.mubr.msk.bf16.gmra.mrb[16].mxu1 %vm537_vm4, %v1019_v47  ;;  %v2986_v47 = vsel %vm2951_vm7, %v2976_v25, %v2985_v55  ;;  %v3012_v25 = vor.u32 %v3011_v3, %v3008_v16  ;;  %v5306_v3 = vld [vmem:[%s5535_s28 + $0x18] sm:$0xff]  }
 0x106   : > { %4659 = vmatprep.mubr.msk.bf16.mxu1 %vm537_vm4, %v1021_v11  ;;  %v3003_v11 = vor.u32 %v3002_v31, %v2999_v8  ;;  %v1438_v8 = vrot.slane %v5557_v13, 1  ;;  %v5305_v31 = vld [vmem:[%s5535_s28 + $0x10] sm:$0xff]   ;;  %v3054_v13 = vshll.u32 %v5970_v54, 16 }
 0x107   : > { %4824 = vmatmul.mubr.msk.bf16.gmra.mrb[32].mxu0 %vm537_vm4, %v2674_v38  ;;  %v3018_v38 = vshll.u32 %v5934_v21, 16 }
 0x108   : > { %4829 = vmatprep.mubr.msk.bf16.mxu0 %vm537_vm4, %v2968_v27  ;;  %v3004_v27 = vsel %vm2951_vm7, %v2994_v10, %v3003_v11  ;;  %v3013_v0 = vsel %vm2951_vm7, %v3003_v11, %v3012_v25  ;;  %v3051_v11 = vshrl.u32 %v5970_v54, 16 }
 0x109   : > { %v3020_v23 = vrot.slane %v3018_v38, 3 }
 0x10d   : > { %4660 = vmatmul.mubr.msk.bf16.gmra.mrb[20].mxu1 %vm537_vm4, %v1023_v17  ;;  %v1031_v17 = vsel %vm998_vm6, %v1028_v20, %v1030_v40  ;;  %v1439_v20 = vrot.slane %v5305_v31, 1  ;;  %v3053_v40 = vrot.slane %v3051_v11, 2  ;;  %v5309_v31 = vld [vmem:[%s5535_s28 + $0x30] sm:$0xff]   ;;  %v3090_v11 = vshll.u32 %v6008_v46, 16 }
 0x10e   : > { %4663 = vmatprep.mubr.msk.bf16.mxu1 %vm537_vm4, %v1025_v33  ;;  %v3026_v33 = vrot.slane %v3024_v56, 2  ;;  %v3060_v56 = vshrl.u32 %v5982_v19, 16 }
 0x10f   : > { %4830 = vmatmul.mubr.msk.bf16.vlgmr.msra.gmra.mrb[0].mxu0 %vm537_vm4, %v2977_v18  ;;  %v3029_v18 = vrot.slane %v3027_v50, 3  ;;  %v1440_v35 = vsel %vm998_vm6, %v1438_v8, %v1439_v20  ;;  %v3063_v50 = vshll.u32 %v5982_v19, 16  ;;  %v3074_v8 = vrot.slane %v3072_v58, 3 }
 0x110   : > { %4866 = vmatpush3.bf16.msra.mxu0 %v5916_v4  ;;  %4833 = vmatprep.mubr.msk.bf16.mxu0 %vm537_vm4, %v2986_v47  ;;  %v2995_v4 = vsel %vm2951_vm7, %v2985_v55, %v2994_v10  ;;  %v3021_v55 = vor.u32 %v3020_v23, %v3017_v15  ;;  %v3035_v47 = vrot.slane %v3033_v61, 2  ;;  %v3056_v15 = vrot.slane %v3054_v13, 3  ;;  %v5307_v23 = vld [vmem:[%s5535_s28 + $0x20] sm:$0xff]  }
 0x111   : > { %v3030_v10 = vor.u32 %v3029_v18, %v3026_v33  ;;  %v3069_v61 = vshrl.u32 %v5989_v12, 16  ;;  %v3062_v33 = vrot.slane %v3060_v56, 2  ;;  %v3065_v18 = vrot.slane %v3063_v50, 3 }
 0x112   : > { %v3022_v44 = vsel %vm2951_vm7, %v3012_v25, %v3021_v55  ;;  %v3039_v26 = vor.u32 %v3038_v48, %v3035_v47  ;;  %v3099_v56 = vshll.u32 %v6021_v28, 16 }
 0x113   : > { %v3031_v38 = vsel %vm2951_vm7, %v3021_v55, %v3030_v10  ;;  %v3057_v55 = vor.u32 %v3056_v15, %v3053_v40  ;;  %v3071_v48 = vrot.slane %v3069_v61, 2  ;;  %v3092_v40 = vrot.slane %v3090_v11, 3  ;;  %v5311_v15 = vld [vmem:[%s5535_s28 + $0x40] sm:$0xff]   ;;  %v3392_v11 = vld [vmem:[%s5535_s28 + $0x10] sm:$0x8] }
 0x114   : > { %v3040_v16 = vsel %vm2951_vm7, %v3030_v10, %v3039_v26  ;;  %v3066_v10 = vor.u32 %v3065_v18, %v3062_v33  ;;  %v3108_v61 = vshll.u32 %v6024_v34, 16  ;;  %v3101_v33 = vrot.slane %v3099_v56, 3  ;;  %v6158_v18 = vld [vmem:[%s5535_s28 + $0xa0] ss:$0 sps:$4 sm:$0x77]  }
 0x115   : > { %4664 = vmatmul.mubr.msk.bf16.gmra.mrb[24].mxu1 %vm537_vm4, %v1027_v60  ;;  %v1035_v60 = vsel %vm998_vm6, %v1032_v1, %v1034_v43  ;;  %v1443_v1 = vrot.slane %v5307_v23, 1  ;;  %v5308_v43 = vld [vmem:[%s5535_s28 + $0x28] sm:$0xff]   ;;  %v1451_v23 = vrot.slane %v5311_v15, 1 }
 0x116   : > { %4667 = vmatprep.mubr.msk.bf16.mxu1 %vm537_vm4, %v1029_v37  ;;  %v3044_v37 = vrot.slane %v3042_v24, 2  ;;  %v1445_v47 = vrot.slane %v5308_v43, 1  ;;  %v3078_v24 = vshrl.u32 %v6002_v5, 16  ;;  %v5312_v43 = vld [vmem:[%s5535_s28 + $0x48] sm:$0xff]  }
 0x117   : > { %4834 = vmatmul.mubr.msk.bf16.gmra.mrb[4].mxu0 %vm537_vm4, %v2995_v4  ;;  %v3047_v4 = vrot.slane %v3045_v53, 3  ;;  %v3081_v53 = vshll.u32 %v6002_v5, 16 }
 0x118   : > { %4837 = vmatprep.mubr.msk.bf16.mxu0 %vm537_vm4, %v3004_v27  ;;  %v1441_v27 = vrot.slane %v5306_v3, 1 }
 0x119   : > { %v3048_v25 = vor.u32 %v3047_v4, %v3044_v37  ;;  %v3083_v37 = vrot.slane %v3081_v53, 3  ;;  %v3117_v53 = vshll.u32 %v6158_v18, 16 }
 0x11d   : > { %4668 = vmatmul.mubr.msk.bf16.gmra.mrb[28].mxu1 %vm537_vm4, %v1031_v17  ;;  %v1442_v17 = vsel %vm998_vm6, %v1439_v20, %v1441_v27  ;;  %v1447_v20 = vrot.slane %v5309_v31, 1  ;;  %v5313_v31 = vld [vmem:[%s5535_s28 + $0x50] sm:$0xff]  }
 0x11e   : > { %4671 = vmatprep.mubr.msk.bf16.mxu1 %vm537_vm4, %v1033_v63  ;;  %v1444_v63 = vsel %vm998_vm6, %v1441_v27, %v1443_v1 }
 0x11f   : > { %4838 = vmatmul.mubr.msk.bf16.gmra.mrb[8].mxu0 %vm537_vm4, %v3013_v0  ;;  %v3049_v0 = vsel %vm2951_vm7, %v3039_v26, %v3048_v25  ;;  %v3075_v26 = vor.u32 %v3074_v8, %v3071_v48  ;;  %v1448_v13 = vsel %vm998_vm6, %v1445_v47, %v1447_v20  ;;  %v3110_v8 = vrot.slane %v3108_v61, 3 }
 0x120   : > { %4841 = vmatprep.mubr.msk.bf16.mxu0 %vm537_vm4, %v3022_v44  ;;  %v3058_v44 = vsel %vm2951_vm7, %v3048_v25, %v3057_v55  ;;  %v3096_v25 = vshrl.u32 %v6021_v28, 16  ;;  %v3404_v61 = vrot.slane %v5897_v51, 3 }
 0x121   : > { %v3076_v4 = vsel %vm2951_vm7, %v3066_v10, %v3075_v26 }
 0x125   : > { %4672 = vmatmul.mubr.msk.bf16.gmra.mrb[32].mxu1 %vm537_vm4, %v1035_v60  ;;  %v1446_v60 = vsel %vm998_vm6, %v1443_v1, %v1445_v47  ;;  %v1453_v47 = vrot.slane %v5312_v43, 1  ;;  %v3408_v43 = vrot.slane %v5913_v9, 3  ;;  %v3410_v9 = vrot.slane %v5928_v2, 3 }
 0x126   : > { %4677 = vmatprep.mubr.msk.bf16.mxu1 %vm537_vm4, %v1440_v35  ;;  %v3067_v35 = vsel %vm2951_vm7, %v3057_v55, %v3066_v10  ;;  %v3105_v55 = vshrl.u32 %v6024_v34, 16  ;;  %v1860_v2 = vshrl.u32 %v5817_v62, 16 }
 0x127   : > { %4842 = vmatmul.mubr.msk.bf16.gmra.mrb[12].mxu0 %vm537_vm4, %v3031_v38  ;;  %v3080_v38 = vrot.slane %v3078_v24, 2  ;;  %v3114_v24 = vshrl.u32 %v6158_v18, 16 }
 0x128   : > { %4845 = vmatprep.mubr.msk.bf16.mxu0 %vm537_vm4, %v3040_v16  ;;  %v5310_v16 = vld [vmem:[%s5535_s28 + $0x38] sm:$0xff]   ;;  %v3107_v48 = vrot.slane %v3105_v55, 2 }
 0x129   : > { %v1449_v3 = vrot.slane %v5310_v16, 1  ;;  %v3084_v1 = vor.u32 %v3083_v37, %v3080_v38  ;;  %v3119_v38 = vrot.slane %v3117_v53, 3  ;;  %v3412_v53 = vrot.slane %v5934_v21, 3 }
 0x12a   : > { %v1869_v21 = vshrl.u32 %v5824_v29, 16 }
 0x12b   : > { %v1450_v50 = vsel %vm998_vm6, %v1447_v20, %v1449_v3  ;;  %v1452_v58 = vsel %vm998_vm6, %v1449_v3, %v1451_v23  ;;  %v1455_v20 = vrot.slane %v5313_v31, 1  ;;  %v4296_v3 = vcombine.low %v3392_v11, %v5865_v14 }
 0x12c   : > { %v1469_v31 = vrot.slane %v5851_v57, 1 }
 0x12d   : > { %4678 = vmatmul.mubr.msk.bf16.vlgmr.msra.gmra.mrb[0].mxu1 %vm537_vm4, %v1442_v17 }
 0x12e   : > { %4681 = vmatprep.mubr.msk.bf16.mxu1 %vm537_vm4, %v1444_v63  ;;  %4904 = vmatpush3.bf16.msra.mxu1 %v5539_v6  ;;  %v3087_v6 = vshrl.u32 %v6008_v46, 16  ;;  %v3085_v63 = vsel %vm2951_vm7, %v3075_v26, %v3084_v1  ;;  %v3111_v26 = vor.u32 %v3110_v8, %v3107_v48 }
 0x12f   : > { %4846 = vmatmul.mubr.msk.bf16.gmra.mrb[16].mxu0 %vm537_vm4, %v3049_v0  ;;  %v3098_v0 = vrot.slane %v3096_v25, 2 }
 0x130   : > { %4849 = vmatprep.mubr.msk.bf16.mxu0 %vm537_vm4, %v3058_v44  ;;  %v3089_v27 = vrot.slane %v3087_v6, 2  ;;  %v1456_v6 = vsel %vm998_vm6, %v1453_v47, %v1455_v20 }
 0x131   : > { %v3102_v10 = vor.u32 %v3101_v33, %v3098_v0  ;;  %v1465_v33 = vrot.slane %v5835_v52, 1 }
 0x132   : > { %v3093_v17 = vor.u32 %v3092_v40, %v3089_v27  ;;  %v1459_v27 = vrot.slane %v5804_v42, 1 }
 0x133   : > { %v3112_v37 = vsel %vm2951_vm7, %v3102_v10, %v3111_v26 }
 0x134   : > { %v3094_v44 = vsel %vm2951_vm7, %v3084_v1, %v3093_v17  ;;  %v3400_v1 = vrot.slane %v5880_v45, 3  ;;  %v3402_v45 = vrot.slane %v5891_v49, 3  ;;  %v3406_v49 = vrot.slane %v5907_v59, 3 }
 0x135   : > { %4682 = vmatmul.mubr.msk.bf16.gmra.mrb[4].mxu1 %vm537_vm4, %v1446_v60  ;;  %v1454_v60 = vsel %vm998_vm6, %v1451_v23, %v1453_v47  ;;  %v3399_v23 = vrot.slane %v4296_v3, 3  ;;  %v1851_v59 = vshrl.u32 %v5804_v42, 16 }
 0x136   : > { %4685 = vmatprep.mubr.msk.bf16.mxu1 %vm537_vm4, %v1448_v13  ;;  %v3103_v13 = vsel %vm2951_vm7, %v3093_v17, %v3102_v10  ;;  %v1463_v17 = vrot.slane %v5824_v29, 1  ;;  %v3405_v0 = vsel %vm3398_vm8, %v3402_v45, %v3404_v61  ;;  %v3407_v48 = vsel %vm3398_vm8, %v3404_v61, %v3406_v49 }
 0x137   : > { %4850 = vmatmul.mubr.msk.bf16.gmra.mrb[20].mxu0 %vm537_vm4, %v3067_v35  ;;  %v3116_v35 = vrot.slane %v3114_v24, 2  ;;  %v3401_v14 = vsel %vm3398_vm8, %v3399_v23, %v3400_v1  ;;  %v3409_v8 = vsel %vm3398_vm8, %v3406_v49, %v3408_v43  ;;  %v1854_v10 = vshll.u32 %v5804_v42, 16 }
 0x138   : > { %4853 = vmatprep.mubr.msk.bf16.mxu0 %vm537_vm4, %v3076_v4  ;;  %v5314_v4 = vld [vmem:[%s5535_s28 + $0x58] sm:$0xff]   ;;  %v1466_v51 = vsel %vm998_vm6, %v1463_v17, %v1465_v33  ;;  %v3413_v42 = vsel %vm3398_vm8, %v3410_v9, %v3412_v53  ;;  %v1871_v23 = vrot.slane %v1869_v21, 1  ;;  %v1899_v49 = vshll.u32 %v5851_v57, 16 }
 0x139   : > { %v1457_v16 = vrot.slane %v5314_v4, 1  ;;  %v3120_v40 = vor.u32 %v3119_v38, %v3116_v35  ;;  %v1856_v11 = vrot.slane %v1854_v10, 2  ;;  %v1863_v38 = vshll.u32 %v5817_v62, 16 }
 0x13a   : > { %v1872_v4 = vshll.u32 %v5824_v29, 16 }
 0x13b   : > { %v1458_v15 = vsel %vm998_vm6, %v1455_v20, %v1457_v16  ;;  %v1460_v25 = vsel %vm998_vm6, %v1457_v16, %v1459_v27  ;;  %v3121_v56 = vsel %vm2951_vm7, %v3111_v26, %v3120_v40  ;;  %v1471_v20 = vrot.slane %v5857_v30, 1 }
 0x13c   : > { %v3414_v16 = vrot.slane %v5946_v32, 3  ;;  %v1862_v40 = vrot.slane %v1860_v2, 1 }
 0x13d   : > { %4686 = vmatmul.mubr.msk.bf16.gmra.mrb[8].mxu1 %vm537_vm4, %v1450_v50  ;;  %v1461_v50 = vrot.slane %v5817_v62, 1  ;;  %v1472_v26 = vsel %vm998_vm6, %v1469_v31, %v1471_v20 }
 0x13e   : > { %4689 = vmatprep.mubr.msk.bf16.mxu1 %vm537_vm4, %v1452_v58  ;;  %v3415_v29 = vsel %vm3398_vm8, %v3412_v53, %v3414_v16  ;;  %v1917_v53 = vshll.u32 %v5871_v39, 16 }
 0x13f   : > { %4854 = vmatmul.mubr.msk.bf16.gmra.mrb[24].mxu0 %vm537_vm4, %v3085_v63  ;;  %v1462_v55 = vsel %vm998_vm6, %v1459_v27, %v1461_v50  ;;  %v1464_v58 = vsel %vm998_vm6, %v1461_v50, %v1463_v17  ;;  %v3403_v63 = vsel %vm3398_vm8, %v3400_v1, %v3402_v45  ;;  %v3416_v27 = vrot.slane %v5952_v36, 3 }
 0x140   : > { %4857 = vmatprep.mubr.msk.bf16.mxu0 %vm537_vm4, %v3094_v44  ;;  %v1467_v44 = vrot.slane %v5841_v22, 1  ;;  %v1874_v1 = vrot.slane %v1872_v4, 2  ;;  %v1881_v36 = vshll.u32 %v5835_v52, 16  ;;  %v1887_v50 = vshrl.u32 %v5841_v22, 16 }
 0x141   : > { %v3418_v17 = vrot.slane %v5964_v41, 3  ;;  %v1896_v41 = vshrl.u32 %v5851_v57, 16  ;;  %v3434_v4 = vrot.slane %v6158_v18, 3 }
 0x142   : > { %v1468_v47 = vsel %vm998_vm6, %v1465_v33, %v1467_v44  ;;  %v1470_v24 = vsel %vm998_vm6, %v1467_v44, %v1469_v31 }
 0x143   : > { %v1898_v31 = vrot.slane %v1896_v41, 1 }
 0x145   : > { %4690 = vmatmul.mubr.msk.bf16.gmra.mrb[12].mxu1 %vm537_vm4, %v1454_v60  ;;  %v5304_v60 = vld [vmem:[%s5535_s28 + $0x98] ss:$0 sps:$4 sm:$0x11]  }
 0x146   : > { %4693 = vmatprep.mubr.msk.bf16.mxu1 %vm537_vm4, %v1456_v6  ;;  %v1853_v6 = vrot.slane %v1851_v59, 1  ;;  %v1473_v35 = vrot.slane %v5304_v60, 1  ;;  %v3426_v60 = vrot.slane %v6002_v5, 3  ;;  %v3430_v5 = vrot.slane %v6021_v28, 3 }
 0x147   : > { %4858 = vmatmul.mubr.msk.bf16.gmra.mrb[28].mxu0 %vm537_vm4, %v3103_v13  ;;  %v3411_v13 = vsel %vm3398_vm8, %v3408_v43, %v3410_v9  ;;  %v1908_v43 = vshll.u32 %v5857_v30, 16 }
 0x148   : > { %4861 = vmatprep.mubr.msk.bf16.mxu0 %vm537_vm4, %v3112_v37  ;;  %v1857_v37 = vor.u32 %v1856_v11, %v1853_v6  ;;  %v1474_v3 = vsel %vm998_vm6, %v1471_v20, %v1473_v35  ;;  %v1901_v20 = vrot.slane %v1899_v49, 2  ;;  %v3428_v6 = vrot.slane %v6008_v46, 3 }
 0x149   : > { %v1910_v10 = vrot.slane %v1908_v43, 2 }
 0x14a   : > { %v1858_v62 = vsel %vm1751_vm3, %v5715_v7, %v1857_v37  ;;  %v1890_v7 = vshll.u32 %v5841_v22, 16  ;;  %v3419_v22 = vsel %vm3398_vm8, %v3416_v27, %v3418_v17 }
 0x14d   : > { %4694 = vmatmul.mubr.msk.bf16.gmra.mrb[16].mxu1 %vm537_vm4, %v1458_v15  ;;  %v1865_v15 = vrot.slane %v1863_v38, 2  ;;  %v3432_v38 = vrot.slane %v6024_v34, 3 }
 0x14e   : > { %4697 = vmatprep.mubr.msk.bf16.mxu1 %vm537_vm4, %v1460_v25  ;;  %v3417_v25 = vsel %vm3398_vm8, %v3414_v16, %v3416_v27 }
 0x14f   : > { %4862 = vmatmul.mubr.msk.bf16.gmra.mrb[32].mxu0 %vm537_vm4, %v3121_v56  ;;  %v1866_v32 = vor.u32 %v1865_v15, %v1862_v40  ;;  %v1878_v56 = vshrl.u32 %v5835_v52, 16  ;;  %v1889_v52 = vrot.slane %v1887_v50, 1  ;;  %v3433_v21 = vsel %vm3398_vm8, %v3430_v5, %v3432_v38 }
 0x150   : > { %4867 = vmatprep.mubr.msk.bf16.mxu0 %vm537_vm4, %v3401_v14  ;;  %v1875_v14 = vor.u32 %v1874_v1, %v1871_v23  ;;  %v3435_v16 = vsel %vm3398_vm8, %v3432_v38, %v3434_v4 }
 0x151   : > { %v1867_v45 = vsel %vm1751_vm3, %v1857_v37, %v1866_v32  ;;  %v1880_v61 = vrot.slane %v1878_v56, 1  ;;  %v3431_v37 = vsel %vm3398_vm8, %v3428_v6, %v3430_v5 }
 0x155   : > { %4698 = vmatmul.mubr.msk.bf16.gmra.mrb[20].mxu1 %vm537_vm4, %v1462_v55  ;;  %v3420_v55 = vrot.slane %v5970_v54, 3 }
 0x156   : > { %4701 = vmatprep.mubr.msk.bf16.mxu1 %vm537_vm4, %v1464_v58  ;;  %v1883_v58 = vrot.slane %v1881_v36, 2 }
 0x157   : > { %4868 = vmatmul.mubr.msk.bf16.vlgmr.msra.gmra.mrb[0].mxu0 %vm537_vm4, %v3403_v63  ;;  %v1876_v63 = vsel %vm1751_vm3, %v1866_v32, %v1875_v14  ;;  %v3421_v33 = vsel %vm3398_vm8, %v3418_v17, %v3420_v55 }
 0x158   : > { %4871 = vmatprep.mubr.msk.bf16.mxu0 %vm537_vm4, %v3405_v0  ;;  %v1892_v0 = vrot.slane %v1890_v7, 2  ;;  %v1884_v44 = vor.u32 %v1883_v58, %v1880_v61  ;;  %v6316_v61 = vld [vmem:[#allocation4] ss:$0 sm:$0xff] }
 0x15a   : > { %v1893_v54 = vor.u32 %v1892_v0, %v1889_v52 }
 0x15c   : > { %v1894_v59 = vsel %vm1751_vm3, %v1884_v44, %v1893_v54 }
 0x15d   : > { %4702 = vmatmul.mubr.msk.bf16.gmra.mrb[24].mxu1 %vm537_vm4, %v1466_v51  ;;  %v1905_v51 = vshrl.u32 %v5857_v30, 16 }
 0x15e   : > { %4705 = vmatprep.mubr.msk.bf16.mxu1 %vm537_vm4, %v1468_v47  ;;  %v3422_v47 = vrot.slane %v5982_v19, 3  ;;  %v1914_v19 = vshrl.u32 %v5871_v39, 16  ;;  %v3429_v39 = vsel %vm3398_vm8, %v3426_v60, %v3428_v6 }
 0x15f   : > { %4872 = vmatmul.mubr.msk.bf16.gmra.mrb[4].mxu0 %vm537_vm4, %v3407_v48  ;;  %v1885_v48 = vsel %vm1751_vm3, %v1875_v14, %v1884_v44  ;;  %v1907_v57 = vrot.slane %v1905_v51, 1 }
 0x160   : > { %4875 = vmatprep.mubr.msk.bf16.mxu0 %vm537_vm4, %v3409_v8  ;;  %v3424_v8 = vrot.slane %v5989_v12, 3  ;;  %v3423_v30 = vsel %vm3398_vm8, %v3420_v55, %v3422_v47  ;;  %v1916_v11 = vrot.slane %v1914_v19, 1 }
 0x161   : > { %v1911_v12 = vor.u32 %v1910_v10, %v1907_v57 }
 0x162   : > { %v3425_v9 = vsel %vm3398_vm8, %v3422_v47, %v3424_v8  ;;  %v3427_v35 = vsel %vm3398_vm8, %v3424_v8, %v3426_v60 }
 0x165   : > { %4706 = vmatmul.mubr.msk.bf16.gmra.mrb[28].mxu1 %vm537_vm4, %v1470_v24  ;;  %v1902_v24 = vor.u32 %v1901_v20, %v1898_v31 }
 0x166   : > { %4709 = vmatprep.mubr.msk.bf16.mxu1 %vm537_vm4, %v1472_v26 }
 0x167   : > { %4876 = vmatmul.mubr.msk.bf16.gmra.mrb[8].mxu0 %vm537_vm4, %v3411_v13  ;;  %v1903_v26 = vsel %vm1751_vm3, %v1893_v54, %v1902_v24  ;;  %v1919_v13 = vrot.slane %v1917_v53, 2 }
 0x168   : > { %4879 = vmatprep.mubr.msk.bf16.mxu0 %vm537_vm4, %v3413_v42  ;;  %v1912_v42 = vsel %vm1751_vm3, %v1902_v24, %v1911_v12 }
 0x169   : > { %v1920_v2 = vor.u32 %v1919_v13, %v1916_v11 }
 0x16b   : > { %v1921_v46 = vsel %vm1751_vm3, %v1911_v12, %v1920_v2 }
 0x16d   : > { %4710 = vmatmul.mubr.msk.bf16.gmra.mrb[32].mxu1 %vm537_vm4, %v1474_v3 }
 0x16e   : > { %4735 = vmatprep.mubr.msk.bf16.mxu1 %vm537_vm4, %v1858_v62 }
 0x16f   : > { %4880 = vmatmul.mubr.msk.bf16.gmra.mrb[12].mxu0 %vm537_vm4, %v3415_v29 }
 0x170   : > { %4883 = vmatprep.mubr.msk.bf16.mxu0 %vm537_vm4, %v3417_v25 }
 0x175   : > { %4736 = vmatmul.mubr.msk.bf16.vlgmr.msra.gmra.mrb[20].mxu1 %vm537_vm4, %v1867_v45 }
 0x176   : > { %4739 = vmatprep.mubr.msk.bf16.mxu1 %vm537_vm4, %v1876_v63 }
 0x177   : > { %4884 = vmatmul.mubr.msk.bf16.gmra.mrb[16].mxu0 %vm537_vm4, %v3419_v22 }
 0x178   : > { %4887 = vmatprep.mubr.msk.bf16.mxu0 %vm537_vm4, %v3421_v33 }
 0x17d   : > { %4740 = vmatmul.mubr.msk.bf16.gmra.mrb[24].mxu1 %vm537_vm4, %v1885_v48 }
 0x17e   : > { %4743 = vmatprep.mubr.msk.bf16.mxu1 %vm537_vm4, %v1894_v59 }
 0x17f   : > { %4888 = vmatmul.mubr.msk.bf16.gmra.mrb[20].mxu0 %vm537_vm4, %v3423_v30 }
 0x180   : > { %4891 = vmatprep.mubr.msk.bf16.mxu0 %vm537_vm4, %v3425_v9 }
 0x185   : > { %4744 = vmatmul.mubr.msk.bf16.gmra.mrb[28].mxu1 %vm537_vm4, %v1903_v26 }
 0x186   : > { %4747 = vmatprep.mubr.msk.bf16.mxu1 %vm537_vm4, %v1912_v42 }
 0x187   : > { %4892 = vmatmul.mubr.msk.bf16.gmra.mrb[24].mxu0 %vm537_vm4, %v3427_v35 }
 0x188   : > { %4895 = vmatprep.mubr.msk.bf16.mxu0 %vm537_vm4, %v3429_v39 }
 0x18d   : > { %4748 = vmatmul.mubr.msk.bf16.gmra.mrb[32].mxu1 %vm537_vm4, %v1921_v46 }
 0x18f   : > { %4896 = vmatmul.mubr.msk.bf16.gmra.mrb[28].mxu0 %vm537_vm4, %v3431_v37 }
 0x190   : > { %4899 = vmatprep.mubr.msk.bf16.mxu0 %vm537_vm4, %v3433_v21 }
 0x197   : > { %4900 = vmatmul.mubr.msk.bf16.gmra.mrb[32].mxu0 %vm537_vm4, %v3435_v16 }
 0x200   : > { %v4679_v28 = vpop.f32.mrb[0].mxu1 }
 0x201   : > { %v1566_v3 = vpop.f32.mrb[1].mxu1 }
 0x202   : > { %v4680_v27 = vpop.f32.mrb[2].mxu1 }
 0x203   : > { %v1569_v34 = vpop.f32.mrb[3].mxu1 }
 0x208   : > { %v4683_v40 = vpop.f32.mrb[4].mxu1 }
 0x209   : > { %v1582_v15 = vpop.f32.mrb[5].mxu1 }
 0x20a   : > { %v4684_v62 = vpop.f32.mrb[6].mxu1 }
 0x20b   : > { %v1585_v23 = vpop.f32.mrb[7].mxu1 }
 0x210   : > { %v4687_v1 = vpop.f32.mrb[8].mxu1 }
 0x211   : > { %v6294_v29 = vpop.f32.mrb[9].mxu1 }
 0x212   : > { %v6296_v25 = vpop.f32.mrb[10].mxu1 }
 0x213   : > { %v6298_v32 = vpop.f32.mrb[11].mxu1 }
 0x218   : > { %v6300_v18 = vpop.f32.mrb[12].mxu1 }
 0x219   : > { %v6302_v56 = vpop.f32.mrb[13].mxu1 }
 0x21a   : > { %v6304_v36 = vpop.f32.mrb[14].mxu1 }
 0x21b   : > { %v6306_v14 = vpop.f32.mrb[15].mxu1 }
 0x220   : > { %v6308_v50 = vpop.f32.mrb[16].mxu1 }
 0x221   : > { %v6310_v7 = vpop.f32.mrb[17].mxu1 }
 0x222   : > { %v6312_v17 = vpop.f32.mrb[18].mxu1 }
 0x223   : > { %v6314_v45 = vpop.f32.mrb[19].mxu1 }
 0x22a   : > { %v4869_v55 = vpop.f32.mrb[0].mxu0 }
 0x22b   : > { %v4905_v58 = vadd.f32 %v4869_v55, %v4679_v28  ;;  %v3527_v63 = vpop.f32.mrb[1].mxu0 }
 0x22c   : > { %v4906_v52 = vadd.f32 %v3527_v63, %v1566_v3  ;;  %v4870_v0 = vpop.f32.mrb[2].mxu0 }
 0x22d   : > { %v3715_v22 = vadd.f32 %v4905_v58, %v6316_v61  ;;  %v4907_v33 = vadd.f32 %v4870_v0, %v4680_v27  ;;  %v3530_v44 = vpop.f32.mrb[3].mxu0 }
 0x22e   : > { %v3713_v41 = vadd.f32 %v4906_v52, %v6316_v61  ;;  %v4908_v49 = vadd.f32 %v3530_v44, %v1569_v34 }
 0x22f   : > { %v3751_v54 = vmax.f32 %v3715_v22, 0.0  ;;  %v3716_v51 = vadd.f32 %v4907_v33, %v6316_v61 }
 0x230   : > { %v3749_v43 = vmax.f32 %v3713_v41, 0.0  ;;  %v3714_v47 = vadd.f32 %v4908_v49, %v6316_v61 }
 0x231   : > { %v4356_v48 = vpack.c.bf16 %v3751_v54, %v3751_v54  ;;  %v3752_v8 = vmax.f32 %v3716_v51, 0.0 }
 0x232   : > { %v4354_v31 = vpack.c.bf16 %v3749_v43, %v3749_v43  ;;  %v3750_v20 = vmax.f32 %v3714_v47, 0.0  ;;  %v4873_v59 = vpop.f32.mrb[4].mxu0 }
 0x233   : > { %3932 = vst.msk [vmem:[%s6325_s4 + $0x8] sm:$0xf] %vm3929_vm9, %v4356_v48  ;;  %v4357_v57 = vpack.c.bf16 %v3752_v8, %v3752_v8  ;;  %v4909_v10 = vadd.f32 %v4873_v59, %v4683_v40  ;;  %v3543_v30 = vpop.f32.mrb[5].mxu0 }
 0x234   : > { %3930 = vst.msk [vmem:[%s6325_s4] sm:$0xf] %vm3929_vm9, %v4354_v31  ;;  %v4355_v9 = vpack.c.bf16 %v3750_v20, %v3750_v20  ;;  %v4910_v24 = vadd.f32 %v3543_v30, %v1582_v15  ;;  %v4874_v19 = vpop.f32.mrb[6].mxu0 }
 0x235   : > { %3933 = vst.msk [vmem:[%s6325_s4 + $0xc] sm:$0xf] %vm3929_vm9, %v4357_v57  ;;  %v3719_v53 = vadd.f32 %v4909_v10, %v6316_v61  ;;  %v4911_v12 = vadd.f32 %v4874_v19, %v4684_v62  ;;  %v3546_v60 = vpop.f32.mrb[7].mxu0 }
 0x236   : > { %3931 = vst.msk [vmem:[%s6325_s4 + $0x4] sm:$0xf] %vm3929_vm9, %v4355_v9  ;;  %v3717_v26 = vadd.f32 %v4910_v24, %v6316_v61  ;;  %v4912_v6 = vadd.f32 %v3546_v60, %v1585_v23 }
 0x237   : > { %v3755_v11 = vmax.f32 %v3719_v53, 0.0  ;;  %v3720_v13 = vadd.f32 %v4911_v12, %v6316_v61 }
 0x238   : > { %v3753_v42 = vmax.f32 %v3717_v26, 0.0  ;;  %v3718_v35 = vadd.f32 %v4912_v6, %v6316_v61 }
 0x239   : > { %v4360_v39 = vpack.c.bf16 %v3755_v11, %v3755_v11  ;;  %v3756_v2 = vmax.f32 %v3720_v13, 0.0 }
 0x23a   : > { %v4358_v5 = vpack.c.bf16 %v3753_v42, %v3753_v42  ;;  %v3754_v46 = vmax.f32 %v3718_v35, 0.0  ;;  %v4877_v38 = vpop.f32.mrb[8].mxu0 }
 0x23b   : > { %3936 = vst.msk [vmem:[%s6325_s4 + $0x18] sm:$0xf] %vm3929_vm9, %v4360_v39  ;;  %v4361_v37 = vpack.c.bf16 %v3756_v2, %v3756_v2  ;;  %v4913_v21 = vadd.f32 %v4877_v38, %v4687_v1  ;;  %v3559_v4 = vpop.f32.mrb[9].mxu0 }
 0x23c   : > { %3934 = vst.msk [vmem:[%s6325_s4 + $0x10] sm:$0xf] %vm3929_vm9, %v4358_v5  ;;  %v4359_v16 = vpack.c.bf16 %v3754_v46, %v3754_v46  ;;  %v4914_v28 = vadd.f32 %v3559_v4, %v6294_v29  ;;  %v4878_v3 = vpop.f32.mrb[10].mxu0 }
 0x23d   : > { %3937 = vst.msk [vmem:[%s6325_s4 + $0x1c] sm:$0xf] %vm3929_vm9, %v4361_v37  ;;  %v3723_v27 = vadd.f32 %v4913_v21, %v6316_v61  ;;  %v4915_v34 = vadd.f32 %v4878_v3, %v6296_v25  ;;  %v3562_v40 = vpop.f32.mrb[11].mxu0 }
 0x23e   : > { %3935 = vst.msk [vmem:[%s6325_s4 + $0x14] sm:$0xf] %vm3929_vm9, %v4359_v16  ;;  %v3721_v15 = vadd.f32 %v4914_v28, %v6316_v61  ;;  %v4916_v62 = vadd.f32 %v3562_v40, %v6298_v32 }
 0x23f   : > { %v3759_v23 = vmax.f32 %v3723_v27, 0.0  ;;  %v3724_v1 = vadd.f32 %v4915_v34, %v6316_v61 }
 0x240   : > { %v3757_v29 = vmax.f32 %v3721_v15, 0.0  ;;  %v3722_v55 = vadd.f32 %v4916_v62, %v6316_v61 }
 0x241   : > { %v4364_v58 = vpack.c.bf16 %v3759_v23, %v3759_v23  ;;  %v3760_v63 = vmax.f32 %v3724_v1, 0.0 }
 0x242   : > { %v4362_v52 = vpack.c.bf16 %v3757_v29, %v3757_v29  ;;  %v3758_v25 = vmax.f32 %v3722_v55, 0.0  ;;  %v4881_v0 = vpop.f32.mrb[12].mxu0 }
 0x243   : > { %3940 = vst.msk [vmem:[%s6325_s4 + $0x28] sm:$0xf] %vm3929_vm9, %v4364_v58  ;;  %v4365_v22 = vpack.c.bf16 %v3760_v63, %v3760_v63  ;;  %v4917_v33 = vadd.f32 %v4881_v0, %v6300_v18  ;;  %v3575_v44 = vpop.f32.mrb[13].mxu0 }
 0x244   : > { %3938 = vst.msk [vmem:[%s6325_s4 + $0x20] sm:$0xf] %vm3929_vm9, %v4362_v52  ;;  %v4363_v32 = vpack.c.bf16 %v3758_v25, %v3758_v25  ;;  %v4918_v41 = vadd.f32 %v3575_v44, %v6302_v56  ;;  %v4882_v49 = vpop.f32.mrb[14].mxu0 }
 0x245   : > { %3941 = vst.msk [vmem:[%s6325_s4 + $0x2c] sm:$0xf] %vm3929_vm9, %v4365_v22  ;;  %v3727_v54 = vadd.f32 %v4917_v33, %v6316_v61  ;;  %v4919_v51 = vadd.f32 %v4882_v49, %v6304_v36  ;;  %v3578_v43 = vpop.f32.mrb[15].mxu0 }
 0x246   : > { %3939 = vst.msk [vmem:[%s6325_s4 + $0x24] sm:$0xf] %vm3929_vm9, %v4363_v32  ;;  %v3725_v47 = vadd.f32 %v4918_v41, %v6316_v61  ;;  %v4920_v18 = vadd.f32 %v3578_v43, %v6306_v14 }
 0x247   : > { %v3763_v48 = vmax.f32 %v3727_v54, 0.0  ;;  %v3728_v8 = vadd.f32 %v4919_v51, %v6316_v61 }
 0x248   : > { %v4737_v56 = vpop.f32.mrb[20].mxu1  ;;  %v3761_v31 = vmax.f32 %v3725_v47, 0.0  ;;  %v3726_v20 = vadd.f32 %v4920_v18, %v6316_v61 }
 0x249   : > { %v2093_v59 = vpop.f32.mrb[21].mxu1  ;;  %v4368_v57 = vpack.c.bf16 %v3763_v48, %v3763_v48  ;;  %v3764_v36 = vmax.f32 %v3728_v8, 0.0 }
 0x24a   : > { %v4738_v10 = vpop.f32.mrb[22].mxu1  ;;  %v4366_v30 = vpack.c.bf16 %v3761_v31, %v3761_v31  ;;  %v3762_v9 = vmax.f32 %v3726_v20, 0.0  ;;  %v4885_v24 = vpop.f32.mrb[16].mxu0 }
 0x24b   : > { %v2096_v19 = vpop.f32.mrb[23].mxu1  ;;  %3944 = vst.msk [vmem:[%s6325_s4 + $0x38] sm:$0xf] %vm3929_vm9, %v4368_v57  ;;  %v4369_v14 = vpack.c.bf16 %v3764_v36, %v3764_v36  ;;  %v4921_v53 = vadd.f32 %v4885_v24, %v6308_v50  ;;  %v3591_v12 = vpop.f32.mrb[17].mxu0 }
 0x24c   : > { %3942 = vst.msk [vmem:[%s6325_s4 + $0x30] sm:$0xf] %vm3929_vm9, %v4366_v30  ;;  %v4367_v60 = vpack.c.bf16 %v3762_v9, %v3762_v9  ;;  %v4922_v26 = vadd.f32 %v3591_v12, %v6310_v7  ;;  %v4886_v6 = vpop.f32.mrb[18].mxu0 }
 0x24d   : > { %3945 = vst.msk [vmem:[%s6325_s4 + $0x3c] sm:$0xf] %vm3929_vm9, %v4369_v14  ;;  %v3731_v11 = vadd.f32 %v4921_v53, %v6316_v61  ;;  %v4923_v13 = vadd.f32 %v4886_v6, %v6312_v17  ;;  %v3594_v42 = vpop.f32.mrb[19].mxu0 }
 0x24e   : > { %3943 = vst.msk [vmem:[%s6325_s4 + $0x34] sm:$0xf] %vm3929_vm9, %v4367_v60  ;;  %v3729_v35 = vadd.f32 %v4922_v26, %v6316_v61  ;;  %v4924_v50 = vadd.f32 %v3594_v42, %v6314_v45 }
 0x24f   : > { %v3767_v39 = vmax.f32 %v3731_v11, 0.0  ;;  %v3732_v2 = vadd.f32 %v4923_v13, %v6316_v61 }
 0x250   : > { %v4741_v7 = vpop.f32.mrb[24].mxu1  ;;  %v3765_v5 = vmax.f32 %v3729_v35, 0.0  ;;  %v3730_v46 = vadd.f32 %v4924_v50, %v6316_v61 }
 0x251   : > { %v2109_v38 = vpop.f32.mrb[25].mxu1  ;;  %v4372_v37 = vpack.c.bf16 %v3767_v39, %v3767_v39  ;;  %v3768_v17 = vmax.f32 %v3732_v2, 0.0 }
 0x252   : > { %v4742_v21 = vpop.f32.mrb[26].mxu1  ;;  %v4370_v4 = vpack.c.bf16 %v3765_v5, %v3765_v5  ;;  %v3766_v16 = vmax.f32 %v3730_v46, 0.0  ;;  %v4889_v28 = vpop.f32.mrb[20].mxu0 }
 0x253   : > { %v2112_v3 = vpop.f32.mrb[27].mxu1  ;;  %3948 = vst.msk [vmem:[%s6325_s4 + $0x48] sm:$0xf] %vm3929_vm9, %v4372_v37  ;;  %v4373_v45 = vpack.c.bf16 %v3768_v17, %v3768_v17  ;;  %v4925_v27 = vadd.f32 %v4889_v28, %v4737_v56  ;;  %v3607_v34 = vpop.f32.mrb[21].mxu0 }
 0x254   : > { %3946 = vst.msk [vmem:[%s6325_s4 + $0x40] sm:$0xf] %vm3929_vm9, %v4370_v4  ;;  %v4371_v40 = vpack.c.bf16 %v3766_v16, %v3766_v16  ;;  %v4926_v15 = vadd.f32 %v3607_v34, %v2093_v59  ;;  %v4890_v62 = vpop.f32.mrb[22].mxu0 }
 0x255   : > { %3949 = vst.msk [vmem:[%s6325_s4 + $0x4c] sm:$0xf] %vm3929_vm9, %v4373_v45  ;;  %v3735_v23 = vadd.f32 %v4925_v27, %v6316_v61  ;;  %v4927_v1 = vadd.f32 %v4890_v62, %v4738_v10  ;;  %v3610_v29 = vpop.f32.mrb[23].mxu0 }
 0x256   : > { %3947 = vst.msk [vmem:[%s6325_s4 + $0x44] sm:$0xf] %vm3929_vm9, %v4371_v40  ;;  %v3733_v55 = vadd.f32 %v4926_v15, %v6316_v61  ;;  %v4928_v58 = vadd.f32 %v3610_v29, %v2096_v19 }
 0x257   : > { %v3771_v63 = vmax.f32 %v3735_v23, 0.0  ;;  %v3736_v52 = vadd.f32 %v4927_v1, %v6316_v61 }
 0x258   : > { %v4745_v25 = vpop.f32.mrb[28].mxu1  ;;  %v3769_v0 = vmax.f32 %v3733_v55, 0.0  ;;  %v3734_v22 = vadd.f32 %v4928_v58, %v6316_v61 }
 0x259   : > { %v2125_v33 = vpop.f32.mrb[29].mxu1  ;;  %v4376_v44 = vpack.c.bf16 %v3771_v63, %v3771_v63  ;;  %v3772_v32 = vmax.f32 %v3736_v52, 0.0 }
 0x25a   : > { %v4746_v41 = vpop.f32.mrb[30].mxu1  ;;  %v4374_v49 = vpack.c.bf16 %v3769_v0, %v3769_v0  ;;  %v3770_v54 = vmax.f32 %v3734_v22, 0.0  ;;  %v4893_v51 = vpop.f32.mrb[24].mxu0 }
 0x25b   : > { %v2128_v43 = vpop.f32.mrb[31].mxu1  ;;  %3952 = vst.msk [vmem:[%s6325_s4 + $0x58] sm:$0xf] %vm3929_vm9, %v4376_v44  ;;  %v4377_v47 = vpack.c.bf16 %v3772_v32, %v3772_v32  ;;  %v4929_v18 = vadd.f32 %v4893_v51, %v4741_v7  ;;  %v3623_v48 = vpop.f32.mrb[25].mxu0 }
 0x25c   : > { %3950 = vst.msk [vmem:[%s6325_s4 + $0x50] sm:$0xf] %vm3929_vm9, %v4374_v49  ;;  %v4375_v8 = vpack.c.bf16 %v3770_v54, %v3770_v54  ;;  %v4930_v56 = vadd.f32 %v3623_v48, %v2109_v38  ;;  %v4894_v31 = vpop.f32.mrb[26].mxu0 }
 0x25d   : > { %3953 = vst.msk [vmem:[%s6325_s4 + $0x5c] sm:$0xf] %vm3929_vm9, %v4377_v47  ;;  %v3739_v20 = vadd.f32 %v4929_v18, %v6316_v61  ;;  %v4931_v59 = vadd.f32 %v4894_v31, %v4742_v21  ;;  %v3626_v57 = vpop.f32.mrb[27].mxu0 }
 0x25e   : > { %3951 = vst.msk [vmem:[%s6325_s4 + $0x54] sm:$0xf] %vm3929_vm9, %v4375_v8  ;;  %v3737_v36 = vadd.f32 %v4930_v56, %v6316_v61  ;;  %v4932_v10 = vadd.f32 %v3626_v57, %v2112_v3 }
 0x25f   : > { %v3775_v30 = vmax.f32 %v3739_v20, 0.0  ;;  %v3740_v9 = vadd.f32 %v4931_v59, %v6316_v61 }
 0x260   : > { %v4749_v24 = vpop.f32.mrb[32].mxu1  ;;  %v3773_v19 = vmax.f32 %v3737_v36, 0.0  ;;  %v3738_v14 = vadd.f32 %v4932_v10, %v6316_v61 }
 0x261   : > { %v2141_v53 = vpop.f32.mrb[33].mxu1  ;;  %v4380_v12 = vpack.c.bf16 %v3775_v30, %v3775_v30  ;;  %v3776_v60 = vmax.f32 %v3740_v9, 0.0 }
 0x262   : > { %v4750_v26 = vpop.f32.mrb[34].mxu1  ;;  %v4378_v6 = vpack.c.bf16 %v3773_v19, %v3773_v19  ;;  %v3774_v11 = vmax.f32 %v3738_v14, 0.0  ;;  %v4897_v13 = vpop.f32.mrb[28].mxu0 }
 0x263   : > { %v2144_v42 = vpop.f32.mrb[35].mxu1  ;;  %3956 = vst.msk [vmem:[%s6325_s4 + $0x68] sm:$0xf] %vm3929_vm9, %v4380_v12  ;;  %v4381_v35 = vpack.c.bf16 %v3776_v60, %v3776_v60  ;;  %v4933_v50 = vadd.f32 %v4897_v13, %v4745_v25  ;;  %v3639_v39 = vpop.f32.mrb[29].mxu0 }
 0x264   : > { %3954 = vst.msk [vmem:[%s6325_s4 + $0x60] sm:$0xf] %vm3929_vm9, %v4378_v6  ;;  %v4379_v2 = vpack.c.bf16 %v3774_v11, %v3774_v11  ;;  %v4934_v7 = vadd.f32 %v3639_v39, %v2125_v33  ;;  %v4898_v5 = vpop.f32.mrb[30].mxu0 }
 0x265   : > { %3957 = vst.msk [vmem:[%s6325_s4 + $0x6c] sm:$0xf] %vm3929_vm9, %v4381_v35  ;;  %v3743_v46 = vadd.f32 %v4933_v50, %v6316_v61  ;;  %v4935_v38 = vadd.f32 %v4898_v5, %v4746_v41  ;;  %v3642_v37 = vpop.f32.mrb[31].mxu0 }
 0x266   : > { %3955 = vst.msk [vmem:[%s6325_s4 + $0x64] sm:$0xf] %vm3929_vm9, %v4379_v2  ;;  %v3741_v17 = vadd.f32 %v4934_v7, %v6316_v61  ;;  %v4936_v21 = vadd.f32 %v3642_v37, %v2128_v43 }
 0x267   : > { %v3779_v4 = vmax.f32 %v3743_v46, 0.0  ;;  %v3744_v16 = vadd.f32 %v4935_v38, %v6316_v61 }
 0x268   : > { %v3777_v28 = vmax.f32 %v3741_v17, 0.0  ;;  %v3742_v3 = vadd.f32 %v4936_v21, %v6316_v61 }
 0x269   : > { %v4384_v45 = vpack.c.bf16 %v3779_v4, %v3779_v4  ;;  %v3780_v27 = vmax.f32 %v3744_v16, 0.0 }
 0x26a   : > { %v4382_v34 = vpack.c.bf16 %v3777_v28, %v3777_v28  ;;  %v3778_v40 = vmax.f32 %v3742_v3, 0.0  ;;  %v4901_v15 = vpop.f32.mrb[32].mxu0 }
 0x26b   : > { %3960 = vst.msk [vmem:[%s6325_s4 + $0x78] sm:$0xf] %vm3929_vm9, %v4384_v45  ;;  %v4385_v62 = vpack.c.bf16 %v3780_v27, %v3780_v27  ;;  %v4937_v23 = vadd.f32 %v4901_v15, %v4749_v24  ;;  %v3655_v1 = vpop.f32.mrb[33].mxu0 }
 0x26c   : > { %3958 = vst.msk [vmem:[%s6325_s4 + $0x70] sm:$0xf] %vm3929_vm9, %v4382_v34  ;;  %v4383_v29 = vpack.c.bf16 %v3778_v40, %v3778_v40  ;;  %v4938_v55 = vadd.f32 %v3655_v1, %v2141_v53  ;;  %v4902_v58 = vpop.f32.mrb[34].mxu0 }
 0x26d   : > { %3961 = vst.msk [vmem:[%s6325_s4 + $0x7c] sm:$0xf] %vm3929_vm9, %v4385_v62  ;;  %v3747_v63 = vadd.f32 %v4937_v23, %v6316_v61  ;;  %v4939_v52 = vadd.f32 %v4902_v58, %v4750_v26  ;;  %v3658_v25 = vpop.f32.mrb[35].mxu0 }
 0x26e   : > { %3959 = vst.msk [vmem:[%s6325_s4 + $0x74] sm:$0xf] %vm3929_vm9, %v4383_v29  ;;  %v3745_v0 = vadd.f32 %v4938_v55, %v6316_v61  ;;  %v4940_v22 = vadd.f32 %v3658_v25, %v2144_v42 }
 0x26f   : > { %v3783_v33 = vmax.f32 %v3747_v63, 0.0  ;;  %v3748_v44 = vadd.f32 %v4939_v52, %v6316_v61 }
 0x270   : > { %v3781_v32 = vmax.f32 %v3745_v0, 0.0  ;;  %v3746_v41 = vadd.f32 %v4940_v22, %v6316_v61 }
 0x271   : > { %v4388_v49 = vpack.c.bf16 %v3783_v33, %v3783_v33  ;;  %v3784_v54 = vmax.f32 %v3748_v44, 0.0 }
 0x272   : > { %v4386_v51 = vpack.c.bf16 %v3781_v32, %v3781_v32  ;;  %v3782_v43 = vmax.f32 %v3746_v41, 0.0 }
 0x273   : > { %3964 = vst.msk [vmem:[%s6325_s4 + $0x88] sm:$0xf] %vm3929_vm9, %v4388_v49  ;;  %v4389_v47 = vpack.c.bf16 %v3784_v54, %v3784_v54 }
 0x274   : > { %3962 = vst.msk [vmem:[%s6325_s4 + $0x80] sm:$0xf] %vm3929_vm9, %v4386_v51  ;;  %v4387_v18 = vpack.c.bf16 %v3782_v43, %v3782_v43 }
 0x275   : > { %3965 = vst.msk [vmem:[%s6325_s4 + $0x8c] sm:$0xf] %vm3929_vm9, %v4389_v47 }
 0x276   : > { %3963 = vst.msk [vmem:[%s6325_s4 + $0x84] sm:$0xf] %vm3929_vm9, %v4387_v18 }
 0x277 PF: > { %s15_s14 = sadd.s32 1, %s5401_s14   ;;  %s6464_s12 = smov %s5397_s13 }
 0x278   : > { %p12_p6 = scmp.ge.s32.totalorder %s15_s14, 6   ;;  %s6465_s13 = smov %s6467_s16 }
 0x27a   :  { %14 = sbr.rel (!%p12_p6) target bundleno = 3 (0x3), region = 81 }
 0x281   :  { %3993 = vsyncpa [#allocation3], 1 }
 0x282   :  { %3995 = vsyncpa [#allocation3 + $0x1], 1 }
 0x283   :  { %3996 = vsyncpa [#allocation5], 1 }

// kernel: vgg_distance.21
= control target key start
LH: loop header
LB: loop body
LE: loop exit
PB: predicated region body
PF: predicated region fallthrough
CT: control target
= control target key end

     0   :  { %vm12_vm0 = vcmask 1024   ;;  %vm221_vm1 = vcmask 1041409   ;;  %vm224_vm2 = vcmask 58368   ;;  %s380_s0 = inlined_call_operand.vmem [shape: bf16[2,2,8,2048], index: 0, kind: input, shape index: {}]   ;;  %s381_s1 = inlined_call_operand.vmem [shape: f32[2,1], index: 1, kind: output, shape index: {}]  }
   0x1   :  { %v14_v0 = vld [vmem:[%s380_s0] sm:$0xff]  ;;  %v15_v1 = vld [vmem:[%s380_s0 + $0x8] sm:$0xff]  ;;  %v16_v6 = vld [vmem:[%s380_s0 + $0x10] sm:$0xff] }
   0x2   :  { %v242_v2 = vld [vmem:[%s380_s0 + $0x80] sm:$0xff]  ;;  %v243_v3 = vld [vmem:[%s380_s0 + $0x88] sm:$0xff]  ;;  %v30_v4 = vunpack.c.l.bf16 %v14_v0  ;;  %v31_v5 = vunpack.c.h.bf16 %v14_v0  ;;  %v32_v7 = vunpack.c.l.bf16 %v15_v1  ;;  %v244_v11 = vld [vmem:[%s380_s0 + $0x90] sm:$0xff]  ;;  %v33_v12 = vunpack.c.h.bf16 %v15_v1 }
   0x3   :  { %v79_v8 = vunpack.c.l.bf16 %v242_v2  ;;  %v80_v9 = vunpack.c.h.bf16 %v242_v2  ;;  %v81_v10 = vunpack.c.l.bf16 %v243_v3  ;;  %v82_v13 = vunpack.c.h.bf16 %v243_v3  ;;  %v17_v15 = vld [vmem:[%s380_s0 + $0x18] sm:$0xff]  ;;  %v18_v24 = vld [vmem:[%s380_s0 + $0x20] sm:$0xff]  ;;  %v19_v38 = vld [vmem:[%s380_s0 + $0x28] sm:$0xff] }
   0x4   :  { %v34_v14 = vunpack.c.l.bf16 %v16_v6  ;;  %v245_v16 = vld [vmem:[%s380_s0 + $0x98] sm:$0xff]  ;;  %v83_v17 = vunpack.c.l.bf16 %v244_v11  ;;  %v35_v21 = vunpack.c.h.bf16 %v16_v6  ;;  %v84_v22 = vunpack.c.h.bf16 %v244_v11  ;;  %v246_v32 = vld [vmem:[%s380_s0 + $0xa0] sm:$0xff]  ;;  %v306_v39 = vld [vmem:[%s380_s0 + $0x30] sm:$0xff] }
   0x5   :  { %v111_v18 = vsub.f32 %v30_v4, %v79_v8  ;;  %v112_v19 = vsub.f32 %v31_v5, %v80_v9  ;;  %v113_v20 = vsub.f32 %v32_v7, %v81_v10  ;;  %v114_v23 = vsub.f32 %v33_v12, %v82_v13  ;;  %v247_v45 = vld [vmem:[%s380_s0 + $0xa8] sm:$0xff]  ;;  %v22_v50 = vld [vmem:[%s380_s0 + $0x40] sm:$0xff]  ;;  %v322_v56 = vld [vmem:[%s380_s0 + $0x38] sm:$0xff] }
   0x6   :  { %v36_v25 = vunpack.c.l.bf16 %v17_v15  ;;  %v85_v26 = vunpack.c.l.bf16 %v245_v16  ;;  %v115_v27 = vsub.f32 %v34_v14, %v83_v17  ;;  %v37_v31 = vunpack.c.h.bf16 %v17_v15  ;;  %v250_v55 = vld [vmem:[%s380_s0 + $0xc0] sm:$0xff]  ;;  %v23_v61 = vld [vmem:[%s380_s0 + $0x48] sm:$0xff]  ;;  %v248_v63 = vld [vmem:[%s380_s0 + $0xb0] sm:$0xff] }
   0x7   :  { %v143_v28 = vand.u32 2147483647, %v111_v18  ;;  %v144_v29 = vand.u32 2147483647, %v112_v19  ;;  %v145_v30 = vand.u32 2147483647, %v113_v20  ;;  %v86_v33 = vunpack.c.h.bf16 %v245_v16 }
   0x8   :  { %v116_v34 = vsub.f32 %v35_v21, %v84_v22  ;;  %v146_v35 = vand.u32 2147483647, %v114_v23  ;;  %v38_v37 = vunpack.c.l.bf16 %v18_v24  ;;  %v87_v40 = vunpack.c.l.bf16 %v246_v32  ;;  %v251_v62 = vld [vmem:[%s380_s0 + $0xc8] sm:$0xff]  ;;  %v249_v12 = vld [vmem:[%s380_s0 + $0xb8] sm:$0xff]  ;;  %v24_v17 = vld [vmem:[%s380_s0 + $0x50] sm:$0xff] }
   0x9   :  { %v175_v36 = vadd.f32 %v144_v29, %v143_v28  ;;  %v117_v41 = vsub.f32 %v36_v25, %v85_v26  ;;  %v147_v42 = vand.u32 2147483647, %v115_v27  ;;  %v39_v44 = vunpack.c.h.bf16 %v18_v24  ;;  %v252_v18 = vld [vmem:[%s380_s0 + $0xd0] sm:$0xff] }
   0xa   :  { %v88_v46 = vunpack.c.h.bf16 %v246_v32  ;;  %v118_v47 = vsub.f32 %v37_v31, %v86_v33  ;;  %v148_v48 = vand.u32 2147483647, %v116_v34  ;;  %v40_v51 = vunpack.c.l.bf16 %v19_v38 }
   0xb   :  { %v176_v43 = vadd.f32 %v175_v36, %v145_v30  ;;  %v41_v52 = vunpack.c.h.bf16 %v19_v38  ;;  %v42_v53 = vunpack.c.l.bf16 %v306_v39  ;;  %v43_v54 = vunpack.c.h.bf16 %v306_v39  ;;  %v253_v36 = vld [vmem:[%s380_s0 + $0xd8] sm:$0xff] }
   0xc   :  { %v89_v57 = vunpack.c.l.bf16 %v247_v45  ;;  %v119_v58 = vsub.f32 %v38_v37, %v87_v40  ;;  %v149_v59 = vand.u32 2147483647, %v117_v41  ;;  %v90_v0 = vunpack.c.h.bf16 %v247_v45  ;;  %v26_v45 = vld [vmem:[%s380_s0 + $0x60] sm:$0xff] }
   0xd   :  { %v177_v49 = vadd.f32 %v176_v43, %v146_v35  ;;  %v120_v1 = vsub.f32 %v39_v44, %v88_v46  ;;  %v46_v2 = vunpack.c.l.bf16 %v22_v50  ;;  %v47_v3 = vunpack.c.h.bf16 %v22_v50  ;;  %v25_v35 = vld [vmem:[%s380_s0 + $0x58] sm:$0xff] }
   0xe   :  { %v150_v4 = vand.u32 2147483647, %v118_v47  ;;  %v95_v6 = vunpack.c.l.bf16 %v250_v55  ;;  %v96_v7 = vunpack.c.h.bf16 %v250_v55  ;;  %v44_v8 = vunpack.c.l.bf16 %v322_v56 }
   0xf   :  { %v178_v60 = vadd.f32 %v177_v49, %v147_v42  ;;  %v45_v9 = vunpack.c.h.bf16 %v322_v56  ;;  %v48_v10 = vunpack.c.l.bf16 %v23_v61  ;;  %v97_v11 = vunpack.c.l.bf16 %v251_v62 }
  0x10   :  { %v91_v13 = vunpack.c.l.bf16 %v248_v63  ;;  %v121_v14 = vsub.f32 %v40_v51, %v89_v57  ;;  %v151_v15 = vand.u32 2147483647, %v119_v58  ;;  %v92_v19 = vunpack.c.h.bf16 %v248_v63  ;;  %v27_v63 = vld [vmem:[%s380_s0 + $0x68] sm:$0xff] }
  0x11   :  { %v179_v5 = vadd.f32 %v178_v60, %v148_v48  ;;  %v122_v20 = vsub.f32 %v41_v52, %v90_v0  ;;  %v49_v21 = vunpack.c.h.bf16 %v23_v61  ;;  %v98_v22 = vunpack.c.h.bf16 %v251_v62 }
  0x12   :  { %v152_v23 = vand.u32 2147483647, %v120_v1  ;;  %v127_v25 = vsub.f32 %v46_v2, %v95_v6  ;;  %v128_v26 = vsub.f32 %v47_v3, %v96_v7  ;;  %v93_v27 = vunpack.c.l.bf16 %v249_v12  ;;  %v255_v7 = vld [vmem:[%s380_s0 + $0xe8] sm:$0xff] }
  0x13   :  { %v180_v16 = vadd.f32 %v179_v5, %v149_v59  ;;  %v50_v28 = vunpack.c.l.bf16 %v24_v17  ;;  %v99_v29 = vunpack.c.l.bf16 %v252_v18  ;;  %v129_v30 = vsub.f32 %v48_v10, %v97_v11 }
  0x14   :  { %v94_v31 = vunpack.c.h.bf16 %v249_v12  ;;  %v123_v32 = vsub.f32 %v42_v53, %v91_v13  ;;  %v153_v33 = vand.u32 2147483647, %v121_v14  ;;  %v124_v37 = vsub.f32 %v43_v54, %v92_v19  ;;  %v254_v54 = vld [vmem:[%s380_s0 + $0xe0] sm:$0xff] }
  0x15   :  { %v181_v24 = vadd.f32 %v180_v16, %v150_v4  ;;  %v51_v38 = vunpack.c.h.bf16 %v24_v17  ;;  %v100_v39 = vunpack.c.h.bf16 %v252_v18  ;;  %v130_v40 = vsub.f32 %v49_v21, %v98_v22  ;;  %v256_v22 = vld [vmem:[%s380_s0 + $0xf0] sm:$0xff] }
  0x16   :  { %v154_v41 = vand.u32 2147483647, %v122_v20  ;;  %v159_v43 = vand.u32 2147483647, %v127_v25  ;;  %v160_v44 = vand.u32 2147483647, %v128_v26  ;;  %v52_v46 = vunpack.c.l.bf16 %v25_v35 }
  0x17   :  { %v182_v34 = vadd.f32 %v181_v24, %v151_v15  ;;  %v101_v47 = vunpack.c.l.bf16 %v253_v36  ;;  %v131_v48 = vsub.f32 %v50_v28, %v99_v29  ;;  %v161_v49 = vand.u32 2147483647, %v129_v30  ;;  %v28_v15 = vld [vmem:[%s380_s0 + $0x70] sm:$0xff]  ;;  %v29_v29 = vld [vmem:[%s380_s0 + $0x78] sm:$0xff] }
  0x18   :  { %v125_v50 = vsub.f32 %v44_v8, %v93_v27  ;;  %v155_v51 = vand.u32 2147483647, %v123_v32  ;;  %v53_v53 = vunpack.c.h.bf16 %v25_v35  ;;  %v102_v55 = vunpack.c.h.bf16 %v253_v36  ;;  %v257_v35 = vld [vmem:[%s380_s0 + $0xf8] sm:$0xff] }
  0x19   :  { %v183_v42 = vadd.f32 %v182_v34, %v152_v23  ;;  %v132_v56 = vsub.f32 %v51_v38, %v100_v39  ;;  %v162_v57 = vand.u32 2147483647, %v130_v40  ;;  %v192_v58 = vadd.f32 %v160_v44, %v159_v43 }
  0x1a   :  { %v126_v59 = vsub.f32 %v45_v9, %v94_v31  ;;  %v156_v60 = vand.u32 2147483647, %v124_v37  ;;  %v54_v62 = vunpack.c.l.bf16 %v26_v45  ;;  %v103_v0 = vunpack.c.l.bf16 %v254_v54 }
  0x1b   :  { %v184_v52 = vadd.f32 %v183_v42, %v153_v33  ;;  %v133_v1 = vsub.f32 %v52_v46, %v101_v47  ;;  %v163_v2 = vand.u32 2147483647, %v131_v48  ;;  %v193_v3 = vadd.f32 %v192_v58, %v161_v49 }
  0x1c   :  { %v157_v4 = vand.u32 2147483647, %v125_v50  ;;  %v55_v6 = vunpack.c.h.bf16 %v26_v45  ;;  %v104_v8 = vunpack.c.h.bf16 %v254_v54  ;;  %v134_v9 = vsub.f32 %v53_v53, %v102_v55 }
  0x1d   :  { %v185_v61 = vadd.f32 %v184_v52, %v154_v41  ;;  %v164_v10 = vand.u32 2147483647, %v132_v56  ;;  %v194_v11 = vadd.f32 %v193_v3, %v162_v57  ;;  %v158_v12 = vand.u32 2147483647, %v126_v59 }
  0x1e   :  { %v56_v14 = vunpack.c.l.bf16 %v27_v63  ;;  %v105_v16 = vunpack.c.l.bf16 %v255_v7  ;;  %v135_v17 = vsub.f32 %v54_v62, %v103_v0  ;;  %v165_v18 = vand.u32 2147483647, %v133_v1 }
  0x1f   :  { %v186_v5 = vadd.f32 %v185_v61, %v155_v51  ;;  %v195_v19 = vadd.f32 %v194_v11, %v163_v2  ;;  %v57_v21 = vunpack.c.h.bf16 %v27_v63  ;;  %v106_v23 = vunpack.c.h.bf16 %v255_v7 }
  0x20   :  { %v136_v24 = vsub.f32 %v55_v6, %v104_v8  ;;  %v166_v25 = vand.u32 2147483647, %v134_v9  ;;  %v58_v28 = vunpack.c.l.bf16 %v28_v15  ;;  %v107_v30 = vunpack.c.l.bf16 %v256_v22 }
  0x21   :  { %v187_v13 = vadd.f32 %v186_v5, %v156_v60  ;;  %v196_v26 = vadd.f32 %v195_v19, %v164_v10  ;;  %v137_v31 = vsub.f32 %v56_v14, %v105_v16  ;;  %v167_v32 = vand.u32 2147483647, %v135_v17 }
  0x22   :  { %v59_v34 = vunpack.c.h.bf16 %v28_v15  ;;  %v108_v36 = vunpack.c.h.bf16 %v256_v22  ;;  %v138_v37 = vsub.f32 %v57_v21, %v106_v23  ;;  %v168_v38 = vand.u32 2147483647, %v136_v24 }
  0x23   :  { %v188_v20 = vadd.f32 %v187_v13, %v157_v4  ;;  %v197_v33 = vadd.f32 %v196_v26, %v165_v18  ;;  %v60_v40 = vunpack.c.l.bf16 %v29_v29  ;;  %v109_v41 = vunpack.c.l.bf16 %v257_v35 }
  0x24   :  { %v139_v42 = vsub.f32 %v58_v28, %v107_v30  ;;  %v169_v43 = vand.u32 2147483647, %v137_v31  ;;  %v61_v45 = vunpack.c.h.bf16 %v29_v29  ;;  %v110_v46 = vunpack.c.h.bf16 %v257_v35 }
  0x25   :  { %v189_v27 = vadd.f32 %v188_v20, %v158_v12  ;;  %v198_v39 = vadd.f32 %v197_v33, %v166_v25  ;;  %v140_v47 = vsub.f32 %v59_v34, %v108_v36  ;;  %v170_v48 = vand.u32 2147483647, %v138_v37 }
  0x26   :  { %v141_v50 = vsub.f32 %v60_v40, %v109_v41  ;;  %v171_v51 = vand.u32 2147483647, %v139_v42  ;;  %v142_v53 = vsub.f32 %v61_v45, %v110_v46  ;;  %v259_v62 = vmov 0.0  }
  0x27   :  { %190 = vadd.xlane.f32.xlu0 %v189_v27  ;;  %v199_v44 = vadd.f32 %v198_v39, %v167_v32  ;;  %v172_v54 = vand.u32 2147483647, %v140_v47  ;;  %13 = vst.msk [vmem:[#allocation2] sm:$0x3] %vm12_vm0, %v259_v62  ;;  %v211_v63 = vlaneseq }
  0x28   :  { %v173_v56 = vand.u32 2147483647, %v141_v50  ;;  %v174_v58 = vand.u32 2147483647, %v142_v53 }
  0x29   :  { %v200_v49 = vadd.f32 %v199_v44, %v168_v38  ;;  %v212_v0 = vand.u32 127, %v211_v63  ;;  %v214_v1 = vshrl.u32 %v211_v63, 7 }
  0x2b   :  { %v201_v52 = vadd.f32 %v200_v49, %v169_v43  ;;  %v215_v3 = vsub.s32 %v212_v0, %v214_v1 }
  0x2d   :  { %v202_v55 = vadd.f32 %v201_v52, %v170_v48 }
  0x2e   :  { %v228_v9 = vld [vmem:[#allocation2] sm:$0x3] }
  0x2f   :  { %v203_v57 = vadd.f32 %v202_v55, %v171_v51 }
  0x31   :  { %v204_v59 = vadd.f32 %v203_v57, %v172_v54 }
  0x33   :  { %v205_v60 = vadd.f32 %v204_v59, %v173_v56 }
  0x35   :  { %v206_v61 = vadd.f32 %v205_v60, %v174_v58 }
  0x37   :  { %207 = vadd.xlane.f32.xlu0 %v206_v61 }
  0xb4   :  { %v191_v2 = vpop.xlane.xlu0 %190 }
  0xb5   :  { %v216_v5 = vrot.slane %v191_v2, %v215_v3 }
  0xc4   :  { %v208_v4 = vpop.xlane.xlu0 %207 }
  0xc5   :  { %v220_v6 = vrot.slane %v208_v4, %v215_v3 }
  0xc7   :  { %v222_v7 = vsel %vm221_vm1, %v220_v6, %v216_v5 }
  0xc8   :  { %v225_v8 = vsel %vm224_vm2, %v222_v7, 0.0 }
  0xc9   :  { %226 = vadd.xlane.f32.xlu1 %v225_v8 }
 0x156   :  { %v227_v10 = vpop.xlane.xlu1 %226 }
 0x157   :  { %v229_v11 = vadd.f32 %v228_v9, %v227_v10 }
 0x159   :  { %231 = vst.msk [vmem:[#allocation2] sm:$0x3] %vm12_vm0, %v229_v11 }
 0x160   :  { %v235_v12 = vld [vmem:[#allocation2] sm:$0x3] }
 0x161   :  { %v236_v13 = vmul.f32 6.1035156e-05, %v235_v12 }
 0x163   :  { %237 = vst.msk [vmem:[%s381_s1] sm:$0x3] %vm12_vm0, %v236_v13 }

// kernel: vgg_distance.14
= control target key start
LH: loop header
LB: loop body
LE: loop exit
PB: predicated region body
PF: predicated region fallthrough
CT: control target
= control target key end

     0   :  { %s400_s6 = smov 0   ;;  %s402_s7 = smov 0   ;;  %s455_s0 = inlined_call_operand.vmem [shape: bf16[4,16,8,128], index: 0, kind: input, shape index: {}]   ;;  %s456_s1 = inlined_call_operand.vmem [shape: bf16[4,8,8,64], index: 1, kind: output, shape index: {}]  }
   0x1   :  { %s404_s8 = smov 0  }
   0x2 LB: > { %s23_s9 = sadd.s32 1, %s382_s7  ;;  %p329_p0 = scmp.ge.s32.totalorder %s386_s8, 1  ;;  %s386_s8 = sphi %s404_s8, %s11_s8   ;;  %s382_s7 = sphi %s402_s7, %s458_s7   ;;  %s378_s6 = sphi %s400_s6, %s457_s6  }
   0x3   : > { %p25_p1 = scmp.ge.s32.totalorder %s23_s9, 4  ;;  %p108_p2 = scmp.lt.s32.totalorder %s386_s8, 5 }
   0x5   : > { %s460_s9 = smov (%p25_p1, %s23_s9), 0  ;;  %p109_p3 = pnand %p329_p0, %p108_p2 }
   0x6   : > { %p137_p4 = scmp.lt.s32.totalorder (!%p109_p3), %s378_s6, 3  ;;  %s388_s14 = smov (!%p109_p3), 64   ;;  %vm229_vm0 = vcmask (!%p109_p3), 519168   ;;  %v389_v28 = vmov (!%p109_p3), 0  }
   0x7   : > { %112 = sbr.rel (%p109_p3) target bundleno = 153 (0x99), region = 24 }
   0xe   : > { %s462_s6 = smov (!%p137_p4, %s378_s6), 3 }
   0xf   : > { %s336_s10 = sshll.u32 %s462_s6, 6  ;;  %s337_s15 = sshll.u32 %s462_s6, 5 }
  0x10   : > { %s144_s13 = scalar_lea.vmem %s455_s0, %s336_s10  ;;  %s428_s18 = scalar_lea.vmem %s456_s1, %s337_s15 }
  0x11   : > { %v161_v0 = vld [vmem:[%s144_s13 + $0x10] sm:$0xf]  ;;  %v162_v1 = vld [vmem:[%s144_s13 + $0x14] sm:$0xf]  ;;  %v157_v2 = vld [vmem:[%s144_s13] sm:$0xf] }
  0x12   : > { %v175_v3 = vmax.bf16 %v162_v1, %v161_v0  ;;  %v158_v4 = vld [vmem:[%s144_s13 + $0x4] sm:$0xf]  ;;  %v163_v5 = vld [vmem:[%s144_s13 + $0x18] sm:$0xf]  ;;  %v164_v6 = vld [vmem:[%s144_s13 + $0x1c] sm:$0xf] }
  0x13   : > { %v173_v7 = vmax.bf16 %v158_v4, %v157_v2  ;;  %v159_v8 = vld [vmem:[%s144_s13 + $0x8] sm:$0xf]  ;;  %v160_v9 = vld [vmem:[%s144_s13 + $0xc] sm:$0xf]  ;;  %v176_v10 = vmax.bf16 %v164_v6, %v163_v5  ;;  %v165_v14 = vld [vmem:[%s144_s13 + $0x20] sm:$0xf] }
  0x14   : > { %193 = vrot.lane.b32.xlu1 %v175_v3, %s388_s14  ;;  %v174_v11 = vmax.bf16 %v160_v9, %v159_v8  ;;  %v167_v12 = vld [vmem:[%s144_s13 + $0x28] sm:$0xf]  ;;  %v168_v13 = vld [vmem:[%s144_s13 + $0x2c] sm:$0xf]  ;;  %v166_v15 = vld [vmem:[%s144_s13 + $0x24] sm:$0xf] }
  0x15   : > { %189 = vrot.lane.b32.xlu0 %v173_v7, %s388_s14  ;;  %v178_v16 = vmax.bf16 %v168_v13, %v167_v12  ;;  %v177_v17 = vmax.bf16 %v166_v15, %v165_v14  ;;  %v171_v18 = vld [vmem:[%s144_s13 + $0x38] sm:$0xf]  ;;  %v172_v19 = vld [vmem:[%s144_s13 + $0x3c] sm:$0xf]  ;;  %v169_v20 = vld [vmem:[%s144_s13 + $0x30] sm:$0xf] }
  0x16   : > { %v170_v21 = vld [vmem:[%s144_s13 + $0x34] sm:$0xf]  ;;  %v180_v22 = vmax.bf16 %v172_v19, %v171_v18 }
  0x17   : > { %v179_v23 = vmax.bf16 %v170_v21, %v169_v20 }
  0x18   : > { %195 = vrot.lane.b32.xlu1 %v176_v10, %s388_s14 }
  0x19   : > { %191 = vrot.lane.b32.xlu0 %v174_v11, %s388_s14 }
  0x1c   : > { %199 = vrot.lane.b32.xlu1 %v178_v16, %s388_s14 }
  0x1d   : > { %197 = vrot.lane.b32.xlu0 %v177_v17, %s388_s14 }
  0x20   : > { %203 = vrot.lane.b32.xlu1 %v180_v22, %s388_s14 }
  0x21   : > { %201 = vrot.lane.b32.xlu0 %v179_v23, %s388_s14 }
  0x86   : > { %v194_v24 = vpop.permute.xlu1 %193 }
  0x87   : > { %v215_v25 = vmax.bf16 %v194_v24, %v175_v3  ;;  %v190_v26 = vpop.permute.xlu0 %189 }
  0x88   : > { %v213_v27 = vmax.bf16 %v190_v26, %v173_v7 }
  0x89   : > { %v223_v29 = vmax.bf16 %v389_v28, %v215_v25 }
  0x8a   : > { %v221_v30 = vmax.bf16 %v389_v28, %v213_v27  ;;  %v196_v31 = vpop.permute.xlu1 %195 }
  0x8b   : > { %232 = vst.msk [vmem:[%s428_s18 + $0x8] sm:$0xf] %vm229_vm0, %v223_v29  ;;  %v216_v32 = vmax.bf16 %v196_v31, %v176_v10  ;;  %v192_v33 = vpop.permute.xlu0 %191 }
  0x8c   : > { %230 = vst.msk [vmem:[%s428_s18] sm:$0xf] %vm229_vm0, %v221_v30  ;;  %v214_v34 = vmax.bf16 %v192_v33, %v174_v11 }
  0x8d   : > { %v224_v35 = vmax.bf16 %v389_v28, %v216_v32 }
  0x8e   : > { %v222_v36 = vmax.bf16 %v389_v28, %v214_v34  ;;  %v200_v37 = vpop.permute.xlu1 %199 }
  0x8f   : > { %233 = vst.msk [vmem:[%s428_s18 + $0xc] sm:$0xf] %vm229_vm0, %v224_v35  ;;  %v218_v38 = vmax.bf16 %v200_v37, %v178_v16  ;;  %v198_v39 = vpop.permute.xlu0 %197 }
  0x90   : > { %231 = vst.msk [vmem:[%s428_s18 + $0x4] sm:$0xf] %vm229_vm0, %v222_v36  ;;  %v217_v40 = vmax.bf16 %v198_v39, %v177_v17 }
  0x91   : > { %v226_v41 = vmax.bf16 %v389_v28, %v218_v38 }
  0x92   : > { %v225_v42 = vmax.bf16 %v389_v28, %v217_v40  ;;  %v204_v43 = vpop.permute.xlu1 %203 }
  0x93   : > { %235 = vst.msk [vmem:[%s428_s18 + $0x14] sm:$0xf] %vm229_vm0, %v226_v41  ;;  %v220_v44 = vmax.bf16 %v204_v43, %v180_v22  ;;  %v202_v45 = vpop.permute.xlu0 %201 }
  0x94   : > { %234 = vst.msk [vmem:[%s428_s18 + $0x10] sm:$0xf] %vm229_vm0, %v225_v42  ;;  %v219_v46 = vmax.bf16 %v202_v45, %v179_v23 }
  0x95   : > { %v228_v47 = vmax.bf16 %v389_v28, %v220_v44 }
  0x96   : > { %v227_v48 = vmax.bf16 %v389_v28, %v219_v46 }
  0x97   : > { %237 = vst.msk [vmem:[%s428_s18 + $0x1c] sm:$0xf] %vm229_vm0, %v228_v47 }
  0x98   : > { %236 = vst.msk [vmem:[%s428_s18 + $0x18] sm:$0xf] %vm229_vm0, %v227_v48 }
  0x99 PF: > { %s11_s8 = sadd.s32 1, %s386_s8   ;;  %s457_s6 = smov %s382_s7 }
  0x9a   : > { %p8_p5 = scmp.ge.s32.totalorder %s11_s8, 6   ;;  %s458_s7 = smov %s460_s9 }
  0x9c   :  { %10 = sbr.rel (!%p8_p5) target bundleno = 2 (0x2), region = 54 }

// kernel: vgg_distance.13
= control target key start
LH: loop header
LB: loop body
LE: loop exit
PB: predicated region body
PF: predicated region fallthrough
CT: control target
= control target key end

     0   :  { %s5782_s12 = smov 0   ;;  %s5784_s13 = smov 0   ;;  %s6819_s0 = inlined_call_operand.vmem [shape: bf16[4,342,64], index: 0, kind: input, shape index: {}]   ;;  %s6820_s1 = inlined_call_operand.vmem [shape: bf16[9,64,64], index: 1, kind: input, shape index: {}]   ;;  %s6821_s2 = inlined_call_operand.vmem [shape: f32[1,64], index: 2, kind: input, shape index: {}]   ;;  %s6822_s3 = inlined_call_operand.vmem [shape: bf16[4,288,64], index: 3, kind: output, shape index: {}]  }
   0x1   :  { %s5786_s14 = smov 0  }
   0x2 LB: > { %s32_s15 = sadd.s32 1, %s5756_s13  ;;  %p4303_p0 = scmp.ge.s32.totalorder %s5760_s14, 1  ;;  %s5760_s14 = sphi %s5786_s14, %s13_s14   ;;  %s5756_s13 = sphi %s5784_s13, %s6824_s13   ;;  %s5752_s12 = sphi %s5782_s12, %s6823_s12  }
   0x3   : > { %p34_p1 = scmp.ge.s32.totalorder %s32_s15, 4  ;;  %p187_p2 = scmp.lt.s32.totalorder %s5760_s14, 5 }
   0x5   : > { %s6826_s15 = smov (%p34_p1, %s32_s15), 0  ;;  %p188_p3 = pnand %p4303_p0, %p187_p2 }
   0x6   : > { %v5621_v0 = vld [vmem:[%s6820_s1 + $0x20] sm:$0xff] (!%p188_p3)   ;;  %p228_p4 = scmp.lt.s32.totalorder (!%p188_p3), %s5752_s12, 3  ;;  %v5623_v2 = vld [vmem:[%s6820_s1 + $0x28] sm:$0xff] (!%p188_p3)   ;;  %v5625_v4 = vld [vmem:[%s6820_s1 + $0x30] sm:$0xff] (!%p188_p3)   ;;  %vm577_vm0 = vcmask (!%p188_p3), 523264   ;;  %vm2343_vm3 = vcmask (!%p188_p3), 1045504  }
   0x7   : > { %191 = sbr.rel (%p188_p3) target bundleno = 573 (0x23d), region = 32  ;;  %v5622_v1 = vld [vmem:[%s6820_s1 + $0x80] sm:$0xff] (!%p188_p3)   ;;  %4903 = vmatprep.subr.bf16.mxu1 (!%p188_p3), %v5621_v0  ;;  %v5624_v3 = vld [vmem:[%s6820_s1 + $0x88] sm:$0xff] (!%p188_p3)   ;;  %v5626_v5 = vld [vmem:[%s6820_s1 + $0x90] sm:$0xff] (!%p188_p3)   ;;  %vm404_vm1 = vsmask.f32 (!%p188_p3), 7424 }
   0x8   : > { %5079 = vmatprep.subr.bf16.mxu0 (!%p188_p3), %v5622_v1  ;;  %4904 = vmatpush3.bf16.msra.mxu1 (!%p188_p3), %v5621_v0  ;;  %v5627_v6 = vld [vmem:[%s6820_s1 + $0x38] sm:$0xff] (!%p188_p3)   ;;  %vm1868_vm2 = vsmask.f32 (!%p188_p3), 6400  ;;  %v5635_v38 = vld [vmem:[%s6820_s1 + $0xa0] sm:$0xff] (!%p188_p3)   ;;  %v5641_v61 = vld [vmem:[%s6820_s1 + $0xa8] sm:$0xff] (!%p188_p3)   ;;  %vm1059_vm4 = vcmask (!%p188_p3), 1046528  }
   0x9   : > { %5080 = vmatpush3.bf16.msra.mxu0 (!%p188_p3), %v5622_v1  ;;  %4905 = vmatprep.subr.bf16.mxu1 (!%p188_p3), %v5623_v2  ;;  %v5628_v7 = vld [vmem:[%s6820_s1 + $0x98] sm:$0xff] (!%p188_p3)   ;;  %v5639_v56 = vld [vmem:[%s6820_s1] sm:$0xff] (!%p188_p3)   ;;  %vm3152_vm5 = vsmask.f32 (!%p188_p3), 5376  ;;  %vm3627_vm6 = vcmask (!%p188_p3), 1044480   ;;  %vm4143_vm7 = vcmask (!%p188_p3), 519168  }
   0xa   : > { %5081 = vmatprep.subr.bf16.mxu0 (!%p188_p3), %v5624_v3 }
   0xc   : > { %4906 = vmatpush3.bf16.msra.mxu1 (!%p188_p3), %v5623_v2 }
   0xd   : > { %5082 = vmatpush3.bf16.msra.mxu0 (!%p188_p3), %v5624_v3  ;;  %4907 = vmatprep.subr.bf16.mxu1 (!%p188_p3), %v5625_v4 }
   0xe   : > { %s6828_s12 = smov (!%p228_p4, %s5752_s12), 3  ;;  %5083 = vmatprep.subr.bf16.mxu0 %v5626_v5 }
   0xf   : > { %s5595_s26 = smul.u32 172, %s6828_s12 }
  0x10   : > { %4908 = vmatpush3.bf16.msra.mxu1 %v5625_v4 }
  0x11   : > { %s5827_s6 = scalar_lea.vmem %s6819_s0, %s5595_s26  ;;  %5084 = vmatpush3.bf16.msra.mxu0 %v5626_v5  ;;  %4909 = vmatprep.subr.bf16.mxu1 %v5627_v6 }
  0x12   : > { %v257_v8 = vld [vmem:[%s5827_s6] sm:$0xf]  ;;  %v258_v9 = vld [vmem:[%s5827_s6 + $0x4] sm:$0xf]  ;;  %v5837_v11 = vld [vmem:[%s5827_s6 + $0x8] sm:$0xff]   ;;  %5085 = vmatprep.subr.bf16.mxu0 %v5628_v7 }
  0x13   : > { %v5834_v10 = vcombine.low %v257_v8, %v258_v9  ;;  %v5840_v12 = vld [vmem:[%s5827_s6 + $0x10] sm:$0xff]   ;;  %v1388_v13 = vld [vmem:[%s5827_s6 + $0x8] sm:$0xe]  ;;  %v5844_v14 = vld [vmem:[%s5827_s6 + $0xc] sm:$0xf]  ;;  %v413_v17 = vshll.u32 %v5837_v11, 16 }
  0x14   : > { %v417_v18 = vshrl.u32 %v5837_v11, 16  ;;  %v5851_v19 = vcombine.low %v1388_v13, %v5844_v14  ;;  %v1878_v20 = vshrl.u32 %v5840_v12, 16  ;;  %v1881_v21 = vshll.u32 %v5840_v12, 16  ;;  %v5856_v24 = vld [vmem:[%s5827_s6 + $0x10] sm:$0xff]   ;;  %v5859_v25 = vld [vmem:[%s5827_s6 + $0x18] sm:$0xff]   ;;  %4910 = vmatpush3.bf16.msra.mxu1 %v5627_v6  ;;  %v5876_v46 = vld [vmem:[%s5827_s6 + $0x20] sm:$0xff]  }
  0x15   : > { %v406_v15 = vshrl.u32 %v5834_v10, 16  ;;  %v408_v16 = vshll.u32 %v5834_v10, 16  ;;  %v415_v23 = vrot.slane %v413_v17, 1  ;;  %v421_v32 = vshll.u32 %v5856_v24, 16  ;;  %5086 = vmatpush3.bf16.msra.mxu0 %v5628_v7  ;;  %v5872_v44 = vld [vmem:[%s5827_s6 + $0x18] sm:$0xff]   ;;  %v5883_v52 = vld [vmem:[%s5827_s6 + $0x20] sm:$0xff]   ;;  %4947 = vmatprep.subr.bf16.mxu1 %v5639_v56 }
  0x16   : > { %v1870_v26 = vshrl.u32 %v5851_v19, 16  ;;  %v1873_v27 = vshll.u32 %v5851_v19, 16  ;;  %v1880_v28 = vrot.slane %v1878_v20, 1  ;;  %v1883_v29 = vrot.slane %v1881_v21, 2  ;;  %5123 = vmatprep.subr.bf16.mxu0 %v5635_v38  ;;  %v5895_v60 = vld [vmem:[%s5827_s6 + $0x28] sm:$0xff]   ;;  %v5910_v8 = vld [vmem:[%s5827_s6 + $0x30] sm:$0xff]  }
  0x17   : > { %v410_v22 = vrot.slane %v408_v16, 1  ;;  %v419_v31 = vor.u32 %v417_v18, %v415_v23  ;;  %v1887_v33 = vshrl.u32 %v5859_v25, 16  ;;  %v1890_v37 = vshll.u32 %v5859_v25, 16  ;;  %v5906_v6 = vld [vmem:[%s5827_s6 + $0x28] sm:$0xff]  }
  0x18   : > { %v1872_v34 = vrot.slane %v1870_v26, 1  ;;  %v1875_v35 = vrot.slane %v1873_v27, 2  ;;  %v1884_v36 = vor.u32 %v1883_v29, %v1880_v28  ;;  %v423_v40 = vrot.slane %v421_v32, 1  ;;  %v5925_v29 = vld [vmem:[%s5827_s6 + $0x38] sm:$0xff]  }
  0x19   : > { %v411_v30 = vor.u32 %v410_v22, %v406_v15  ;;  %v1889_v41 = vrot.slane %v1887_v33, 1  ;;  %v1892_v43 = vrot.slane %v1890_v37, 2  ;;  %v425_v45 = vshrl.u32 %v5856_v24, 16  ;;  %v5914_v15 = vld [vmem:[%s5827_s6 + $0x30] sm:$0xff]  }
  0x1a   : > { %v1876_v42 = vor.u32 %v1875_v35, %v1872_v34  ;;  %v424_v47 = vsel %vm404_vm1, %v419_v31, %v423_v40  ;;  %v429_v51 = vshll.u32 %v5872_v44, 16  ;;  %v1896_v53 = vshrl.u32 %v5876_v46, 16  ;;  %v5646_v33 = vld [vmem:[%s6820_s1 + $0xb0] sm:$0xff]  }
  0x1b   : > { %v416_v39 = vsel %vm404_vm1, %v411_v30, %v415_v23  ;;  %v1893_v49 = vor.u32 %v1892_v43, %v1889_v41  ;;  %v427_v50 = vor.u32 %v425_v45, %v423_v40  ;;  %v1899_v54 = vshll.u32 %v5876_v46, 16  ;;  %v5944_v43 = vld [vmem:[%s5827_s6 + $0x40] sm:$0xff]  }
  0x1c   : > { %4911 = vmatprep.mubr.msk.bf16.mxu1 %vm577_vm0, %v416_v39  ;;  %v1885_v48 = vsel %vm1868_vm2, %v1876_v42, %v1884_v36  ;;  %v433_v55 = vshrl.u32 %v5872_v44, 16  ;;  %v431_v58 = vrot.slane %v429_v51, 1  ;;  %v437_v59 = vshll.u32 %v5883_v52, 16  ;;  %v5941_v42 = vld [vmem:[%s5827_s6 + $0x40] sm:$0xff]  }
  0x1d   : > { %4912 = vmatmul.mubr.msk.bf16.vlgmr.msra.gmra.mrb[0].mxu1 %vm577_vm0, %v424_v47  ;;  %5087 = vmatprep.mubr.msk.bf16.mxu0 %vm577_vm0, %v1885_v48  ;;  %v1894_v57 = vsel %vm1868_vm2, %v1884_v36, %v1893_v49  ;;  %v1898_v62 = vrot.slane %v1896_v53, 1  ;;  %v1901_v63 = vrot.slane %v1899_v54, 2  ;;  %v1905_v3 = vshrl.u32 %v5895_v60, 16 }
  0x1e   : > { %5088 = vmatmul.mubr.msk.bf16.vlgmr.msra.gmra.mrb[0].mxu0 %vm577_vm0, %v1894_v57  ;;  %v432_v0 = vsel %vm404_vm1, %v427_v50, %v431_v58  ;;  %v435_v1 = vor.u32 %v433_v55, %v431_v58  ;;  %v439_v2 = vrot.slane %v437_v59, 1  ;;  %4948 = vmatpush3.bf16.msra.mxu1 %v5639_v56  ;;  %v1908_v5 = vshll.u32 %v5895_v60, 16  ;;  %v5955_v58 = vld [vmem:[%s5827_s6 + $0x48] sm:$0xff]  }
  0x1f   : > { %5124 = vmatpush3.bf16.msra.mxu0 %v5635_v38  ;;  %4915 = vmatprep.mubr.msk.bf16.mxu1 %vm577_vm0, %v432_v0  ;;  %v1902_v4 = vor.u32 %v1901_v63, %v1898_v62  ;;  %v441_v7 = vshrl.u32 %v5883_v52, 16  ;;  %v1907_v13 = vrot.slane %v1905_v3, 1  ;;  %v445_v20 = vshll.u32 %v5906_v6, 16  ;;  %v5934_v38 = vld [vmem:[%s5827_s6 + $0x38] sm:$0xff]   ;;  %v5651_v59 = vld [vmem:[%s6820_s1 + $0x8] sm:$0xff]  }
  0x20   : > { %5125 = vmatprep.subr.bf16.mxu0 %v5641_v61  ;;  %v440_v9 = vsel %vm404_vm1, %v435_v1, %v439_v2  ;;  %v1910_v17 = vrot.slane %v1908_v5, 2  ;;  %v1914_v21 = vshrl.u32 %v5910_v8, 16  ;;  %v1917_v22 = vshll.u32 %v5910_v8, 16  ;;  %v5652_v63 = vld [vmem:[%s6820_s1 + $0xb8] sm:$0xff]   ;;  %4949 = vmatprep.subr.bf16.mxu1 %v5651_v59 }
  0x21   : > { %v1903_v16 = vsel %vm1868_vm2, %v1893_v49, %v1902_v4  ;;  %v443_v18 = vor.u32 %v441_v7, %v439_v2  ;;  %v449_v23 = vshrl.u32 %v5906_v6, 16  ;;  %v453_v26 = vshll.u32 %v5914_v15, 16 }
  0x22   : > { %5091 = vmatprep.mubr.msk.bf16.mxu0 %vm577_vm0, %v1903_v16  ;;  %v1911_v27 = vor.u32 %v1910_v17, %v1907_v13  ;;  %v447_v28 = vrot.slane %v445_v20, 1  ;;  %v1916_v30 = vrot.slane %v1914_v21, 1  ;;  %v1919_v31 = vrot.slane %v1917_v22, 2  ;;  %4950 = vmatpush3.bf16.msra.mxu1 %v5651_v59  ;;  %v5970_v13 = vld [vmem:[%s5827_s6 + $0x48] sm:$0xff]   ;;  %v5976_v21 = vld [vmem:[%s5827_s6 + $0x50] sm:$0xff]  }
  0x23   : > { %5126 = vmatpush3.bf16.msra.mxu0 %v5641_v61  ;;  %v455_v32 = vrot.slane %v453_v26, 1  ;;  %v1923_v37 = vshrl.u32 %v5925_v29, 16  ;;  %v1926_v40 = vshll.u32 %v5925_v29, 16  ;;  %v457_v41 = vshrl.u32 %v5914_v15, 16  ;;  %v5979_v22 = vld [vmem:[%s5827_s6 + $0x50] sm:$0xff]  }
  0x24   : > { %v1912_v34 = vsel %vm1868_vm2, %v1902_v4, %v1911_v27  ;;  %v448_v35 = vsel %vm404_vm1, %v443_v18, %v447_v28  ;;  %v451_v36 = vor.u32 %v449_v23, %v447_v28  ;;  %v1920_v39 = vor.u32 %v1919_v31, %v1916_v30  ;;  %5127 = vmatprep.subr.bf16.mxu0 %v5646_v33 }
  0x25   : > { %4916 = vmatmul.mubr.msk.bf16.gmra.mrb[4].mxu1 %vm577_vm0, %v440_v9  ;;  %v1925_v47 = vrot.slane %v1923_v37, 1  ;;  %v461_v48 = vshll.u32 %v5934_v38, 16  ;;  %v1928_v50 = vrot.slane %v1926_v40, 2  ;;  %v459_v51 = vor.u32 %v457_v41, %v455_v32 }
  0x26   : > { %5092 = vmatmul.mubr.msk.bf16.gmra.mrb[4].mxu0 %vm577_vm0, %v1912_v34  ;;  %4919 = vmatprep.mubr.msk.bf16.mxu1 %vm577_vm0, %v448_v35  ;;  %v456_v45 = vsel %vm404_vm1, %v451_v36, %v455_v32  ;;  %v1921_v49 = vsel %vm1868_vm2, %v1911_v27, %v1920_v39  ;;  %v1932_v53 = vshrl.u32 %v5941_v42, 16  ;;  %v1935_v55 = vshll.u32 %v5941_v42, 16  ;;  %v5989_v34 = vld [vmem:[%s5827_s6 + $0x58] sm:$0xff]  }
  0x27   : > { %5128 = vmatpush3.bf16.msra.mxu0 %v5646_v33  ;;  %5095 = vmatprep.mubr.msk.bf16.mxu0 %vm577_vm0, %v1921_v49  ;;  %v463_v54 = vrot.slane %v461_v48, 1  ;;  %v465_v56 = vshrl.u32 %v5934_v38, 16  ;;  %v469_v57 = vshll.u32 %v5944_v43, 16  ;;  %v1929_v61 = vor.u32 %v1928_v50, %v1925_v47  ;;  %v5992_v36 = vld [vmem:[%s5827_s6 + $0x58] sm:$0xff]   ;;  %v5998_v47 = vld [vmem:[%s5827_s6 + $0x60] sm:$0xff]  }
  0x28   : > { %v1934_v62 = vrot.slane %v1932_v53, 1  ;;  %v1937_v1 = vrot.slane %v1935_v55, 2  ;;  %v1941_v5 = vshrl.u32 %v5955_v58, 16  ;;  %v1944_v7 = vshll.u32 %v5955_v58, 16  ;;  %5129 = vmatprep.subr.bf16.mxu0 %v5652_v63 }
  0x29   : > { %v464_v0 = vsel %vm404_vm1, %v459_v51, %v463_v54  ;;  %v467_v2 = vor.u32 %v465_v56, %v463_v54  ;;  %v471_v3 = vrot.slane %v469_v57, 1  ;;  %v1930_v4 = vsel %vm1868_vm2, %v1920_v39, %v1929_v61 }
  0x2a   : > { %v1938_v9 = vor.u32 %v1937_v1, %v1934_v62  ;;  %v473_v16 = vshrl.u32 %v5944_v43, 16  ;;  %v1943_v18 = vrot.slane %v1941_v5, 1  ;;  %v1946_v20 = vrot.slane %v1944_v7, 2  ;;  %v5660_v62 = vld [vmem:[%s6820_s1 + $0xc0] sm:$0xff]  }
  0x2b   : > { %v472_v17 = vsel %vm404_vm1, %v467_v2, %v471_v3  ;;  %v477_v27 = vshll.u32 %v5970_v13, 16  ;;  %5130 = vmatpush3.bf16.msra.mxu0 %v5652_v63  ;;  %v481_v28 = vshrl.u32 %v5970_v13, 16  ;;  %v1950_v31 = vshrl.u32 %v5976_v21, 16 }
  0x2c   : > { %v1939_v23 = vsel %vm1868_vm2, %v1929_v61, %v1938_v9  ;;  %v475_v26 = vor.u32 %v473_v16, %v471_v3  ;;  %v1947_v30 = vor.u32 %v1946_v20, %v1943_v18  ;;  %v1953_v32 = vshll.u32 %v5976_v21, 16  ;;  %v6018_v3 = vld [vmem:[%s5827_s6 + $0x68] sm:$0xff]   ;;  %5167 = vmatprep.subr.bf16.mxu0 %v5660_v62  ;;  %v6030_v20 = vld [vmem:[%s5827_s6 + $0x70] sm:$0xff]  }
  0x2d   : > { %4920 = vmatmul.mubr.msk.bf16.gmra.mrb[8].mxu1 %vm577_vm0, %v456_v45  ;;  %v485_v33 = vshll.u32 %v5979_v22, 16  ;;  %v479_v35 = vrot.slane %v477_v27, 1  ;;  %v1952_v39 = vrot.slane %v1950_v31, 1  ;;  %v2330_v45 = vld [vmem:[%s5827_s6 + $0x8] sm:$0xc]  ;;  %v1959_v50 = vshrl.u32 %v5989_v34, 16 }
  0x2e   : > { %4923 = vmatprep.mubr.msk.bf16.mxu1 %vm577_vm0, %v464_v0  ;;  %5096 = vmatmul.mubr.msk.bf16.gmra.mrb[8].mxu0 %vm577_vm0, %v1930_v4  ;;  %v1948_v37 = vsel %vm1868_vm2, %v1938_v9, %v1947_v30  ;;  %v1955_v40 = vrot.slane %v1953_v32, 2  ;;  %v1962_v51 = vshll.u32 %v5989_v34, 16  ;;  %v489_v54 = vshrl.u32 %v5979_v22, 16  ;;  %v6037_v31 = vld [vmem:[%s5827_s6 + $0x78] sm:$0xff]  }
  0x2f   : > { %5099 = vmatprep.mubr.msk.bf16.mxu0 %vm577_vm0, %v1939_v23  ;;  %v487_v41 = vrot.slane %v485_v33, 1  ;;  %v480_v48 = vsel %vm404_vm1, %v475_v26, %v479_v35  ;;  %v483_v49 = vor.u32 %v481_v28, %v479_v35  ;;  %v493_v55 = vshll.u32 %v5992_v36, 16  ;;  %v5667_v35 = vld [vmem:[%s6820_s1 + $0x18] sm:$0xff]  }
  0x30   : > { %v1956_v53 = vor.u32 %v1955_v40, %v1952_v39  ;;  %v4496_v56 = vcombine.low %v2330_v45, %v5844_v14  ;;  %v1961_v59 = vrot.slane %v1959_v50, 1  ;;  %v1964_v61 = vrot.slane %v1962_v51, 2  ;;  %v5661_v14 = vld [vmem:[%s6820_s1 + $0x10] sm:$0xff]   ;;  %v5666_v50 = vld [vmem:[%s6820_s1 + $0xc8] sm:$0xff]  }
  0x31   : > { %v488_v57 = vsel %vm404_vm1, %v483_v49, %v487_v41  ;;  %v491_v0 = vor.u32 %v489_v54, %v487_v41  ;;  %v495_v1 = vrot.slane %v493_v55, 1  ;;  %v2345_v2 = vrot.slane %v5840_v12, 2  ;;  %4951 = vmatprep.subr.bf16.mxu1 %v5661_v14  ;;  %v6054_v49 = vld [vmem:[%s5827_s6 + $0x80] sm:$0xff]  }
  0x32   : > { %v1957_v63 = vsel %vm1868_vm2, %v1947_v30, %v1956_v53  ;;  %v6021_v4 = vor.u32 %v1964_v61, %v1961_v59  ;;  %v2344_v5 = vrot.slane %v4496_v56, 2  ;;  %v497_v7 = vshrl.u32 %v5992_v36, 16  ;;  %4952 = vmatpush3.bf16.msra.mxu1 %v5661_v14 }
  0x33   : > { %v501_v9 = vshll.u32 %v5998_v47, 16  ;;  %v496_v12 = vsel %vm404_vm1, %v491_v0, %v495_v1  ;;  %v505_v16 = vshrl.u32 %v5998_v47, 16  ;;  %v2347_v32 = vrot.slane %v5859_v25, 2  ;;  %4953 = vmatprep.subr.bf16.mxu1 %v5667_v35 }
  0x34   : > { %v1966_v23 = vsel %vm1868_vm2, %v1956_v53, %v6021_v4  ;;  %v499_v26 = vor.u32 %v497_v7, %v495_v1  ;;  %v2346_v27 = vsel %vm2343_vm3, %v2344_v5, %v2345_v2  ;;  %v517_v33 = vshll.u32 %v6030_v20, 16  ;;  %v6062_v53 = vld [vmem:[%s5827_s6 + $0x88] sm:$0xff]   ;;  %v6085_v5 = vld [vmem:[%s5827_s6 + $0x90] ss:$0 sps:$4 sm:$0x11]  }
  0x35   : > { %4924 = vmatmul.mubr.msk.bf16.gmra.mrb[12].mxu1 %vm577_vm0, %v472_v17  ;;  %v509_v17 = vshll.u32 %v6018_v3, 16  ;;  %v503_v18 = vrot.slane %v501_v9, 1  ;;  %v2349_v39 = vrot.slane %v5876_v46, 2  ;;  %v513_v40 = vshrl.u32 %v6018_v3, 16 }
  0x36   : > { %4927 = vmatprep.mubr.msk.bf16.mxu1 %vm577_vm0, %v480_v48  ;;  %5100 = vmatmul.mubr.msk.bf16.gmra.mrb[12].mxu0 %vm577_vm0, %v1948_v37  ;;  %v521_v45 = vshrl.u32 %v6030_v20, 16  ;;  %v525_v25 = vshll.u32 %v6037_v31, 16  ;;  %v519_v48 = vrot.slane %v517_v33, 1  ;;  %v2348_v46 = vsel %vm2343_vm3, %v2345_v2, %v2347_v32  ;;  %v6105_v33 = vld [vmem:[%s6820_s1 + $0xe0] sm:$0xff]  }
  0x37   : > { %5103 = vmatprep.mubr.msk.bf16.mxu0 %vm577_vm0, %v1957_v63  ;;  %v507_v28 = vor.u32 %v505_v16, %v503_v18  ;;  %v511_v30 = vrot.slane %v509_v17, 1  ;;  %v504_v37 = vsel %vm404_vm1, %v499_v26, %v503_v18  ;;  %4954 = vmatpush3.bf16.msra.mxu1 %v5667_v35  ;;  %v2350_v54 = vsel %vm2343_vm3, %v2347_v32, %v2349_v39  ;;  %v5676_v18 = vld [vmem:[%s6820_s1 + $0xd8] sm:$0xff]  }
  0x38   : > { %v523_v55 = vor.u32 %v521_v45, %v519_v48  ;;  %v527_v56 = vrot.slane %v525_v25, 1  ;;  %v2351_v59 = vrot.slane %v5895_v60, 2  ;;  %v2353_v61 = vrot.slane %v5910_v8, 2  ;;  %v5670_v8 = vld [vmem:[%s6820_s1 + $0xd0] sm:$0xff]  }
  0x39   : > { %v512_v41 = vsel %vm404_vm1, %v507_v28, %v511_v30  ;;  %v515_v51 = vor.u32 %v513_v40, %v511_v30  ;;  %v533_v63 = vshll.u32 %v6054_v49, 16  ;;  %v529_v1 = vshrl.u32 %v6037_v31, 16 }
  0x3a   : > { %v537_v2 = vshrl.u32 %v6054_v49, 16  ;;  %v528_v14 = vsel %vm404_vm1, %v523_v55, %v527_v56  ;;  %v541_v60 = vshll.u32 %v6062_v53, 16  ;;  %v2352_v7 = vsel %vm2343_vm3, %v2349_v39, %v2351_v59  ;;  %v5692_v55 = vld [vmem:[%s6820_s1 + $0x58] sm:$0xff]  }
  0x3b   : > { %v520_v0 = vsel %vm404_vm1, %v515_v51, %v519_v48  ;;  %v531_v9 = vor.u32 %v529_v1, %v527_v56  ;;  %v549_v28 = vshll.u32 %v6085_v5, 16  ;;  %v2357_v32 = vrot.slane %v5941_v42, 2  ;;  %v6123_v48 = vld [vmem:[%s5827_s6 + $0x60] sm:$0xff]   ;;  %v6183_v1 = vld [vmem:[%s5827_s6 + $0x88] sm:$0xff]  }
  0x3c   : > { %v543_v17 = vrot.slane %v541_v60, 1  ;;  %v2359_v40 = vrot.slane %v5955_v58, 2  ;;  %v2363_v58 = vrot.slane %v5989_v34, 2  ;;  %v6142_v34 = vld [vmem:[%s5827_s6 + $0x70] sm:$0xff]   ;;  %v2375_v60 = vrot.slane %v6183_v1, 2 }
  0x3d   : > { %4928 = vmatmul.mubr.msk.bf16.gmra.mrb[16].mxu1 %vm577_vm0, %v488_v57  ;;  %v6068_v57 = vld [vmem:[%s6820_s1 + $0x40] sm:$0xff]  }
  0x3e   : > { %4931 = vmatprep.mubr.msk.bf16.mxu1 %vm577_vm0, %v496_v12  ;;  %5104 = vmatmul.mubr.msk.bf16.gmra.mrb[16].mxu0 %vm577_vm0, %v1966_v23  ;;  %v2354_v12 = vsel %vm2343_vm3, %v2351_v59, %v2353_v61  ;;  %v2355_v23 = vrot.slane %v5925_v29, 2  ;;  %v2360_v45 = vsel %vm2343_vm3, %v2357_v32, %v2359_v40 }
  0x3f   : > { %5131 = vmatprep.mubr.msk.bf16.mxu0 %vm577_vm0, %v2346_v27  ;;  %4991 = vmatprep.subr.bf16.mxu1 %v6068_v57  ;;  %v545_v27 = vshrl.u32 %v6062_v53, 16 }
  0x40   : > { %v2356_v29 = vsel %vm2343_vm3, %v2353_v61, %v2355_v23  ;;  %v2358_v39 = vsel %vm2343_vm3, %v2355_v23, %v2357_v32  ;;  %v6165_v61 = vld [vmem:[%s5827_s6 + $0x80] sm:$0xff]  }
  0x41   : > { %v547_v35 = vor.u32 %v545_v27, %v543_v17 }
  0x45   : > { %4932 = vmatmul.mubr.msk.bf16.gmra.mrb[20].mxu1 %vm577_vm0, %v504_v37  ;;  %v551_v37 = vrot.slane %v549_v28, 1 }
  0x46   : > { %4935 = vmatprep.mubr.msk.bf16.mxu1 %vm577_vm0, %v512_v41  ;;  %5132 = vmatmul.mubr.msk.bf16.vlgmr.msra.gmra.mrb[0].mxu0 %vm577_vm0, %v2348_v46  ;;  %v2361_v41 = vrot.slane %v5976_v21, 2  ;;  %v2365_v21 = vrot.slane %v6123_v48, 2 }
  0x47   : > { %5168 = vmatpush3.bf16.msra.mxu0 %v5660_v62  ;;  %5135 = vmatprep.mubr.msk.bf16.mxu0 %vm577_vm0, %v2350_v54  ;;  %v535_v62 = vrot.slane %v533_v63, 1  ;;  %v552_v42 = vsel %vm404_vm1, %v547_v35, %v551_v37  ;;  %v6170_v63 = vld [vmem:[%s6820_s1 + $0x60] sm:$0xff]  }
  0x48   : > { %5169 = vmatprep.subr.bf16.mxu0 %v5666_v50  ;;  %v2362_v25 = vsel %vm2343_vm3, %v2359_v40, %v2361_v41  ;;  %v2364_v46 = vsel %vm2343_vm3, %v2361_v41, %v2363_v58  ;;  %v2366_v51 = vsel %vm2343_vm3, %v2363_v58, %v2365_v21  ;;  %v6243_v41 = vld [vmem:[%s5827_s6 + $0x38] sm:$0xff]  }
  0x49   : > { %v539_v16 = vor.u32 %v537_v2, %v535_v62  ;;  %v536_v26 = vsel %vm404_vm1, %v531_v9, %v535_v62  ;;  %v2672_v62 = vld [vmem:[%s5827_s6 + $0x10] sm:$0xc]  ;;  %v2820_v58 = vrot.slane %v6243_v41, 2 }
  0x4b   : > { %5170 = vmatpush3.bf16.msra.mxu0 %v5666_v50  ;;  %v544_v30 = vsel %vm404_vm1, %v539_v16, %v543_v17  ;;  %v5679_v50 = vld [vmem:[%s6820_s1 + $0x48] sm:$0xff]  }
  0x4c   : > { %5171 = vmatprep.subr.bf16.mxu0 %v5670_v8 }
  0x4d   : > { %4936 = vmatmul.mubr.msk.bf16.gmra.mrb[24].mxu1 %vm577_vm0, %v520_v0 }
  0x4e   : > { %4939 = vmatprep.mubr.msk.bf16.mxu1 %vm577_vm0, %v528_v14  ;;  %5136 = vmatmul.mubr.msk.bf16.gmra.mrb[4].mxu0 %vm577_vm0, %v2352_v7  ;;  %v6187_v14 = vld [vmem:[%s5827_s6 + $0x90] sm:$0xff]  }
  0x4f   : > { %5139 = vmatprep.mubr.msk.bf16.mxu0 %vm577_vm0, %v2354_v12  ;;  %5172 = vmatpush3.bf16.msra.mxu0 %v5670_v8  ;;  %v2377_v8 = vrot.slane %v6187_v14, 2  ;;  %v6195_v7 = vld [vmem:[%s5827_s6 + $0x14] sm:$0xf]  ;;  %v6203_v12 = vld [vmem:[%s5827_s6 + $0x98] ss:$0 sps:$4 sm:$0x33]  }
  0x50   : > { %5173 = vmatprep.subr.bf16.mxu0 %v5676_v18  ;;  %v6207_v17 = vcombine.low %v2672_v62, %v6195_v7  ;;  %v2379_v23 = vrot.slane %v6203_v12, 2 }
  0x51   : > { %v2378_v16 = vsel %vm2343_vm3, %v2375_v60, %v2377_v8 }
  0x52   : > { %v2380_v28 = vsel %vm2343_vm3, %v2377_v8, %v2379_v23  ;;  %v5720_v8 = vld [vmem:[%s5827_s6 + $0x8] sm:$0xff]  }
  0x53   : > { %5174 = vmatpush3.bf16.msra.mxu0 %v5676_v18  ;;  %v6210_v18 = vld [vmem:[%s5827_s6 + $0x18] sm:$0xff]   ;;  %v1061_v62 = vrot.slane %v5720_v8, 1 }
  0x54   : > { %5211 = vmatprep.subr.bf16.mxu0 %v6105_v33  ;;  %v2812_v27 = vrot.slane %v6210_v18, 2 }
  0x55   : > { %4940 = vmatmul.mubr.msk.bf16.gmra.mrb[28].mxu1 %vm577_vm0, %v536_v26  ;;  %v2811_v26 = vrot.slane %v6207_v17, 2 }
  0x56   : > { %4943 = vmatprep.mubr.msk.bf16.mxu1 %vm577_vm0, %v544_v30  ;;  %5140 = vmatmul.mubr.msk.bf16.gmra.mrb[8].mxu0 %vm577_vm0, %v2356_v29  ;;  %v6223_v30 = vld [vmem:[%s5827_s6 + $0x20] sm:$0xff]   ;;  %v6227_v29 = vld [vmem:[%s5827_s6 + $0x28] sm:$0xff]  }
  0x57   : > { %5143 = vmatprep.mubr.msk.bf16.mxu0 %vm577_vm0, %v2358_v39  ;;  %v2813_v32 = vsel %vm2343_vm3, %v2811_v26, %v2812_v27  ;;  %v2814_v35 = vrot.slane %v6223_v30, 2  ;;  %v2816_v37 = vrot.slane %v6227_v29, 2 }
  0x59   : > { %v2815_v39 = vsel %vm2343_vm3, %v2812_v27, %v2814_v35  ;;  %v2817_v40 = vsel %vm2343_vm3, %v2814_v35, %v2816_v37  ;;  %v6307_v35 = vld [vmem:[%s5827_s6 + $0x60] sm:$0xff]  }
  0x5d   : > { %4944 = vmatmul.mubr.msk.bf16.gmra.mrb[32].mxu1 %vm577_vm0, %v552_v42  ;;  %v6239_v42 = vld [vmem:[%s5827_s6 + $0x30] sm:$0xff]  }
  0x5e   : > { %4955 = vmatprep.mubr.msk.bf16.mxu1 %vm577_vm0, %v5834_v10  ;;  %5144 = vmatmul.mubr.msk.bf16.gmra.mrb[12].mxu0 %vm577_vm0, %v2360_v45  ;;  %v6135_v10 = vld [vmem:[%s5827_s6 + $0x68] sm:$0xff]  }
  0x5f   : > { %5147 = vmatprep.mubr.msk.bf16.mxu0 %vm577_vm0, %v2362_v25  ;;  %v2367_v54 = vrot.slane %v6135_v10, 2  ;;  %v5691_v45 = vld [vmem:[%s6820_s1 + $0xe8] sm:$0xff]   ;;  %v2818_v25 = vrot.slane %v6239_v42, 2 }
  0x61   : > { %v2368_v56 = vsel %vm2343_vm3, %v2365_v21, %v2367_v54  ;;  %v5698_v21 = vld [vmem:[%s6820_s1 + $0xf0] sm:$0xff]  }
  0x65   : > { %4956 = vmatmul.mubr.msk.bf16.vlgmr.msra.gmra.mrb[0].mxu1 %vm577_vm0, %v5837_v11  ;;  %v5686_v11 = vld [vmem:[%s6820_s1 + $0x50] sm:$0xff]  }
  0x66   : > { %4959 = vmatprep.mubr.msk.bf16.mxu1 %vm577_vm0, %v5856_v24  ;;  %4992 = vmatpush3.bf16.msra.mxu1 %v6068_v57  ;;  %v2369_v24 = vrot.slane %v6142_v34, 2  ;;  %v6161_v57 = vld [vmem:[%s5827_s6 + $0x78] sm:$0xff]  }
  0x67   : > { %4993 = vmatprep.subr.bf16.mxu1 %v5679_v50  ;;  %5148 = vmatmul.mubr.msk.bf16.gmra.mrb[16].mxu0 %vm577_vm0, %v2364_v46  ;;  %v2821_v46 = vsel %vm2343_vm3, %v2818_v25, %v2820_v58 }
  0x68   : > { %5151 = vmatprep.mubr.msk.bf16.mxu0 %vm577_vm0, %v2366_v51  ;;  %v2370_v59 = vsel %vm2343_vm3, %v2367_v54, %v2369_v24  ;;  %v6266_v51 = vld [vmem:[%s5827_s6 + $0x48] sm:$0xff]   ;;  %v1046_v54 = vld [vmem:[%s5827_s6] sm:$0xe] }
  0x6a   : > { %4994 = vmatpush3.bf16.msra.mxu1 %v5679_v50  ;;  %v2819_v50 = vsel %vm2343_vm3, %v2816_v37, %v2818_v25 }
  0x6b   : > { %4995 = vmatprep.subr.bf16.mxu1 %v5686_v11 }
  0x6d   : > { %4960 = vmatmul.mubr.msk.bf16.gmra.mrb[4].mxu1 %vm577_vm0, %v5872_v44  ;;  %v2371_v44 = vrot.slane %v6161_v57, 2 }
  0x6e   : > { %4963 = vmatprep.mubr.msk.bf16.mxu1 %vm577_vm0, %v5883_v52  ;;  %4996 = vmatpush3.bf16.msra.mxu1 %v5686_v11  ;;  %v2373_v52 = vrot.slane %v6165_v61, 2  ;;  %v5704_v11 = vld [vmem:[%s6820_s1 + $0xf8] sm:$0xff]  }
  0x6f   : > { %4997 = vmatprep.subr.bf16.mxu1 %v5692_v55  ;;  %5152 = vmatmul.mubr.msk.bf16.gmra.mrb[20].mxu0 %vm577_vm0, %v2368_v56  ;;  %v2372_v0 = vsel %vm2343_vm3, %v2369_v24, %v2371_v44  ;;  %v5719_v56 = vld [vmem:[%s5827_s6 + $0x4] sm:$0xf] }
  0x70   : > { %5155 = vmatprep.mubr.msk.bf16.mxu0 %vm577_vm0, %v2370_v59  ;;  %v2374_v2 = vsel %vm2343_vm3, %v2371_v44, %v2373_v52  ;;  %v2376_v9 = vsel %vm2343_vm3, %v2373_v52, %v2375_v60  ;;  %v4385_v59 = vcombine.low %v1046_v54, %v5719_v56  ;;  %v6280_v44 = vld [vmem:[%s6820_s1 + $0x100] sm:$0xff]  }
  0x71   : > { %v5723_v54 = vld [vmem:[%s5827_s6 + $0x20] sm:$0xff]  }
  0x72   : > { %4998 = vmatpush3.bf16.msra.mxu1 %v5692_v55  ;;  %v2824_v55 = vrot.slane %v6266_v51, 2  ;;  %v1060_v60 = vrot.slane %v4385_v59, 1  ;;  %v1069_v59 = vrot.slane %v5906_v6, 1 }
  0x73   : > { %5035 = vmatprep.subr.bf16.mxu1 %v6170_v63 }
  0x74   : > { %v1062_v23 = vsel %vm1059_vm4, %v1060_v60, %v1061_v62 }
  0x75   : > { %4964 = vmatmul.mubr.msk.bf16.gmra.mrb[8].mxu1 %vm577_vm0, %v5906_v6 }
  0x76   : > { %4967 = vmatprep.mubr.msk.bf16.mxu1 %vm577_vm0, %v5914_v15 }
  0x77   : > { %5156 = vmatmul.mubr.msk.bf16.gmra.mrb[24].mxu0 %vm577_vm0, %v2372_v0  ;;  %v6288_v0 = vld [vmem:[%s5827_s6 + $0x50] sm:$0xff]  }
  0x78   : > { %5159 = vmatprep.mubr.msk.bf16.mxu0 %vm577_vm0, %v2374_v2 }
  0x7d   : > { %4968 = vmatmul.mubr.msk.bf16.gmra.mrb[12].mxu1 %vm577_vm0, %v5934_v38 }
  0x7e   : > { %4971 = vmatprep.mubr.msk.bf16.mxu1 %vm577_vm0, %v5944_v43 }
  0x7f   : > { %5160 = vmatmul.mubr.msk.bf16.gmra.mrb[28].mxu0 %vm577_vm0, %v2376_v9  ;;  %v6293_v9 = vld [vmem:[%s5827_s6 + $0x58] sm:$0xff]  }
  0x80   : > { %5163 = vmatprep.mubr.msk.bf16.mxu0 %vm577_vm0, %v2378_v16  ;;  %v2826_v16 = vrot.slane %v6288_v0, 2  ;;  %v2828_v26 = vrot.slane %v6293_v9, 2 }
  0x82   : > { %v2827_v27 = vsel %vm2343_vm3, %v2824_v55, %v2826_v16  ;;  %v2829_v37 = vsel %vm2343_vm3, %v2826_v16, %v2828_v26 }
  0x85   : > { %4972 = vmatmul.mubr.msk.bf16.gmra.mrb[16].mxu1 %vm577_vm0, %v5970_v13 }
  0x86   : > { %4975 = vmatprep.mubr.msk.bf16.mxu1 %vm577_vm0, %v5979_v22 }
  0x87   : > { %5164 = vmatmul.mubr.msk.bf16.gmra.mrb[32].mxu0 %vm577_vm0, %v2380_v28  ;;  %v5721_v28 = vld [vmem:[%s5827_s6 + $0x10] sm:$0xff]  }
  0x88   : > { %5175 = vmatprep.mubr.msk.bf16.mxu0 %vm577_vm0, %v2813_v32  ;;  %v1063_v32 = vrot.slane %v5721_v28, 1  ;;  %v1073_v28 = vrot.slane %v5934_v38, 1  ;;  %v6369_v38 = vld [vmem:[%s6820_s1 + $0x80] sm:$0xff]  }
  0x8a   : > { %v1064_v25 = vsel %vm1059_vm4, %v1061_v62, %v1063_v32  ;;  %v5713_v62 = vld [vmem:[%s6820_s1 + $0x78] sm:$0xff]  }
  0x8d   : > { %4976 = vmatmul.mubr.msk.bf16.gmra.mrb[20].mxu1 %vm577_vm0, %v5992_v36 }
  0x8e   : > { %4979 = vmatprep.mubr.msk.bf16.mxu1 %vm577_vm0, %v5998_v47 }
  0x8f   : > { %5176 = vmatmul.mubr.msk.bf16.vlgmr.msra.gmra.mrb[0].mxu0 %vm577_vm0, %v2815_v39  ;;  %v5722_v39 = vld [vmem:[%s5827_s6 + $0x18] sm:$0xff]  }
  0x90   : > { %5212 = vmatpush3.bf16.msra.mxu0 %v6105_v33  ;;  %5179 = vmatprep.mubr.msk.bf16.mxu0 %vm577_vm0, %v2817_v40  ;;  %v6262_v33 = vld [vmem:[%s5827_s6 + $0x40] sm:$0xff]   ;;  %v1065_v40 = vrot.slane %v5722_v39, 1 }
  0x91   : > { %5213 = vmatprep.subr.bf16.mxu0 %v5691_v45  ;;  %v2822_v24 = vrot.slane %v6262_v33, 2 }
  0x93   : > { %v2823_v52 = vsel %vm2343_vm3, %v2820_v58, %v2822_v24  ;;  %v2825_v2 = vsel %vm2343_vm3, %v2822_v24, %v2824_v55  ;;  %v2830_v58 = vrot.slane %v6307_v35, 2  ;;  %v1067_v24 = vrot.slane %v5723_v54, 1  ;;  %v6328_v55 = vld [vmem:[%s5827_s6 + $0x70] sm:$0xff]  }
  0x94   : > { %5214 = vmatpush3.bf16.msra.mxu0 %v5691_v45  ;;  %v6312_v45 = vld [vmem:[%s5827_s6 + $0x68] sm:$0xff]  }
  0x95   : > { %4980 = vmatmul.mubr.msk.bf16.gmra.mrb[24].mxu1 %vm577_vm0, %v6018_v3  ;;  %5215 = vmatprep.subr.bf16.mxu0 %v5698_v21  ;;  %v1068_v60 = vsel %vm1059_vm4, %v1065_v40, %v1067_v24  ;;  %v1070_v6 = vsel %vm1059_vm4, %v1067_v24, %v1069_v59 }
  0x96   : > { %4983 = vmatprep.mubr.msk.bf16.mxu1 %vm577_vm0, %v6030_v20 }
  0x97   : > { %5180 = vmatmul.mubr.msk.bf16.gmra.mrb[4].mxu0 %vm577_vm0, %v2819_v50  ;;  %v2832_v50 = vrot.slane %v6312_v45, 2 }
  0x98   : > { %5183 = vmatprep.mubr.msk.bf16.mxu0 %vm577_vm0, %v2821_v46  ;;  %5216 = vmatpush3.bf16.msra.mxu0 %v5698_v21  ;;  %v1066_v21 = vsel %vm1059_vm4, %v1063_v32, %v1065_v40  ;;  %v5707_v46 = vld [vmem:[%s6820_s1 + $0x68] sm:$0xff]  }
  0x99   : > { %5217 = vmatprep.subr.bf16.mxu0 %v5704_v11  ;;  %v2833_v56 = vsel %vm2343_vm3, %v2830_v58, %v2832_v50  ;;  %v6358_v32 = vld [vmem:[%s5827_s6 + $0x88] sm:$0xff]  }
  0x9a   : > { %v2840_v40 = vrot.slane %v6358_v32, 2 }
  0x9c   : > { %5218 = vmatpush3.bf16.msra.mxu0 %v5704_v11  ;;  %v2831_v11 = vsel %vm2343_vm3, %v2828_v26, %v2830_v58  ;;  %v6353_v26 = vld [vmem:[%s5827_s6 + $0x80] sm:$0xff]   ;;  %v1075_v58 = vrot.slane %v5944_v43, 1  ;;  %v3154_v43 = vshrl.u32 %v6207_v17, 16 }
  0x9d   : > { %4984 = vmatmul.mubr.msk.bf16.gmra.mrb[28].mxu1 %vm577_vm0, %v6037_v31  ;;  %5255 = vmatprep.subr.bf16.mxu0 %v6280_v44 }
  0x9e   : > { %4987 = vmatprep.mubr.msk.bf16.mxu1 %vm577_vm0, %v6054_v49  ;;  %v1076_v54 = vsel %vm1059_vm4, %v1073_v28, %v1075_v58 }
  0x9f   : > { %5184 = vmatmul.mubr.msk.bf16.gmra.mrb[8].mxu0 %vm577_vm0, %v2823_v52  ;;  %v6334_v52 = vld [vmem:[%s5827_s6 + $0x78] sm:$0xff]  }
  0xa0   : > { %5187 = vmatprep.mubr.msk.bf16.mxu0 %vm577_vm0, %v2825_v2  ;;  %v5711_v2 = vld [vmem:[%s6820_s1 + $0x70] sm:$0xff]   ;;  %v2836_v8 = vrot.slane %v6334_v52, 2 }
  0xa5   : > { %4988 = vmatmul.mubr.msk.bf16.gmra.mrb[32].mxu1 %vm577_vm0, %v6062_v53 }
  0xa6   : > { %4999 = vmatprep.mubr.msk.bf16.mxu1 %vm577_vm0, %v1062_v23  ;;  %v1071_v23 = vrot.slane %v5914_v15, 1  ;;  %v2838_v15 = vrot.slane %v6353_v26, 2 }
  0xa7   : > { %5188 = vmatmul.mubr.msk.bf16.gmra.mrb[12].mxu0 %vm577_vm0, %v2827_v27 }
  0xa8   : > { %5191 = vmatprep.mubr.msk.bf16.mxu0 %vm577_vm0, %v2829_v37  ;;  %v1072_v37 = vsel %vm1059_vm4, %v1069_v59, %v1071_v23  ;;  %v1074_v39 = vsel %vm1059_vm4, %v1071_v23, %v1073_v28 }
  0xad   : > { %5000 = vmatmul.mubr.msk.bf16.vlgmr.msra.gmra.mrb[0].mxu1 %vm577_vm0, %v1064_v25  ;;  %v2839_v25 = vsel %vm2343_vm3, %v2836_v8, %v2838_v15 }
  0xae   : > { %5003 = vmatprep.mubr.msk.bf16.mxu1 %vm577_vm0, %v1066_v21  ;;  %5036 = vmatpush3.bf16.msra.mxu1 %v6170_v63  ;;  %v2834_v63 = vrot.slane %v6328_v55, 2  ;;  %v6377_v21 = vld [vmem:[%s5827_s6 + $0x90] sm:$0xff]  }
  0xaf   : > { %5037 = vmatprep.subr.bf16.mxu1 %v5707_v46  ;;  %5192 = vmatmul.mubr.msk.bf16.gmra.mrb[16].mxu0 %vm577_vm0, %v2831_v11  ;;  %v6382_v11 = vld [vmem:[%s5827_s6 + $0x98] sm:$0xff]   ;;  %v2842_v24 = vrot.slane %v6377_v21, 2 }
  0xb0   : > { %5195 = vmatprep.mubr.msk.bf16.mxu0 %vm577_vm0, %v2833_v56  ;;  %v2835_v16 = vsel %vm2343_vm3, %v2832_v50, %v2834_v63  ;;  %v2837_v27 = vsel %vm2343_vm3, %v2834_v63, %v2836_v8  ;;  %v1077_v50 = vrot.slane %v5970_v13, 1  ;;  %v2844_v59 = vrot.slane %v6382_v11, 2  ;;  %v5709_v8 = vld [vmem:[%s5827_s6 + $0xa0] ss:$0 sps:$4 sm:$0x33]  }
  0xb1   : > { %v3157_v13 = vshll.u32 %v6207_v17, 16  ;;  %v1079_v63 = vrot.slane %v5979_v22, 1  ;;  %v2846_v22 = vrot.slane %v5709_v8, 2  ;;  %v3192_v8 = vshll.u32 %v6239_v42, 16 }
  0xb2   : > { %5038 = vmatpush3.bf16.msra.mxu1 %v5707_v46  ;;  %v2841_v46 = vsel %vm2343_vm3, %v2838_v15, %v2840_v40  ;;  %v1078_v56 = vsel %vm1059_vm4, %v1075_v58, %v1077_v50  ;;  %v2845_v23 = vsel %vm2343_vm3, %v2842_v24, %v2844_v59  ;;  %v3180_v58 = vshrl.u32 %v6227_v29, 16 }
  0xb3   : > { %5039 = vmatprep.subr.bf16.mxu1 %v5711_v2 }
  0xb5   : > { %5004 = vmatmul.mubr.msk.bf16.gmra.mrb[4].mxu1 %vm577_vm0, %v1068_v60  ;;  %v3165_v60 = vshll.u32 %v6210_v18, 16 }
  0xb6   : > { %5007 = vmatprep.mubr.msk.bf16.mxu1 %vm577_vm0, %v1070_v6  ;;  %5040 = vmatpush3.bf16.msra.mxu1 %v5711_v2  ;;  %v3162_v2 = vshrl.u32 %v6210_v18, 16  ;;  %v2843_v6 = vsel %vm2343_vm3, %v2840_v40, %v2842_v24  ;;  %v3174_v40 = vshll.u32 %v6223_v30, 16 }
  0xb7   : > { %5041 = vmatprep.subr.bf16.mxu1 %v5713_v62  ;;  %5196 = vmatmul.mubr.msk.bf16.gmra.mrb[20].mxu0 %vm577_vm0, %v2835_v16  ;;  %v3156_v16 = vrot.slane %v3154_v43, 2  ;;  %v3167_v28 = vrot.slane %v3165_v60, 3 }
  0xb8   : > { %5199 = vmatprep.mubr.msk.bf16.mxu0 %vm577_vm0, %v2837_v27  ;;  %v3159_v27 = vrot.slane %v3157_v13, 3  ;;  %v3164_v17 = vrot.slane %v3162_v2, 2  ;;  %v1085_v13 = vrot.slane %v6018_v3, 1  ;;  %v3182_v2 = vrot.slane %v3180_v58, 2 }
  0xb9   : > { %v3201_v3 = vshll.u32 %v6243_v41, 16  ;;  %v3210_v58 = vshll.u32 %v6262_v33, 16 }
  0xba   : > { %5042 = vmatpush3.bf16.msra.mxu1 %v5713_v62  ;;  %v1081_v62 = vrot.slane %v5992_v36, 1  ;;  %v3160_v36 = vor.u32 %v3159_v27, %v3156_v16 }
  0xbb   : > { %5299 = vmatprep.subr.bf16.mxu1 %v6369_v38 }
  0xbc   : > { %v1082_v15 = vsel %vm1059_vm4, %v1079_v63, %v1081_v62 }
  0xbd   : > { %5008 = vmatmul.mubr.msk.bf16.gmra.mrb[8].mxu1 %vm577_vm0, %v1072_v37  ;;  %v1080_v37 = vsel %vm1059_vm4, %v1077_v50, %v1079_v63  ;;  %v2847_v50 = vsel %vm2343_vm3, %v2844_v59, %v2846_v22  ;;  %v3189_v59 = vshrl.u32 %v6239_v42, 16  ;;  %v1089_v22 = vrot.slane %v6037_v31, 1 }
  0xbe   : > { %5011 = vmatprep.mubr.msk.bf16.mxu1 %vm577_vm0, %v1074_v39  ;;  %v3171_v39 = vshrl.u32 %v6223_v30, 16 }
  0xbf   : > { %5200 = vmatmul.mubr.msk.bf16.gmra.mrb[24].mxu0 %vm577_vm0, %v2839_v25  ;;  %v3168_v25 = vor.u32 %v3167_v28, %v3164_v17  ;;  %v3191_v17 = vrot.slane %v3189_v59, 2  ;;  %v3194_v28 = vrot.slane %v3192_v8, 3  ;;  %v5715_v59 = vld [vmem:[%s6820_s1 + $0x118] sm:$0xff]  }
  0xc0   : > { %5203 = vmatprep.mubr.msk.bf16.mxu0 %vm577_vm0, %v2841_v46  ;;  %v3183_v46 = vshll.u32 %v6227_v29, 16  ;;  %v3173_v24 = vrot.slane %v3171_v39, 2  ;;  %v3203_v39 = vrot.slane %v3201_v3, 3  ;;  %v3234_v3 = vshrl.u32 %v6293_v9, 16 }
  0xc1   : > { %v3169_v43 = vsel %vm3152_vm5, %v3160_v36, %v3168_v25  ;;  %v3195_v36 = vor.u32 %v3194_v28, %v3191_v17 }
  0xc2   : > { %v3185_v60 = vrot.slane %v3183_v46, 3 }
  0xc4   : > { %v3186_v16 = vor.u32 %v3185_v60, %v3182_v2  ;;  %v1093_v60 = vrot.slane %v6062_v53, 1 }
  0xc5   : > { %5012 = vmatmul.mubr.msk.bf16.gmra.mrb[12].mxu1 %vm577_vm0, %v1076_v54  ;;  %v1083_v54 = vrot.slane %v5998_v47, 1 }
  0xc6   : > { %5015 = vmatprep.mubr.msk.bf16.mxu1 %vm577_vm0, %v1078_v56  ;;  %v3176_v56 = vrot.slane %v3174_v40, 3  ;;  %v5712_v40 = vld [vmem:[%s6820_s1 + $0x108] sm:$0xff]  }
  0xc7   : > { %5204 = vmatmul.mubr.msk.bf16.gmra.mrb[28].mxu0 %vm577_vm0, %v2843_v6  ;;  %v1084_v63 = vsel %vm1059_vm4, %v1081_v62, %v1083_v54  ;;  %v1086_v47 = vsel %vm1059_vm4, %v1083_v54, %v1085_v13  ;;  %v1087_v62 = vrot.slane %v6030_v20, 1  ;;  %v3219_v54 = vshll.u32 %v6266_v51, 16 }
  0xc8   : > { %5207 = vmatprep.mubr.msk.bf16.mxu0 %vm577_vm0, %v2845_v23  ;;  %v3177_v6 = vor.u32 %v3176_v56, %v3173_v24  ;;  %v3198_v23 = vshrl.u32 %v6243_v41, 16  ;;  %v3196_v24 = vsel %vm3152_vm5, %v3186_v16, %v3195_v36  ;;  %v1091_v56 = vrot.slane %v6054_v49, 1 }
  0xc9   : > { %v1088_v20 = vsel %vm1059_vm4, %v1085_v13, %v1087_v62  ;;  %v1090_v31 = vsel %vm1059_vm4, %v1087_v62, %v1089_v22  ;;  %v3212_v13 = vrot.slane %v3210_v58, 3  ;;  %v1095_v62 = vrot.slane %v6085_v5, 1 }
  0xca   : > { %v3178_v27 = vsel %vm3152_vm5, %v3168_v25, %v3177_v6  ;;  %v3207_v25 = vshrl.u32 %v6262_v33, 16  ;;  %v1092_v49 = vsel %vm1059_vm4, %v1089_v22, %v1091_v56  ;;  %v1094_v53 = vsel %vm1059_vm4, %v1091_v56, %v1093_v60 }
  0xcb   : > { %v1527_v22 = vrot.slane %v5851_v19, 1  ;;  %v1096_v5 = vsel %vm1059_vm4, %v1093_v60, %v1095_v62  ;;  %v3243_v58 = vshrl.u32 %v6307_v35, 16  ;;  %v3246_v19 = vshll.u32 %v6307_v35, 16  ;;  %v5727_v60 = vld [vmem:[%s5827_s6 + $0x20] sm:$0xff]  }
  0xcd   : > { %5016 = vmatmul.mubr.msk.bf16.gmra.mrb[16].mxu1 %vm577_vm0, %v1080_v37  ;;  %v3187_v37 = vsel %vm3152_vm5, %v3177_v6, %v3186_v16  ;;  %v3221_v6 = vrot.slane %v3219_v54, 3  ;;  %v3228_v16 = vshll.u32 %v6288_v0, 16  ;;  %v3255_v54 = vshll.u32 %v6312_v45, 16 }
  0xce   : > { %5019 = vmatprep.mubr.msk.bf16.mxu1 %vm577_vm0, %v1082_v15  ;;  %v3200_v15 = vrot.slane %v3198_v23, 2 }
  0xcf   : > { %5208 = vmatmul.mubr.msk.bf16.gmra.mrb[32].mxu0 %vm577_vm0, %v2847_v50  ;;  %v3216_v50 = vshrl.u32 %v6266_v51, 16 }
  0xd0   : > { %5219 = vmatprep.mubr.msk.bf16.mxu0 %vm577_vm0, %v3169_v43  ;;  %v3204_v46 = vor.u32 %v3203_v39, %v3200_v15  ;;  %v3209_v43 = vrot.slane %v3207_v25, 2  ;;  %v5725_v39 = vld [vmem:[%s5827_s6 + $0x10] sm:$0xff]  }
  0xd2   : > { %v3205_v2 = vsel %vm3152_vm5, %v3195_v36, %v3204_v46  ;;  %v3213_v8 = vor.u32 %v3212_v13, %v3209_v43  ;;  %v3245_v43 = vrot.slane %v3243_v58, 2  ;;  %v3248_v13 = vrot.slane %v3246_v19, 3 }
  0xd3   : > { %v3282_v19 = vshll.u32 %v6353_v26, 16 }
  0xd4   : > { %v3214_v17 = vsel %vm3152_vm5, %v3204_v46, %v3213_v8 }
  0xd5   : > { %5020 = vmatmul.mubr.msk.bf16.gmra.mrb[20].mxu1 %vm577_vm0, %v1084_v63  ;;  %v3218_v63 = vrot.slane %v3216_v50, 2  ;;  %v3252_v50 = vshrl.u32 %v6312_v45, 16 }
  0xd6   : > { %5023 = vmatprep.mubr.msk.bf16.mxu1 %vm577_vm0, %v1086_v47  ;;  %v3225_v47 = vshrl.u32 %v6288_v0, 16 }
  0xd7   : > { %5220 = vmatmul.mubr.msk.bf16.vlgmr.msra.gmra.mrb[0].mxu0 %vm577_vm0, %v3178_v27  ;;  %v3222_v23 = vor.u32 %v3221_v6, %v3218_v63  ;;  %v3237_v27 = vshll.u32 %v6293_v9, 16  ;;  %v1532_v63 = vrot.slane %v5727_v60, 1  ;;  %v3254_v6 = vrot.slane %v3252_v50, 2 }
  0xd8   : > { %5256 = vmatpush3.bf16.msra.mxu0 %v6280_v44  ;;  %5223 = vmatprep.mubr.msk.bf16.mxu0 %vm577_vm0, %v3187_v37  ;;  %v5714_v44 = vld [vmem:[%s6820_s1 + $0x110] sm:$0xff]   ;;  %v3227_v28 = vrot.slane %v3225_v47, 2  ;;  %v3230_v37 = vrot.slane %v3228_v16, 3  ;;  %v3261_v47 = vshrl.u32 %v6328_v55, 16  ;;  %v3264_v16 = vshll.u32 %v6328_v55, 16 }
  0xd9   : > { %5257 = vmatprep.subr.bf16.mxu0 %v5712_v40  ;;  %v3223_v15 = vsel %vm3152_vm5, %v3213_v8, %v3222_v23  ;;  %v3239_v36 = vrot.slane %v3237_v27, 3  ;;  %v3249_v8 = vor.u32 %v3248_v13, %v3245_v43  ;;  %v3273_v27 = vshll.u32 %v6334_v52, 16 }
  0xda   : > { %v3231_v25 = vor.u32 %v3230_v37, %v3227_v28  ;;  %v3263_v37 = vrot.slane %v3261_v47, 2  ;;  %v3288_v50 = vshrl.u32 %v6358_v32, 16 }
  0xdc   : > { %5258 = vmatpush3.bf16.msra.mxu0 %v5712_v40  ;;  %v1528_v40 = vrot.slane %v5725_v39, 1  ;;  %v5729_v39 = vld [vmem:[%s5827_s6 + $0x30] sm:$0xff]  }
  0xdd   : > { %5024 = vmatmul.mubr.msk.bf16.gmra.mrb[24].mxu1 %vm577_vm0, %v1088_v20  ;;  %5259 = vmatprep.subr.bf16.mxu0 %v5714_v44  ;;  %v3236_v20 = vrot.slane %v3234_v3, 2  ;;  %v3270_v3 = vshrl.u32 %v6334_v52, 16 }
  0xde   : > { %5027 = vmatprep.mubr.msk.bf16.mxu1 %vm577_vm0, %v1090_v31  ;;  %v1529_v31 = vsel %vm1059_vm4, %v1527_v22, %v1528_v40  ;;  %v3266_v22 = vrot.slane %v3264_v16, 3 }
  0xdf   : > { %5224 = vmatmul.mubr.msk.bf16.gmra.mrb[4].mxu0 %vm577_vm0, %v3196_v24  ;;  %v3240_v46 = vor.u32 %v3239_v36, %v3236_v20  ;;  %v5726_v24 = vld [vmem:[%s5827_s6 + $0x18] sm:$0xff]   ;;  %v3272_v20 = vrot.slane %v3270_v3, 2  ;;  %v3275_v36 = vrot.slane %v3273_v27, 3 }
  0xe0   : > { %5227 = vmatprep.mubr.msk.bf16.mxu0 %vm577_vm0, %v3205_v2  ;;  %5260 = vmatpush3.bf16.msra.mxu0 %v5714_v44  ;;  %v3232_v44 = vsel %vm3152_vm5, %v3222_v23, %v3231_v25  ;;  %v1530_v56 = vrot.slane %v5726_v24, 1  ;;  %v3267_v58 = vor.u32 %v3266_v22, %v3263_v37  ;;  %v5735_v37 = vld [vmem:[%s5827_s6 + $0x48] sm:$0xff]  }
  0xe1   : > { %5261 = vmatprep.subr.bf16.mxu0 %v5715_v59  ;;  %v3241_v2 = vsel %vm3152_vm5, %v3231_v25, %v3240_v46  ;;  %v3250_v62 = vsel %vm3152_vm5, %v3240_v46, %v3249_v8  ;;  %v3276_v46 = vor.u32 %v3275_v36, %v3272_v20  ;;  %v1542_v22 = vrot.slane %v5735_v37, 1  ;;  %v5736_v36 = vld [vmem:[%s5827_s6 + $0x50] sm:$0xff]  }
  0xe2   : > { %v1554_v37 = vrot.slane %v6161_v57, 1 }
  0xe3   : > { %v3277_v60 = vsel %vm3152_vm5, %v3267_v58, %v3276_v46 }
  0xe4   : > { %5262 = vmatpush3.bf16.msra.mxu0 %v5715_v59  ;;  %v3257_v59 = vrot.slane %v3255_v54, 3  ;;  %v3291_v54 = vshll.u32 %v6358_v32, 16 }
  0xe5   : > { %5028 = vmatmul.mubr.msk.bf16.gmra.mrb[28].mxu1 %vm577_vm0, %v1092_v49  ;;  %v1531_v49 = vsel %vm1059_vm4, %v1528_v40, %v1530_v56  ;;  %v1536_v40 = vrot.slane %v5729_v39, 1 }
  0xe6   : > { %5031 = vmatprep.mubr.msk.bf16.mxu1 %vm577_vm0, %v1094_v53  ;;  %v1533_v53 = vsel %vm1059_vm4, %v1530_v56, %v1532_v63  ;;  %v3258_v23 = vor.u32 %v3257_v59, %v3254_v6  ;;  %v5732_v56 = vld [vmem:[%s5827_s6 + $0x38] sm:$0xff]   ;;  %v3290_v59 = vrot.slane %v3288_v50, 2 }
  0xe7   : > { %5228 = vmatmul.mubr.msk.bf16.gmra.mrb[8].mxu0 %vm577_vm0, %v3214_v17  ;;  %v5728_v17 = vld [vmem:[%s5827_s6 + $0x28] sm:$0xff]   ;;  %v1538_v43 = vrot.slane %v5732_v56, 1  ;;  %v5737_v56 = vld [vmem:[%s5827_s6 + $0x58] sm:$0xff]  }
  0xe8   : > { %5231 = vmatprep.mubr.msk.bf16.mxu0 %vm577_vm0, %v3223_v15  ;;  %v1534_v28 = vrot.slane %v5728_v17, 1  ;;  %v3259_v15 = vsel %vm3152_vm5, %v3249_v8, %v3258_v23  ;;  %v3268_v24 = vsel %vm3152_vm5, %v3258_v23, %v3267_v58  ;;  %v5734_v8 = vld [vmem:[%s6820_s1 + $0x98] sm:$0xff]   ;;  %v3300_v23 = vshll.u32 %v6377_v21, 16 }
  0xe9   : > { %v1539_v47 = vsel %vm1059_vm4, %v1536_v40, %v1538_v43  ;;  %v3309_v17 = vshll.u32 %v6382_v11, 16 }
  0xea   : > { %v1535_v25 = vsel %vm1059_vm4, %v1532_v63, %v1534_v28  ;;  %v5733_v63 = vld [vmem:[%s5827_s6 + $0x40] sm:$0xff]   ;;  %v3302_v39 = vrot.slane %v3300_v23, 3 }
  0xeb   : > { %v1540_v6 = vrot.slane %v5733_v63, 1  ;;  %v3311_v58 = vrot.slane %v3309_v17, 3  ;;  %v1548_v63 = vrot.slane %v6123_v48, 1  ;;  %v3633_v17 = vrot.slane %v6227_v29, 3 }
  0xec   : > { %v3635_v29 = vrot.slane %v6239_v42, 3  ;;  %v1971_v42 = vshll.u32 %v6123_v48, 16 }
  0xed   : > { %5032 = vmatmul.mubr.msk.bf16.gmra.mrb[32].mxu1 %vm577_vm0, %v1096_v5  ;;  %v5730_v5 = vld [vmem:[%s6820_s1 + $0x88] sm:$0xff]   ;;  %v1541_v3 = vsel %vm1059_vm4, %v1538_v43, %v1540_v6  ;;  %v1546_v43 = vrot.slane %v5737_v56, 1  ;;  %v1977_v56 = vshrl.u32 %v6135_v10, 16 }
  0xee   : > { %5043 = vmatprep.mubr.msk.bf16.mxu1 %vm577_vm0, %v1529_v31  ;;  %v1537_v31 = vsel %vm1059_vm4, %v1534_v28, %v1536_v40  ;;  %v6533_v40 = vld [vmem:[%s5827_s6 + $0xa0] ss:$0 sps:$4 sm:$0x77]  }
  0xef   : > { %5232 = vmatmul.mubr.msk.bf16.gmra.mrb[12].mxu0 %vm577_vm0, %v3232_v44  ;;  %v5731_v44 = vld [vmem:[%s6820_s1 + $0x90] sm:$0xff]  }
  0xf0   : > { %5235 = vmatprep.mubr.msk.bf16.mxu0 %vm577_vm0, %v3241_v2  ;;  %v3284_v2 = vrot.slane %v3282_v19, 3 }
  0xf5   : > { %5044 = vmatmul.mubr.msk.bf16.vlgmr.msra.gmra.mrb[0].mxu1 %vm577_vm0, %v1531_v49  ;;  %v3293_v49 = vrot.slane %v3291_v54, 3 }
  0xf6   : > { %5047 = vmatprep.mubr.msk.bf16.mxu1 %vm577_vm0, %v1533_v53  ;;  %5303 = vmatpush3.bf16.msra.mxu1 %v6369_v38  ;;  %v3279_v38 = vshrl.u32 %v6353_v26, 16  ;;  %v3297_v53 = vshrl.u32 %v6377_v21, 16 }
  0xf7   : > { %5300 = vmatprep.subr.bf16.mxu1 %v5730_v5  ;;  %5236 = vmatmul.mubr.msk.bf16.gmra.mrb[16].mxu0 %vm577_vm0, %v3250_v62  ;;  %v3294_v27 = vor.u32 %v3293_v49, %v3290_v59  ;;  %v3306_v62 = vshrl.u32 %v6382_v11, 16 }
  0xf8   : > { %5239 = vmatprep.mubr.msk.bf16.mxu0 %vm577_vm0, %v3259_v15  ;;  %v3281_v13 = vrot.slane %v3279_v38, 2  ;;  %v3299_v15 = vrot.slane %v3297_v53, 2  ;;  %v1543_v38 = vsel %vm1059_vm4, %v1540_v6, %v1542_v22 }
  0xfa   : > { %5304 = vmatpush3.bf16.msra.mxu1 %v5730_v5  ;;  %v3285_v16 = vor.u32 %v3284_v2, %v3281_v13  ;;  %v1544_v5 = vrot.slane %v5736_v36, 1  ;;  %v3303_v19 = vor.u32 %v3302_v39, %v3299_v15  ;;  %v1556_v15 = vrot.slane %v6165_v61, 1 }
  0xfb   : > { %5301 = vmatprep.subr.bf16.mxu1 %v5731_v44  ;;  %v3636_v36 = vsel %vm3627_vm6, %v3633_v17, %v3635_v29 }
  0xfc   : > { %v3286_v28 = vsel %vm3152_vm5, %v3276_v46, %v3285_v16  ;;  %v3295_v20 = vsel %vm3152_vm5, %v3285_v16, %v3294_v27  ;;  %v3318_v46 = vshll.u32 %v6533_v40, 16  ;;  %v1545_v50 = vsel %vm1059_vm4, %v1542_v22, %v1544_v5 }
  0xfd   : > { %5048 = vmatmul.mubr.msk.bf16.gmra.mrb[4].mxu1 %vm577_vm0, %v1535_v25  ;;  %v3308_v25 = vrot.slane %v3306_v62, 2  ;;  %v1547_v59 = vsel %vm1059_vm4, %v1544_v5, %v1546_v43  ;;  %v3629_v16 = vrot.slane %v6210_v18, 3  ;;  %v3631_v18 = vrot.slane %v6223_v30, 3 }
  0xfe   : > { %5051 = vmatprep.mubr.msk.bf16.mxu1 %vm577_vm0, %v1537_v31  ;;  %5305 = vmatpush3.bf16.msra.mxu1 %v5731_v44  ;;  %v3315_v31 = vshrl.u32 %v6533_v40, 16  ;;  %v3614_v44 = vld [vmem:[%s5827_s6 + $0x10] sm:$0x8]  ;;  %v3320_v2 = vrot.slane %v3318_v46, 3  ;;  %v1557_v39 = vsel %vm1059_vm4, %v1554_v37, %v1556_v15  ;;  %v1558_v5 = vrot.slane %v6183_v1, 1 }
  0xff   : > { %5302 = vmatprep.subr.bf16.mxu1 %v5734_v8  ;;  %5240 = vmatmul.mubr.msk.bf16.gmra.mrb[20].mxu0 %vm577_vm0, %v3268_v24  ;;  %v3312_v54 = vor.u32 %v3311_v58, %v3308_v25  ;;  %v3304_v24 = vsel %vm3152_vm5, %v3294_v27, %v3303_v19  ;;  %v4607_v6 = vcombine.low %v3614_v44, %v6195_v7  ;;  %v1550_v7 = vrot.slane %v6135_v10, 1 }
 0x100   : > { %5243 = vmatprep.mubr.msk.bf16.mxu0 %vm577_vm0, %v3277_v60  ;;  %v3317_v13 = vrot.slane %v3315_v31, 2  ;;  %v3634_v22 = vsel %vm3627_vm6, %v3631_v18, %v3633_v17  ;;  %v1560_v58 = vrot.slane %v6187_v14, 1  ;;  %v5718_v31 = vld [vmem:[%s5827_s6 + $0x98] ss:$0 sps:$4 sm:$0x11]   ;;  %v1973_v44 = vrot.slane %v1971_v42, 2 }
 0x101   : > { %v3313_v60 = vsel %vm3152_vm5, %v3303_v19, %v3312_v54  ;;  %v1551_v27 = vsel %vm1059_vm4, %v1548_v63, %v1550_v7  ;;  %v3639_v19 = vrot.slane %v6262_v33, 3  ;;  %s5596_s6 = smul.u32 144, %s6828_s12 }
 0x102   : > { %5306 = vmatpush3.bf16.msra.mxu1 %v5734_v8  ;;  %v3321_v49 = vor.u32 %v3320_v2, %v3317_v13  ;;  %v1549_v8 = vsel %vm1059_vm4, %v1546_v43, %v1548_v63  ;;  %v1561_v46 = vsel %vm1059_vm4, %v1558_v5, %v1560_v58  ;;  %v1980_v43 = vshll.u32 %v6135_v10, 16 }
 0x103   : > { %v1986_v2 = vshrl.u32 %v6142_v34, 16  ;;  %v3643_v63 = vrot.slane %v6288_v0, 3  ;;  %v1998_v0 = vshll.u32 %v6161_v57, 16  ;;  %s6693_s11 = scalar_lea.vmem %s6822_s3, %s5596_s6 }
 0x104   : > { %v3322_v53 = vsel %vm3152_vm5, %v3312_v54, %v3321_v49  ;;  %v3645_v49 = vrot.slane %v6293_v9, 3  ;;  %v2007_v9 = vshll.u32 %v6165_v61, 16 }
 0x105   : > { %5052 = vmatmul.mubr.msk.bf16.gmra.mrb[8].mxu1 %vm577_vm0, %v1539_v47  ;;  %v3628_v47 = vrot.slane %v4607_v6, 3  ;;  %v1979_v6 = vrot.slane %v1977_v56, 1 }
 0x106   : > { %5055 = vmatprep.mubr.msk.bf16.mxu1 %vm577_vm0, %v1541_v3  ;;  %v1552_v3 = vrot.slane %v6142_v34, 1 }
 0x107   : > { %5244 = vmatmul.mubr.msk.bf16.gmra.mrb[24].mxu0 %vm577_vm0, %v3286_v28  ;;  %v3630_v23 = vsel %vm3627_vm6, %v3628_v47, %v3629_v16  ;;  %v3632_v28 = vsel %vm3627_vm6, %v3629_v16, %v3631_v18 }
 0x108   : > { %5247 = vmatprep.mubr.msk.bf16.mxu0 %vm577_vm0, %v3295_v20  ;;  %v1553_v62 = vsel %vm1059_vm4, %v1550_v7, %v1552_v3  ;;  %v1555_v30 = vsel %vm1059_vm4, %v1552_v3, %v1554_v37  ;;  %v3637_v20 = vrot.slane %v6243_v41, 3  ;;  %v1559_v41 = vsel %vm1059_vm4, %v1556_v15, %v1558_v5 }
 0x109   : > { %v3646_v7 = vsel %vm3627_vm6, %v3643_v63, %v3645_v49  ;;  %v2009_v37 = vrot.slane %v2007_v9, 2  ;;  %v2013_v15 = vshrl.u32 %v6183_v1, 16 }
 0x10a   : > { %v3638_v25 = vsel %vm3627_vm6, %v3635_v29, %v3637_v20 }
 0x10b   : > { %v2015_v5 = vrot.slane %v2013_v15, 1 }
 0x10d   : > { %5056 = vmatmul.mubr.msk.bf16.gmra.mrb[12].mxu1 %vm577_vm0, %v1543_v38  ;;  %v1968_v38 = vshrl.u32 %v6123_v48, 16  ;;  %v1562_v48 = vrot.slane %v5718_v31, 1  ;;  %v2034_v31 = vshll.u32 %v6203_v12, 16 }
 0x10e   : > { %5059 = vmatprep.mubr.msk.bf16.mxu1 %vm577_vm0, %v1545_v50  ;;  %v3641_v50 = vrot.slane %v6266_v51, 3  ;;  %v1989_v51 = vshll.u32 %v6142_v34, 16 }
 0x10f   : > { %5248 = vmatmul.mubr.msk.bf16.gmra.mrb[28].mxu0 %vm577_vm0, %v3304_v24  ;;  %v1970_v54 = vrot.slane %v1968_v38, 1  ;;  %v3640_v24 = vsel %vm3627_vm6, %v3637_v20, %v3639_v19 }
 0x110   : > { %5251 = vmatprep.mubr.msk.bf16.mxu0 %vm577_vm0, %v3313_v60  ;;  %v3642_v33 = vsel %vm3627_vm6, %v3639_v19, %v3641_v50  ;;  %v1563_v60 = vsel %vm1059_vm4, %v1560_v58, %v1562_v48  ;;  %v1991_v47 = vrot.slane %v1989_v51, 2  ;;  %v3644_v34 = vsel %vm3627_vm6, %v3641_v50, %v3643_v63 }
 0x111   : > { %v1974_v13 = vor.u32 %v1973_v44, %v1970_v54  ;;  %v2031_v19 = vshrl.u32 %v6203_v12, 16  ;;  %v3655_v50 = vrot.slane %v6353_v26, 3  ;;  %v2036_v44 = vrot.slane %v2034_v31, 2 }
 0x112   : > { %v3657_v48 = vrot.slane %v6358_v32, 3  ;;  %v3663_v51 = vrot.slane %v6533_v40, 3 }
 0x113   : > { %v1975_v10 = vsel %vm1868_vm2, %v6021_v4, %v1974_v13  ;;  %v2004_v4 = vshrl.u32 %v6165_v61, 16  ;;  %v2033_v54 = vrot.slane %v2031_v19, 1 }
 0x115   : > { %5060 = vmatmul.mubr.msk.bf16.gmra.mrb[16].mxu1 %vm577_vm0, %v1547_v59  ;;  %v1982_v59 = vrot.slane %v1980_v43, 2  ;;  %v2037_v56 = vor.u32 %v2036_v44, %v2033_v54  ;;  %v3658_v43 = vsel %vm3627_vm6, %v3655_v50, %v3657_v48 }
 0x116   : > { %5063 = vmatprep.mubr.msk.bf16.mxu1 %vm577_vm0, %v1549_v8  ;;  %v1988_v8 = vrot.slane %v1986_v2, 1 }
 0x117   : > { %5252 = vmatmul.mubr.msk.bf16.gmra.mrb[32].mxu0 %vm577_vm0, %v3322_v53  ;;  %v1983_v16 = vor.u32 %v1982_v59, %v1979_v6  ;;  %v1995_v53 = vshrl.u32 %v6161_v57, 16  ;;  %v3649_v57 = vrot.slane %v6312_v45, 3  ;;  %v2025_v45 = vshll.u32 %v6187_v14, 16 }
 0x118   : > { %5263 = vmatprep.mubr.msk.bf16.mxu0 %vm577_vm0, %v3630_v23  ;;  %v1992_v23 = vor.u32 %v1991_v47, %v1988_v8 }
 0x119   : > { %v1984_v3 = vsel %vm1868_vm2, %v1974_v13, %v1983_v16  ;;  %v1997_v18 = vrot.slane %v1995_v53, 1  ;;  %v2027_v42 = vrot.slane %v2025_v45, 2  ;;  %v3661_v13 = vrot.slane %v6382_v11, 3 }
 0x11a   : > { %v1993_v17 = vsel %vm1868_vm2, %v1983_v16, %v1992_v23 }
 0x11d   : > { %5064 = vmatmul.mubr.msk.bf16.gmra.mrb[20].mxu1 %vm577_vm0, %v1551_v27  ;;  %v3647_v27 = vrot.slane %v6307_v35, 3 }
 0x11e   : > { %5067 = vmatprep.mubr.msk.bf16.mxu1 %vm577_vm0, %v1553_v62  ;;  %v2000_v62 = vrot.slane %v1998_v0, 2 }
 0x11f   : > { %5264 = vmatmul.mubr.msk.bf16.vlgmr.msra.gmra.mrb[0].mxu0 %vm577_vm0, %v3632_v28  ;;  %v2006_v28 = vrot.slane %v2004_v4, 1  ;;  %v3648_v61 = vsel %vm3627_vm6, %v3645_v49, %v3647_v27  ;;  %v3650_v35 = vsel %vm3627_vm6, %v3647_v27, %v3649_v57 }
 0x120   : > { %5267 = vmatprep.mubr.msk.bf16.mxu0 %vm577_vm0, %v3634_v22  ;;  %v2001_v22 = vor.u32 %v2000_v62, %v1997_v18  ;;  %v6687_v62 = vld [vmem:[%s6821_s2] ss:$0 sm:$0xff] }
 0x121   : > { %v2010_v29 = vor.u32 %v2009_v37, %v2006_v28 }
 0x122   : > { %v2002_v20 = vsel %vm1868_vm2, %v1992_v23, %v2001_v22 }
 0x123   : > { %v2011_v58 = vsel %vm1868_vm2, %v2001_v22, %v2010_v29 }
 0x125   : > { %5068 = vmatmul.mubr.msk.bf16.gmra.mrb[24].mxu1 %vm577_vm0, %v1555_v30  ;;  %v2016_v30 = vshll.u32 %v6183_v1, 16  ;;  %v3653_v1 = vrot.slane %v6334_v52, 3 }
 0x126   : > { %5071 = vmatprep.mubr.msk.bf16.mxu1 %vm577_vm0, %v1557_v39  ;;  %v2022_v39 = vshrl.u32 %v6187_v14, 16 }
 0x127   : > { %5268 = vmatmul.mubr.msk.bf16.gmra.mrb[4].mxu0 %vm577_vm0, %v3636_v36  ;;  %v3651_v36 = vrot.slane %v6328_v55, 3  ;;  %v3656_v12 = vsel %vm3627_vm6, %v3653_v1, %v3655_v50 }
 0x128   : > { %5271 = vmatprep.mubr.msk.bf16.mxu0 %vm577_vm0, %v3638_v25  ;;  %v2018_v25 = vrot.slane %v2016_v30, 2  ;;  %v2024_v38 = vrot.slane %v2022_v39, 1 }
 0x129   : > { %v3652_v14 = vsel %vm3627_vm6, %v3649_v57, %v3651_v36  ;;  %v3654_v55 = vsel %vm3627_vm6, %v3651_v36, %v3653_v1 }
 0x12d   : > { %5072 = vmatmul.mubr.msk.bf16.gmra.mrb[28].mxu1 %vm577_vm0, %v1559_v41  ;;  %v2019_v41 = vor.u32 %v2018_v25, %v2015_v5 }
 0x12e   : > { %5075 = vmatprep.mubr.msk.bf16.mxu1 %vm577_vm0, %v1561_v46  ;;  %v2028_v46 = vor.u32 %v2027_v42, %v2024_v38 }
 0x12f   : > { %5272 = vmatmul.mubr.msk.bf16.gmra.mrb[8].mxu0 %vm577_vm0, %v3640_v24  ;;  %v2020_v52 = vsel %vm1868_vm2, %v2010_v29, %v2019_v41 }
 0x130   : > { %5275 = vmatprep.mubr.msk.bf16.mxu0 %vm577_vm0, %v3642_v33  ;;  %v2029_v24 = vsel %vm1868_vm2, %v2019_v41, %v2028_v46  ;;  %v2038_v26 = vsel %vm1868_vm2, %v2028_v46, %v2037_v56  ;;  %v3659_v33 = vrot.slane %v6377_v21, 3 }
 0x132   : > { %v3660_v32 = vsel %vm3627_vm6, %v3657_v48, %v3659_v33  ;;  %v3662_v2 = vsel %vm3627_vm6, %v3659_v33, %v3661_v13 }
 0x135   : > { %5076 = vmatmul.mubr.msk.bf16.gmra.mrb[32].mxu1 %vm577_vm0, %v1563_v60  ;;  %v3664_v60 = vsel %vm3627_vm6, %v3661_v13, %v3663_v51 }
 0x136   : > { %5107 = vmatprep.mubr.msk.bf16.mxu1 %vm577_vm0, %v1975_v10 }
 0x137   : > { %5276 = vmatmul.mubr.msk.bf16.gmra.mrb[12].mxu0 %vm577_vm0, %v3644_v34 }
 0x138   : > { %5279 = vmatprep.mubr.msk.bf16.mxu0 %vm577_vm0, %v3646_v7 }
 0x13d   : > { %5108 = vmatmul.mubr.msk.bf16.vlgmr.msra.gmra.mrb[20].mxu1 %vm577_vm0, %v1984_v3 }
 0x13e   : > { %5111 = vmatprep.mubr.msk.bf16.mxu1 %vm577_vm0, %v1993_v17 }
 0x13f   : > { %5280 = vmatmul.mubr.msk.bf16.gmra.mrb[16].mxu0 %vm577_vm0, %v3648_v61 }
 0x140   : > { %5283 = vmatprep.mubr.msk.bf16.mxu0 %vm577_vm0, %v3650_v35 }
 0x145   : > { %5112 = vmatmul.mubr.msk.bf16.gmra.mrb[24].mxu1 %vm577_vm0, %v2002_v20 }
 0x146   : > { %5115 = vmatprep.mubr.msk.bf16.mxu1 %vm577_vm0, %v2011_v58 }
 0x147   : > { %5284 = vmatmul.mubr.msk.bf16.gmra.mrb[20].mxu0 %vm577_vm0, %v3652_v14 }
 0x148   : > { %5287 = vmatprep.mubr.msk.bf16.mxu0 %vm577_vm0, %v3654_v55 }
 0x14d   : > { %5116 = vmatmul.mubr.msk.bf16.gmra.mrb[28].mxu1 %vm577_vm0, %v2020_v52 }
 0x14e   : > { %5119 = vmatprep.mubr.msk.bf16.mxu1 %vm577_vm0, %v2029_v24 }
 0x14f   : > { %5288 = vmatmul.mubr.msk.bf16.gmra.mrb[24].mxu0 %vm577_vm0, %v3656_v12 }
 0x150   : > { %5291 = vmatprep.mubr.msk.bf16.mxu0 %vm577_vm0, %v3658_v43 }
 0x155   : > { %5120 = vmatmul.mubr.msk.bf16.gmra.mrb[32].mxu1 %vm577_vm0, %v2038_v26 }
 0x157   : > { %5292 = vmatmul.mubr.msk.bf16.gmra.mrb[28].mxu0 %vm577_vm0, %v3660_v32 }
 0x158   : > { %5295 = vmatprep.mubr.msk.bf16.mxu0 %vm577_vm0, %v3662_v2 }
 0x15f   : > { %5296 = vmatmul.mubr.msk.bf16.gmra.mrb[32].mxu0 %vm577_vm0, %v3664_v60 }
 0x1c8   : > { %v5045_v63 = vpop.f32.mrb[0].mxu1 }
 0x1c9   : > { %v1676_v21 = vpop.f32.mrb[1].mxu1 }
 0x1ca   : > { %v5046_v6 = vpop.f32.mrb[2].mxu1 }
 0x1cb   : > { %v1679_v11 = vpop.f32.mrb[3].mxu1 }
 0x1d0   : > { %v5049_v59 = vpop.f32.mrb[4].mxu1 }
 0x1d1   : > { %v1692_v10 = vpop.f32.mrb[5].mxu1 }
 0x1d2   : > { %v5050_v49 = vpop.f32.mrb[6].mxu1 }
 0x1d3   : > { %v1695_v8 = vpop.f32.mrb[7].mxu1 }
 0x1d8   : > { %v5053_v47 = vpop.f32.mrb[8].mxu1 }
 0x1d9   : > { %v1708_v34 = vpop.f32.mrb[9].mxu1 }
 0x1da   : > { %v5054_v16 = vpop.f32.mrb[10].mxu1 }
 0x1db   : > { %v1711_v53 = vpop.f32.mrb[11].mxu1 }
 0x1e0   : > { %v6667_v0 = vpop.f32.mrb[12].mxu1 }
 0x1e1   : > { %v6669_v40 = vpop.f32.mrb[13].mxu1 }
 0x1e2   : > { %v6671_v7 = vpop.f32.mrb[14].mxu1 }
 0x1e3   : > { %v6673_v23 = vpop.f32.mrb[15].mxu1 }
 0x1e8   : > { %v6675_v4 = vpop.f32.mrb[16].mxu1 }
 0x1e9   : > { %v6677_v9 = vpop.f32.mrb[17].mxu1 }
 0x1ea   : > { %v6679_v3 = vpop.f32.mrb[18].mxu1 }
 0x1eb   : > { %v6681_v27 = vpop.f32.mrb[19].mxu1 }
 0x1f2   : > { %v5265_v18 = vpop.f32.mrb[0].mxu0 }
 0x1f3   : > { %v5307_v17 = vadd.f32 %v5265_v18, %v5045_v63  ;;  %v3777_v57 = vpop.f32.mrb[1].mxu0 }
 0x1f4   : > { %v5308_v28 = vadd.f32 %v3777_v57, %v1676_v21  ;;  %v5266_v37 = vpop.f32.mrb[2].mxu0 }
 0x1f5   : > { %v3965_v61 = vadd.f32 %v5307_v17, %v6687_v62  ;;  %v5309_v22 = vadd.f32 %v5266_v37, %v5046_v6  ;;  %v3780_v15 = vpop.f32.mrb[3].mxu0 }
 0x1f6   : > { %v3963_v30 = vadd.f32 %v5308_v28, %v6687_v62  ;;  %v5310_v35 = vadd.f32 %v3780_v15, %v1679_v11 }
 0x1f7   : > { %v4671_v29 = vpack.c.bf16 %v3965_v61, %v3965_v61  ;;  %v3966_v39 = vadd.f32 %v5309_v22, %v6687_v62 }
 0x1f8   : > { %v4669_v45 = vpack.c.bf16 %v3963_v30, %v3963_v30  ;;  %v3964_v20 = vadd.f32 %v5310_v35, %v6687_v62 }
 0x1f9   : > { %4146 = vst.msk [vmem:[%s6693_s11 + $0x8] sm:$0xf] %vm4143_vm7, %v4671_v29  ;;  %v4672_v36 = vpack.c.bf16 %v3966_v39, %v3966_v39 }
 0x1fa   : > { %4144 = vst.msk [vmem:[%s6693_s11] sm:$0xf] %vm4143_vm7, %v4669_v45  ;;  %v4670_v5 = vpack.c.bf16 %v3964_v20, %v3964_v20  ;;  %v5269_v25 = vpop.f32.mrb[4].mxu0 }
 0x1fb   : > { %4147 = vst.msk [vmem:[%s6693_s11 + $0xc] sm:$0xf] %vm4143_vm7, %v4672_v36  ;;  %v5311_v58 = vadd.f32 %v5269_v25, %v5049_v59  ;;  %v3793_v1 = vpop.f32.mrb[5].mxu0 }
 0x1fc   : > { %4145 = vst.msk [vmem:[%s6693_s11 + $0x4] sm:$0xf] %vm4143_vm7, %v4670_v5  ;;  %v5312_v38 = vadd.f32 %v3793_v1, %v1692_v10  ;;  %v5270_v42 = vpop.f32.mrb[6].mxu0 }
 0x1fd   : > { %v3969_v14 = vadd.f32 %v5311_v58, %v6687_v62  ;;  %v5313_v41 = vadd.f32 %v5270_v42, %v5050_v49  ;;  %v3796_v19 = vpop.f32.mrb[7].mxu0 }
 0x1fe   : > { %v3967_v31 = vadd.f32 %v5312_v38, %v6687_v62  ;;  %v5314_v55 = vadd.f32 %v3796_v19, %v1695_v8 }
 0x1ff   : > { %v4675_v46 = vpack.c.bf16 %v3969_v14, %v3969_v14  ;;  %v3970_v52 = vadd.f32 %v5313_v41, %v6687_v62 }
 0x200   : > { %v4673_v50 = vpack.c.bf16 %v3967_v31, %v3967_v31  ;;  %v3968_v54 = vadd.f32 %v5314_v55, %v6687_v62 }
 0x201   : > { %4150 = vst.msk [vmem:[%s6693_s11 + $0x18] sm:$0xf] %vm4143_vm7, %v4675_v46  ;;  %v4676_v44 = vpack.c.bf16 %v3970_v52, %v3970_v52 }
 0x202   : > { %4148 = vst.msk [vmem:[%s6693_s11 + $0x10] sm:$0xf] %vm4143_vm7, %v4673_v50  ;;  %v4674_v24 = vpack.c.bf16 %v3968_v54, %v3968_v54  ;;  %v5273_v48 = vpop.f32.mrb[8].mxu0 }
 0x203   : > { %4151 = vst.msk [vmem:[%s6693_s11 + $0x1c] sm:$0xf] %vm4143_vm7, %v4676_v44  ;;  %v5315_v12 = vadd.f32 %v5273_v48, %v5053_v47  ;;  %v3809_v56 = vpop.f32.mrb[9].mxu0 }
 0x204   : > { %4149 = vst.msk [vmem:[%s6693_s11 + $0x14] sm:$0xf] %vm4143_vm7, %v4674_v24  ;;  %v5316_v43 = vadd.f32 %v3809_v56, %v1708_v34  ;;  %v5274_v26 = vpop.f32.mrb[10].mxu0 }
 0x205   : > { %v3973_v33 = vadd.f32 %v5315_v12, %v6687_v62  ;;  %v5317_v13 = vadd.f32 %v5274_v26, %v5054_v16  ;;  %v3812_v32 = vpop.f32.mrb[11].mxu0 }
 0x206   : > { %v3971_v2 = vadd.f32 %v5316_v43, %v6687_v62  ;;  %v5318_v51 = vadd.f32 %v3812_v32, %v1711_v53 }
 0x207   : > { %v4679_v60 = vpack.c.bf16 %v3973_v33, %v3973_v33  ;;  %v3974_v63 = vadd.f32 %v5317_v13, %v6687_v62 }
 0x208   : > { %v4677_v21 = vpack.c.bf16 %v3971_v2, %v3971_v2  ;;  %v3972_v6 = vadd.f32 %v5318_v51, %v6687_v62 }
 0x209   : > { %4154 = vst.msk [vmem:[%s6693_s11 + $0x28] sm:$0xf] %vm4143_vm7, %v4679_v60  ;;  %v4680_v11 = vpack.c.bf16 %v3974_v63, %v3974_v63 }
 0x20a   : > { %4152 = vst.msk [vmem:[%s6693_s11 + $0x20] sm:$0xf] %vm4143_vm7, %v4677_v21  ;;  %v4678_v59 = vpack.c.bf16 %v3972_v6, %v3972_v6  ;;  %v5277_v10 = vpop.f32.mrb[12].mxu0 }
 0x20b   : > { %4155 = vst.msk [vmem:[%s6693_s11 + $0x2c] sm:$0xf] %vm4143_vm7, %v4680_v11  ;;  %v5319_v49 = vadd.f32 %v5277_v10, %v6667_v0  ;;  %v3825_v8 = vpop.f32.mrb[13].mxu0 }
 0x20c   : > { %4153 = vst.msk [vmem:[%s6693_s11 + $0x24] sm:$0xf] %vm4143_vm7, %v4678_v59  ;;  %v5320_v47 = vadd.f32 %v3825_v8, %v6669_v40  ;;  %v5278_v34 = vpop.f32.mrb[14].mxu0 }
 0x20d   : > { %v3977_v16 = vadd.f32 %v5319_v49, %v6687_v62  ;;  %v5321_v53 = vadd.f32 %v5278_v34, %v6671_v7  ;;  %v3828_v18 = vpop.f32.mrb[15].mxu0 }
 0x20e   : > { %v3975_v17 = vadd.f32 %v5320_v47, %v6687_v62  ;;  %v5322_v57 = vadd.f32 %v3828_v18, %v6673_v23 }
 0x20f   : > { %v4683_v0 = vpack.c.bf16 %v3977_v16, %v3977_v16  ;;  %v3978_v37 = vadd.f32 %v5321_v53, %v6687_v62 }
 0x210   : > { %v5109_v28 = vpop.f32.mrb[20].mxu1  ;;  %v4681_v22 = vpack.c.bf16 %v3975_v17, %v3975_v17  ;;  %v3976_v40 = vadd.f32 %v5322_v57, %v6687_v62 }
 0x211   : > { %v2231_v61 = vpop.f32.mrb[21].mxu1  ;;  %4158 = vst.msk [vmem:[%s6693_s11 + $0x38] sm:$0xf] %vm4143_vm7, %v4683_v0  ;;  %v4684_v30 = vpack.c.bf16 %v3978_v37, %v3978_v37 }
 0x212   : > { %v5110_v15 = vpop.f32.mrb[22].mxu1  ;;  %4156 = vst.msk [vmem:[%s6693_s11 + $0x30] sm:$0xf] %vm4143_vm7, %v4681_v22  ;;  %v4682_v35 = vpack.c.bf16 %v3976_v40, %v3976_v40  ;;  %v5281_v29 = vpop.f32.mrb[16].mxu0 }
 0x213   : > { %v2234_v7 = vpop.f32.mrb[23].mxu1  ;;  %4159 = vst.msk [vmem:[%s6693_s11 + $0x3c] sm:$0xf] %vm4143_vm7, %v4684_v30  ;;  %v5323_v23 = vadd.f32 %v5281_v29, %v6675_v4  ;;  %v3841_v39 = vpop.f32.mrb[17].mxu0 }
 0x214   : > { %4157 = vst.msk [vmem:[%s6693_s11 + $0x34] sm:$0xf] %vm4143_vm7, %v4682_v35  ;;  %v5324_v45 = vadd.f32 %v3841_v39, %v6677_v9  ;;  %v5282_v20 = vpop.f32.mrb[18].mxu0 }
 0x215   : > { %v3981_v36 = vadd.f32 %v5323_v23, %v6687_v62  ;;  %v5325_v5 = vadd.f32 %v5282_v20, %v6679_v3  ;;  %v3844_v25 = vpop.f32.mrb[19].mxu0 }
 0x216   : > { %v3979_v58 = vadd.f32 %v5324_v45, %v6687_v62  ;;  %v5326_v1 = vadd.f32 %v3844_v25, %v6681_v27 }
 0x217   : > { %v4687_v4 = vpack.c.bf16 %v3981_v36, %v3981_v36  ;;  %v3982_v42 = vadd.f32 %v5325_v5, %v6687_v62 }
 0x218   : > { %v5113_v38 = vpop.f32.mrb[24].mxu1  ;;  %v4685_v41 = vpack.c.bf16 %v3979_v58, %v3979_v58  ;;  %v3980_v9 = vadd.f32 %v5326_v1, %v6687_v62 }
 0x219   : > { %v2247_v14 = vpop.f32.mrb[25].mxu1  ;;  %4162 = vst.msk [vmem:[%s6693_s11 + $0x48] sm:$0xf] %vm4143_vm7, %v4687_v4  ;;  %v4688_v31 = vpack.c.bf16 %v3982_v42, %v3982_v42 }
 0x21a   : > { %v5114_v19 = vpop.f32.mrb[26].mxu1  ;;  %4160 = vst.msk [vmem:[%s6693_s11 + $0x40] sm:$0xf] %vm4143_vm7, %v4685_v41  ;;  %v4686_v55 = vpack.c.bf16 %v3980_v9, %v3980_v9  ;;  %v5285_v46 = vpop.f32.mrb[20].mxu0 }
 0x21b   : > { %v2250_v3 = vpop.f32.mrb[27].mxu1  ;;  %4163 = vst.msk [vmem:[%s6693_s11 + $0x4c] sm:$0xf] %vm4143_vm7, %v4688_v31  ;;  %v5327_v27 = vadd.f32 %v5285_v46, %v5109_v28  ;;  %v3857_v52 = vpop.f32.mrb[21].mxu0 }
 0x21c   : > { %4161 = vst.msk [vmem:[%s6693_s11 + $0x44] sm:$0xf] %vm4143_vm7, %v4686_v55  ;;  %v5328_v50 = vadd.f32 %v3857_v52, %v2231_v61  ;;  %v5286_v54 = vpop.f32.mrb[22].mxu0 }
 0x21d   : > { %v3985_v44 = vadd.f32 %v5327_v27, %v6687_v62  ;;  %v5329_v24 = vadd.f32 %v5286_v54, %v5110_v15  ;;  %v3860_v48 = vpop.f32.mrb[23].mxu0 }
 0x21e   : > { %v3983_v12 = vadd.f32 %v5328_v50, %v6687_v62  ;;  %v5330_v56 = vadd.f32 %v3860_v48, %v2234_v7 }
 0x21f   : > { %v4691_v26 = vpack.c.bf16 %v3985_v44, %v3985_v44  ;;  %v3986_v33 = vadd.f32 %v5329_v24, %v6687_v62 }
 0x220   : > { %v5117_v43 = vpop.f32.mrb[28].mxu1  ;;  %v4689_v32 = vpack.c.bf16 %v3983_v12, %v3983_v12  ;;  %v3984_v2 = vadd.f32 %v5330_v56, %v6687_v62 }
 0x221   : > { %v2263_v13 = vpop.f32.mrb[29].mxu1  ;;  %4166 = vst.msk [vmem:[%s6693_s11 + $0x58] sm:$0xf] %vm4143_vm7, %v4691_v26  ;;  %v4692_v60 = vpack.c.bf16 %v3986_v33, %v3986_v33 }
 0x222   : > { %v5118_v51 = vpop.f32.mrb[30].mxu1  ;;  %4164 = vst.msk [vmem:[%s6693_s11 + $0x50] sm:$0xf] %vm4143_vm7, %v4689_v32  ;;  %v4690_v21 = vpack.c.bf16 %v3984_v2, %v3984_v2  ;;  %v5289_v6 = vpop.f32.mrb[24].mxu0 }
 0x223   : > { %v2266_v63 = vpop.f32.mrb[31].mxu1  ;;  %4167 = vst.msk [vmem:[%s6693_s11 + $0x5c] sm:$0xf] %vm4143_vm7, %v4692_v60  ;;  %v5331_v11 = vadd.f32 %v5289_v6, %v5113_v38  ;;  %v3873_v59 = vpop.f32.mrb[25].mxu0 }
 0x224   : > { %4165 = vst.msk [vmem:[%s6693_s11 + $0x54] sm:$0xf] %vm4143_vm7, %v4690_v21  ;;  %v5332_v10 = vadd.f32 %v3873_v59, %v2247_v14  ;;  %v5290_v49 = vpop.f32.mrb[26].mxu0 }
 0x225   : > { %v3989_v8 = vadd.f32 %v5331_v11, %v6687_v62  ;;  %v5333_v47 = vadd.f32 %v5290_v49, %v5114_v19  ;;  %v3876_v34 = vpop.f32.mrb[27].mxu0 }
 0x226   : > { %v3987_v16 = vadd.f32 %v5332_v10, %v6687_v62  ;;  %v5334_v53 = vadd.f32 %v3876_v34, %v2250_v3 }
 0x227   : > { %v4695_v17 = vpack.c.bf16 %v3989_v8, %v3989_v8  ;;  %v3990_v57 = vadd.f32 %v5333_v47, %v6687_v62 }
 0x228   : > { %v5121_v18 = vpop.f32.mrb[32].mxu1  ;;  %v4693_v0 = vpack.c.bf16 %v3987_v16, %v3987_v16  ;;  %v3988_v37 = vadd.f32 %v5334_v53, %v6687_v62 }
 0x229   : > { %v2279_v28 = vpop.f32.mrb[33].mxu1  ;;  %4170 = vst.msk [vmem:[%s6693_s11 + $0x68] sm:$0xf] %vm4143_vm7, %v4695_v17  ;;  %v4696_v22 = vpack.c.bf16 %v3990_v57, %v3990_v57 }
 0x22a   : > { %v5122_v61 = vpop.f32.mrb[34].mxu1  ;;  %4168 = vst.msk [vmem:[%s6693_s11 + $0x60] sm:$0xf] %vm4143_vm7, %v4693_v0  ;;  %v4694_v15 = vpack.c.bf16 %v3988_v37, %v3988_v37  ;;  %v5293_v30 = vpop.f32.mrb[28].mxu0 }
 0x22b   : > { %v2282_v40 = vpop.f32.mrb[35].mxu1  ;;  %4171 = vst.msk [vmem:[%s6693_s11 + $0x6c] sm:$0xf] %vm4143_vm7, %v4696_v22  ;;  %v5335_v7 = vadd.f32 %v5293_v30, %v5117_v43  ;;  %v3889_v35 = vpop.f32.mrb[29].mxu0 }
 0x22c   : > { %4169 = vst.msk [vmem:[%s6693_s11 + $0x64] sm:$0xf] %vm4143_vm7, %v4694_v15  ;;  %v5336_v29 = vadd.f32 %v3889_v35, %v2263_v13  ;;  %v5294_v23 = vpop.f32.mrb[30].mxu0 }
 0x22d   : > { %v3993_v39 = vadd.f32 %v5335_v7, %v6687_v62  ;;  %v5337_v45 = vadd.f32 %v5294_v23, %v5118_v51  ;;  %v3892_v20 = vpop.f32.mrb[31].mxu0 }
 0x22e   : > { %v3991_v36 = vadd.f32 %v5336_v29, %v6687_v62  ;;  %v5338_v5 = vadd.f32 %v3892_v20, %v2266_v63 }
 0x22f   : > { %v4699_v25 = vpack.c.bf16 %v3993_v39, %v3993_v39  ;;  %v3994_v58 = vadd.f32 %v5337_v45, %v6687_v62 }
 0x230   : > { %v4697_v1 = vpack.c.bf16 %v3991_v36, %v3991_v36  ;;  %v3992_v38 = vadd.f32 %v5338_v5, %v6687_v62 }
 0x231   : > { %4174 = vst.msk [vmem:[%s6693_s11 + $0x78] sm:$0xf] %vm4143_vm7, %v4699_v25  ;;  %v4700_v4 = vpack.c.bf16 %v3994_v58, %v3994_v58 }
 0x232   : > { %4172 = vst.msk [vmem:[%s6693_s11 + $0x70] sm:$0xf] %vm4143_vm7, %v4697_v1  ;;  %v4698_v42 = vpack.c.bf16 %v3992_v38, %v3992_v38  ;;  %v5297_v14 = vpop.f32.mrb[32].mxu0 }
 0x233   : > { %4175 = vst.msk [vmem:[%s6693_s11 + $0x7c] sm:$0xf] %vm4143_vm7, %v4700_v4  ;;  %v5339_v41 = vadd.f32 %v5297_v14, %v5121_v18  ;;  %v3905_v9 = vpop.f32.mrb[33].mxu0 }
 0x234   : > { %4173 = vst.msk [vmem:[%s6693_s11 + $0x74] sm:$0xf] %vm4143_vm7, %v4698_v42  ;;  %v5340_v19 = vadd.f32 %v3905_v9, %v2279_v28  ;;  %v5298_v31 = vpop.f32.mrb[34].mxu0 }
 0x235   : > { %v3997_v3 = vadd.f32 %v5339_v41, %v6687_v62  ;;  %v5341_v55 = vadd.f32 %v5298_v31, %v5122_v61  ;;  %v3908_v46 = vpop.f32.mrb[35].mxu0 }
 0x236   : > { %v3995_v27 = vadd.f32 %v5340_v19, %v6687_v62  ;;  %v5342_v52 = vadd.f32 %v3908_v46, %v2282_v40 }
 0x237   : > { %v4703_v50 = vpack.c.bf16 %v3997_v3, %v3997_v3  ;;  %v3998_v54 = vadd.f32 %v5341_v55, %v6687_v62 }
 0x238   : > { %v4701_v44 = vpack.c.bf16 %v3995_v27, %v3995_v27  ;;  %v3996_v24 = vadd.f32 %v5342_v52, %v6687_v62 }
 0x239   : > { %4178 = vst.msk [vmem:[%s6693_s11 + $0x88] sm:$0xf] %vm4143_vm7, %v4703_v50  ;;  %v4704_v48 = vpack.c.bf16 %v3998_v54, %v3998_v54 }
 0x23a   : > { %4176 = vst.msk [vmem:[%s6693_s11 + $0x80] sm:$0xf] %vm4143_vm7, %v4701_v44  ;;  %v4702_v12 = vpack.c.bf16 %v3996_v24, %v3996_v24 }
 0x23b   : > { %4179 = vst.msk [vmem:[%s6693_s11 + $0x8c] sm:$0xf] %vm4143_vm7, %v4704_v48 }
 0x23c   : > { %4177 = vst.msk [vmem:[%s6693_s11 + $0x84] sm:$0xf] %vm4143_vm7, %v4702_v12 }
 0x23d PF: > { %s13_s14 = sadd.s32 1, %s5760_s14   ;;  %s6823_s12 = smov %s5756_s13 }
 0x23e   : > { %p10_p5 = scmp.ge.s32.totalorder %s13_s14, 6   ;;  %s6824_s13 = smov %s6826_s15 }
 0x240   :  { %12 = sbr.rel (!%p10_p5) target bundleno = 2 (0x2), region = 76 }

// kernel: vgg_distance.15
= control target key start
LH: loop header
LB: loop body
LE: loop exit
PB: predicated region body
PF: predicated region fallthrough
CT: control target
= control target key end

     0   :  { %s2656_s12 = smov 0   ;;  %s2658_s13 = smov 0   ;;  %s3200_s0 = inlined_call_operand.vmem [shape: bf16[4,110,64], index: 0, kind: input, shape index: {}]   ;;  %s3201_s1 = inlined_call_operand.vmem [shape: bf16[9,64,128], index: 1, kind: input, shape index: {}]   ;;  %s3202_s2 = inlined_call_operand.vmem [shape: f32[1,128], index: 2, kind: input, shape index: {}]   ;;  %s3203_s3 = inlined_call_operand.vmem [shape: bf16[4,80,128], index: 3, kind: output, shape index: {}]  }
   0x1   :  { %s2660_s14 = smov 0  }
   0x2 LB: > { %s32_s15 = sadd.s32 1, %s2628_s13  ;;  %p1959_p0 = scmp.ge.s32.totalorder %s2632_s14, 1  ;;  %s2632_s14 = sphi %s2660_s14, %s13_s14   ;;  %s2628_s13 = sphi %s2658_s13, %s3205_s13   ;;  %s2624_s12 = sphi %s2656_s12, %s3204_s12  }
   0x3   : > { %p34_p1 = scmp.ge.s32.totalorder %s32_s15, 4  ;;  %p187_p2 = scmp.lt.s32.totalorder %s2632_s14, 5 }
   0x5   : > { %s3207_s15 = smov (%p34_p1, %s32_s15), 0  ;;  %p188_p3 = pnand %p1959_p0, %p187_p2 }
   0x6   : > { %v2551_v0 = vld [vmem:[%s3201_s1 + $0x20] sm:$0xff] (!%p188_p3)   ;;  %v2634_v1 = vmov (!%p188_p3), 0.0   ;;  %v2552_v2 = vld [vmem:[%s3201_s1 + $0x28] sm:$0xff] (!%p188_p3)   ;;  %p228_p4 = scmp.lt.s32.totalorder (!%p188_p3), %s2624_s12, 3  ;;  %vm2635_vm0 = vmmov (!%p188_p3), 0   ;;  %v2553_v3 = vld [vmem:[%s3201_s1 + $0x30] sm:$0xff] (!%p188_p3)  }
   0x7   : > { %191 = sbr.rel (%p188_p3) target bundleno = 427 (0x1ab), region = 32  ;;  %2515 = vmatprep.subr.bf16.mxu1 (!%p188_p3), %v2634_v1  ;;  %2263 = vmatprep.subr.bf16.mxu0 (!%p188_p3), %v2634_v1  ;;  %v2554_v4 = vld [vmem:[%s3201_s1 + $0x38] sm:$0xff] (!%p188_p3)   ;;  %vm313_vm1 = vsmask.f32 (!%p188_p3), 7424  ;;  %vm382_vm2 = vcmask (!%p188_p3), 523264   ;;  %v2557_v21 = vld [vmem:[%s3201_s1] sm:$0xff] (!%p188_p3)  }
   0x8   : > { %2519 = vmatpush3.bf16.msra.mxu1 (!%p188_p3), %v2551_v0  ;;  %2264 = vmatpush3.bf16.msra.mxu0 (!%p188_p3), %v2551_v0  ;;  %v2562_v28 = vld [vmem:[%s3201_s1 + $0x40] sm:$0xff] (!%p188_p3)   ;;  %v2558_v31 = vld [vmem:[%s3201_s1 + $0x8] sm:$0xff] (!%p188_p3)   ;;  %v2563_v35 = vld [vmem:[%s3201_s1 + $0x10] sm:$0xff] (!%p188_p3)   ;;  %vm591_vm3 = vcmask (!%p188_p3), 1046528   ;;  %vm919_vm4 = vsmask.f32 (!%p188_p3), 6400 }
   0x9   : > { %2516 = vmatprep.subr.bf16.mxu1 (!%p188_p3), %v2634_v1  ;;  %2265 = vmatprep.subr.bf16.mxu0 (!%p188_p3), %v2634_v1  ;;  %v2564_v36 = vld [vmem:[%s3201_s1 + $0x48] sm:$0xff] (!%p188_p3)   ;;  %v2566_v43 = vld [vmem:[%s3201_s1 + $0x50] sm:$0xff] (!%p188_p3)   ;;  %v2567_v47 = vld [vmem:[%s3201_s1 + $0x18] sm:$0xff] (!%p188_p3)   ;;  %vm1108_vm5 = vcmask (!%p188_p3), 1045504   ;;  %vm1625_vm6 = vcmask (!%p188_p3), 1044480  }
   0xa   : > { %2279 = vmatprep.mubr.msk.bf16.mxu1 (!%p188_p3), %vm2635_vm0, %v2634_v1  ;;  %2271 = vmatprep.mubr.msk.bf16.mxu0 (!%p188_p3), %vm2635_vm0, %v2634_v1  ;;  %v2568_v48 = vld [vmem:[%s3201_s1 + $0x58] sm:$0xff] (!%p188_p3)   ;;  %v2571_v53 = vld [vmem:[%s3201_s1 + $0x80] sm:$0xff] (!%p188_p3)   ;;  %v2573_v55 = vld [vmem:[%s3201_s1 + $0x88] sm:$0xff] (!%p188_p3)   ;;  %vm1436_vm7 = vsmask.f32 (!%p188_p3), 5376 }
   0xb   : > { %v2570_v56 = vld [vmem:[%s3201_s1 + $0x60] sm:$0xff] (!%p188_p3)   ;;  %v2575_v60 = vld [vmem:[%s3201_s1 + $0x90] sm:$0xff] (!%p188_p3)   ;;  %v2572_v0 = vld [vmem:[%s3201_s1 + $0x68] sm:$0xff] (!%p188_p3)  }
   0xc   : > { %2520 = vmatpush3.bf16.msra.mxu1 (!%p188_p3), %v2552_v2  ;;  %2266 = vmatpush3.bf16.msra.mxu0 (!%p188_p3), %v2552_v2 }
   0xd   : > { %2517 = vmatprep.subr.bf16.mxu1 (!%p188_p3), %v2634_v1  ;;  %2267 = vmatprep.subr.bf16.mxu0 (!%p188_p3), %v2634_v1 }
   0xe   : > { %s3209_s12 = smov (!%p228_p4, %s2624_s12), 3 }
   0xf   : > { %s2523_s22 = smul.u32 56, %s3209_s12 }
  0x10   : > { %2521 = vmatpush3.bf16.msra.mxu1 %v2553_v3  ;;  %2268 = vmatpush3.bf16.msra.mxu0 %v2553_v3  ;;  %s2524_s26 = smul.u32 40, %s3209_s12 }
  0x11   : > { %s2702_s27 = scalar_lea.vmem %s3200_s0, %s2523_s22  ;;  %2518 = vmatprep.subr.bf16.mxu1 %v2634_v1  ;;  %2269 = vmatprep.subr.bf16.mxu0 %v2634_v1 }
  0x12   : > { %v2705_v5 = vld [vmem:[%s2702_s27 + $0x10] sm:$0xff]   ;;  %v2708_v6 = vld [vmem:[%s2702_s27 + $0x18] sm:$0xff]   ;;  %v257_v7 = vld [vmem:[%s2702_s27] sm:$0xf]  ;;  %s3169_s30 = scalar_lea.vmem %s3203_s3, %s2524_s26 }
  0x13   : > { %v2714_v8 = vld [vmem:[%s2702_s27 + $0x4] sm:$0xf]  ;;  %v330_v9 = vshll.u32 %v2705_v5, 16  ;;  %v334_v10 = vshrl.u32 %v2705_v5, 16  ;;  %v338_v11 = vshll.u32 %v2708_v6, 16  ;;  %v2723_v13 = vld [vmem:[%s2702_s27 + $0x8] sm:$0xff]  }
  0x14   : > { %v2720_v12 = vcombine.low %v257_v7, %v2714_v8  ;;  %v2726_v14 = vld [vmem:[%s2702_s27 + $0x20] sm:$0xff]   ;;  %2522 = vmatpush3.bf16.msra.mxu1 %v2554_v4  ;;  %2270 = vmatpush3.bf16.msra.mxu0 %v2554_v4  ;;  %v322_v19 = vshll.u32 %v2723_v13, 16  ;;  %v342_v23 = vshrl.u32 %v2708_v6, 16  ;;  %v326_v29 = vshrl.u32 %v2723_v13, 16  ;;  %v2577_v7 = vld [vmem:[%s3201_s1 + $0x98] sm:$0xff]  }
  0x15   : > { %v332_v15 = vrot.slane %v330_v9, 1  ;;  %v340_v16 = vrot.slane %v338_v11, 1  ;;  %2291 = vmatprep.subr.bf16.mxu1 %v2634_v1  ;;  %2319 = vmatprep.subr.bf16.mxu0 %v2634_v1  ;;  %v346_v24 = vshll.u32 %v2726_v14, 16  ;;  %v2745_v30 = vld [vmem:[%s2702_s27 + $0x28] ss:$0 sps:$4 sm:$0x11]  }
  0x16   : > { %v315_v17 = vshrl.u32 %v2720_v12, 16  ;;  %v317_v18 = vshll.u32 %v2720_v12, 16  ;;  %v324_v25 = vrot.slane %v322_v19, 1  ;;  %v578_v38 = vld [vmem:[%s2702_s27] sm:$0xe]  ;;  %v350_v40 = vshrl.u32 %v2726_v14, 16 }
  0x17   : > { %v336_v20 = vor.u32 %v334_v10, %v332_v15  ;;  %v344_v33 = vor.u32 %v342_v23, %v340_v16  ;;  %v348_v34 = vrot.slane %v346_v24, 1  ;;  %v354_v41 = vshll.u32 %v2745_v30, 16  ;;  %v2812_v57 = vld [vmem:[%s2702_s27 + $0x1c] sm:$0xff]   ;;  %v2815_v58 = vld [vmem:[%s2702_s27 + $0x24] sm:$0xff]   ;;  %v2574_v9 = vld [vmem:[%s3201_s1 + $0x70] sm:$0xff]  }
  0x18   : > { %v319_v22 = vrot.slane %v317_v18, 1  ;;  %v328_v37 = vor.u32 %v326_v29, %v324_v25  ;;  %v2002_v44 = vcombine.low %v578_v38, %v2714_v8  ;;  %v593_v50 = vrot.slane %v2723_v13, 1  ;;  %v2590_v63 = vld [vmem:[%s2702_s27 + $0x2c] ss:$0 sps:$4 sm:$0x11]  }
  0x19   : > { %v341_v26 = vsel %vm313_vm1, %v336_v20, %v340_v16  ;;  %v349_v39 = vsel %vm313_vm1, %v344_v33, %v348_v34  ;;  %v352_v45 = vor.u32 %v350_v40, %v348_v34  ;;  %v356_v46 = vrot.slane %v354_v41, 1  ;;  %v2875_v18 = vld [vmem:[%s2702_s27 + $0xc] sm:$0xff]  }
  0x1a   : > { %v320_v27 = vor.u32 %v319_v22, %v315_v17  ;;  %2280 = vmatmul.mubr.msk.bf16.vlgmr.msra.gmra.mrb[0].mxu1 %vm382_vm2, %v341_v26  ;;  %v333_v42 = vsel %vm313_vm1, %v328_v37, %v332_v15  ;;  %v592_v49 = vrot.slane %v2002_v44, 1  ;;  %v595_v54 = vrot.slane %v2705_v5, 1  ;;  %v2869_v15 = vld [vmem:[%s2702_s27 + $0x8] sm:$0xf] }
  0x1b   : > { %2292 = vmatpush3.bf16.msra.mxu1 %v2557_v21  ;;  %2283 = vmatprep.mubr.msk.bf16.mxu1 %vm2635_vm0, %v2634_v1  ;;  %v357_v51 = vsel %vm313_vm1, %v352_v45, %v356_v46  ;;  %v778_v61 = vrot.slane %v2812_v57, 1  ;;  %v780_v62 = vrot.slane %v2815_v58, 1  ;;  %v782_v3 = vrot.slane %v2590_v63, 1  ;;  %v2587_v46 = vld [vmem:[%s3201_s1 + $0xd0] sm:$0xff]  }
  0x1c   : > { %v325_v32 = vsel %vm313_vm1, %v320_v27, %v324_v25  ;;  %2293 = vmatprep.subr.bf16.mxu1 %v2634_v1  ;;  %v594_v52 = vsel %vm591_vm3, %v592_v49, %v593_v50  ;;  %v596_v59 = vsel %vm591_vm3, %v593_v50, %v595_v54  ;;  %v597_v4 = vrot.slane %v2708_v6, 1 }
  0x1d   : > { %2272 = vmatmul.mubr.msk.bf16.vlgmr.msra.gmra.mrb[0].mxu0 %vm382_vm2, %v325_v32  ;;  %v2835_v2 = vsel %vm591_vm3, %v778_v61, %v780_v62  ;;  %v2847_v8 = vsel %vm591_vm3, %v780_v62, %v782_v3  ;;  %v599_v11 = vrot.slane %v2726_v14, 1  ;;  %v601_v19 = vrot.slane %v2745_v30, 1  ;;  %v2589_v62 = vld [vmem:[%s3201_s1 + $0xb8] sm:$0xff]  }
  0x1e   : > { %2320 = vmatpush3.bf16.msra.mxu0 %v2562_v28  ;;  %2275 = vmatprep.mubr.msk.bf16.mxu0 %vm2635_vm0, %v2634_v1  ;;  %v598_v10 = vsel %vm591_vm3, %v595_v54, %v597_v4  ;;  %v929_v22 = vshrl.u32 %v2875_v18, 16  ;;  %v932_v23 = vshll.u32 %v2875_v18, 16  ;;  %v2889_v28 = vld [vmem:[%s2702_s27 + $0x14] sm:$0xff]   ;;  %v774_v37 = vrot.slane %v2875_v18, 1 }
  0x1f   : > { %2321 = vmatprep.subr.bf16.mxu0 %v2634_v1  ;;  %2294 = vmatpush3.bf16.msra.mxu1 %v2558_v31  ;;  %v600_v16 = vsel %vm591_vm3, %v597_v4, %v599_v11  ;;  %v602_v24 = vsel %vm591_vm3, %v599_v11, %v601_v19  ;;  %v938_v31 = vshrl.u32 %v2889_v28, 16  ;;  %v941_v32 = vshll.u32 %v2889_v28, 16  ;;  %v2586_v54 = vld [vmem:[%s3201_s1 + $0xb0] sm:$0xff]   ;;  %v1095_v19 = vld [vmem:[%s2702_s27 + $0x4] sm:$0xc] }
  0x20   : > { %2295 = vmatprep.subr.bf16.mxu1 %v2634_v1  ;;  %v931_v26 = vrot.slane %v929_v22, 1  ;;  %v934_v27 = vrot.slane %v932_v23, 2  ;;  %v947_v40 = vshrl.u32 %v2812_v57, 16  ;;  %v956_v50 = vshrl.u32 %v2815_v58, 16 }
  0x21   : > { %v940_v34 = vrot.slane %v938_v31, 1  ;;  %v2061_v22 = vcombine.low %v1095_v19, %v2869_v15  ;;  %v1112_v31 = vrot.slane %v2889_v28, 2 }
  0x22   : > { %2322 = vmatpush3.bf16.msra.mxu0 %v2564_v36  ;;  %2284 = vmatmul.mubr.msk.bf16.gmra.mrb[4].mxu1 %vm382_vm2, %v349_v39  ;;  %v935_v30 = vor.u32 %v934_v27, %v931_v26  ;;  %v2584_v39 = vld [vmem:[%s3201_s1 + $0xc8] sm:$0xff]   ;;  %v949_v44 = vrot.slane %v947_v40, 1 }
  0x23   : > { %2323 = vmatprep.subr.bf16.mxu0 %v2634_v1  ;;  %2296 = vmatpush3.bf16.msra.mxu1 %v2563_v35  ;;  %v943_v35 = vrot.slane %v941_v32, 2  ;;  %v2600_v26 = vld [vmem:[%s3201_s1 + $0x108] sm:$0xff]  }
  0x24   : > { %2287 = vmatprep.mubr.msk.bf16.mxu1 %vm2635_vm0, %v2634_v1  ;;  %2297 = vmatprep.subr.bf16.mxu1 %v2634_v1  ;;  %v2599_v32 = vld [vmem:[%s3201_s1 + $0xe8] sm:$0xff]  }
  0x25   : > { %2276 = vmatmul.mubr.msk.bf16.gmra.mrb[4].mxu0 %vm382_vm2, %v333_v42  ;;  %v944_v38 = vor.u32 %v943_v35, %v940_v34  ;;  %v2580_v42 = vld [vmem:[%s3201_s1 + $0xa0] sm:$0xff]   ;;  %v2602_v34 = vld [vmem:[%s3201_s1 + $0xf0] sm:$0xff]  }
  0x26   : > { %2324 = vmatpush3.bf16.msra.mxu0 %v2566_v43  ;;  %2327 = vmatprep.mubr.msk.bf16.mxu0 %vm2635_vm0, %v2634_v1 }
  0x27   : > { %2325 = vmatprep.subr.bf16.mxu0 %v2634_v1  ;;  %2298 = vmatpush3.bf16.msra.mxu1 %v2567_v47  ;;  %v945_v43 = vsel %vm919_vm4, %v935_v30, %v944_v38  ;;  %v776_v47 = vrot.slane %v2889_v28, 1 }
  0x28   : > { %2347 = vmatprep.subr.bf16.mxu1 %v2634_v1 }
  0x29   : > { %v779_v4 = vsel %vm591_vm3, %v776_v47, %v778_v61  ;;  %v1242_v61 = vld [vmem:[%s2702_s27 + $0x8] sm:$0xc] }
  0x2a   : > { %2326 = vmatpush3.bf16.msra.mxu0 %v2568_v48  ;;  %2288 = vmatmul.mubr.msk.bf16.gmra.mrb[8].mxu1 %vm382_vm2, %v357_v51  ;;  %v2583_v48 = vld [vmem:[%s3201_s1 + $0xa8] sm:$0xff]   ;;  %v959_v51 = vshll.u32 %v2815_v58, 16 }
  0x2b   : > { %2375 = vmatprep.subr.bf16.mxu0 %v2634_v1  ;;  %2299 = vmatprep.mubr.msk.bf16.mxu1 %vm2635_vm0, %v2634_v1 }
  0x2d   : > { %2328 = vmatmul.mubr.msk.bf16.vlgmr.msra.gmra.mrb[8].mxu0 %vm382_vm2, %v594_v52  ;;  %v2592_v52 = vld [vmem:[%s3201_s1 + $0xd8] sm:$0xff]  }
  0x2e   : > { %2376 = vmatpush3.bf16.msra.mxu0 %v2571_v53  ;;  %2331 = vmatprep.mubr.msk.bf16.mxu0 %vm2635_vm0, %v2634_v1  ;;  %v777_v53 = vsel %vm591_vm3, %v774_v37, %v776_v47 }
  0x2f   : > { %2377 = vmatprep.subr.bf16.mxu0 %v2634_v1 }
  0x32   : > { %2378 = vmatpush3.bf16.msra.mxu0 %v2573_v55  ;;  %2300 = vmatmul.mubr.msk.bf16.vlgmr.msra.gmra.mrb[12].mxu1 %vm382_vm2, %v2720_v12  ;;  %v2576_v12 = vld [vmem:[%s3201_s1 + $0x78] sm:$0xff]  }
  0x33   : > { %2379 = vmatprep.subr.bf16.mxu0 %v2634_v1  ;;  %2348 = vmatpush3.bf16.msra.mxu1 %v2570_v56  ;;  %v958_v56 = vrot.slane %v956_v50, 1 }
  0x34   : > { %2303 = vmatprep.mubr.msk.bf16.mxu1 %vm2635_vm0, %v2634_v1  ;;  %2349 = vmatprep.subr.bf16.mxu1 %v2634_v1 }
  0x35   : > { %2332 = vmatmul.mubr.msk.bf16.gmra.mrb[12].mxu0 %vm382_vm2, %v596_v59  ;;  %v961_v59 = vrot.slane %v959_v51, 2 }
  0x36   : > { %2335 = vmatprep.mubr.msk.bf16.mxu0 %vm2635_vm0, %v2634_v1  ;;  %2380 = vmatpush3.bf16.msra.mxu0 %v2575_v60  ;;  %v2951_v60 = vld [vmem:[%s2702_s27 + $0x2c] ss:$0 sps:$4 sm:$0x33]  }
  0x37   : > { %2381 = vmatprep.subr.bf16.mxu0 %v2634_v1  ;;  %2350 = vmatpush3.bf16.msra.mxu1 %v2572_v0  ;;  %v962_v63 = vor.u32 %v961_v59, %v958_v56  ;;  %v965_v0 = vshrl.u32 %v2951_v60, 16  ;;  %v968_v3 = vshll.u32 %v2951_v60, 16  ;;  %v1118_v47 = vrot.slane %v2951_v60, 2 }
  0x38   : > { %2351 = vmatprep.subr.bf16.mxu1 %v2634_v1 }
  0x3a   : > { %2382 = vmatpush3.bf16.msra.mxu0 %v2577_v7  ;;  %2304 = vmatmul.mubr.msk.bf16.gmra.mrb[16].mxu1 %vm382_vm2, %v2723_v13  ;;  %v725_v13 = vld [vmem:[%s2702_s27 + $0x4] sm:$0xe] }
  0x3b   : > { %2431 = vmatprep.subr.bf16.mxu0 %v2634_v1  ;;  %2307 = vmatprep.mubr.msk.bf16.mxu1 %vm2635_vm0, %v2634_v1  ;;  %v2020_v17 = vcombine.low %v725_v13, %v2869_v15 }
  0x3c   : > { %2352 = vmatpush3.bf16.msra.mxu1 %v2574_v9  ;;  %v967_v9 = vrot.slane %v965_v0, 1 }
  0x3d   : > { %2336 = vmatmul.mubr.msk.bf16.gmra.mrb[16].mxu0 %vm382_vm2, %v598_v10  ;;  %2353 = vmatprep.subr.bf16.mxu1 %v2634_v1  ;;  %v921_v20 = vshrl.u32 %v2020_v17, 16  ;;  %v924_v21 = vshll.u32 %v2020_v17, 16  ;;  %v773_v36 = vrot.slane %v2020_v17, 1  ;;  %v970_v10 = vrot.slane %v968_v3, 2  ;;  %v2986_v17 = vld [vmem:[%s2702_s27 + $0x10] sm:$0xff]  }
  0x3e   : > { %2339 = vmatprep.mubr.msk.bf16.mxu0 %vm2635_vm0, %v2634_v1  ;;  %v1449_v50 = vshll.u32 %v2986_v17, 16 }
  0x3f   : > { %v923_v25 = vrot.slane %v921_v20, 1  ;;  %v775_v41 = vsel %vm591_vm3, %v773_v36, %v774_v37  ;;  %v971_v11 = vor.u32 %v970_v10, %v967_v9  ;;  %v3054_v36 = vld [vmem:[%s2702_s27 + $0x28] sm:$0xff]   ;;  %v1114_v37 = vrot.slane %v2812_v57, 2 }
  0x40   : > { %2354 = vmatpush3.bf16.msra.mxu1 %v2576_v12  ;;  %v2979_v12 = vld [vmem:[%s2702_s27 + $0xc] sm:$0xf]  ;;  %v1451_v59 = vrot.slane %v1449_v50, 3 }
  0x41   : > { %2403 = vmatprep.subr.bf16.mxu1 %v2634_v1  ;;  %v972_v13 = vsel %vm919_vm4, %v962_v63, %v971_v11  ;;  %v1115_v40 = vsel %vm1108_vm5, %v1112_v31, %v1114_v37 }
  0x42   : > { %2308 = vmatmul.mubr.msk.bf16.gmra.mrb[20].mxu1 %vm382_vm2, %v2705_v5  ;;  %v926_v5 = vrot.slane %v924_v21, 2  ;;  %v1291_v21 = vrot.slane %v2986_v17, 2 }
  0x43   : > { %2311 = vmatprep.mubr.msk.bf16.mxu1 %vm2635_vm0, %v2634_v1 }
  0x44   : > { %v927_v29 = vor.u32 %v926_v5, %v923_v25  ;;  %v1109_v25 = vrot.slane %v2061_v22, 2  ;;  %v1110_v5 = vrot.slane %v2875_v18, 2  ;;  %v2596_v18 = vld [vmem:[%s3201_s1 + $0xe0] sm:$0xff]  }
  0x45   : > { %2340 = vmatmul.mubr.msk.bf16.gmra.mrb[20].mxu0 %vm382_vm2, %v600_v16  ;;  %v2983_v16 = vcombine.low %v1242_v61, %v2979_v12 }
  0x46   : > { %2343 = vmatprep.mubr.msk.bf16.mxu0 %vm2635_vm0, %v2634_v1  ;;  %v936_v33 = vsel %vm919_vm4, %v927_v29, %v935_v30  ;;  %v3025_v29 = vld [vmem:[%s2702_s27 + $0x20] sm:$0xff]   ;;  %v2603_v30 = vld [vmem:[%s3201_s1 + $0x110] sm:$0xff]   ;;  %v1113_v28 = vsel %vm1108_vm5, %v1110_v5, %v1112_v31 }
  0x47   : > { %v1290_v20 = vrot.slane %v2983_v16, 2 }
  0x49   : > { %v1292_v23 = vsel %vm1108_vm5, %v1290_v20, %v1291_v21 }
  0x4a   : > { %2312 = vmatmul.mubr.msk.bf16.gmra.mrb[24].mxu1 %vm382_vm2, %v2708_v6  ;;  %v2581_v6 = vld [vmem:[%s3201_s1 + $0xc0] sm:$0xff]  }
  0x4b   : > { %2315 = vmatprep.mubr.msk.bf16.mxu1 %vm2635_vm0, %v2634_v1 }
  0x4d   : > { %2344 = vmatmul.mubr.msk.bf16.gmra.mrb[24].mxu0 %vm382_vm2, %v602_v24  ;;  %v3004_v24 = vld [vmem:[%s2702_s27 + $0x18] sm:$0xff]  }
  0x4e   : > { %2383 = vmatprep.mubr.msk.bf16.mxu0 %vm2635_vm0, %v2634_v1  ;;  %v1293_v15 = vrot.slane %v3004_v24, 2  ;;  %v1455_v0 = vshrl.u32 %v3004_v24, 16  ;;  %v1458_v3 = vshll.u32 %v3004_v24, 16 }
  0x50   : > { %v1294_v27 = vsel %vm1108_vm5, %v1291_v21, %v1293_v15  ;;  %v1457_v9 = vrot.slane %v1455_v0, 2  ;;  %v1460_v10 = vrot.slane %v1458_v3, 3 }
  0x52   : > { %2316 = vmatmul.mubr.msk.bf16.gmra.mrb[28].mxu1 %vm382_vm2, %v2726_v14  ;;  %v950_v14 = vshll.u32 %v2812_v57, 16  ;;  %v1461_v61 = vor.u32 %v1460_v10, %v1457_v9 }
  0x53   : > { %2355 = vmatprep.mubr.msk.bf16.mxu1 %vm2635_vm0, %v2634_v1 }
  0x54   : > { %v952_v45 = vrot.slane %v950_v14, 2  ;;  %v2606_v14 = vld [vmem:[%s2702_s27 + $0x30] ss:$0 sps:$4 sm:$0x33]  }
  0x55   : > { %2384 = vmatmul.mubr.msk.bf16.vlgmr.msra.gmra.mrb[28].mxu0 %vm382_vm2, %v936_v33  ;;  %v1295_v33 = vrot.slane %v3025_v29, 2 }
  0x56   : > { %2432 = vmatpush3.bf16.msra.mxu0 %v2581_v6  ;;  %2387 = vmatprep.mubr.msk.bf16.mxu0 %vm2635_vm0, %v2634_v1  ;;  %v953_v49 = vor.u32 %v952_v45, %v949_v44  ;;  %v2607_v6 = vld [vmem:[%s3201_s1 + $0x118] sm:$0xff]  }
  0x57   : > { %2433 = vmatprep.subr.bf16.mxu0 %v2634_v1  ;;  %v1296_v35 = vsel %vm1108_vm5, %v1293_v15, %v1295_v33 }
  0x58   : > { %v954_v55 = vsel %vm919_vm4, %v944_v38, %v953_v49  ;;  %v963_v7 = vsel %vm919_vm4, %v953_v49, %v962_v63  ;;  %v2605_v38 = vld [vmem:[%s3201_s1 + $0xf8] sm:$0xff]   ;;  %v1446_v49 = vshrl.u32 %v2986_v17, 16 }
  0x5a   : > { %2434 = vmatpush3.bf16.msra.mxu0 %v2584_v39  ;;  %2356 = vmatmul.mubr.msk.bf16.vlgmr.msra.gmra.mrb[32].mxu1 %vm382_vm2, %v775_v41  ;;  %v1297_v39 = vrot.slane %v3054_v36, 2  ;;  %v1116_v41 = vrot.slane %v2815_v58, 2  ;;  %v1438_v58 = vshrl.u32 %v2983_v16, 16  ;;  %v1448_v56 = vrot.slane %v1446_v49, 2 }
  0x5b   : > { %2435 = vmatprep.subr.bf16.mxu0 %v2634_v1  ;;  %2404 = vmatpush3.bf16.msra.mxu1 %v2580_v42  ;;  %v1299_v42 = vrot.slane %v2606_v14, 2 }
  0x5c   : > { %2359 = vmatprep.mubr.msk.bf16.mxu1 %vm2635_vm0, %v2634_v1  ;;  %2405 = vmatprep.subr.bf16.mxu1 %v2634_v1  ;;  %v1298_v57 = vsel %vm1108_vm5, %v1295_v33, %v1297_v39  ;;  %v1117_v44 = vsel %vm1108_vm5, %v1114_v37, %v1116_v41  ;;  %v1452_v63 = vor.u32 %v1451_v59, %v1448_v56 }
  0x5d   : > { %2388 = vmatmul.mubr.msk.bf16.gmra.mrb[32].mxu0 %vm382_vm2, %v945_v43  ;;  %v1612_v43 = vld [vmem:[%s2702_s27 + $0x8] sm:$0x8]  ;;  %v1300_v45 = vsel %vm1108_vm5, %v1297_v39, %v1299_v42 }
  0x5e   : > { %2391 = vmatprep.mubr.msk.bf16.mxu0 %vm2635_vm0, %v2634_v1  ;;  %2436 = vmatpush3.bf16.msra.mxu0 %v2587_v46  ;;  %v2120_v46 = vcombine.low %v1612_v43, %v2979_v12  ;;  %v1464_v12 = vshrl.u32 %v3025_v29, 16 }
  0x5f   : > { %2437 = vmatprep.subr.bf16.mxu0 %v2634_v1  ;;  %2406 = vmatpush3.bf16.msra.mxu1 %v2583_v48  ;;  %v1441_v48 = vshll.u32 %v2983_v16, 16  ;;  %v1631_v16 = vrot.slane %v3025_v29, 3 }
  0x60   : > { %2407 = vmatprep.subr.bf16.mxu1 %v2634_v1  ;;  %v1626_v51 = vrot.slane %v2120_v46, 3  ;;  %v1466_v19 = vrot.slane %v1464_v12, 2 }
  0x62   : > { %2438 = vmatpush3.bf16.msra.mxu0 %v2592_v52  ;;  %2360 = vmatmul.mubr.msk.bf16.gmra.mrb[36].mxu1 %vm382_vm2, %v777_v53  ;;  %v1627_v52 = vrot.slane %v2986_v17, 3  ;;  %v1119_v53 = vsel %vm1108_vm5, %v1116_v41, %v1118_v47  ;;  %v1462_v17 = vsel %vm1436_vm7, %v1452_v63, %v1461_v61 }
  0x63   : > { %2487 = vmatprep.subr.bf16.mxu0 %v2634_v1  ;;  %2363 = vmatprep.mubr.msk.bf16.mxu1 %vm2635_vm0, %v2634_v1 }
  0x64   : > { %2408 = vmatpush3.bf16.msra.mxu1 %v2586_v54  ;;  %v1440_v54 = vrot.slane %v1438_v58, 2  ;;  %v1628_v60 = vsel %vm1625_vm6, %v1626_v51, %v1627_v52 }
  0x65   : > { %2392 = vmatmul.mubr.msk.bf16.gmra.mrb[36].mxu0 %vm382_vm2, %v954_v55  ;;  %2409 = vmatprep.subr.bf16.mxu1 %v2634_v1  ;;  %v1443_v55 = vrot.slane %v1441_v48, 3 }
  0x66   : > { %2395 = vmatprep.mubr.msk.bf16.mxu0 %vm2635_vm0, %v2634_v1 }
  0x68   : > { %2410 = vmatpush3.bf16.msra.mxu1 %v2589_v62  ;;  %v1444_v62 = vor.u32 %v1443_v55, %v1440_v54 }
  0x69   : > { %2459 = vmatprep.subr.bf16.mxu1 %v2634_v1 }
  0x6a   : > { %2364 = vmatmul.mubr.msk.bf16.gmra.mrb[40].mxu1 %vm382_vm2, %v779_v4  ;;  %v1629_v4 = vrot.slane %v3004_v24, 3  ;;  %v1633_v24 = vrot.slane %v3054_v36, 3 }
  0x6b   : > { %2367 = vmatprep.mubr.msk.bf16.mxu1 %vm2635_vm0, %v2634_v1 }
  0x6c   : > { %v1630_v11 = vsel %vm1625_vm6, %v1627_v52, %v1629_v4  ;;  %v1632_v21 = vsel %vm1625_vm6, %v1629_v4, %v1631_v16 }
  0x6d   : > { %2396 = vmatmul.mubr.msk.bf16.gmra.mrb[40].mxu0 %vm382_vm2, %v963_v7  ;;  %v1453_v7 = vsel %vm1436_vm7, %v1444_v62, %v1452_v63 }
  0x6e   : > { %2399 = vmatprep.mubr.msk.bf16.mxu0 %vm2635_vm0, %v2634_v1 }
  0x72   : > { %2368 = vmatmul.mubr.msk.bf16.gmra.mrb[44].mxu1 %vm382_vm2, %v2835_v2  ;;  %v2597_v2 = vld [vmem:[%s3201_s1 + $0x100] sm:$0xff]  }
  0x73   : > { %2371 = vmatprep.mubr.msk.bf16.mxu1 %vm2635_vm0, %v2634_v1 }
  0x75   : > { %2400 = vmatmul.mubr.msk.bf16.gmra.mrb[44].mxu0 %vm382_vm2, %v972_v13  ;;  %v1467_v13 = vshll.u32 %v3025_v29, 16 }
  0x76   : > { %2439 = vmatprep.mubr.msk.bf16.mxu0 %vm2635_vm0, %v2634_v1 }
  0x77   : > { %v1469_v20 = vrot.slane %v1467_v13, 3 }
  0x79   : > { %v1470_v22 = vor.u32 %v1469_v20, %v1466_v19 }
  0x7a   : > { %2372 = vmatmul.mubr.msk.bf16.gmra.mrb[48].mxu1 %vm382_vm2, %v2847_v8  ;;  %v1111_v8 = vsel %vm1108_vm5, %v1109_v25, %v1110_v5 }
  0x7b   : > { %2411 = vmatprep.mubr.msk.bf16.mxu1 %vm2635_vm0, %v2634_v1  ;;  %v1471_v25 = vsel %vm1436_vm7, %v1461_v61, %v1470_v22 }
  0x7d   : > { %2440 = vmatmul.mubr.msk.bf16.vlgmr.msra.gmra.mrb[48].mxu0 %vm382_vm2, %v1292_v23  ;;  %v1473_v23 = vshrl.u32 %v3054_v36, 16 }
  0x7e   : > { %2488 = vmatpush3.bf16.msra.mxu0 %v2597_v2  ;;  %2443 = vmatprep.mubr.msk.bf16.mxu0 %vm2635_vm0, %v2634_v1  ;;  %v1476_v2 = vshll.u32 %v3054_v36, 16 }
  0x7f   : > { %2489 = vmatprep.subr.bf16.mxu0 %v2634_v1  ;;  %v1475_v5 = vrot.slane %v1473_v23, 2 }
  0x80   : > { %v1478_v15 = vrot.slane %v1476_v2, 3 }
  0x82   : > { %2490 = vmatpush3.bf16.msra.mxu0 %v2600_v26  ;;  %2412 = vmatmul.mubr.msk.bf16.vlgmr.msra.gmra.mrb[52].mxu1 %vm382_vm2, %v1111_v8  ;;  %v2609_v26 = vld [vmem:[%s2702_s27 + $0x30] ss:$0 sps:$4 sm:$0x77]   ;;  %v1634_v8 = vsel %vm1625_vm6, %v1631_v16, %v1633_v24 }
  0x83   : > { %2491 = vmatprep.subr.bf16.mxu0 %v2634_v1  ;;  %2460 = vmatpush3.bf16.msra.mxu1 %v2596_v18  ;;  %v1479_v18 = vor.u32 %v1478_v15, %v1475_v5  ;;  %v1485_v29 = vshll.u32 %v2609_v26, 16 }
  0x84   : > { %2415 = vmatprep.mubr.msk.bf16.mxu1 %vm2635_vm0, %v2634_v1  ;;  %2461 = vmatprep.subr.bf16.mxu1 %v2634_v1 }
  0x85   : > { %2444 = vmatmul.mubr.msk.bf16.gmra.mrb[52].mxu0 %vm382_vm2, %v1294_v27  ;;  %v1482_v27 = vshrl.u32 %v2609_v26, 16  ;;  %v1480_v31 = vsel %vm1436_vm7, %v1470_v22, %v1479_v18  ;;  %v1487_v33 = vrot.slane %v1485_v29, 3 }
  0x86   : > { %2447 = vmatprep.mubr.msk.bf16.mxu0 %vm2635_vm0, %v2634_v1  ;;  %2492 = vmatpush3.bf16.msra.mxu0 %v2603_v30  ;;  %v1635_v30 = vrot.slane %v2609_v26, 3 }
  0x87   : > { %2493 = vmatprep.subr.bf16.mxu0 %v2634_v1  ;;  %2462 = vmatpush3.bf16.msra.mxu1 %v2599_v32  ;;  %v1484_v32 = vrot.slane %v1482_v27, 2 }
  0x88   : > { %2463 = vmatprep.subr.bf16.mxu1 %v2634_v1 }
  0x8a   : > { %2494 = vmatpush3.bf16.msra.mxu0 %v2607_v6  ;;  %2416 = vmatmul.mubr.msk.bf16.gmra.mrb[56].mxu1 %vm382_vm2, %v1113_v28  ;;  %v1636_v6 = vsel %vm1625_vm6, %v1633_v24, %v1635_v30  ;;  %v1488_v28 = vor.u32 %v1487_v33, %v1484_v32 }
  0x8b   : > { %2419 = vmatprep.mubr.msk.bf16.mxu1 %vm2635_vm0, %v2634_v1  ;;  %2464 = vmatpush3.bf16.msra.mxu1 %v2602_v34 }
  0x8c   : > { %2465 = vmatprep.subr.bf16.mxu1 %v2634_v1  ;;  %v1489_v34 = vsel %vm1436_vm7, %v1479_v18, %v1488_v28 }
  0x8d   : > { %2448 = vmatmul.mubr.msk.bf16.gmra.mrb[56].mxu0 %vm382_vm2, %v1296_v35 }
  0x8e   : > { %2451 = vmatprep.mubr.msk.bf16.mxu0 %vm2635_vm0, %v2634_v1 }
  0x8f   : > { %2466 = vmatpush3.bf16.msra.mxu1 %v2605_v38 }
  0x92   : > { %2420 = vmatmul.mubr.msk.bf16.gmra.mrb[60].mxu1 %vm382_vm2, %v1115_v40 }
  0x93   : > { %2423 = vmatprep.mubr.msk.bf16.mxu1 %vm2635_vm0, %v2634_v1 }
  0x95   : > { %2452 = vmatmul.mubr.msk.bf16.gmra.mrb[60].mxu0 %vm382_vm2, %v1298_v57 }
  0x96   : > { %2455 = vmatprep.mubr.msk.bf16.mxu0 %vm2635_vm0, %v2634_v1 }
  0x9a   : > { %2424 = vmatmul.mubr.msk.bf16.gmra.mrb[64].mxu1 %vm382_vm2, %v1117_v44 }
  0x9b   : > { %2427 = vmatprep.mubr.msk.bf16.mxu1 %vm2635_vm0, %v2634_v1 }
  0x9d   : > { %2456 = vmatmul.mubr.msk.bf16.gmra.mrb[64].mxu0 %vm382_vm2, %v1300_v45 }
  0x9e   : > { %2495 = vmatprep.mubr.msk.bf16.mxu0 %vm2635_vm0, %v2634_v1 }
  0xa2   : > { %2428 = vmatmul.mubr.msk.bf16.gmra.mrb[68].mxu1 %vm382_vm2, %v1119_v53 }
  0xa3   : > { %2467 = vmatprep.mubr.msk.bf16.mxu1 %vm2635_vm0, %v2634_v1 }
  0xa5   : > { %2496 = vmatmul.mubr.msk.bf16.vlgmr.msra.gmra.mrb[68].mxu0 %vm382_vm2, %v1628_v60 }
  0xa6   : > { %2499 = vmatprep.mubr.msk.bf16.mxu0 %vm2635_vm0, %v2634_v1 }
  0xaa   : > { %2468 = vmatmul.mubr.msk.bf16.vlgmr.msra.gmra.mrb[72].mxu1 %vm382_vm2, %v1453_v7 }
  0xab   : > { %2471 = vmatprep.mubr.msk.bf16.mxu1 %vm2635_vm0, %v2634_v1 }
  0xad   : > { %2500 = vmatmul.mubr.msk.bf16.gmra.mrb[72].mxu0 %vm382_vm2, %v1630_v11 }
  0xae   : > { %2503 = vmatprep.mubr.msk.bf16.mxu0 %vm2635_vm0, %v2634_v1 }
  0xb2   : > { %2472 = vmatmul.mubr.msk.bf16.gmra.mrb[76].mxu1 %vm382_vm2, %v1462_v17 }
  0xb3   : > { %2475 = vmatprep.mubr.msk.bf16.mxu1 %vm2635_vm0, %v2634_v1 }
  0xb5   : > { %2504 = vmatmul.mubr.msk.bf16.gmra.mrb[76].mxu0 %vm382_vm2, %v1632_v21 }
  0xb6   : > { %2507 = vmatprep.mubr.msk.bf16.mxu0 %vm2635_vm0, %v2634_v1 }
  0xba   : > { %2476 = vmatmul.mubr.msk.bf16.gmra.mrb[80].mxu1 %vm382_vm2, %v1471_v25 }
  0xbb   : > { %2479 = vmatprep.mubr.msk.bf16.mxu1 %vm2635_vm0, %v2634_v1 }
  0xbd   : > { %2508 = vmatmul.mubr.msk.bf16.gmra.mrb[80].mxu0 %vm382_vm2, %v1634_v8 }
  0xbe   : > { %2511 = vmatprep.mubr.msk.bf16.mxu0 %vm2635_vm0, %v2634_v1 }
  0xc2   : > { %2480 = vmatmul.mubr.msk.bf16.gmra.mrb[84].mxu1 %vm382_vm2, %v1480_v31 }
  0xc3   : > { %2483 = vmatprep.mubr.msk.bf16.mxu1 %vm2635_vm0, %v2634_v1 }
  0xc5   : > { %2512 = vmatmul.mubr.msk.bf16.gmra.mrb[84].mxu0 %vm382_vm2, %v1636_v6 }
  0xca   : > { %2484 = vmatmul.mubr.msk.bf16.gmra.mrb[88].mxu1 %vm382_vm2, %v1489_v34 }
  0xed   : > { %v448_v35 = vpop.f32.mrb[0].mxu1 }
  0xee   : > { %v2281_v36 = vpop.f32.mrb[1].mxu1 }
  0xef   : > { %v451_v37 = vpop.f32.mrb[2].mxu1 }
  0xf0   : > { %v432_v38 = vpop.f32.mrb[0].mxu0  ;;  %v2282_v39 = vpop.f32.mrb[3].mxu1 }
  0xf1   : > { %v2273_v40 = vpop.f32.mrb[1].mxu0 }
  0xf2   : > { %v435_v57 = vpop.f32.mrb[2].mxu0 }
  0xf3   : > { %v2274_v14 = vpop.f32.mrb[3].mxu0 }
  0xf5   : > { %v456_v41 = vpop.f32.mrb[4].mxu1 }
  0xf6   : > { %v2285_v42 = vpop.f32.mrb[5].mxu1 }
  0xf7   : > { %v459_v43 = vpop.f32.mrb[6].mxu1 }
  0xf8   : > { %v440_v44 = vpop.f32.mrb[4].mxu0  ;;  %v2286_v1 = vpop.f32.mrb[7].mxu1 }
  0xf9   : > { %v2277_v45 = vpop.f32.mrb[5].mxu0 }
  0xfa   : > { %v443_v46 = vpop.f32.mrb[6].mxu0 }
  0xfb   : > { %v2278_v47 = vpop.f32.mrb[7].mxu0 }
  0xfd   : > { %v464_v58 = vpop.f32.mrb[8].mxu1 }
  0xfe   : > { %v2289_v48 = vpop.f32.mrb[9].mxu1 }
  0xff   : > { %v467_v49 = vpop.f32.mrb[10].mxu1 }
 0x100   : > { %v676_v50 = vpop.f32.mrb[8].mxu0  ;;  %v2290_v51 = vpop.f32.mrb[11].mxu1 }
 0x101   : > { %v2329_v52 = vpop.f32.mrb[9].mxu0 }
 0x102   : > { %v679_v53 = vpop.f32.mrb[10].mxu0 }
 0x103   : > { %v2330_v54 = vpop.f32.mrb[11].mxu0 }
 0x105   : > { %v539_v55 = vpop.f32.mrb[12].mxu1 }
 0x106   : > { %v540_v56 = vadd.f32 %v539_v55, %v432_v38  ;;  %v2301_v59 = vpop.f32.mrb[13].mxu1 }
 0x107   : > { %v542_v60 = vpop.f32.mrb[14].mxu1 }
 0x108   : > { %v684_v62 = vpop.f32.mrb[12].mxu0  ;;  %v715_v63 = vadd.f32 %v676_v50, %v540_v56  ;;  %v543_v0 = vadd.f32 %v542_v60, %v435_v57  ;;  %v2302_v3 = vpop.f32.mrb[15].mxu1 }
 0x109   : > { %v2333_v4 = vpop.f32.mrb[13].mxu0 }
 0x10a   : > { %v687_v7 = vpop.f32.mrb[14].mxu0  ;;  %v716_v9 = vadd.f32 %v679_v53, %v543_v0 }
 0x10b   : > { %v2334_v10 = vpop.f32.mrb[15].mxu0 }
 0x10d   : > { %v547_v11 = vpop.f32.mrb[16].mxu1 }
 0x10e   : > { %v548_v61 = vadd.f32 %v547_v11, %v440_v44  ;;  %v2305_v12 = vpop.f32.mrb[17].mxu1 }
 0x10f   : > { %v550_v13 = vpop.f32.mrb[18].mxu1 }
 0x110   : > { %v692_v16 = vpop.f32.mrb[16].mxu0  ;;  %v717_v17 = vadd.f32 %v684_v62, %v548_v61  ;;  %v551_v19 = vadd.f32 %v550_v13, %v443_v46  ;;  %v2306_v20 = vpop.f32.mrb[19].mxu1 }
 0x111   : > { %v2337_v21 = vpop.f32.mrb[17].mxu0 }
 0x112   : > { %v695_v22 = vpop.f32.mrb[18].mxu0  ;;  %v718_v23 = vadd.f32 %v687_v7, %v551_v19 }
 0x113   : > { %v2338_v2 = vpop.f32.mrb[19].mxu0 }
 0x115   : > { %v555_v24 = vpop.f32.mrb[20].mxu1 }
 0x116   : > { %v556_v25 = vadd.f32 %v555_v24, %v448_v35  ;;  %v2309_v5 = vpop.f32.mrb[21].mxu1 }
 0x117   : > { %v558_v15 = vpop.f32.mrb[22].mxu1 }
 0x118   : > { %v700_v26 = vpop.f32.mrb[20].mxu0  ;;  %v719_v8 = vadd.f32 %v692_v16, %v556_v25  ;;  %v559_v18 = vadd.f32 %v558_v15, %v451_v37  ;;  %v2310_v27 = vpop.f32.mrb[23].mxu1 }
 0x119   : > { %v2341_v29 = vpop.f32.mrb[21].mxu0 }
 0x11a   : > { %v703_v30 = vpop.f32.mrb[22].mxu0  ;;  %v720_v31 = vadd.f32 %v695_v22, %v559_v18 }
 0x11b   : > { %v2342_v32 = vpop.f32.mrb[23].mxu0 }
 0x11d   : > { %v563_v33 = vpop.f32.mrb[24].mxu1 }
 0x11e   : > { %v564_v6 = vadd.f32 %v563_v33, %v456_v41  ;;  %v2313_v28 = vpop.f32.mrb[25].mxu1 }
 0x11f   : > { %v566_v34 = vpop.f32.mrb[26].mxu1 }
 0x120   : > { %v708_v36 = vpop.f32.mrb[24].mxu0  ;;  %v721_v38 = vadd.f32 %v700_v26, %v564_v6  ;;  %v567_v39 = vadd.f32 %v566_v34, %v459_v43  ;;  %v2314_v40 = vpop.f32.mrb[27].mxu1 }
 0x121   : > { %v2345_v57 = vpop.f32.mrb[25].mxu0 }
 0x122   : > { %v711_v35 = vpop.f32.mrb[26].mxu0  ;;  %v722_v14 = vadd.f32 %v703_v30, %v567_v39 }
 0x123   : > { %v2346_v42 = vpop.f32.mrb[27].mxu0 }
 0x125   : > { %v571_v44 = vpop.f32.mrb[28].mxu1 }
 0x126   : > { %v572_v1 = vadd.f32 %v571_v44, %v464_v58  ;;  %v2317_v37 = vpop.f32.mrb[29].mxu1 }
 0x127   : > { %v574_v45 = vpop.f32.mrb[30].mxu1 }
 0x128   : > { %v1046_v46 = vpop.f32.mrb[28].mxu0  ;;  %v723_v47 = vadd.f32 %v708_v36, %v572_v1  ;;  %v575_v48 = vadd.f32 %v574_v45, %v467_v49  ;;  %v2318_v50 = vpop.f32.mrb[31].mxu1 }
 0x129   : > { %v2385_v51 = vpop.f32.mrb[29].mxu0 }
 0x12a   : > { %v1049_v41 = vpop.f32.mrb[30].mxu0  ;;  %v724_v52 = vadd.f32 %v711_v35, %v575_v48 }
 0x12b   : > { %v2386_v53 = vpop.f32.mrb[31].mxu0 }
 0x12d   : > { %v857_v54 = vpop.f32.mrb[32].mxu1 }
 0x12e   : > { %v896_v55 = vadd.f32 %v857_v54, %v715_v63  ;;  %v2357_v43 = vpop.f32.mrb[33].mxu1 }
 0x12f   : > { %v860_v56 = vpop.f32.mrb[34].mxu1 }
 0x130   : > { %v1054_v59 = vpop.f32.mrb[32].mxu0  ;;  %v1085_v60 = vadd.f32 %v1046_v46, %v896_v55  ;;  %v897_v62 = vadd.f32 %v860_v56, %v716_v9  ;;  %v2358_v0 = vpop.f32.mrb[35].mxu1 }
 0x131   : > { %v2389_v3 = vpop.f32.mrb[33].mxu0 }
 0x132   : > { %v1057_v58 = vpop.f32.mrb[34].mxu0  ;;  %v1086_v4 = vadd.f32 %v1049_v41, %v897_v62 }
 0x133   : > { %v2390_v7 = vpop.f32.mrb[35].mxu0 }
 0x135   : > { %v865_v10 = vpop.f32.mrb[36].mxu1 }
 0x136   : > { %v898_v11 = vadd.f32 %v865_v10, %v717_v17  ;;  %v2361_v49 = vpop.f32.mrb[37].mxu1 }
 0x137   : > { %v868_v61 = vpop.f32.mrb[38].mxu1 }
 0x138   : > { %v1062_v12 = vpop.f32.mrb[36].mxu0  ;;  %v1087_v13 = vadd.f32 %v1054_v59, %v898_v11  ;;  %v899_v16 = vadd.f32 %v868_v61, %v718_v23  ;;  %v2362_v19 = vpop.f32.mrb[39].mxu1 }
 0x139   : > { %v2393_v20 = vpop.f32.mrb[37].mxu0 }
 0x13a   : > { %v1065_v63 = vpop.f32.mrb[38].mxu0  ;;  %v1088_v21 = vadd.f32 %v1057_v58, %v899_v16 }
 0x13b   : > { %v2394_v22 = vpop.f32.mrb[39].mxu0 }
 0x13d   : > { %v873_v2 = vpop.f32.mrb[40].mxu1 }
 0x13e   : > { %v900_v24 = vadd.f32 %v873_v2, %v719_v8  ;;  %v2365_v9 = vpop.f32.mrb[41].mxu1 }
 0x13f   : > { %v876_v25 = vpop.f32.mrb[42].mxu1 }
 0x140   : > { %v1070_v5 = vpop.f32.mrb[40].mxu0  ;;  %v1089_v15 = vadd.f32 %v1062_v12, %v900_v24  ;;  %v901_v26 = vadd.f32 %v876_v25, %v720_v31  ;;  %v2366_v18 = vpop.f32.mrb[43].mxu1 }
 0x141   : > { %v2397_v27 = vpop.f32.mrb[41].mxu0 }
 0x142   : > { %v1073_v17 = vpop.f32.mrb[42].mxu0  ;;  %v1090_v29 = vadd.f32 %v1065_v63, %v901_v26 }
 0x143   : > { %v2398_v30 = vpop.f32.mrb[43].mxu0 }
 0x145   : > { %v881_v32 = vpop.f32.mrb[44].mxu1 }
 0x146   : > { %v902_v33 = vadd.f32 %v881_v32, %v721_v38  ;;  %v2369_v23 = vpop.f32.mrb[45].mxu1 }
 0x147   : > { %v884_v6 = vpop.f32.mrb[46].mxu1 }
 0x148   : > { %v1078_v28 = vpop.f32.mrb[44].mxu0  ;;  %v1091_v34 = vadd.f32 %v1070_v5, %v902_v33  ;;  %v903_v36 = vadd.f32 %v884_v6, %v722_v14  ;;  %v2370_v39 = vpop.f32.mrb[47].mxu1 }
 0x149   : > { %v2401_v40 = vpop.f32.mrb[45].mxu0 }
 0x14a   : > { %v1081_v8 = vpop.f32.mrb[46].mxu0  ;;  %v1092_v57 = vadd.f32 %v1073_v17, %v903_v36 }
 0x14b   : > { %v2402_v35 = vpop.f32.mrb[47].mxu0 }
 0x14d   : > { %v889_v42 = vpop.f32.mrb[48].mxu1 }
 0x14e   : > { %v904_v44 = vadd.f32 %v889_v42, %v723_v47  ;;  %v2373_v31 = vpop.f32.mrb[49].mxu1 }
 0x14f   : > { %v892_v1 = vpop.f32.mrb[50].mxu1 }
 0x150   : > { %v1374_v37 = vpop.f32.mrb[48].mxu0  ;;  %v1093_v45 = vadd.f32 %v1078_v28, %v904_v44  ;;  %v905_v46 = vadd.f32 %v892_v1, %v724_v52  ;;  %v2374_v48 = vpop.f32.mrb[51].mxu1 }
 0x151   : > { %v2441_v50 = vpop.f32.mrb[49].mxu0 }
 0x152   : > { %v1377_v38 = vpop.f32.mrb[50].mxu0  ;;  %v1094_v51 = vadd.f32 %v1081_v8, %v905_v46 }
 0x153   : > { %v2442_v41 = vpop.f32.mrb[51].mxu0 }
 0x155   : > { %v1193_v53 = vpop.f32.mrb[52].mxu1 }
 0x156   : > { %v1232_v54 = vadd.f32 %v1193_v53, %v1085_v60  ;;  %v2413_v14 = vpop.f32.mrb[53].mxu1 }
 0x157   : > { %v1196_v55 = vpop.f32.mrb[54].mxu1 }
 0x158   : > { %v1382_v43 = vpop.f32.mrb[52].mxu0  ;;  %v1413_v56 = vadd.f32 %v1374_v37, %v1232_v54  ;;  %v1233_v59 = vadd.f32 %v1196_v55, %v1086_v4  ;;  %v2414_v62 = vpop.f32.mrb[55].mxu1 }
 0x159   : > { %v2445_v0 = vpop.f32.mrb[53].mxu0 }
 0x15a   : > { %v1385_v47 = vpop.f32.mrb[54].mxu0  ;;  %v1414_v3 = vadd.f32 %v1377_v38, %v1233_v59 }
 0x15b   : > { %v2446_v58 = vpop.f32.mrb[55].mxu0 }
 0x15d   : > { %v1201_v7 = vpop.f32.mrb[56].mxu1 }
 0x15e   : > { %v1234_v10 = vadd.f32 %v1201_v7, %v1087_v13  ;;  %v2417_v52 = vpop.f32.mrb[57].mxu1 }
 0x15f   : > { %v1204_v11 = vpop.f32.mrb[58].mxu1 }
 0x160   : > { %v1390_v49 = vpop.f32.mrb[56].mxu0  ;;  %v1415_v61 = vadd.f32 %v1382_v43, %v1234_v10  ;;  %v1235_v12 = vadd.f32 %v1204_v11, %v1088_v21  ;;  %v2418_v16 = vpop.f32.mrb[59].mxu1 }
 0x161   : > { %v2449_v19 = vpop.f32.mrb[57].mxu0 }
 0x162   : > { %v1393_v60 = vpop.f32.mrb[58].mxu0  ;;  %v3144_v20 = vadd.f32 %v1385_v47, %v1235_v12 }
 0x163   : > { %v2450_v63 = vpop.f32.mrb[59].mxu0 }
 0x165   : > { %v1209_v22 = vpop.f32.mrb[60].mxu1 }
 0x166   : > { %v1236_v4 = vadd.f32 %v1209_v22, %v1089_v15  ;;  %v2421_v2 = vpop.f32.mrb[61].mxu1 }
 0x167   : > { %v1212_v24 = vpop.f32.mrb[62].mxu1 }
 0x168   : > { %v1398_v9 = vpop.f32.mrb[60].mxu0  ;;  %v3146_v25 = vadd.f32 %v1390_v49, %v1236_v4  ;;  %v1237_v5 = vadd.f32 %v1212_v24, %v1090_v29  ;;  %v2422_v13 = vpop.f32.mrb[63].mxu1 }
 0x169   : > { %v2453_v26 = vpop.f32.mrb[61].mxu0 }
 0x16a   : > { %v1401_v18 = vpop.f32.mrb[62].mxu0  ;;  %v3148_v27 = vadd.f32 %v1393_v60, %v1237_v5 }
 0x16b   : > { %v2454_v21 = vpop.f32.mrb[63].mxu0 }
 0x16d   : > { %v1217_v17 = vpop.f32.mrb[64].mxu1 }
 0x16e   : > { %v1238_v30 = vadd.f32 %v1217_v17, %v1091_v34  ;;  %v2425_v32 = vpop.f32.mrb[65].mxu1 }
 0x16f   : > { %v1220_v33 = vpop.f32.mrb[66].mxu1 }
 0x170   : > { %v1406_v23 = vpop.f32.mrb[64].mxu0  ;;  %v3150_v6 = vadd.f32 %v1398_v9, %v1238_v30  ;;  %v1239_v15 = vadd.f32 %v1220_v33, %v1092_v57  ;;  %v2426_v28 = vpop.f32.mrb[67].mxu1 }
 0x171   : > { %v2457_v36 = vpop.f32.mrb[65].mxu0 }
 0x172   : > { %v1409_v39 = vpop.f32.mrb[66].mxu0  ;;  %v3152_v40 = vadd.f32 %v1401_v18, %v1239_v15 }
 0x173   : > { %v2458_v29 = vpop.f32.mrb[67].mxu0 }
 0x175   : > { %v1225_v8 = vpop.f32.mrb[68].mxu1 }
 0x176   : > { %v1240_v35 = vadd.f32 %v1225_v8, %v1093_v45  ;;  %v2429_v42 = vpop.f32.mrb[69].mxu1  ;;  %v3161_v45 = vld [vmem:[%s3202_s2] ss:$0 sm:$0xff] }
 0x177   : > { %v1228_v44 = vpop.f32.mrb[70].mxu1 }
 0x178   : > { %v1710_v31 = vpop.f32.mrb[68].mxu0  ;;  %v3154_v1 = vadd.f32 %v1406_v23, %v1240_v35  ;;  %v1241_v34 = vadd.f32 %v1228_v44, %v1094_v51  ;;  %v2430_v37 = vpop.f32.mrb[71].mxu1 }
 0x179   : > { %v2497_v46 = vpop.f32.mrb[69].mxu0 }
 0x17a   : > { %v1713_v48 = vpop.f32.mrb[70].mxu0  ;;  %v3156_v50 = vadd.f32 %v1409_v39, %v1241_v34 }
 0x17b   : > { %v2498_v57 = vpop.f32.mrb[71].mxu0 }
 0x17d   : > { %v1563_v38 = vpop.f32.mrb[72].mxu1 }
 0x17e   : > { %v1602_v41 = vadd.f32 %v1563_v38, %v1413_v56  ;;  %v2469_v53 = vpop.f32.mrb[73].mxu1 }
 0x17f   : > { %v1566_v54 = vpop.f32.mrb[74].mxu1 }
 0x180   : > { %v1718_v14 = vpop.f32.mrb[72].mxu0  ;;  %v1749_v55 = vadd.f32 %v1710_v31, %v1602_v41  ;;  %v1603_v43 = vadd.f32 %v1566_v54, %v1414_v3  ;;  %v2470_v51 = vpop.f32.mrb[75].mxu1 }
 0x181   : > { %v2501_v59 = vpop.f32.mrb[73].mxu0 }
 0x182   : > { %v1721_v62 = vpop.f32.mrb[74].mxu0  ;;  %v1766_v0 = vadd.f32 %v3161_v45, %v1749_v55  ;;  %v1750_v47 = vadd.f32 %v1713_v48, %v1603_v43 }
 0x183   : > { %v2502_v58 = vpop.f32.mrb[75].mxu0 }
 0x184   : > { %v1767_v56 = vadd.f32 %v3161_v45, %v1750_v47  ;;  %v1776_v10 = vmax.f32 %v1766_v0, 0.0 }
 0x185   : > { %v1571_v7 = vpop.f32.mrb[76].mxu1 }
 0x186   : > { %v1777_v52 = vmax.f32 %v1767_v56, 0.0  ;;  %v1604_v11 = vadd.f32 %v1571_v7, %v1415_v61  ;;  %v2473_v49 = vpop.f32.mrb[77].mxu1 }
 0x187   : > { %v1574_v3 = vpop.f32.mrb[78].mxu1 }
 0x188   : > { %v1726_v12 = vpop.f32.mrb[76].mxu0  ;;  %v2156_v16 = vpack.c.bf16 %v1777_v52, %v1776_v10  ;;  %v1751_v19 = vadd.f32 %v1718_v14, %v1604_v11  ;;  %v1605_v60 = vadd.f32 %v1574_v3, %v3144_v20  ;;  %v2474_v63 = vpop.f32.mrb[79].mxu1 }
 0x189   : > { %v2505_v22 = vpop.f32.mrb[77].mxu0 }
 0x18a   : > { %v1729_v4 = vpop.f32.mrb[78].mxu0  ;;  %2157 = vst [vmem:[%s3169_s30] sm:$0xff] %v2156_v16   ;;  %v1768_v2 = vadd.f32 %v3161_v45, %v1751_v19  ;;  %v1752_v61 = vadd.f32 %v1721_v62, %v1605_v60 }
 0x18b   : > { %v2506_v24 = vpop.f32.mrb[79].mxu0 }
 0x18c   : > { %v1769_v9 = vadd.f32 %v3161_v45, %v1752_v61  ;;  %v1778_v13 = vmax.f32 %v1768_v2, 0.0 }
 0x18d   : > { %v1579_v5 = vpop.f32.mrb[80].mxu1 }
 0x18e   : > { %v1779_v26 = vmax.f32 %v1769_v9, 0.0  ;;  %v1606_v18 = vadd.f32 %v1579_v5, %v3146_v25  ;;  %v2477_v21 = vpop.f32.mrb[81].mxu1 }
 0x18f   : > { %v1582_v17 = vpop.f32.mrb[82].mxu1 }
 0x190   : > { %v1734_v30 = vpop.f32.mrb[80].mxu0  ;;  %v2161_v20 = vpack.c.bf16 %v1779_v26, %v1778_v13  ;;  %v1753_v32 = vadd.f32 %v1726_v12, %v1606_v18  ;;  %v1607_v33 = vadd.f32 %v1582_v17, %v3148_v27  ;;  %v2478_v23 = vpop.f32.mrb[83].mxu1 }
 0x191   : > { %v2509_v15 = vpop.f32.mrb[81].mxu0 }
 0x192   : > { %v1737_v28 = vpop.f32.mrb[82].mxu0  ;;  %2178 = vst [vmem:[%s3169_s30 + $0x8] sm:$0xff] %v2161_v20   ;;  %v1770_v36 = vadd.f32 %v3161_v45, %v1753_v32  ;;  %v1754_v39 = vadd.f32 %v1729_v4, %v1607_v33 }
 0x193   : > { %v2510_v29 = vpop.f32.mrb[83].mxu0 }
 0x194   : > { %v1771_v8 = vadd.f32 %v3161_v45, %v1754_v39  ;;  %v1780_v25 = vmax.f32 %v1770_v36, 0.0 }
 0x195   : > { %v1587_v35 = vpop.f32.mrb[84].mxu1 }
 0x196   : > { %v1781_v42 = vmax.f32 %v1771_v8, 0.0  ;;  %v1608_v44 = vadd.f32 %v1587_v35, %v3150_v6  ;;  %v2481_v31 = vpop.f32.mrb[85].mxu1 }
 0x197   : > { %v1590_v34 = vpop.f32.mrb[86].mxu1 }
 0x198   : > { %v1742_v37 = vpop.f32.mrb[84].mxu0  ;;  %v2166_v27 = vpack.c.bf16 %v1781_v42, %v1780_v25  ;;  %v1755_v46 = vadd.f32 %v1734_v30, %v1608_v44  ;;  %v1609_v48 = vadd.f32 %v1590_v34, %v3152_v40  ;;  %v2482_v57 = vpop.f32.mrb[87].mxu1 }
 0x199   : > { %v2513_v38 = vpop.f32.mrb[85].mxu0 }
 0x19a   : > { %v1745_v41 = vpop.f32.mrb[86].mxu0  ;;  %2179 = vst [vmem:[%s3169_s30 + $0x10] sm:$0xff] %v2166_v27   ;;  %v1772_v53 = vadd.f32 %v3161_v45, %v1755_v46  ;;  %v1756_v54 = vadd.f32 %v1737_v28, %v1609_v48 }
 0x19b   : > { %v2514_v14 = vpop.f32.mrb[87].mxu0 }
 0x19c   : > { %v1773_v55 = vadd.f32 %v3161_v45, %v1756_v54  ;;  %v1782_v6 = vmax.f32 %v1772_v53, 0.0 }
 0x19d   : > { %v1595_v43 = vpop.f32.mrb[88].mxu1 }
 0x19e   : > { %v1783_v51 = vmax.f32 %v1773_v55, 0.0  ;;  %v1610_v59 = vadd.f32 %v1595_v43, %v3154_v1  ;;  %v2485_v62 = vpop.f32.mrb[89].mxu1 }
 0x19f   : > { %v1598_v0 = vpop.f32.mrb[90].mxu1 }
 0x1a0   : > { %v2171_v40 = vpack.c.bf16 %v1783_v51, %v1782_v6  ;;  %v1757_v47 = vadd.f32 %v1742_v37, %v1610_v59  ;;  %v1611_v58 = vadd.f32 %v1598_v0, %v3156_v50  ;;  %v2486_v56 = vpop.f32.mrb[91].mxu1 }
 0x1a2   : > { %2180 = vst [vmem:[%s3169_s30 + $0x18] sm:$0xff] %v2171_v40   ;;  %v1774_v7 = vadd.f32 %v3161_v45, %v1757_v47  ;;  %v1758_v10 = vadd.f32 %v1745_v41, %v1611_v58 }
 0x1a4   : > { %v1775_v52 = vadd.f32 %v3161_v45, %v1758_v10  ;;  %v1784_v11 = vmax.f32 %v1774_v7, 0.0 }
 0x1a6   : > { %v1785_v49 = vmax.f32 %v1775_v52, 0.0 }
 0x1a8   : > { %v2176_v3 = vpack.c.bf16 %v1785_v49, %v1784_v11 }
 0x1aa   : > { %2181 = vst [vmem:[%s3169_s30 + $0x20] sm:$0xff] %v2176_v3  }
 0x1ab PF: > { %s13_s14 = sadd.s32 1, %s2632_s14   ;;  %s3204_s12 = smov %s2628_s13 }
 0x1ac   : > { %p10_p5 = scmp.ge.s32.totalorder %s13_s14, 6   ;;  %s3205_s13 = smov %s3207_s15 }
 0x1ae   :  { %12 = sbr.rel (!%p10_p5) target bundleno = 2 (0x2), region = 76 }

// kernel: vgg_distance.22
= control target key start
LH: loop header
LB: loop body
LE: loop exit
PB: predicated region body
PF: predicated region fallthrough
CT: control target
= control target key end

     0   :  { %vm12_vm0 = vcmask 1024   ;;  %vm125_vm1 = vcmask 1041409   ;;  %vm128_vm2 = vcmask 58368   ;;  %s220_s0 = inlined_call_operand.vmem [shape: bf16[2,2,8,1024], index: 0, kind: input, shape index: {}]   ;;  %s221_s1 = inlined_call_operand.vmem [shape: f32[2,1], index: 1, kind: output, shape index: {}]  }
   0x1   :  { %v14_v0 = vld [vmem:[%s220_s0] sm:$0xff]  ;;  %v15_v1 = vld [vmem:[%s220_s0 + $0x8] sm:$0xff]  ;;  %v16_v2 = vld [vmem:[%s220_s0 + $0x10] sm:$0xff] }
   0x2   :  { %v17_v3 = vld [vmem:[%s220_s0 + $0x18] sm:$0xff]  ;;  %v22_v4 = vunpack.c.l.bf16 %v14_v0  ;;  %v23_v5 = vunpack.c.h.bf16 %v14_v0  ;;  %v24_v6 = vunpack.c.l.bf16 %v15_v1  ;;  %v25_v7 = vunpack.c.h.bf16 %v15_v1  ;;  %v146_v8 = vld [vmem:[%s220_s0 + $0x40] sm:$0xff]  ;;  %v147_v9 = vld [vmem:[%s220_s0 + $0x48] sm:$0xff] }
   0x3   :  { %v26_v10 = vunpack.c.l.bf16 %v16_v2  ;;  %v27_v11 = vunpack.c.h.bf16 %v16_v2  ;;  %v148_v12 = vld [vmem:[%s220_s0 + $0x50] sm:$0xff]  ;;  %v149_v13 = vld [vmem:[%s220_s0 + $0x58] sm:$0xff]  ;;  %v47_v14 = vunpack.c.l.bf16 %v146_v8  ;;  %v48_v15 = vunpack.c.h.bf16 %v146_v8  ;;  %v18_v28 = vld [vmem:[%s220_s0 + $0x20] sm:$0xff] }
   0x4   :  { %v49_v16 = vunpack.c.l.bf16 %v147_v9  ;;  %v50_v17 = vunpack.c.h.bf16 %v147_v9  ;;  %v28_v18 = vunpack.c.l.bf16 %v17_v3  ;;  %v51_v19 = vunpack.c.l.bf16 %v148_v12  ;;  %v19_v29 = vld [vmem:[%s220_s0 + $0x28] sm:$0xff]  ;;  %v150_v35 = vld [vmem:[%s220_s0 + $0x60] sm:$0xff]  ;;  %v20_v39 = vld [vmem:[%s220_s0 + $0x30] sm:$0xff] }
   0x5   :  { %v52_v20 = vunpack.c.h.bf16 %v148_v12  ;;  %v53_v21 = vunpack.c.l.bf16 %v149_v13  ;;  %v63_v22 = vsub.f32 %v22_v4, %v47_v14  ;;  %v64_v23 = vsub.f32 %v23_v5, %v48_v15  ;;  %v151_v41 = vld [vmem:[%s220_s0 + $0x68] sm:$0xff]  ;;  %v152_v42 = vld [vmem:[%s220_s0 + $0x70] sm:$0xff]  ;;  %v21_v51 = vld [vmem:[%s220_s0 + $0x38] sm:$0xff] }
   0x6   :  { %v65_v24 = vsub.f32 %v24_v6, %v49_v16  ;;  %v66_v25 = vsub.f32 %v25_v7, %v50_v17  ;;  %v29_v26 = vunpack.c.h.bf16 %v17_v3  ;;  %v54_v27 = vunpack.c.h.bf16 %v149_v13  ;;  %v153_v53 = vld [vmem:[%s220_s0 + $0x78] sm:$0xff] }
   0x7   :  { %v67_v30 = vsub.f32 %v26_v10, %v51_v19  ;;  %v79_v31 = vand.u32 2147483647, %v63_v22  ;;  %v80_v32 = vand.u32 2147483647, %v64_v23  ;;  %v68_v34 = vsub.f32 %v27_v11, %v52_v20 }
   0x8   :  { %v81_v33 = vand.u32 2147483647, %v65_v24  ;;  %v69_v36 = vsub.f32 %v28_v18, %v53_v21  ;;  %v82_v37 = vand.u32 2147483647, %v66_v25  ;;  %v30_v40 = vunpack.c.l.bf16 %v18_v28 }
   0x9   :  { %v95_v38 = vadd.f32 %v80_v32, %v79_v31  ;;  %v70_v43 = vsub.f32 %v29_v26, %v54_v27  ;;  %v31_v44 = vunpack.c.h.bf16 %v18_v28  ;;  %v32_v45 = vunpack.c.l.bf16 %v19_v29 }
   0xa   :  { %v33_v46 = vunpack.c.h.bf16 %v19_v29  ;;  %v83_v47 = vand.u32 2147483647, %v67_v30  ;;  %v55_v49 = vunpack.c.l.bf16 %v150_v35  ;;  %v56_v50 = vunpack.c.h.bf16 %v150_v35 }
   0xb   :  { %v96_v48 = vadd.f32 %v95_v38, %v81_v33  ;;  %v34_v52 = vunpack.c.l.bf16 %v20_v39  ;;  %v57_v54 = vunpack.c.l.bf16 %v151_v41  ;;  %v58_v55 = vunpack.c.h.bf16 %v151_v41 }
   0xc   :  { %v59_v56 = vunpack.c.l.bf16 %v152_v42  ;;  %v84_v57 = vand.u32 2147483647, %v68_v34  ;;  %v35_v59 = vunpack.c.h.bf16 %v20_v39  ;;  %v71_v60 = vsub.f32 %v30_v40, %v55_v49 }
   0xd   :  { %v97_v58 = vadd.f32 %v96_v48, %v82_v37  ;;  %v60_v61 = vunpack.c.h.bf16 %v152_v42  ;;  %v72_v62 = vsub.f32 %v31_v44, %v56_v50  ;;  %v73_v63 = vsub.f32 %v32_v45, %v57_v54 }
   0xe   :  { %v74_v0 = vsub.f32 %v33_v46, %v58_v55  ;;  %v85_v1 = vand.u32 2147483647, %v69_v36  ;;  %v36_v3 = vunpack.c.l.bf16 %v21_v51  ;;  %v61_v4 = vunpack.c.l.bf16 %v153_v53 }
   0xf   :  { %v98_v2 = vadd.f32 %v97_v58, %v83_v47  ;;  %v75_v5 = vsub.f32 %v34_v52, %v59_v56  ;;  %v87_v6 = vand.u32 2147483647, %v71_v60  ;;  %v88_v7 = vand.u32 2147483647, %v72_v62 }
  0x10   :  { %v89_v8 = vand.u32 2147483647, %v73_v63  ;;  %v86_v9 = vand.u32 2147483647, %v70_v43  ;;  %v37_v11 = vunpack.c.h.bf16 %v21_v51  ;;  %v62_v12 = vunpack.c.h.bf16 %v153_v53 }
  0x11   :  { %v99_v10 = vadd.f32 %v98_v2, %v84_v57  ;;  %v76_v13 = vsub.f32 %v35_v59, %v60_v61  ;;  %v90_v14 = vand.u32 2147483647, %v74_v0  ;;  %v104_v15 = vadd.f32 %v88_v7, %v87_v6 }
  0x12   :  { %v77_v17 = vsub.f32 %v36_v3, %v61_v4  ;;  %v91_v18 = vand.u32 2147483647, %v75_v5  ;;  %v78_v21 = vsub.f32 %v37_v11, %v62_v12  ;;  %v155_v30 = vmov 0.0  }
  0x13   :  { %v100_v16 = vadd.f32 %v99_v10, %v85_v1  ;;  %v105_v19 = vadd.f32 %v104_v15, %v89_v8  ;;  %v92_v22 = vand.u32 2147483647, %v76_v13  ;;  %13 = vst.msk [vmem:[#allocation2] sm:$0x3] %vm12_vm0, %v155_v30  ;;  %v115_v31 = vlaneseq }
  0x14   :  { %v93_v24 = vand.u32 2147483647, %v77_v17  ;;  %v94_v26 = vand.u32 2147483647, %v78_v21 }
  0x15   :  { %v101_v20 = vadd.f32 %v100_v16, %v86_v9  ;;  %v106_v23 = vadd.f32 %v105_v19, %v90_v14  ;;  %v116_v32 = vand.u32 127, %v115_v31  ;;  %v118_v33 = vshrl.u32 %v115_v31, 7 }
  0x17   :  { %102 = vadd.xlane.f32.xlu0 %v101_v20  ;;  %v107_v25 = vadd.f32 %v106_v23, %v91_v18  ;;  %v119_v35 = vsub.s32 %v116_v32, %v118_v33 }
  0x19   :  { %v108_v27 = vadd.f32 %v107_v25, %v92_v22 }
  0x1a   :  { %v132_v41 = vld [vmem:[#allocation2] sm:$0x3] }
  0x1b   :  { %v109_v28 = vadd.f32 %v108_v27, %v93_v24 }
  0x1d   :  { %v110_v29 = vadd.f32 %v109_v28, %v94_v26 }
  0x1f   :  { %111 = vadd.xlane.f32.xlu0 %v110_v29 }
  0xa4   :  { %v103_v34 = vpop.xlane.xlu0 %102 }
  0xa5   :  { %v120_v37 = vrot.slane %v103_v34, %v119_v35 }
  0xac   :  { %v112_v36 = vpop.xlane.xlu0 %111 }
  0xad   :  { %v124_v38 = vrot.slane %v112_v36, %v119_v35 }
  0xaf   :  { %v126_v39 = vsel %vm125_vm1, %v124_v38, %v120_v37 }
  0xb0   :  { %v129_v40 = vsel %vm128_vm2, %v126_v39, 0.0 }
  0xb1   :  { %130 = vadd.xlane.f32.xlu1 %v129_v40 }
 0x13e   :  { %v131_v42 = vpop.xlane.xlu1 %130 }
 0x13f   :  { %v133_v43 = vadd.f32 %v132_v41, %v131_v42 }
 0x141   :  { %135 = vst.msk [vmem:[#allocation2] sm:$0x3] %vm12_vm0, %v133_v43 }
 0x148   :  { %v139_v44 = vld [vmem:[#allocation2] sm:$0x3] }
 0x149   :  { %v140_v45 = vmul.f32 0.00012207031, %v139_v44 }
 0x14b   :  { %141 = vst.msk [vmem:[%s221_s1] sm:$0x3] %vm12_vm0, %v140_v45 }

// kernel: vgg_distance.17
= control target key start
LH: loop header
LB: loop body
LE: loop exit
PB: predicated region body
PF: predicated region fallthrough
CT: control target
= control target key end

     0   :  { %s359_s6 = smov 0   ;;  %s361_s7 = smov 0   ;;  %s392_s0 = inlined_call_operand.vmem [shape: bf16[4,8,4,256], index: 0, kind: input, shape index: {}]   ;;  %s393_s1 = inlined_call_operand.vmem [shape: bf16[4,4,4,128], index: 1, kind: output, shape index: {}]  }
   0x1   :  { %s363_s8 = smov 0  }
   0x2 LB: > { %s23_s9 = sadd.s32 1, %s342_s7  ;;  %p290_p0 = scmp.ge.s32.totalorder %s346_s8, 1  ;;  %s346_s8 = sphi %s363_s8, %s11_s8   ;;  %s342_s7 = sphi %s361_s7, %s395_s7   ;;  %s338_s6 = sphi %s359_s6, %s394_s6  }
   0x3   : > { %p25_p1 = scmp.ge.s32.totalorder %s23_s9, 4  ;;  %p109_p2 = scmp.lt.s32.totalorder %s346_s8, 5 }
   0x5   : > { %s397_s9 = smov (%p25_p1, %s23_s9), 0  ;;  %p110_p3 = pnand %p290_p0, %p109_p2 }
   0x6   : > { %p139_p4 = scmp.lt.s32.totalorder (!%p110_p3), %s338_s6, 3  ;;  %v348_v19 = vmov (!%p110_p3), 0  }
   0x7   : > { %113 = sbr.rel (%p110_p3) target bundleno = 29 (0x1d), region = 24 }
   0xe   : > { %s399_s6 = smov (!%p139_p4, %s338_s6), 3 }
   0xf   : > { %s297_s10 = sshll.u32 %s399_s6, 5  ;;  %s298_s14 = sshll.u32 %s399_s6, 3 }
  0x10   : > { %s147_s13 = scalar_lea.vmem %s392_s0, %s297_s10  ;;  %s157_s17 = scalar_lea.vmem %s393_s1, %s298_s14 }
  0x11   : > { %v160_v0 = vld [vmem:[%s147_s13] sm:$0xf]  ;;  %v161_v1 = vld [vmem:[%s147_s13 + $0x4] sm:$0xf]  ;;  %v162_v2 = vld [vmem:[%s147_s13 + $0x8] sm:$0xf] }
  0x12   : > { %v168_v3 = vmax.bf16 %v161_v1, %v160_v0  ;;  %v163_v4 = vld [vmem:[%s147_s13 + $0xc] sm:$0xf]  ;;  %v164_v5 = vld [vmem:[%s147_s13 + $0x10] sm:$0xf]  ;;  %v165_v6 = vld [vmem:[%s147_s13 + $0x14] sm:$0xf] }
  0x13   : > { %v169_v7 = vmax.bf16 %v163_v4, %v162_v2  ;;  %v170_v8 = vmax.bf16 %v165_v6, %v164_v5  ;;  %v166_v9 = vld [vmem:[%s147_s13 + $0x18] sm:$0xf]  ;;  %v167_v10 = vld [vmem:[%s147_s13 + $0x1c] sm:$0xf] }
  0x14   : > { %v176_v11 = vrot.slane %v168_v3, 2  ;;  %v171_v12 = vmax.bf16 %v167_v10, %v166_v9 }
  0x15   : > { %v177_v13 = vrot.slane %v169_v7, 2  ;;  %v178_v14 = vrot.slane %v170_v8, 2 }
  0x16   : > { %v184_v15 = vmax.bf16 %v176_v11, %v168_v3  ;;  %v179_v16 = vrot.slane %v171_v12, 2 }
  0x17   : > { %v185_v17 = vmax.bf16 %v177_v13, %v169_v7  ;;  %v186_v18 = vmax.bf16 %v178_v14, %v170_v8 }
  0x18   : > { %v188_v20 = vmax.bf16 %v348_v19, %v184_v15  ;;  %v187_v21 = vmax.bf16 %v179_v16, %v171_v12 }
  0x19   : > { %v189_v22 = vmax.bf16 %v348_v19, %v185_v17  ;;  %v190_v23 = vmax.bf16 %v348_v19, %v186_v18 }
  0x1a   : > { %192 = vst [vmem:[%s157_s17] sm:$0x3] %v188_v20  ;;  %v191_v24 = vmax.bf16 %v348_v19, %v187_v21 }
  0x1b   : > { %193 = vst [vmem:[%s157_s17 + $0x2] sm:$0x3] %v189_v22  ;;  %194 = vst [vmem:[%s157_s17 + $0x4] sm:$0x3] %v190_v23 }
  0x1c   : > { %195 = vst [vmem:[%s157_s17 + $0x6] sm:$0x3] %v191_v24 }
  0x1d PF: > { %s11_s8 = sadd.s32 1, %s346_s8   ;;  %s394_s6 = smov %s342_s7 }
  0x1e   : > { %p8_p5 = scmp.ge.s32.totalorder %s11_s8, 6   ;;  %s395_s7 = smov %s397_s9 }
  0x20   :  { %10 = sbr.rel (!%p8_p5) target bundleno = 2 (0x2), region = 54 }

// kernel: vgg_distance.16
= control target key start
LH: loop header
LB: loop body
LE: loop exit
PB: predicated region body
PF: predicated region fallthrough
CT: control target
= control target key end

     0   :  { %s2700_s12 = smov 0   ;;  %s2702_s13 = smov 0   ;;  %s3144_s0 = inlined_call_operand.vmem [shape: bf16[4,110,128], index: 0, kind: input, shape index: {}]   ;;  %s3145_s1 = inlined_call_operand.vmem [shape: bf16[1,1152,128], index: 1, kind: input, shape index: {}]   ;;  %s3146_s2 = inlined_call_operand.vmem [shape: f32[1,128], index: 2, kind: input, shape index: {}]   ;;  %s3147_s3 = inlined_call_operand.vmem [shape: bf16[4,80,128], index: 3, kind: output, shape index: {}]  }
   0x1   :  { %s2704_s14 = smov 0  }
   0x2 LB: > { %s32_s15 = sadd.s32 1, %s2672_s13  ;;  %p2072_p0 = scmp.ge.s32.totalorder %s2676_s14, 1  ;;  %s2676_s14 = sphi %s2704_s14, %s13_s14   ;;  %s2672_s13 = sphi %s2702_s13, %s3149_s13   ;;  %s2668_s12 = sphi %s2700_s12, %s3148_s12  }
   0x3   : > { %p34_p1 = scmp.ge.s32.totalorder %s32_s15, 4  ;;  %p186_p2 = scmp.lt.s32.totalorder %s2676_s14, 5 }
   0x5   : > { %s3151_s15 = smov (%p34_p1, %s32_s15), 0  ;;  %p187_p3 = pnand %p2072_p0, %p186_p2 }
   0x6   : > { %v2529_v0 = vld [vmem:[%s3145_s1 + $0x40] sm:$0xff] (!%p187_p3)   ;;  %v2533_v4 = vld [vmem:[%s3145_s1 + $0x48] sm:$0xff] (!%p187_p3)   ;;  %v2537_v8 = vld [vmem:[%s3145_s1 + $0x50] sm:$0xff] (!%p187_p3)   ;;  %p227_p4 = scmp.lt.s32.totalorder (!%p187_p3), %s2668_s12, 3  ;;  %vm433_vm0 = vcmask (!%p187_p3), 1046528   ;;  %vm657_vm2 = vcmask (!%p187_p3), 1045504  }
   0x7   : > { %190 = sbr.rel (%p187_p3) target bundleno = 355 (0x163), region = 32  ;;  %v2530_v1 = vld [vmem:[%s3145_s1 + $0xc0] sm:$0xff] (!%p187_p3)   ;;  %2252 = vmatprep.subr.bf16.mxu0 (!%p187_p3), %v2529_v0  ;;  %v2534_v5 = vld [vmem:[%s3145_s1 + $0xc8] sm:$0xff] (!%p187_p3)   ;;  %v2538_v9 = vld [vmem:[%s3145_s1 + $0xd0] sm:$0xff] (!%p187_p3)   ;;  %vm339_vm1 = vsmask.f32 (!%p187_p3), 7424 }
   0x8   : > { %v2531_v2 = vld [vmem:[%s3145_s1] sm:$0xff] (!%p187_p3)   ;;  %2298 = vmatprep.subr.bf16.mxu1 (!%p187_p3), %v2530_v1  ;;  %v2535_v6 = vld [vmem:[%s3145_s1 + $0x8] sm:$0xff] (!%p187_p3)   ;;  %v2539_v10 = vld [vmem:[%s3145_s1 + $0x10] sm:$0xff] (!%p187_p3)   ;;  %vm778_vm3 = vsmask.f32 (!%p187_p3), 5376  ;;  %vm2679_vm5 = vmmov (!%p187_p3), 0  }
   0x9   : > { %v2532_v3 = vld [vmem:[%s3145_s1 + $0x80] sm:$0xff] (!%p187_p3)   ;;  %2253 = vmatpush3.bf16.msra.mxu0 (!%p187_p3), %v2531_v2  ;;  %v2536_v7 = vld [vmem:[%s3145_s1 + $0x88] sm:$0xff] (!%p187_p3)   ;;  %v2540_v11 = vld [vmem:[%s3145_s1 + $0x90] sm:$0xff] (!%p187_p3)   ;;  %vm554_vm4 = vsmask.f32 (!%p187_p3), 6400  ;;  %vm881_vm6 = vcmask (!%p187_p3), 1044480  }
   0xa   : > { %2299 = vmatpush3.bf16.msra.mxu1 (!%p187_p3), %v2532_v3  ;;  %2254 = vmatprep.subr.bf16.mxu0 (!%p187_p3), %v2533_v4  ;;  %v2541_v12 = vld [vmem:[%s3145_s1 + $0x58] sm:$0xff] (!%p187_p3)   ;;  %v2545_v16 = vld [vmem:[%s3145_s1 + $0x60] sm:$0xff] (!%p187_p3)   ;;  %v2549_v20 = vld [vmem:[%s3145_s1 + $0x68] sm:$0xff] (!%p187_p3)  }
   0xb   : > { %2300 = vmatprep.subr.bf16.mxu1 (!%p187_p3), %v2534_v5  ;;  %v2542_v13 = vld [vmem:[%s3145_s1 + $0xd8] sm:$0xff] (!%p187_p3)   ;;  %v2546_v17 = vld [vmem:[%s3145_s1 + $0xe0] sm:$0xff] (!%p187_p3)   ;;  %v2550_v21 = vld [vmem:[%s3145_s1 + $0xe8] sm:$0xff] (!%p187_p3)  }
   0xc   : > { %v2543_v14 = vld [vmem:[%s3145_s1 + $0x18] sm:$0xff] (!%p187_p3)   ;;  %v2547_v18 = vld [vmem:[%s3145_s1 + $0x20] sm:$0xff] (!%p187_p3)   ;;  %v2551_v22 = vld [vmem:[%s3145_s1 + $0x28] sm:$0xff] (!%p187_p3)  }
   0xd   : > { %2255 = vmatpush3.bf16.msra.mxu0 (!%p187_p3), %v2535_v6  ;;  %v2544_v15 = vld [vmem:[%s3145_s1 + $0x98] sm:$0xff] (!%p187_p3)   ;;  %v2548_v19 = vld [vmem:[%s3145_s1 + $0xa0] sm:$0xff] (!%p187_p3)   ;;  %v2552_v23 = vld [vmem:[%s3145_s1 + $0xa8] sm:$0xff] (!%p187_p3)  }
   0xe   : > { %2301 = vmatpush3.bf16.msra.mxu1 %v2536_v7  ;;  %2256 = vmatprep.subr.bf16.mxu0 %v2537_v8  ;;  %s3153_s12 = smov (!%p227_p4, %s2668_s12), 3  ;;  %v2553_v24 = vld [vmem:[%s3145_s1 + $0x70] sm:$0xff]   ;;  %v2557_v28 = vld [vmem:[%s3145_s1 + $0x78] sm:$0xff]   ;;  %v2568_v49 = vld [vmem:[%s3145_s1 + $0x140] sm:$0xff]  }
   0xf   : > { %2302 = vmatprep.subr.bf16.mxu1 %v2538_v9  ;;  %v2554_v25 = vld [vmem:[%s3145_s1 + $0xf0] sm:$0xff]   ;;  %s2501_s24 = smul.u32 56, %s3153_s12  ;;  %v2558_v29 = vld [vmem:[%s3145_s1 + $0xf8] sm:$0xff]   ;;  %v2569_v52 = vld [vmem:[%s3145_s1 + $0x100] sm:$0xff]  }
  0x10   : > { %v2555_v26 = vld [vmem:[%s3145_s1 + $0x30] sm:$0xff]   ;;  %v2559_v30 = vld [vmem:[%s3145_s1 + $0x38] sm:$0xff]   ;;  %v2570_v53 = vld [vmem:[%s3145_s1 + $0x148] sm:$0xff]   ;;  %s2502_s30 = smul.u32 40, %s3153_s12 }
  0x11   : > { %2257 = vmatpush3.bf16.msra.mxu0 %v2539_v10  ;;  %v2556_v27 = vld [vmem:[%s3145_s1 + $0xb0] sm:$0xff]   ;;  %s2821_s8 = scalar_lea.vmem %s3144_s0, %s2501_s24  ;;  %v2560_v31 = vld [vmem:[%s3145_s1 + $0xb8] sm:$0xff]   ;;  %v2571_v56 = vld [vmem:[%s3145_s1 + $0x108] sm:$0xff]  }
  0x12   : > { %2303 = vmatpush3.bf16.msra.mxu1 %v2540_v11  ;;  %2258 = vmatprep.subr.bf16.mxu0 %v2541_v12  ;;  %v2561_v32 = vld [vmem:[%s2821_s8] sm:$0xff]   ;;  %v2562_v33 = vld [vmem:[%s2821_s8 + $0x8] sm:$0xff]   ;;  %v2572_v57 = vld [vmem:[%s2821_s8 + $0x10] sm:$0xff]   ;;  %s253_s6 = scalar_lea.vmem %s3147_s3, %s2502_s30 }
  0x13   : > { %2304 = vmatprep.subr.bf16.mxu1 %v2542_v13  ;;  %v341_v34 = vshrl.u32 %v2561_v32, 16  ;;  %v343_v35 = vshll.u32 %v2561_v32, 16  ;;  %v348_v36 = vshll.u32 %v2562_v33, 16  ;;  %v2564_v37 = vld [vmem:[%s2821_s8 + $0xc] sm:$0xff]   ;;  %v2563_v38 = vld [vmem:[%s2821_s8 + $0x4] sm:$0xfe]  }
  0x14   : > { %v495_v41 = vrot.slane %v2564_v37, 1  ;;  %v2565_v42 = vld [vmem:[%s2821_s8] sm:$0xff]   ;;  %v494_v43 = vrot.slane %v2563_v38, 1  ;;  %v2567_v44 = vld [vmem:[%s2821_s8 + $0x8] sm:$0xff]   ;;  %v352_v54 = vshrl.u32 %v2562_v33, 16  ;;  %v2573_v58 = vld [vmem:[%s2821_s8 + $0x14] sm:$0xff]  }
  0x15   : > { %2259 = vmatpush3.bf16.msra.mxu0 %v2543_v14  ;;  %v345_v39 = vrot.slane %v343_v35, 1  ;;  %v350_v40 = vrot.slane %v348_v36, 1  ;;  %v2566_v46 = vld [vmem:[%s2821_s8] sm:$0xfe]   ;;  %v435_v48 = vrot.slane %v2567_v44, 1  ;;  %v356_v60 = vshll.u32 %v2572_v57, 16 }
  0x16   : > { %2305 = vmatpush3.bf16.msra.mxu1 %v2544_v15  ;;  %2260 = vmatprep.subr.bf16.mxu0 %v2545_v16  ;;  %v496_v47 = vsel %vm433_vm0, %v494_v43, %v495_v41  ;;  %v434_v51 = vrot.slane %v2566_v46, 1  ;;  %v2574_v61 = vld [vmem:[%s2821_s8 + $0x8] sm:$0xff]   ;;  %v497_v62 = vrot.slane %v2573_v58, 1  ;;  %v2575_v63 = vld [vmem:[%s2821_s8 + $0x10] sm:$0xff]   ;;  %v2576_v1 = vld [vmem:[%s3145_s1 + $0x1c0] sm:$0xff]   ;;  %v360_v10 = vshrl.u32 %v2572_v57, 16 }
  0x17   : > { %2306 = vmatprep.subr.bf16.mxu1 %v2546_v17  ;;  %v346_v45 = vor.u32 %v345_v39, %v341_v34  ;;  %1636 = vmatprep.mubr.bf16.mxu1 %v496_v47  ;;  %v354_v59 = vor.u32 %v352_v54, %v350_v40  ;;  %v358_v0 = vrot.slane %v356_v60, 1  ;;  %v437_v3 = vrot.slane %v2575_v63, 1  ;;  %v2577_v4 = vld [vmem:[%s3145_s1 + $0x180] sm:$0xff]   ;;  %v2578_v6 = vld [vmem:[%s3145_s1 + $0x150] sm:$0xff]   ;;  %v2580_v9 = vld [vmem:[%s3145_s1 + $0x1c8] sm:$0xff]  }
  0x18   : > { %v436_v55 = vsel %vm433_vm0, %v434_v51, %v435_v48  ;;  %v498_v2 = vsel %vm433_vm0, %v495_v41, %v497_v62  ;;  %v2579_v8 = vld [vmem:[%s3145_s1 + $0x110] sm:$0xff]   ;;  %v2581_v11 = vld [vmem:[%s3145_s1 + $0x188] sm:$0xff]   ;;  %v2582_v12 = vld [vmem:[%s2821_s8 + $0x18] sm:$0xff]  }
  0x19   : > { %2261 = vmatpush3.bf16.msra.mxu0 %v2547_v18  ;;  %v351_v50 = vsel %vm339_vm1, %v346_v45, %v350_v40  ;;  %v359_v5 = vsel %vm339_vm1, %v354_v59, %v358_v0  ;;  %v438_v7 = vsel %vm433_vm0, %v435_v48, %v437_v3  ;;  %v2583_v13 = vld [vmem:[%s2821_s8 + $0x1c] sm:$0xff]   ;;  %v362_v14 = vor.u32 %v360_v10, %v358_v0  ;;  %v2585_v18 = vld [vmem:[%s2821_s8 + $0x10] sm:$0xff]   ;;  %v2595_v34 = vld [vmem:[%s2821_s8 + $0x24] sm:$0xff]  }
  0x1a   : > { %2307 = vmatpush3.bf16.msra.mxu1 %v2548_v19  ;;  %2262 = vmatprep.subr.bf16.mxu0 %v2549_v20  ;;  %v364_v15 = vshll.u32 %v2582_v12, 16  ;;  %v2584_v16 = vld [vmem:[%s3145_s1 + $0x158] sm:$0xff]   ;;  %v499_v17 = vrot.slane %v2583_v13, 1  ;;  %v2594_v33 = vld [vmem:[%s2821_s8 + $0x20] sm:$0xff]   ;;  %v501_v38 = vrot.slane %v2595_v34, 1  ;;  %v2599_v44 = vld [vmem:[%s3145_s1 + $0x168] sm:$0xff]  }
  0x1b   : > { %2308 = vmatprep.subr.bf16.mxu1 %v2550_v21  ;;  %1563 = vmatprep.mubr.bf16.mxu0 %v351_v50  ;;  %v2586_v20 = vld [vmem:[%s2821_s8 + $0x18] sm:$0xff]   ;;  %v372_v36 = vshll.u32 %v2594_v33, 16  ;;  %v2597_v39 = vld [vmem:[%s2821_s8 + $0x20] sm:$0xff]   ;;  %v2601_v48 = vld [vmem:[%s3145_s1 + $0x128] sm:$0xff]   ;;  %v376_v51 = vshrl.u32 %v2594_v33, 16 }
  0x1c   : > { %v366_v19 = vrot.slane %v364_v15, 1  ;;  %v500_v21 = vsel %vm433_vm0, %v497_v62, %v499_v17  ;;  %v2593_v32 = vld [vmem:[%s3145_s1 + $0x198] sm:$0xff]   ;;  %v2598_v41 = vld [vmem:[%s3145_s1 + $0x1e0] sm:$0xff]   ;;  %v441_v43 = vrot.slane %v2597_v39, 1  ;;  %v2603_v50 = vld [vmem:[%s3145_s1 + $0x1a8] sm:$0xff]  }
  0x1d   : > { %2263 = vmatpush3.bf16.msra.mxu0 %v2551_v22  ;;  %v2587_v22 = vld [vmem:[%s3145_s1 + $0x118] sm:$0xff]   ;;  %v374_v40 = vrot.slane %v372_v36, 1  ;;  %v2600_v46 = vld [vmem:[%s3145_s1 + $0x1a0] sm:$0xff]   ;;  %v2607_v54 = vld [vmem:[%s3145_s1 + $0x130] sm:$0xff]  }
  0x1e   : > { %2309 = vmatpush3.bf16.msra.mxu1 %v2552_v23  ;;  %2264 = vmatprep.subr.bf16.mxu0 %v2553_v24  ;;  %v367_v23 = vsel %vm339_vm1, %v362_v14, %v366_v19  ;;  %v439_v24 = vrot.slane %v2586_v20, 1  ;;  %v2596_v37 = vld [vmem:[%s2821_s8 + $0x18] sm:$0xff]   ;;  %v2608_v58 = vld [vmem:[%s2821_s8 + $0x20] sm:$0xff]   ;;  %v2610_v59 = vld [vmem:[%s3145_s1 + $0x1f0] sm:$0xff]  }
  0x1f   : > { %2310 = vmatprep.subr.bf16.mxu1 %v2554_v25  ;;  %v2588_v25 = vld [vmem:[%s3145_s1 + $0x1d0] sm:$0xff]   ;;  %v2609_v63 = vld [vmem:[%s2821_s8 + $0x28] ss:$0 sps:$4 sm:$0x11]   ;;  %v2618_v13 = vld [vmem:[%s2821_s8 + $0x8] sm:$0xfc]  }
  0x20   : > { %v442_v47 = vsel %vm433_vm0, %v439_v24, %v441_v43  ;;  %v2617_v10 = vld [vmem:[%s2821_s8 + $0xc] sm:$0xff]  }
  0x21   : > { %2265 = vmatpush3.bf16.msra.mxu0 %v2555_v26  ;;  %v2589_v26 = vld [vmem:[%s3145_s1 + $0x190] sm:$0xff]   ;;  %v2622_v36 = vld [vmem:[%s2821_s8 + $0x8] sm:$0xfc]  }
  0x22   : > { %2311 = vmatpush3.bf16.msra.mxu1 %v2556_v27  ;;  %2266 = vmatprep.subr.bf16.mxu0 %v2557_v28  ;;  %v440_v27 = vsel %vm433_vm0, %v437_v3, %v439_v24  ;;  %v2590_v28 = vld [vmem:[%s3145_s1 + $0x160] sm:$0xff]   ;;  %v2612_v3 = vld [vmem:[%s3145_s1 + $0x178] sm:$0xff]   ;;  %v2619_v14 = vld [vmem:[%s2821_s8 + $0x10] sm:$0xff]  }
  0x23   : > { %2312 = vmatprep.subr.bf16.mxu1 %v2558_v29  ;;  %v2591_v29 = vld [vmem:[%s3145_s1 + $0x1d8] sm:$0xff]   ;;  %v2621_v15 = vld [vmem:[%s2821_s8 + $0xc] sm:$0xff]   ;;  %v791_v20 = vshll.u32 %v2619_v14, 16 }
  0x24   : > { %v564_v24 = vshrl.u32 %v2621_v15, 16 }
  0x25   : > { %2267 = vmatpush3.bf16.msra.mxu0 %v2559_v30  ;;  %v2592_v30 = vld [vmem:[%s3145_s1 + $0x120] sm:$0xff]  }
  0x26   : > { %2313 = vmatpush3.bf16.msra.mxu1 %v2560_v31  ;;  %2344 = vmatprep.subr.bf16.mxu0 %v2568_v49  ;;  %v368_v31 = vshrl.u32 %v2582_v12, 16  ;;  %v2602_v49 = vld [vmem:[%s3145_s1 + $0x1e8] sm:$0xff]   ;;  %v659_v12 = vrot.slane %v2617_v10, 2 }
  0x27   : > { %2390 = vmatprep.subr.bf16.mxu1 %v2576_v1 }
  0x28   : > { %1564 = vmatmul.mubr.bf16.vlgmr.msra.gmra.mrb[0].mxu0 %v2565_v42  ;;  %v370_v35 = vor.u32 %v368_v31, %v366_v19  ;;  %v502_v42 = vsel %vm433_vm0, %v499_v17, %v501_v38  ;;  %v780_v17 = vshrl.u32 %v2618_v13, 16  ;;  %v788_v19 = vshrl.u32 %v2619_v14, 16 }
  0x29   : > { %1637 = vmatmul.mubr.bf16.vlgmr.msra.gmra.mrb[0].mxu1 %v436_v55  ;;  %2345 = vmatpush3.bf16.msra.mxu0 %v2569_v52  ;;  %v2604_v52 = vld [vmem:[%s3145_s1 + $0x170] sm:$0xff]   ;;  %v2606_v55 = vld [vmem:[%s2821_s8 + $0x2c] ss:$0 sps:$4 sm:$0x11]   ;;  %v566_v31 = vrot.slane %v564_v24, 1 }
  0x2a   : > { %2346 = vmatprep.subr.bf16.mxu0 %v2570_v53  ;;  %1644 = vmatprep.mubr.bf16.mxu1 %v498_v2  ;;  %v375_v45 = vsel %vm339_vm1, %v370_v35, %v374_v40  ;;  %v2605_v53 = vld [vmem:[%s2821_s8 + $0x28] ss:$0 sps:$4 sm:$0x11]   ;;  %v503_v60 = vrot.slane %v2606_v55, 1  ;;  %v443_v2 = vrot.slane %v2609_v63, 1 }
  0x2b   : > { %1571 = vmatprep.mubr.bf16.mxu0 %v359_v5  ;;  %2391 = vmatpush3.bf16.msra.mxu1 %v2577_v4  ;;  %v380_v57 = vshll.u32 %v2605_v53, 16  ;;  %v2613_v4 = vld [vmem:[%s3145_s1 + $0x138] sm:$0xff]  }
  0x2c   : > { %2392 = vmatprep.subr.bf16.mxu1 %v2580_v9  ;;  %v504_v0 = vsel %vm433_vm0, %v501_v38, %v503_v60  ;;  %v444_v5 = vsel %vm433_vm0, %v441_v43, %v443_v2  ;;  %v2616_v9 = vld [vmem:[%s2821_s8 + $0x4] sm:$0xfc]   ;;  %v2629_v53 = vld [vmem:[%s2821_s8 + $0x18] sm:$0xff]  }
  0x2d   : > { %2347 = vmatpush3.bf16.msra.mxu0 %v2571_v56  ;;  %v378_v56 = vor.u32 %v376_v51, %v374_v40  ;;  %v382_v62 = vrot.slane %v380_v57, 1  ;;  %v2630_v57 = vld [vmem:[%s3145_s1 + $0x210] sm:$0xff]   ;;  %v721_v60 = vrot.slane %v2629_v53, 2  ;;  %v2632_v2 = vld [vmem:[%s2821_s8 + $0x20] sm:$0xff]  }
  0x2e   : > { %2348 = vmatprep.subr.bf16.mxu0 %v2578_v6  ;;  %v2614_v6 = vld [vmem:[%s3145_s1 + $0x1f8] sm:$0xff]   ;;  %v809_v10 = vshll.u32 %v2632_v2, 16 }
  0x2f   : > { %2393 = vmatpush3.bf16.msra.mxu1 %v2581_v11  ;;  %v383_v1 = vsel %vm339_vm1, %v378_v56, %v382_v62  ;;  %v658_v11 = vrot.slane %v2616_v9, 2  ;;  %v806_v9 = vshrl.u32 %v2632_v2, 16 }
  0x30   : > { %1572 = vmatmul.mubr.bf16.gmra.mrb[4].mxu0 %v2574_v61  ;;  %2394 = vmatprep.subr.bf16.mxu1 %v2588_v25  ;;  %v2611_v61 = vld [vmem:[%s3145_s1 + $0x1b0] sm:$0xff]  }
  0x31   : > { %1645 = vmatmul.mubr.bf16.gmra.mrb[4].mxu1 %v438_v7  ;;  %2349 = vmatpush3.bf16.msra.mxu0 %v2579_v8  ;;  %v2615_v7 = vld [vmem:[%s3145_s1 + $0x1b8] sm:$0xff]   ;;  %v2678_v8 = vmov 0.0   ;;  %v2623_v25 = vld [vmem:[%s2821_s8 + $0x10] sm:$0xff]  }
  0x32   : > { %2350 = vmatprep.subr.bf16.mxu0 %v2584_v16  ;;  %1652 = vmatprep.mubr.bf16.mxu1 %v500_v21  ;;  %v660_v16 = vsel %vm657_vm2, %v658_v11, %v659_v12  ;;  %v2620_v21 = vld [vmem:[%s2821_s8 + $0x4] sm:$0xfe]   ;;  %v719_v38 = vrot.slane %v2623_v25, 2 }
  0x33   : > { %1579 = vmatprep.mubr.bf16.mxu0 %v367_v23  ;;  %2395 = vmatpush3.bf16.msra.mxu1 %v2589_v26  ;;  %v790_v26 = vrot.slane %v788_v19, 2  ;;  %v2999_v11 = vld [vmem:[%s2821_s8 + $0x20] sm:$0xff]   ;;  %v2638_v25 = vld [vmem:[%s2821_s8 + $0x28] sm:$0xff]  }
  0x34   : > { %2396 = vmatprep.subr.bf16.mxu1 %v2591_v29  ;;  %v559_v29 = vshll.u32 %v2620_v21, 16 }
  0x35   : > { %2351 = vmatpush3.bf16.msra.mxu0 %v2587_v22  ;;  %v782_v22 = vrot.slane %v780_v17, 2  ;;  %v811_v17 = vrot.slane %v809_v10, 3  ;;  %v2651_v10 = vld [vmem:[%s2821_s8 + $0x28] sm:$0xff]  }
  0x36   : > { %2352 = vmatprep.subr.bf16.mxu0 %v2590_v28  ;;  %v556_v28 = vshrl.u32 %v2620_v21, 16  ;;  %v561_v35 = vrot.slane %v559_v29, 2  ;;  %v2636_v21 = vld [vmem:[%s3145_s1 + $0x220] sm:$0xff]  }
  0x37   : > { %2397 = vmatpush3.bf16.msra.mxu1 %v2593_v32  ;;  %v567_v32 = vshll.u32 %v2621_v15, 16 }
  0x38   : > { %1580 = vmatmul.mubr.bf16.gmra.mrb[8].mxu0 %v2585_v18  ;;  %2398 = vmatprep.subr.bf16.mxu1 %v2598_v41  ;;  %v783_v18 = vshll.u32 %v2618_v13, 16  ;;  %v558_v34 = vrot.slane %v556_v28, 1  ;;  %v718_v41 = vrot.slane %v2622_v36, 2  ;;  %v2639_v28 = vld [vmem:[%s2821_s8 + $0x24] sm:$0xff]  }
  0x39   : > { %1653 = vmatmul.mubr.bf16.gmra.mrb[8].mxu1 %v440_v27  ;;  %2353 = vmatpush3.bf16.msra.mxu0 %v2592_v30  ;;  %v793_v27 = vrot.slane %v791_v20, 3  ;;  %v591_v36 = vshrl.u32 %v2639_v28, 16 }
  0x3a   : > { %1660 = vmatprep.mubr.bf16.mxu1 %v502_v42  ;;  %1587 = vmatprep.mubr.bf16.mxu0 %v375_v45  ;;  %v785_v23 = vrot.slane %v783_v18, 3  ;;  %v562_v40 = vor.u32 %v561_v35, %v558_v34  ;;  %v2624_v42 = vld [vmem:[%s3145_s1 + $0x200] sm:$0xff]   ;;  %v2625_v45 = vld [vmem:[%s3145_s1 + $0x208] sm:$0xff]   ;;  %v723_v18 = vrot.slane %v2999_v11, 2 }
  0x3b   : > { %2354 = vmatprep.subr.bf16.mxu0 %v2599_v44  ;;  %2399 = vmatpush3.bf16.msra.mxu1 %v2600_v46  ;;  %v794_v33 = vor.u32 %v793_v27, %v790_v26  ;;  %v720_v44 = vsel %vm657_vm2, %v718_v41, %v719_v38  ;;  %v2626_v46 = vld [vmem:[%s2821_s8 + $0x14] sm:$0xff]   ;;  %v2641_v34 = vld [vmem:[%s3145_s1 + $0x228] sm:$0xff]  }
  0x3c   : > { %2400 = vmatprep.subr.bf16.mxu1 %v2602_v49  ;;  %v786_v30 = vor.u32 %v785_v23, %v782_v22  ;;  %v661_v49 = vrot.slane %v2626_v46, 2  ;;  %v2637_v23 = vld [vmem:[%s2821_s8 + $0x24] sm:$0xff]   ;;  %v2642_v41 = vld [vmem:[%s2821_s8 + $0x2c] ss:$0 sps:$4 sm:$0x33]  }
  0x3d   : > { %2355 = vmatpush3.bf16.msra.mxu0 %v2601_v48  ;;  %v2627_v48 = vld [vmem:[%s2821_s8 + $0x18] sm:$0xff]   ;;  %v665_v27 = vrot.slane %v2637_v23, 2  ;;  %v2643_v46 = vld [vmem:[%s2821_s8 + $0x30] ss:$0 sps:$4 sm:$0x77]  }
  0x3e   : > { %2356 = vmatprep.subr.bf16.mxu0 %v2604_v52  ;;  %v795_v39 = vsel %vm778_vm3, %v786_v30, %v794_v33  ;;  %v797_v51 = vshrl.u32 %v2627_v48, 16  ;;  %v800_v52 = vshll.u32 %v2627_v48, 16  ;;  %v724_v30 = vsel %vm657_vm2, %v721_v60, %v723_v18  ;;  %v2644_v48 = vld [vmem:[%s3145_s1 + $0x230] sm:$0xff]  }
  0x3f   : > { %2401 = vmatpush3.bf16.msra.mxu1 %v2603_v50  ;;  %v2628_v50 = vld [vmem:[%s2821_s8 + $0x14] sm:$0xff]  }
  0x40   : > { %1588 = vmatmul.mubr.bf16.gmra.mrb[12].mxu0 %v2596_v37  ;;  %2402 = vmatprep.subr.bf16.mxu1 %v2610_v59  ;;  %v569_v37 = vrot.slane %v567_v32, 2  ;;  %v573_v55 = vshrl.u32 %v2628_v50, 16  ;;  %v576_v56 = vshll.u32 %v2628_v50, 16  ;;  %v802_v59 = vrot.slane %v800_v52, 3 }
  0x41   : > { %1661 = vmatmul.mubr.bf16.gmra.mrb[12].mxu1 %v442_v47  ;;  %2357 = vmatpush3.bf16.msra.mxu0 %v2607_v54  ;;  %v662_v54 = vsel %vm657_vm2, %v659_v12, %v661_v49  ;;  %v2635_v12 = vld [vmem:[%s3145_s1 + $0x218] sm:$0xff]   ;;  %v818_v32 = vshll.u32 %v2638_v25, 16  ;;  %v827_v52 = vshll.u32 %v2643_v46, 16 }
  0x42   : > { %1668 = vmatprep.mubr.bf16.mxu1 %v504_v0  ;;  %1595 = vmatprep.mubr.bf16.mxu0 %v383_v1  ;;  %v570_v43 = vor.u32 %v569_v37, %v566_v31  ;;  %v575_v62 = vrot.slane %v573_v55, 1  ;;  %v578_v63 = vrot.slane %v576_v56, 2  ;;  %v815_v31 = vshrl.u32 %v2638_v25, 16  ;;  %v2646_v55 = vld [vmem:[%s2821_s8 + $0x30] ss:$0 sps:$4 sm:$0x33]  }
  0x43   : > { %2403 = vmatpush3.bf16.msra.mxu1 %v2611_v61  ;;  %2358 = vmatprep.subr.bf16.mxu0 %v2612_v3  ;;  %v2631_v61 = vld [vmem:[%s2821_s8 + $0x1c] sm:$0xff]   ;;  %v594_v37 = vshll.u32 %v2639_v28, 16 }
  0x44   : > { %2404 = vmatprep.subr.bf16.mxu1 %v2614_v6  ;;  %v571_v47 = vsel %vm554_vm4, %v562_v40, %v570_v43  ;;  %v663_v1 = vrot.slane %v2631_v61, 2  ;;  %v579_v3 = vor.u32 %v578_v63, %v575_v62  ;;  %v3071_v25 = vld [vmem:[%s3146_s2] ss:$0 sm:$0xff] }
  0x45   : > { %2359 = vmatpush3.bf16.msra.mxu0 %v2613_v4  ;;  %v722_v4 = vsel %vm657_vm2, %v719_v38, %v721_v60  ;;  %v817_v38 = vrot.slane %v815_v31, 2 }
  0x46   : > { %2449 = vmatprep.subr.bf16.mxu0 %v2678_v8  ;;  %v580_v13 = vsel %vm554_vm4, %v570_v43, %v579_v3  ;;  %v666_v35 = vsel %vm657_vm2, %v663_v1, %v665_v27  ;;  %v596_v43 = vrot.slane %v594_v37, 2 }
  0x47   : > { %2405 = vmatpush3.bf16.msra.mxu1 %v2615_v7  ;;  %v664_v7 = vsel %vm657_vm2, %v661_v49, %v663_v1  ;;  %v2645_v49 = vld [vmem:[%s2821_s8 + $0x2c] ss:$0 sps:$4 sm:$0x33]  }
  0x48   : > { %1596 = vmatmul.mubr.bf16.gmra.mrb[16].mxu0 %v2608_v58  ;;  %2485 = vmatprep.subr.bf16.mxu1 %v2678_v8  ;;  %v799_v58 = vrot.slane %v797_v51, 2  ;;  %v824_v51 = vshrl.u32 %v2643_v46, 16  ;;  %v600_v53 = vshrl.u32 %v2645_v49, 16 }
  0x49   : > { %1669 = vmatmul.mubr.bf16.gmra.mrb[16].mxu1 %v444_v5  ;;  %1709 = vmatprep.mubr.bf16.mxu0 %v660_v16  ;;  %v2633_v5 = vld [vmem:[%s2821_s8 + $0x1c] sm:$0xff]   ;;  %v808_v16 = vrot.slane %v806_v9, 2 }
  0x4a   : > { %1782 = vmatprep.mubr.bf16.mxu1 %v795_v39  ;;  %v803_v0 = vor.u32 %v802_v59, %v799_v58  ;;  %v582_v14 = vshrl.u32 %v2633_v5, 16  ;;  %v585_v15 = vshll.u32 %v2633_v5, 16  ;;  %v820_v39 = vrot.slane %v818_v32, 3  ;;  %v2650_v9 = vld [vmem:[%s2821_s8 + $0x20] sm:$0xff]  }
  0x4b   : > { %v812_v22 = vor.u32 %v811_v17, %v808_v16  ;;  %v826_v58 = vrot.slane %v824_v51, 2  ;;  %v829_v59 = vrot.slane %v827_v52, 3  ;;  %v602_v61 = vrot.slane %v600_v53, 1  ;;  %v2652_v17 = vld [vmem:[%s2821_s8 + $0x18] sm:$0xff]  }
  0x4c   : > { %v804_v6 = vsel %vm778_vm3, %v794_v33, %v803_v0  ;;  %v584_v19 = vrot.slane %v582_v14, 1  ;;  %v587_v20 = vrot.slane %v585_v15, 2  ;;  %v2640_v33 = vld [vmem:[%s2821_s8 + $0x28] sm:$0xff]   ;;  %v889_v14 = vrot.slane %v2651_v10, 3 }
  0x4d   : > { %v813_v26 = vsel %vm778_vm3, %v803_v0, %v812_v22  ;;  %v725_v40 = vrot.slane %v2640_v33, 2  ;;  %v830_v63 = vor.u32 %v829_v59, %v826_v58  ;;  %v2647_v0 = vld [vmem:[%s3145_s1 + $0x238] sm:$0xff]  }
  0x4e   : > { %v588_v24 = vor.u32 %v587_v20, %v584_v19  ;;  %v885_v19 = vrot.slane %v2652_v17, 3 }
  0x50   : > { %1710 = vmatmul.mubr.bf16.vlgmr.msra.gmra.mrb[20].mxu0 %v571_v47  ;;  %v589_v29 = vsel %vm554_vm4, %v579_v3, %v588_v24  ;;  %v727_v3 = vrot.slane %v2646_v55, 2 }
  0x51   : > { %1783 = vmatmul.mubr.bf16.vlgmr.msra.gmra.mrb[20].mxu1 %v720_v44  ;;  %2450 = vmatpush3.bf16.msra.mxu0 %v2624_v42  ;;  %v821_v44 = vor.u32 %v820_v39, %v817_v38 }
  0x52   : > { %2493 = vmatpush3.bf16.msra.mxu1 %v2624_v42  ;;  %2451 = vmatprep.subr.bf16.mxu0 %v2678_v8  ;;  %v593_v42 = vrot.slane %v591_v36, 1 }
  0x53   : > { %2486 = vmatprep.subr.bf16.mxu1 %v2678_v8  ;;  %1717 = vmatprep.mubr.bf16.mxu0 %v662_v54  ;;  %v822_v50 = vsel %vm778_vm3, %v812_v22, %v821_v44  ;;  %v603_v54 = vshll.u32 %v2645_v49, 16  ;;  %v831_v1 = vsel %vm778_vm3, %v821_v44, %v830_v63 }
  0x54   : > { %1790 = vmatprep.mubr.bf16.mxu1 %v804_v6  ;;  %v597_v47 = vor.u32 %v596_v43, %v593_v42  ;;  %v728_v6 = vsel %vm657_vm2, %v725_v40, %v727_v3 }
  0x55   : > { %2452 = vmatpush3.bf16.msra.mxu0 %v2625_v45  ;;  %v605_v62 = vrot.slane %v603_v54, 2 }
  0x56   : > { %2494 = vmatpush3.bf16.msra.mxu1 %v2625_v45  ;;  %2453 = vmatprep.subr.bf16.mxu0 %v2678_v8  ;;  %v667_v45 = vrot.slane %v2642_v41, 2  ;;  %v598_v56 = vsel %vm554_vm4, %v588_v24, %v597_v47 }
  0x57   : > { %2487 = vmatprep.subr.bf16.mxu1 %v2678_v8  ;;  %v606_v2 = vor.u32 %v605_v62, %v602_v61 }
  0x58   : > { %1718 = vmatmul.mubr.bf16.gmra.mrb[24].mxu0 %v580_v13  ;;  %v668_v60 = vsel %vm657_vm2, %v665_v27, %v667_v45  ;;  %v887_v13 = vrot.slane %v2650_v9, 3 }
  0x59   : > { %1791 = vmatmul.mubr.bf16.gmra.mrb[24].mxu1 %v722_v4  ;;  %2454 = vmatpush3.bf16.msra.mxu0 %v2630_v57  ;;  %v2649_v4 = vld [vmem:[%s2821_s8 + $0x10] sm:$0xff]   ;;  %v607_v5 = vsel %vm554_vm4, %v597_v47, %v606_v2 }
  0x5a   : > { %2495 = vmatpush3.bf16.msra.mxu1 %v2630_v57  ;;  %1725 = vmatprep.mubr.bf16.mxu0 %v664_v7  ;;  %v726_v57 = vsel %vm657_vm2, %v723_v18, %v725_v40  ;;  %v2648_v7 = vld [vmem:[%s2821_s8 + $0x8] sm:$0xf8]   ;;  %v890_v16 = vsel %vm881_vm6, %v887_v13, %v889_v14  ;;  %v2653_v18 = vld [vmem:[%s2821_s8 + $0x30] ss:$0 sps:$4 sm:$0x77]   ;;  %v888_v23 = vsel %vm881_vm6, %v885_v19, %v887_v13 }
  0x5b   : > { %2455 = vmatprep.subr.bf16.mxu0 %v2678_v8  ;;  %2488 = vmatprep.subr.bf16.mxu1 %v2678_v8  ;;  %v882_v11 = vrot.slane %v2648_v7, 3  ;;  %v891_v20 = vrot.slane %v2653_v18, 3 }
  0x5c   : > { %1798 = vmatprep.mubr.bf16.mxu1 %v813_v26 }
  0x5d   : > { %2456 = vmatpush3.bf16.msra.mxu0 %v2635_v12  ;;  %v892_v22 = vsel %vm881_vm6, %v889_v14, %v891_v20 }
  0x5e   : > { %2496 = vmatpush3.bf16.msra.mxu1 %v2635_v12  ;;  %2457 = vmatprep.subr.bf16.mxu0 %v2678_v8  ;;  %v883_v12 = vrot.slane %v2649_v4, 3 }
  0x5f   : > { %2489 = vmatprep.subr.bf16.mxu1 %v2678_v8 }
  0x60   : > { %1726 = vmatmul.mubr.bf16.gmra.mrb[28].mxu0 %v589_v29  ;;  %v884_v15 = vsel %vm881_vm6, %v882_v11, %v883_v12 }
  0x61   : > { %1799 = vmatmul.mubr.bf16.gmra.mrb[28].mxu1 %v724_v30  ;;  %2458 = vmatpush3.bf16.msra.mxu0 %v2636_v21 }
  0x62   : > { %2497 = vmatpush3.bf16.msra.mxu1 %v2636_v21  ;;  %1733 = vmatprep.mubr.bf16.mxu0 %v666_v35  ;;  %v886_v21 = vsel %vm881_vm6, %v883_v12, %v885_v19 }
  0x63   : > { %2459 = vmatprep.subr.bf16.mxu0 %v2678_v8  ;;  %2490 = vmatprep.subr.bf16.mxu1 %v2678_v8 }
  0x64   : > { %1806 = vmatprep.mubr.bf16.mxu1 %v822_v50 }
  0x65   : > { %2460 = vmatpush3.bf16.msra.mxu0 %v2641_v34 }
  0x66   : > { %2498 = vmatpush3.bf16.msra.mxu1 %v2641_v34  ;;  %2461 = vmatprep.subr.bf16.mxu0 %v2678_v8 }
  0x67   : > { %2491 = vmatprep.subr.bf16.mxu1 %v2678_v8 }
  0x68   : > { %1734 = vmatmul.mubr.bf16.gmra.mrb[32].mxu0 %v598_v56 }
  0x69   : > { %1807 = vmatmul.mubr.bf16.gmra.mrb[32].mxu1 %v726_v57  ;;  %1741 = vmatprep.mubr.bf16.mxu0 %v668_v60 }
  0x6a   : > { %2499 = vmatpush3.bf16.msra.mxu1 %v2644_v48  ;;  %2462 = vmatpush3.bf16.msra.mxu0 %v2644_v48 }
  0x6b   : > { %1814 = vmatprep.mubr.bf16.mxu1 %v831_v1  ;;  %2463 = vmatprep.subr.bf16.mxu0 %v2678_v8 }
  0x6c   : > { %2492 = vmatprep.subr.bf16.mxu1 %v2678_v8 }
  0x6e   : > { %2500 = vmatpush3.bf16.msra.mxu1 %v2647_v0  ;;  %2464 = vmatpush3.bf16.msra.mxu0 %v2647_v0 }
  0x70   : > { %1742 = vmatmul.mubr.bf16.gmra.mrb[36].mxu0 %v607_v5 }
  0x71   : > { %1815 = vmatmul.mubr.bf16.gmra.mrb[36].mxu1 %v728_v6  ;;  %2465 = vmatprep.mubr.msk.bf16.mxu0 %vm2679_vm5, %v2678_v8 }
  0x72   : > { %2477 = vmatprep.mubr.msk.bf16.mxu1 %vm2679_vm5, %v2678_v8 }
  0x78   : > { %2466 = vmatmul.mubr.bf16.vlgmr.msra.gmra.mrb[40].mxu0 %v884_v15 }
  0x79   : > { %2478 = vmatmul.mubr.bf16.vlgmr.msra.gmra.mrb[40].mxu1 %v890_v16  ;;  %2469 = vmatprep.mubr.msk.bf16.mxu0 %vm2679_vm5, %v2678_v8 }
  0x7a   : > { %2481 = vmatprep.mubr.msk.bf16.mxu1 %vm2679_vm5, %v2678_v8 }
  0x80   : > { %2470 = vmatmul.mubr.bf16.gmra.mrb[44].mxu0 %v886_v21 }
  0x81   : > { %2482 = vmatmul.mubr.bf16.gmra.mrb[44].mxu1 %v892_v22  ;;  %2473 = vmatprep.mubr.msk.bf16.mxu0 %vm2679_vm5, %v2678_v8 }
  0x88   : > { %2474 = vmatmul.mubr.bf16.gmra.mrb[48].mxu0 %v888_v23 }
  0xfb   : > { %v2268_v24 = vpop.f32.mrb[0].mxu0 }
  0xfc   : > { %v2269_v26 = vpop.f32.mrb[1].mxu0  ;;  %v2314_v27 = vpop.f32.mrb[0].mxu1 }
  0xfd   : > { %v2270_v28 = vadd.f32 %v2269_v26, %v2268_v24  ;;  %v2271_v29 = vpop.f32.mrb[2].mxu0  ;;  %v2315_v30 = vpop.f32.mrb[1].mxu1 }
  0xfe   : > { %v2272_v31 = vpop.f32.mrb[3].mxu0  ;;  %v2316_v32 = vadd.f32 %v2315_v30, %v2314_v27  ;;  %v2317_v33 = vpop.f32.mrb[2].mxu1 }
  0xff   : > { %v1566_v34 = vadd.f32 %v2270_v28, %v3071_v25  ;;  %v2273_v8 = vadd.f32 %v2272_v31, %v2271_v29  ;;  %v2318_v35 = vpop.f32.mrb[3].mxu1 }
 0x100   : > { %v2319_v36 = vadd.f32 %v2318_v35, %v2317_v33 }
 0x101   : > { %v1569_v37 = vadd.f32 %v2273_v8, %v3071_v25  ;;  %v3075_v38 = vadd.f32 %v2316_v32, %v1566_v34 }
 0x103   : > { %v3077_v39 = vadd.f32 %v2319_v36, %v1569_v37  ;;  %v2274_v40 = vpop.f32.mrb[4].mxu0 }
 0x104   : > { %v2320_v41 = vpop.f32.mrb[4].mxu1  ;;  %v2275_v42 = vpop.f32.mrb[5].mxu0 }
 0x105   : > { %v2321_v43 = vpop.f32.mrb[5].mxu1  ;;  %v2276_v44 = vadd.f32 %v2275_v42, %v2274_v40  ;;  %v2277_v45 = vpop.f32.mrb[6].mxu0 }
 0x106   : > { %v2322_v46 = vadd.f32 %v2321_v43, %v2320_v41  ;;  %v2323_v47 = vpop.f32.mrb[6].mxu1  ;;  %v2278_v48 = vpop.f32.mrb[7].mxu0 }
 0x107   : > { %v2324_v49 = vpop.f32.mrb[7].mxu1  ;;  %v1574_v50 = vadd.f32 %v2276_v44, %v3071_v25  ;;  %v2279_v51 = vadd.f32 %v2278_v48, %v2277_v45 }
 0x108   : > { %v2325_v52 = vadd.f32 %v2324_v49, %v2323_v47 }
 0x109   : > { %v1577_v53 = vadd.f32 %v2279_v51, %v3071_v25  ;;  %v3081_v54 = vadd.f32 %v2322_v46, %v1574_v50 }
 0x10b   : > { %v3083_v55 = vadd.f32 %v2325_v52, %v1577_v53  ;;  %v2280_v56 = vpop.f32.mrb[8].mxu0 }
 0x10c   : > { %v2281_v57 = vpop.f32.mrb[9].mxu0  ;;  %v2326_v58 = vpop.f32.mrb[8].mxu1 }
 0x10d   : > { %v2282_v59 = vadd.f32 %v2281_v57, %v2280_v56  ;;  %v2283_v60 = vpop.f32.mrb[10].mxu0  ;;  %v2327_v61 = vpop.f32.mrb[9].mxu1 }
 0x10e   : > { %v2284_v62 = vpop.f32.mrb[11].mxu0  ;;  %v2328_v63 = vadd.f32 %v2327_v61, %v2326_v58  ;;  %v2329_v0 = vpop.f32.mrb[10].mxu1 }
 0x10f   : > { %v1582_v1 = vadd.f32 %v2282_v59, %v3071_v25  ;;  %v2285_v2 = vadd.f32 %v2284_v62, %v2283_v60  ;;  %v2330_v3 = vpop.f32.mrb[11].mxu1 }
 0x110   : > { %v2331_v4 = vadd.f32 %v2330_v3, %v2329_v0 }
 0x111   : > { %v1585_v5 = vadd.f32 %v2285_v2, %v3071_v25  ;;  %v3087_v6 = vadd.f32 %v2328_v63, %v1582_v1 }
 0x113   : > { %v3089_v7 = vadd.f32 %v2331_v4, %v1585_v5  ;;  %v2286_v9 = vpop.f32.mrb[12].mxu0 }
 0x114   : > { %v2332_v10 = vpop.f32.mrb[12].mxu1  ;;  %v2287_v11 = vpop.f32.mrb[13].mxu0 }
 0x115   : > { %v2333_v12 = vpop.f32.mrb[13].mxu1  ;;  %v2288_v13 = vadd.f32 %v2287_v11, %v2286_v9  ;;  %v2289_v14 = vpop.f32.mrb[14].mxu0 }
 0x116   : > { %v2334_v15 = vadd.f32 %v2333_v12, %v2332_v10  ;;  %v2335_v16 = vpop.f32.mrb[14].mxu1  ;;  %v2290_v17 = vpop.f32.mrb[15].mxu0 }
 0x117   : > { %v2336_v18 = vpop.f32.mrb[15].mxu1  ;;  %v1590_v19 = vadd.f32 %v2288_v13, %v3071_v25  ;;  %v2291_v20 = vadd.f32 %v2290_v17, %v2289_v14 }
 0x118   : > { %v2337_v21 = vadd.f32 %v2336_v18, %v2335_v16 }
 0x119   : > { %v1593_v22 = vadd.f32 %v2291_v20, %v3071_v25  ;;  %v3093_v23 = vadd.f32 %v2334_v15, %v1590_v19 }
 0x11b   : > { %v3095_v24 = vadd.f32 %v2337_v21, %v1593_v22  ;;  %v2292_v26 = vpop.f32.mrb[16].mxu0 }
 0x11c   : > { %v2293_v27 = vpop.f32.mrb[17].mxu0  ;;  %v2338_v28 = vpop.f32.mrb[16].mxu1 }
 0x11d   : > { %v2294_v29 = vadd.f32 %v2293_v27, %v2292_v26  ;;  %v2295_v30 = vpop.f32.mrb[18].mxu0  ;;  %v2339_v31 = vpop.f32.mrb[17].mxu1 }
 0x11e   : > { %v2296_v32 = vpop.f32.mrb[19].mxu0  ;;  %v2340_v33 = vadd.f32 %v2339_v31, %v2338_v28  ;;  %v2341_v34 = vpop.f32.mrb[18].mxu1 }
 0x11f   : > { %v1598_v8 = vadd.f32 %v2294_v29, %v3071_v25  ;;  %v2297_v35 = vadd.f32 %v2296_v32, %v2295_v30  ;;  %v2342_v36 = vpop.f32.mrb[19].mxu1 }
 0x120   : > { %v2343_v37 = vadd.f32 %v2342_v36, %v2341_v34 }
 0x121   : > { %v1601_v40 = vadd.f32 %v2297_v35, %v3071_v25  ;;  %v3099_v41 = vadd.f32 %v2340_v33, %v1598_v8 }
 0x123   : > { %v3101_v42 = vadd.f32 %v2343_v37, %v1601_v40  ;;  %v2360_v44 = vpop.f32.mrb[20].mxu0 }
 0x124   : > { %v2406_v43 = vpop.f32.mrb[20].mxu1  ;;  %v2361_v46 = vpop.f32.mrb[21].mxu0 }
 0x125   : > { %v2407_v45 = vpop.f32.mrb[21].mxu1  ;;  %v2362_v49 = vadd.f32 %v2361_v46, %v2360_v44  ;;  %v2363_v50 = vpop.f32.mrb[22].mxu0 }
 0x126   : > { %v2408_v47 = vadd.f32 %v2407_v45, %v2406_v43  ;;  %v2409_v48 = vpop.f32.mrb[22].mxu1  ;;  %v2364_v52 = vpop.f32.mrb[23].mxu0 }
 0x127   : > { %v2410_v51 = vpop.f32.mrb[23].mxu1  ;;  %v1712_v56 = vadd.f32 %v2362_v49, %v3075_v38  ;;  %v2365_v57 = vadd.f32 %v2364_v52, %v2363_v50 }
 0x128   : > { %v2411_v53 = vadd.f32 %v2410_v51, %v2409_v48 }
 0x129   : > { %v1715_v25 = vadd.f32 %v2365_v57, %v3077_v39  ;;  %v3105_v58 = vadd.f32 %v2408_v47, %v1712_v56 }
 0x12b   : > { %v3107_v59 = vadd.f32 %v2411_v53, %v1715_v25  ;;  %v2366_v60 = vpop.f32.mrb[24].mxu0 }
 0x12c   : > { %v2412_v61 = vpop.f32.mrb[24].mxu1  ;;  %v2367_v62 = vpop.f32.mrb[25].mxu0 }
 0x12d   : > { %v2413_v63 = vpop.f32.mrb[25].mxu1  ;;  %v2368_v0 = vadd.f32 %v2367_v62, %v2366_v60  ;;  %v2369_v1 = vpop.f32.mrb[26].mxu0 }
 0x12e   : > { %v2414_v2 = vadd.f32 %v2413_v63, %v2412_v61  ;;  %v2415_v3 = vpop.f32.mrb[26].mxu1  ;;  %v2370_v4 = vpop.f32.mrb[27].mxu0 }
 0x12f   : > { %v2416_v5 = vpop.f32.mrb[27].mxu1  ;;  %v1720_v9 = vadd.f32 %v2368_v0, %v3081_v54  ;;  %v2371_v38 = vadd.f32 %v2370_v4, %v2369_v1 }
 0x130   : > { %v2417_v10 = vadd.f32 %v2416_v5, %v2415_v3 }
 0x131   : > { %v1723_v39 = vadd.f32 %v2371_v38, %v3083_v55  ;;  %v3111_v11 = vadd.f32 %v2414_v2, %v1720_v9 }
 0x133   : > { %v2372_v12 = vpop.f32.mrb[28].mxu0  ;;  %v3113_v14 = vadd.f32 %v2417_v10, %v1723_v39 }
 0x134   : > { %v2418_v13 = vpop.f32.mrb[28].mxu1  ;;  %v2373_v15 = vpop.f32.mrb[29].mxu0 }
 0x135   : > { %v2419_v16 = vpop.f32.mrb[29].mxu1  ;;  %v2374_v17 = vadd.f32 %v2373_v15, %v2372_v12  ;;  %v2375_v18 = vpop.f32.mrb[30].mxu0 }
 0x136   : > { %v2420_v19 = vadd.f32 %v2419_v16, %v2418_v13  ;;  %v2421_v20 = vpop.f32.mrb[30].mxu1  ;;  %v2376_v21 = vpop.f32.mrb[31].mxu0 }
 0x137   : > { %v2422_v22 = vpop.f32.mrb[31].mxu1  ;;  %v1728_v54 = vadd.f32 %v2374_v17, %v3087_v6  ;;  %v2377_v26 = vadd.f32 %v2376_v21, %v2375_v18 }
 0x138   : > { %v2423_v27 = vadd.f32 %v2422_v22, %v2421_v20 }
 0x139   : > { %v1731_v55 = vadd.f32 %v2377_v26, %v3089_v7  ;;  %v3117_v28 = vadd.f32 %v2420_v19, %v1728_v54 }
 0x13b   : > { %v2378_v29 = vpop.f32.mrb[32].mxu0  ;;  %v3119_v31 = vadd.f32 %v2423_v27, %v1731_v55 }
 0x13c   : > { %v2424_v30 = vpop.f32.mrb[32].mxu1  ;;  %v2379_v32 = vpop.f32.mrb[33].mxu0 }
 0x13d   : > { %v2425_v33 = vpop.f32.mrb[33].mxu1  ;;  %v2380_v34 = vadd.f32 %v2379_v32, %v2378_v29  ;;  %v2381_v8 = vpop.f32.mrb[34].mxu0 }
 0x13e   : > { %v2426_v35 = vadd.f32 %v2425_v33, %v2424_v30  ;;  %v2427_v36 = vpop.f32.mrb[34].mxu1  ;;  %v2382_v37 = vpop.f32.mrb[35].mxu0 }
 0x13f   : > { %v2428_v40 = vpop.f32.mrb[35].mxu1  ;;  %v1736_v6 = vadd.f32 %v2380_v34, %v3093_v23  ;;  %v2383_v43 = vadd.f32 %v2382_v37, %v2381_v8 }
 0x140   : > { %v2429_v44 = vadd.f32 %v2428_v40, %v2427_v36 }
 0x141   : > { %v1739_v7 = vadd.f32 %v2383_v43, %v3095_v24  ;;  %v1809_v45 = vadd.f32 %v2426_v35, %v1736_v6 }
 0x143   : > { %v2384_v46 = vpop.f32.mrb[36].mxu0  ;;  %v1812_v48 = vadd.f32 %v2429_v44, %v1739_v7 }
 0x144   : > { %v2430_v47 = vpop.f32.mrb[36].mxu1  ;;  %v2385_v49 = vpop.f32.mrb[37].mxu0 }
 0x145   : > { %v2431_v50 = vpop.f32.mrb[37].mxu1  ;;  %v2386_v51 = vadd.f32 %v2385_v49, %v2384_v46  ;;  %v2387_v52 = vpop.f32.mrb[38].mxu0 }
 0x146   : > { %v2432_v53 = vadd.f32 %v2431_v50, %v2430_v47  ;;  %v2433_v56 = vpop.f32.mrb[38].mxu1  ;;  %v2388_v57 = vpop.f32.mrb[39].mxu0 }
 0x147   : > { %v2434_v25 = vpop.f32.mrb[39].mxu1  ;;  %v1744_v60 = vadd.f32 %v2386_v51, %v3099_v41  ;;  %v2389_v23 = vadd.f32 %v2388_v57, %v2387_v52 }
 0x148   : > { %v2435_v61 = vadd.f32 %v2434_v25, %v2433_v56 }
 0x149   : > { %v1747_v62 = vadd.f32 %v2389_v23, %v3101_v42  ;;  %v1817_v24 = vadd.f32 %v2432_v53, %v1744_v60 }
 0x14b   : > { %v1857_v63 = vpop.f32.mrb[40].mxu0  ;;  %v1820_v1 = vadd.f32 %v2435_v61, %v1747_v62 }
 0x14c   : > { %v1881_v0 = vpop.f32.mrb[40].mxu1  ;;  %v1858_v2 = vadd.f32 %v1857_v63, %v3105_v58  ;;  %v2467_v4 = vpop.f32.mrb[41].mxu0 }
 0x14d   : > { %v1882_v3 = vadd.f32 %v1881_v0, %v1809_v45  ;;  %v2479_v5 = vpop.f32.mrb[41].mxu1  ;;  %v1860_v9 = vpop.f32.mrb[42].mxu0 }
 0x14e   : > { %v1884_v38 = vpop.f32.mrb[42].mxu1  ;;  %v1861_v10 = vadd.f32 %v1860_v9, %v3107_v59  ;;  %v2468_v41 = vpop.f32.mrb[43].mxu0 }
 0x14f   : > { %v1885_v39 = vadd.f32 %v1884_v38, %v1812_v48  ;;  %v2480_v12 = vpop.f32.mrb[43].mxu1 }
 0x150   : > { %v2226_v42 = vpack.c.bf16 %v1861_v10, %v1858_v2 }
 0x151   : > { %v2241_v13 = vpack.c.bf16 %v1885_v39, %v1882_v3 }
 0x152   : > { %2227 = vst [vmem:[%s253_s6] sm:$0xff] %v2226_v42  }
 0x153   : > { %2250 = vst [vmem:[%s253_s6 + $0x18] sm:$0xff] %v2241_v13   ;;  %v1865_v15 = vpop.f32.mrb[44].mxu0 }
 0x154   : > { %v1889_v58 = vpop.f32.mrb[44].mxu1  ;;  %v1866_v16 = vadd.f32 %v1865_v15, %v3111_v11  ;;  %v2471_v18 = vpop.f32.mrb[45].mxu0 }
 0x155   : > { %v1890_v17 = vadd.f32 %v1889_v58, %v1817_v24  ;;  %v2483_v19 = vpop.f32.mrb[45].mxu1  ;;  %v1868_v20 = vpop.f32.mrb[46].mxu0 }
 0x156   : > { %v1892_v59 = vpop.f32.mrb[46].mxu1  ;;  %v1869_v21 = vadd.f32 %v1868_v20, %v3113_v14  ;;  %v2472_v54 = vpop.f32.mrb[47].mxu0 }
 0x157   : > { %v1893_v22 = vadd.f32 %v1892_v59, %v1820_v1  ;;  %v2484_v26 = vpop.f32.mrb[47].mxu1 }
 0x158   : > { %v2231_v27 = vpack.c.bf16 %v1869_v21, %v1866_v16 }
 0x159   : > { %v2246_v55 = vpack.c.bf16 %v1893_v22, %v1890_v17 }
 0x15a   : > { %2248 = vst [vmem:[%s253_s6 + $0x8] sm:$0xff] %v2231_v27  }
 0x15b   : > { %2251 = vst [vmem:[%s253_s6 + $0x20] sm:$0xff] %v2246_v55   ;;  %v1873_v29 = vpop.f32.mrb[48].mxu0 }
 0x15c   : > { %v1874_v30 = vadd.f32 %v1873_v29, %v3117_v28  ;;  %v2475_v32 = vpop.f32.mrb[49].mxu0 }
 0x15d   : > { %v1876_v33 = vpop.f32.mrb[50].mxu0 }
 0x15e   : > { %v1877_v11 = vadd.f32 %v1876_v33, %v3119_v31  ;;  %v2476_v34 = vpop.f32.mrb[51].mxu0 }
 0x160   : > { %v2236_v8 = vpack.c.bf16 %v1877_v11, %v1874_v30 }
 0x162   : > { %2249 = vst [vmem:[%s253_s6 + $0x10] sm:$0xff] %v2236_v8  }
 0x163 PF: > { %s13_s14 = sadd.s32 1, %s2676_s14   ;;  %s3148_s12 = smov %s2672_s13 }
 0x164   : > { %p10_p5 = scmp.ge.s32.totalorder %s13_s14, 6   ;;  %s3149_s13 = smov %s3151_s15 }
 0x166   :  { %12 = sbr.rel (!%p10_p5) target bundleno = 2 (0x2), region = 68 }

// kernel: vgg_distance.18
= control target key start
LH: loop header
LB: loop body
LE: loop exit
PB: predicated region body
PF: predicated region fallthrough
CT: control target
= control target key end

     0   :  { %s2446_s12 = smov 0   ;;  %s2448_s13 = smov 0   ;;  %s3068_s0 = inlined_call_operand.vmem [shape: bf16[4,42,128], index: 0, kind: input, shape index: {}]   ;;  %s3069_s1 = inlined_call_operand.vmem [shape: bf16[1,1152,256], index: 1, kind: input, shape index: {}]   ;;  %s3070_s2 = inlined_call_operand.vmem [shape: f32[1,256], index: 2, kind: input, shape index: {}]   ;;  %s3071_s3 = inlined_call_operand.vmem [shape: bf16[4,24,256], index: 3, kind: output, shape index: {}]  }
   0x1   :  { %s2450_s14 = smov 0  }
   0x2 LB: > { %s32_s15 = sadd.s32 1, %s2419_s13  ;;  %p1909_p0 = scmp.ge.s32.totalorder %s2423_s14, 1  ;;  %s2423_s14 = sphi %s2450_s14, %s13_s14   ;;  %s2419_s13 = sphi %s2448_s13, %s3085_s13   ;;  %s2415_s12 = sphi %s2446_s12, %s3084_s12  }
   0x3   : > { %p34_p1 = scmp.ge.s32.totalorder %s32_s15, 4  ;;  %p190_p2 = scmp.lt.s32.totalorder %s2423_s14, 5 }
   0x5   : > { %s3087_s15 = smov (%p34_p1, %s32_s15), 0  ;;  %p191_p3 = pnand %p1909_p0, %p190_p2 }
   0x6   : > { %v2163_v0 = vld [vmem:[%s3069_s1 + $0x4] ss:$8 sps:$4 sm:$0xff] (!%p191_p3)   ;;  %v2167_v2 = vld [vmem:[%s3069_s1] ss:$8 sps:$4 sm:$0xff] (!%p191_p3)   ;;  %v2169_v4 = vld [vmem:[%s3069_s1 + $0x14] ss:$8 sps:$4 sm:$0xff] (!%p191_p3)  }
   0x7   : > { %194 = sbr.rel (%p191_p3) target bundleno = 390 (0x186), region = 32  ;;  %v2165_v1 = vld [vmem:[%s3069_s1 + $0x204] ss:$8 sps:$4 sm:$0xff] (!%p191_p3)   ;;  %1496 = vmatprep.subr.bf16.mxu1 (!%p191_p3), %v2163_v0  ;;  %v2168_v3 = vld [vmem:[%s3069_s1 + $0x200] ss:$8 sps:$4 sm:$0xff] (!%p191_p3)   ;;  %p234_p4 = scmp.lt.s32.totalorder (!%p191_p3), %s2415_s12, 3 }
   0x8   : > { %1598 = vmatprep.subr.bf16.mxu0 (!%p191_p3), %v2165_v1  ;;  %1497 = vmatpush1.bf16.msra.mxu1 (!%p191_p3), %v2167_v2  ;;  %v2171_v5 = vld [vmem:[%s3069_s1 + $0x214] ss:$8 sps:$4 sm:$0xff] (!%p191_p3)   ;;  %v2173_v6 = vld [vmem:[%s3069_s1 + $0x10] ss:$8 sps:$4 sm:$0xff] (!%p191_p3)   ;;  %v2175_v8 = vld [vmem:[%s3069_s1 + $0x24] ss:$8 sps:$4 sm:$0xff] (!%p191_p3)  }
   0x9   : > { %1599 = vmatpush1.bf16.msra.mxu0 (!%p191_p3), %v2168_v3  ;;  %1498 = vmatprep.subr.bf16.mxu1 (!%p191_p3), %v2169_v4  ;;  %v2174_v7 = vld [vmem:[%s3069_s1 + $0x210] ss:$8 sps:$4 sm:$0xff] (!%p191_p3)   ;;  %v2177_v9 = vld [vmem:[%s3069_s1 + $0x224] ss:$8 sps:$4 sm:$0xff] (!%p191_p3)   ;;  %v2179_v10 = vld [vmem:[%s3069_s1 + $0x20] ss:$8 sps:$4 sm:$0xff] (!%p191_p3)  }
   0xa   : > { %1600 = vmatprep.subr.bf16.mxu0 (!%p191_p3), %v2171_v5  ;;  %v2180_v11 = vld [vmem:[%s3069_s1 + $0x220] ss:$8 sps:$4 sm:$0xff] (!%p191_p3)   ;;  %v2181_v12 = vld [vmem:[%s3069_s1 + $0x34] ss:$8 sps:$4 sm:$0xff] (!%p191_p3)   ;;  %v2185_v14 = vld [vmem:[%s3069_s1 + $0x30] ss:$8 sps:$4 sm:$0xff] (!%p191_p3)  }
   0xb   : > { %v2183_v13 = vld [vmem:[%s3069_s1 + $0x234] ss:$8 sps:$4 sm:$0xff] (!%p191_p3)   ;;  %v2186_v15 = vld [vmem:[%s3069_s1 + $0x230] ss:$8 sps:$4 sm:$0xff] (!%p191_p3)   ;;  %v2187_v16 = vld [vmem:[%s3069_s1 + $0x44] ss:$8 sps:$4 sm:$0xff] (!%p191_p3)  }
   0xc   : > { %1499 = vmatpush1.bf16.msra.mxu1 (!%p191_p3), %v2173_v6  ;;  %v2189_v17 = vld [vmem:[%s3069_s1 + $0x244] ss:$8 sps:$4 sm:$0xff] (!%p191_p3)   ;;  %v2191_v18 = vld [vmem:[%s3069_s1 + $0x40] ss:$8 sps:$4 sm:$0xff] (!%p191_p3)   ;;  %v2193_v20 = vld [vmem:[%s3069_s1 + $0x54] ss:$8 sps:$4 sm:$0xff] (!%p191_p3)  }
   0xd   : > { %1601 = vmatpush1.bf16.msra.mxu0 (!%p191_p3), %v2174_v7  ;;  %1500 = vmatprep.subr.bf16.mxu1 (!%p191_p3), %v2175_v8  ;;  %v2192_v19 = vld [vmem:[%s3069_s1 + $0x240] ss:$8 sps:$4 sm:$0xff] (!%p191_p3)   ;;  %v2195_v21 = vld [vmem:[%s3069_s1 + $0x254] ss:$8 sps:$4 sm:$0xff] (!%p191_p3)   ;;  %v2197_v22 = vld [vmem:[%s3069_s1 + $0x50] ss:$8 sps:$4 sm:$0xff] (!%p191_p3)  }
   0xe   : > { %1602 = vmatprep.subr.bf16.mxu0 %v2177_v9  ;;  %v2198_v23 = vld [vmem:[%s3069_s1 + $0x250] ss:$8 sps:$4 sm:$0xff]   ;;  %v2199_v24 = vld [vmem:[%s3069_s1 + $0x64] ss:$8 sps:$4 sm:$0xff]   ;;  %v2203_v26 = vld [vmem:[%s3069_s1 + $0x60] ss:$8 sps:$4 sm:$0xff]  }
   0xf   : > { %v2201_v25 = vld [vmem:[%s3069_s1 + $0x264] ss:$8 sps:$4 sm:$0xff]   ;;  %v2204_v27 = vld [vmem:[%s3069_s1 + $0x260] ss:$8 sps:$4 sm:$0xff]   ;;  %v2205_v28 = vld [vmem:[%s3069_s1 + $0x74] ss:$8 sps:$4 sm:$0xff]  }
  0x10   : > { %1501 = vmatpush1.bf16.msra.mxu1 %v2179_v10  ;;  %v2207_v29 = vld [vmem:[%s3069_s1 + $0x274] ss:$8 sps:$4 sm:$0xff]   ;;  %v2209_v30 = vld [vmem:[%s3069_s1 + $0x70] ss:$8 sps:$4 sm:$0xff]   ;;  %v2211_v32 = vld [vmem:[%s3069_s1 + $0x84] ss:$8 sps:$4 sm:$0xff]  }
  0x11   : > { %1603 = vmatpush1.bf16.msra.mxu0 %v2180_v11  ;;  %1502 = vmatprep.subr.bf16.mxu1 %v2181_v12  ;;  %v2210_v31 = vld [vmem:[%s3069_s1 + $0x270] ss:$8 sps:$4 sm:$0xff]   ;;  %v2213_v33 = vld [vmem:[%s3069_s1 + $0x284] ss:$8 sps:$4 sm:$0xff]   ;;  %v2215_v34 = vld [vmem:[%s3069_s1 + $0x80] ss:$8 sps:$4 sm:$0xff]  }
  0x12   : > { %1604 = vmatprep.subr.bf16.mxu0 %v2183_v13  ;;  %v2216_v35 = vld [vmem:[%s3069_s1 + $0x280] ss:$8 sps:$4 sm:$0xff]   ;;  %v2217_v36 = vld [vmem:[%s3069_s1 + $0x94] ss:$8 sps:$4 sm:$0xff]   ;;  %s3089_s12 = smov (!%p234_p4, %s2415_s12), 3  ;;  %vm329_vm6 = vcmask 1042432  }
  0x13   : > { %v2219_v37 = vld [vmem:[%s3069_s1 + $0x294] ss:$8 sps:$4 sm:$0xff]   ;;  %v2221_v38 = vld [vmem:[%s3069_s1 + $0x90] ss:$8 sps:$4 sm:$0xff]   ;;  %v2223_v40 = vld [vmem:[%s3069_s1 + $0xa4] ss:$8 sps:$4 sm:$0xff]  }
  0x14   : > { %1503 = vmatpush1.bf16.msra.mxu1 %v2185_v14  ;;  %v2222_v39 = vld [vmem:[%s3069_s1 + $0x290] ss:$8 sps:$4 sm:$0xff]   ;;  %s2137_s29 = smul.u32 24, %s3089_s12  ;;  %v2225_v41 = vld [vmem:[%s3069_s1 + $0x2a4] ss:$8 sps:$4 sm:$0xff]   ;;  %vm330_vm7 = vcmask 1046532  }
  0x15   : > { %1605 = vmatpush1.bf16.msra.mxu0 %v2186_v15  ;;  %1504 = vmatprep.subr.bf16.mxu1 %v2187_v16  ;;  %vm278_vm0 = vsmask.f32 3328  ;;  %v2227_v42 = vld [vmem:[%s3069_s1 + $0xa0] ss:$8 sps:$4 sm:$0xff]   ;;  %vm279_vm1 = vsmask.f32 7440  ;;  %vm2807_vm8 = vmor %vm329_vm6, %vm330_vm7 }
  0x16   : > { %1606 = vmatprep.subr.bf16.mxu0 %v2189_v17  ;;  %v2228_v43 = vld [vmem:[%s3069_s1 + $0x2a0] ss:$8 sps:$4 sm:$0xff]   ;;  %v2229_v44 = vld [vmem:[%s3069_s1 + $0xb4] ss:$8 sps:$4 sm:$0xff]   ;;  %s2611_s17 = scalar_lea.vmem %s3068_s0, %s2137_s29  ;;  %vm379_vm2 = vsmask.f32 256  ;;  %vm2656_vm4 = vmor %vm278_vm0, %vm279_vm1  ;;  %s265_s30 = scalar_lea.vmem %s3071_s3, %s2137_s29 }
  0x17   : > { %v2231_v45 = vld [vmem:[%s3069_s1 + $0x2b4] ss:$8 sps:$4 sm:$0xff]   ;;  %vm380_vm3 = vsmask.f32 4368  ;;  %v2233_v46 = vld [vmem:[%s3069_s1 + $0xb0] ss:$8 sps:$4 sm:$0xff]  }
  0x18   : > { %1505 = vmatpush1.bf16.msra.mxu1 %v2191_v18  ;;  %v2234_v47 = vld [vmem:[%s3069_s1 + $0x2b0] ss:$8 sps:$4 sm:$0xff]   ;;  %v268_v48 = vld [vmem:[%s2611_s17] sm:$0xf]  ;;  %v2235_v49 = vld [vmem:[%s3069_s1 + $0xc4] ss:$8 sps:$4 sm:$0xff]  }
  0x19   : > { %1607 = vmatpush1.bf16.msra.mxu0 %v2192_v19  ;;  %1506 = vmatprep.subr.bf16.mxu1 %v2193_v20  ;;  %v269_v50 = vld [vmem:[%s2611_s17 + $0x4] sm:$0xf]  ;;  %271 = vst [vmem:[#allocation2] sm:$0xf] %v268_v48  ;;  %v274_v51 = vld [vmem:[%s2611_s17] sm:$0xf]  ;;  %vm2666_vm5 = vmor %vm379_vm2, %vm380_vm3 }
  0x1a   : > { %1608 = vmatprep.subr.bf16.mxu0 %v2195_v21  ;;  %v275_v52 = vld [vmem:[%s2611_s17 + $0x4] sm:$0xf]  ;;  %272 = vst [vmem:[#allocation2 + $0x24] sm:$0xf] %v269_v50  ;;  %v2630_v53 = vld [vmem:[%s2611_s17 + $0x8] sm:$0xf] }
  0x1b   : > { %v282_v54 = vshrl.u32 %v274_v51, 16  ;;  %v285_v55 = vshll.u32 %v274_v51, 16  ;;  %v291_v56 = vshll.u32 %v275_v52, 16  ;;  %v295_v57 = vshrl.u32 %v275_v52, 16  ;;  %v2237_v58 = vld [vmem:[%s3069_s1 + $0x2c4] ss:$8 sps:$4 sm:$0xff]  }
  0x1c   : > { %1507 = vmatpush1.bf16.msra.mxu1 %v2197_v22  ;;  %v301_v59 = vshll.u32 %v2630_v53, 16  ;;  %v2239_v60 = vld [vmem:[%s3069_s1 + $0xc0] ss:$8 sps:$4 sm:$0xff]   ;;  %v2241_v2 = vld [vmem:[%s3069_s1 + $0xd4] ss:$8 sps:$4 sm:$0xff]   ;;  %vm356_vm9 = vcmask 1040384  }
  0x1d   : > { %1609 = vmatpush1.bf16.msra.mxu0 %v2198_v23  ;;  %1508 = vmatprep.subr.bf16.mxu1 %v2199_v24  ;;  %v2240_v61 = vld [vmem:[%s3069_s1 + $0x2c0] ss:$8 sps:$4 sm:$0xff]   ;;  %v284_v62 = vrot.slane %v282_v54, 4  ;;  %v287_v63 = vrot.slane %v285_v55, 5  ;;  %v293_v0 = vrot.slane %v291_v56, 5  ;;  %v297_v1 = vrot.slane %v295_v57, 4 }
  0x1e   : > { %1610 = vmatprep.subr.bf16.mxu0 %v2201_v25  ;;  %v2243_v3 = vld [vmem:[%s3069_s1 + $0x2d4] ss:$8 sps:$4 sm:$0xff]   ;;  %v2648_v4 = vrot.slane %v301_v59, 5  ;;  %v375_v5 = vld [vmem:[%s2611_s17] sm:$0x8]  ;;  %vm357_vm10 = vcmask 1044484  }
  0x1f   : > { %v376_v6 = vld [vmem:[%s2611_s17 + $0x4] sm:$0xf]  ;;  %v288_v7 = vor.u32 %v287_v63, %v284_v62  ;;  %v298_v8 = vor.u32 %v297_v1, %v293_v0  ;;  %v377_v9 = vld [vmem:[%s2611_s17 + $0x8] sm:$0xf]  ;;  %v383_v10 = vshrl.u32 %v375_v5, 16  ;;  %vm433_vm11 = vcmask 1041408   ;;  %vm2849_vm13 = vmor %vm356_vm9, %vm357_vm10 }
  0x20   : > { %1509 = vmatpush1.bf16.msra.mxu1 %v2203_v26  ;;  %v388_v11 = vshrl.u32 %v376_v6, 16  ;;  %v419_v12 = vld [vmem:[%s2611_s17 + $0x4] sm:$0xf]  ;;  %v391_v14 = vshll.u32 %v376_v6, 16  ;;  %v397_v15 = vshrl.u32 %v377_v9, 16  ;;  %v400_v16 = vshll.u32 %v377_v9, 16 }
  0x21   : > { %1611 = vmatpush1.bf16.msra.mxu0 %v2204_v27  ;;  %1510 = vmatprep.subr.bf16.mxu1 %v2205_v28  ;;  %v420_v17 = vld [vmem:[%s2611_s17 + $0x8] sm:$0xf]  ;;  %422 = vst [vmem:[#allocation2 + $0x14] sm:$0xf] %v419_v12  ;;  %v289_v18 = vrot.slane %v288_v7, 4  ;;  %v299_v19 = vrot.slane %v298_v8, 4 }
  0x22   : > { %1612 = vmatprep.subr.bf16.mxu0 %v2207_v29  ;;  %v1914_v20 = vrot.slane %v383_v10, 11  ;;  %v390_v21 = vrot.slane %v388_v11, 7  ;;  %423 = vst [vmem:[#allocation2 + $0x38] sm:$0xf] %v420_v17  ;;  %v2245_v22 = vld [vmem:[%s3069_s1 + $0xd0] ss:$8 sps:$4 sm:$0xff]  }
  0x23   : > { %v2670_v24 = vrot.slane %v397_v15, 7  ;;  %v2246_v25 = vld [vmem:[%s3069_s1 + $0x2d0] ss:$8 sps:$4 sm:$0xff]   ;;  %v2247_v26 = vld [vmem:[%s3069_s1 + $0xe4] ss:$8 sps:$4 sm:$0xff]   ;;  %v294_v27 = vsel %vm2656_vm4, %v289_v18, %v293_v0  ;;  %v304_v28 = vsel %vm2656_vm4, %v299_v19, %v2648_v4  ;;  %vm434_vm12 = vcmask 1045508  }
  0x24   : > { %1511 = vmatpush1.bf16.msra.mxu1 %v2209_v30  ;;  %v393_v29 = vor.u32 %v391_v14, %v390_v21  ;;  %v395_v30 = vrot.slane %v390_v21, 4  ;;  %318 = vst [vmem:[#allocation2 + $0x4] sm:$0xf] %v294_v27  ;;  %319 = vst [vmem:[#allocation2 + $0x28] sm:$0xf] %v304_v28 }
  0x25   : > { %1613 = vmatpush1.bf16.msra.mxu0 %v2210_v31  ;;  %1512 = vmatprep.subr.bf16.mxu1 %v2211_v32  ;;  %v2249_v31 = vld [vmem:[%s3069_s1 + $0x2e4] ss:$8 sps:$4 sm:$0xff]   ;;  %v402_v32 = vor.u32 %v400_v16, %v2670_v24  ;;  %v2268_v48 = vld [vmem:[%s3069_s1 + $0x300] ss:$8 sps:$4 sm:$0xff]   ;;  %v2276_v50 = vld [vmem:[%s3069_s1 + $0x314] ss:$8 sps:$4 sm:$0xff]  }
  0x26   : > { %1614 = vmatprep.subr.bf16.mxu0 %v2213_v33  ;;  %v394_v33 = vsel %vm2666_vm5, %v1914_v20, %v393_v29  ;;  %v2271_v51 = vld [vmem:[%s3069_s1 + $0x110] ss:$8 sps:$4 sm:$0xff]   ;;  %v2279_v54 = vld [vmem:[%s3069_s1 + $0x124] ss:$8 sps:$4 sm:$0xff]   ;;  %v2277_v56 = vld [vmem:[%s3069_s1 + $0x120] ss:$8 sps:$4 sm:$0xff]  }
  0x27   : > { %416 = vst [vmem:[#allocation2 + $0x10] sm:$0xf] %v394_v33  ;;  %v2274_v52 = vld [vmem:[%s3069_s1 + $0x310] ss:$8 sps:$4 sm:$0xff]   ;;  %v2282_v55 = vld [vmem:[%s3069_s1 + $0x324] ss:$8 sps:$4 sm:$0xff]   ;;  %vm2875_vm0 = vmor %vm433_vm11, %vm434_vm12 }
  0x28   : > { %1513 = vmatpush1.bf16.msra.mxu1 %v2215_v34  ;;  %v2251_v34 = vld [vmem:[%s3069_s1 + $0xe0] ss:$8 sps:$4 sm:$0xff]   ;;  %v2288_v59 = vld [vmem:[%s3069_s1 + $0x334] ss:$8 sps:$4 sm:$0xff]   ;;  %v2286_v62 = vld [vmem:[%s3069_s1 + $0x330] ss:$8 sps:$4 sm:$0xff]  }
  0x29   : > { %1615 = vmatpush1.bf16.msra.mxu0 %v2216_v35  ;;  %1514 = vmatprep.subr.bf16.mxu1 %v2217_v36  ;;  %v403_v35 = vsel %vm2666_vm5, %v395_v30, %v402_v32  ;;  %v2252_v36 = vld [vmem:[%s3069_s1 + $0x2e0] ss:$8 sps:$4 sm:$0xff]   ;;  %v2291_v63 = vld [vmem:[%s3069_s1 + $0x144] ss:$8 sps:$4 sm:$0xff]   ;;  %v2300_v5 = vld [vmem:[%s3069_s1 + $0x354] ss:$8 sps:$4 sm:$0xff]  }
  0x2a   : > { %1616 = vmatprep.subr.bf16.mxu0 %v2219_v37  ;;  %v2253_v37 = vld [vmem:[%s3069_s1 + $0xf4] ss:$8 sps:$4 sm:$0xff]   ;;  %417 = vst [vmem:[#allocation2 + $0x34] sm:$0xf] %v403_v35  ;;  %v2280_v57 = vld [vmem:[%s3069_s1 + $0x320] ss:$8 sps:$4 sm:$0xff]  }
  0x2b   : > { %v2294_v0 = vld [vmem:[%s3069_s1 + $0x344] ss:$8 sps:$4 sm:$0xff]   ;;  %v2295_v6 = vld [vmem:[%s3069_s1 + $0x150] ss:$8 sps:$4 sm:$0xff]   ;;  %v2304_v11 = vld [vmem:[%s3069_s1 + $0x360] ss:$8 sps:$4 sm:$0xff]  }
  0x2c   : > { %1515 = vmatpush1.bf16.msra.mxu1 %v2221_v38  ;;  %v2255_v38 = vld [vmem:[%s3069_s1 + $0x2f4] ss:$8 sps:$4 sm:$0xff]   ;;  %v2298_v8 = vld [vmem:[%s3069_s1 + $0x350] ss:$8 sps:$4 sm:$0xff]   ;;  %v2303_v9 = vld [vmem:[%s3069_s1 + $0x164] ss:$8 sps:$4 sm:$0xff]  }
  0x2d   : > { %1617 = vmatpush1.bf16.msra.mxu0 %v2222_v39  ;;  %1516 = vmatprep.subr.bf16.mxu1 %v2223_v40  ;;  %v2257_v39 = vld [vmem:[%s3069_s1 + $0xf0] ss:$8 sps:$4 sm:$0xff]   ;;  %v2306_v10 = vld [vmem:[%s3069_s1 + $0x364] ss:$8 sps:$4 sm:$0xff]   ;;  %v2309_v14 = vld [vmem:[%s3069_s1 + $0x174] ss:$8 sps:$4 sm:$0xff]  }
  0x2e   : > { %1618 = vmatprep.subr.bf16.mxu0 %v2225_v41  ;;  %v2258_v40 = vld [vmem:[%s3069_s1 + $0x2f0] ss:$8 sps:$4 sm:$0xff]   ;;  %v2264_v41 = vld [vmem:[%s3069_s1 + $0x104] ss:$8 sps:$4 sm:$0xff]   ;;  %v2312_v15 = vld [vmem:[%s3069_s1 + $0x374] ss:$8 sps:$4 sm:$0xff]  }
  0x2f   : > { %v270_v16 = vld [vmem:[%s2611_s17 + $0x8] sm:$0xf]  ;;  %v277_v17 = vld [vmem:[%s2611_s17 + $0xc] sm:$0x1]  ;;  %v2310_v27 = vld [vmem:[%s3069_s1 + $0x370] ss:$8 sps:$4 sm:$0xff]  }
  0x30   : > { %1517 = vmatpush1.bf16.msra.mxu1 %v2227_v42  ;;  %v2261_v42 = vld [vmem:[#allocation2 + $0x4] ss:$36 sps:$4 sm:$0xff]   ;;  %v378_v18 = vld [vmem:[%s2611_s17 + $0xc] sm:$0xf]  ;;  %273 = vst [vmem:[#allocation2 + $0x48] sm:$0xf] %v270_v16 }
  0x31   : > { %1619 = vmatpush1.bf16.msra.mxu0 %v2228_v43  ;;  %1518 = vmatprep.subr.bf16.mxu1 %v2229_v44  ;;  %v2270_v43 = vld [vmem:[%s3069_s1 + $0x304] ss:$8 sps:$4 sm:$0xff]   ;;  %v311_v19 = vshll.u32 %v277_v17, 16  ;;  %v406_v20 = vshrl.u32 %v378_v18, 16  ;;  %v409_v21 = vshll.u32 %v378_v18, 16  ;;  %v404_v28 = vrot.slane %v2670_v24, 4 }
  0x32   : > { %1620 = vmatprep.subr.bf16.mxu0 %v2231_v45  ;;  %v2259_v44 = vld [vmem:[#allocation2] ss:$36 sps:$4 sm:$0xff]   ;;  %1528 = vmatprep.mubr.bf16.mxu1 %v2261_v42  ;;  %vm456_vm14 = vsmask.f32 1280  ;;  %vm457_vm15 = vsmask.f32 5392 }
  0x33   : > { %v2262_v45 = vld [vmem:[%s3069_s1 + $0x100] ss:$8 sps:$4 sm:$0xff]   ;;  %v2315_v29 = vld [vmem:[%s3069_s1 + $0x184] ss:$8 sps:$4 sm:$0xff]   ;;  %v313_v30 = vrot.slane %v311_v19, 5  ;;  %vm2930_vm1 = vmor %vm456_vm14, %vm457_vm15 }
  0x34   : > { %1519 = vmatpush1.bf16.msra.mxu1 %v2233_v46  ;;  %v2265_v46 = vld [vmem:[#allocation2 + $0x10] ss:$36 sps:$4 sm:$0xff]   ;;  %v2318_v32 = vld [vmem:[%s3069_s1 + $0x384] ss:$8 sps:$4 sm:$0xff]   ;;  %v2313_v24 = vld [vmem:[%s3069_s1 + $0x180] ss:$8 sps:$4 sm:$0xff]  }
  0x35   : > { %1621 = vmatpush1.bf16.msra.mxu0 %v2234_v47  ;;  %1520 = vmatprep.subr.bf16.mxu1 %v2235_v49  ;;  %v2267_v47 = vld [vmem:[#allocation2 + $0x14] ss:$36 sps:$4 sm:$0xff]   ;;  %v2316_v33 = vld [vmem:[%s3069_s1 + $0x380] ss:$8 sps:$4 sm:$0xff]  }
  0x36   : > { %1622 = vmatprep.subr.bf16.mxu0 %v2237_v58  ;;  %v2273_v49 = vld [vmem:[%s3069_s1 + $0x114] ss:$8 sps:$4 sm:$0xff]   ;;  %1630 = vmatprep.mubr.bf16.mxu0 %v2267_v47  ;;  %v321_v13 = vld [vmem:[%s2611_s17] sm:$0xe]  ;;  %v349_v47 = vld [vmem:[%s2611_s17 + $0x4] sm:$0xf] }
  0x37   : > { %v2285_v58 = vld [vmem:[%s3069_s1 + $0x134] ss:$8 sps:$4 sm:$0xff]  }
  0x38   : > { %1521 = vmatpush1.bf16.msra.mxu1 %v2239_v60  ;;  %v2283_v60 = vld [vmem:[%s3069_s1 + $0x130] ss:$8 sps:$4 sm:$0xff]   ;;  %v2376_v23 = vld [vmem:[%s3069_s1 + $0x414] ss:$8 sps:$4 sm:$0xff]  }
  0x39   : > { %1623 = vmatpush1.bf16.msra.mxu0 %v2240_v61  ;;  %1522 = vmatprep.subr.bf16.mxu1 %v2241_v2  ;;  %v305_v61 = vshrl.u32 %v2630_v53, 16  ;;  %v2289_v53 = vld [vmem:[%s3069_s1 + $0x140] ss:$8 sps:$4 sm:$0xff]  }
  0x3a   : > { %1624 = vmatprep.subr.bf16.mxu0 %v2243_v3  ;;  %v2292_v2 = vld [vmem:[%s3069_s1 + $0x340] ss:$8 sps:$4 sm:$0xff]   ;;  %v2297_v3 = vld [vmem:[%s3069_s1 + $0x154] ss:$8 sps:$4 sm:$0xff]  }
  0x3b   : > { %v307_v1 = vrot.slane %v305_v61, 4 }
  0x3c   : > { %1523 = vmatpush1.bf16.msra.mxu1 %v2245_v22  ;;  %v421_v22 = vld [vmem:[%s2611_s17 + $0xc] sm:$0xf] }
  0x3d   : > { %1625 = vmatpush1.bf16.msra.mxu0 %v2246_v25  ;;  %1524 = vmatprep.subr.bf16.mxu1 %v2247_v26  ;;  %v308_v7 = vor.u32 %v307_v1, %v2648_v4  ;;  %v2301_v4 = vld [vmem:[%s3069_s1 + $0x160] ss:$8 sps:$4 sm:$0xff]   ;;  %v2307_v26 = vld [vmem:[%s3069_s1 + $0x170] ss:$8 sps:$4 sm:$0xff]   ;;  %424 = vst [vmem:[#allocation2 + $0x5c] sm:$0xf] %v421_v22 }
  0x3e   : > { %1626 = vmatprep.subr.bf16.mxu0 %v2249_v31  ;;  %v408_v31 = vrot.slane %v406_v20, 7  ;;  %v452_v1 = vld [vmem:[%s2611_s17 + $0x4] sm:$0xc] }
  0x3f   : > { %v309_v12 = vrot.slane %v308_v7, 4  ;;  %v460_v7 = vshrl.u32 %v452_v1, 16 }
  0x40   : > { %1525 = vmatpush1.bf16.msra.mxu1 %v2251_v34  ;;  %v411_v35 = vor.u32 %v409_v21, %v408_v31  ;;  %v2336_v21 = vld [vmem:[%s3069_s1 + $0x3b4] ss:$8 sps:$4 sm:$0xff]   ;;  %v2334_v31 = vld [vmem:[%s3069_s1 + $0x3b0] ss:$8 sps:$4 sm:$0xff]  }
  0x41   : > { %1627 = vmatpush1.bf16.msra.mxu0 %v2252_v36  ;;  %1526 = vmatprep.subr.bf16.mxu1 %v2253_v37  ;;  %v314_v34 = vsel %vm2656_vm4, %v309_v12, %v313_v30  ;;  %v2321_v36 = vld [vmem:[%s3069_s1 + $0x194] ss:$8 sps:$4 sm:$0xff]   ;;  %v462_v18 = vrot.slane %v460_v7, 6  ;;  %v2331_v30 = vld [vmem:[%s3069_s1 + $0x1b0] ss:$8 sps:$4 sm:$0xff]  }
  0x42   : > { %1628 = vmatprep.subr.bf16.mxu0 %v2255_v38  ;;  %v2324_v37 = vld [vmem:[%s3069_s1 + $0x394] ss:$8 sps:$4 sm:$0xff]   ;;  %320 = vst [vmem:[#allocation2 + $0x4c] sm:$0xf] %v314_v34  ;;  %v412_v38 = vsel %vm2666_vm5, %v404_v28, %v411_v35  ;;  %v351_v35 = vld [vmem:[%s2611_s17 + $0xc] sm:$0x7] }
  0x43   : > { %418 = vst [vmem:[#allocation2 + $0x58] sm:$0xf] %v412_v38 }
  0x44   : > { %1527 = vmatpush1.bf16.msra.mxu1 %v2257_v39  ;;  %v322_v39 = vld [vmem:[%s2611_s17 + $0x4] sm:$0xf] }
  0x45   : > { %1629 = vmatpush1.bf16.msra.mxu0 %v2258_v40  ;;  %1547 = vmatprep.subr.bf16.mxu1 %v2264_v41  ;;  %v2843_v40 = vld [vmem:[%s2611_s17 + $0x8] sm:$0xf]  ;;  %v1912_v41 = vrot.slane %v321_v13, 9  ;;  %v334_v42 = vrot.slane %v322_v39, 5 }
  0x46   : > { %1649 = vmatprep.subr.bf16.mxu0 %v2270_v43  ;;  %v337_v43 = vrot.slane %v2843_v40, 5  ;;  %v2342_v40 = vld [vmem:[%s3069_s1 + $0x3c4] ss:$8 sps:$4 sm:$0xff]  }
  0x47   : > { %1529 = vmatmul.mubr.bf16.vlgmr.msra.gmra.mrb[0].mxu1 %v2259_v44  ;;  %v348_v44 = vld [vmem:[%s2611_s17] sm:$0x8] }
  0x48   : > { %1631 = vmatmul.mubr.bf16.vlgmr.msra.gmra.mrb[0].mxu0 %v2265_v46  ;;  %1548 = vmatpush1.bf16.msra.mxu1 %v2262_v45  ;;  %v2319_v45 = vld [vmem:[%s3069_s1 + $0x190] ss:$8 sps:$4 sm:$0xff]   ;;  %v339_v39 = vrot.slane %v337_v43, 4 }
  0x49   : > { %1650 = vmatpush1.bf16.msra.mxu0 %v2268_v48  ;;  %1549 = vmatprep.subr.bf16.mxu1 %v2273_v49  ;;  %v2322_v46 = vld [vmem:[%s3069_s1 + $0x390] ss:$8 sps:$4 sm:$0xff]   ;;  %v2861_v48 = vld [vmem:[%s2611_s17 + $0x8] sm:$0xf]  ;;  %v1913_v49 = vrot.slane %v348_v44, 11 }
  0x4a   : > { %1651 = vmatprep.subr.bf16.mxu0 %v2276_v50  ;;  %v2327_v50 = vld [vmem:[%s3069_s1 + $0x1a4] ss:$8 sps:$4 sm:$0xff]   ;;  %v539_v16 = vld [vmem:[#allocation2 + $0x58] sm:$0xff] }
  0x4b   : > { %v1931_v22 = vcombine.high %v539_v16, %v539_v16 }
  0x4c   : > { %1550 = vmatpush1.bf16.msra.mxu1 %v2271_v51  ;;  %v2330_v51 = vld [vmem:[%s3069_s1 + $0x3a4] ss:$8 sps:$4 sm:$0xff]  }
  0x4d   : > { %1652 = vmatpush1.bf16.msra.mxu0 %v2274_v52  ;;  %1551 = vmatprep.subr.bf16.mxu1 %v2279_v54  ;;  %v335_v52 = vsel %vm2807_vm8, %v1912_v41, %v334_v42  ;;  %v336_v54 = vrot.slane %v334_v42, 4  ;;  %v455_v42 = vld [vmem:[%s2611_s17 + $0x10] sm:$0x7] }
  0x4e   : > { %1653 = vmatprep.subr.bf16.mxu0 %v2282_v55  ;;  %v361_v55 = vrot.slane %v349_v47, 7  ;;  %345 = vst [vmem:[#allocation2 + $0x8] sm:$0xf] %v335_v52  ;;  %1640 = vmatprep.mubr.bf16.mxu0 %v1931_v22 }
  0x50   : > { %1552 = vmatpush1.bf16.msra.mxu1 %v2277_v56  ;;  %v364_v56 = vrot.slane %v2861_v48, 7 }
  0x51   : > { %1654 = vmatpush1.bf16.msra.mxu0 %v2280_v57  ;;  %1553 = vmatprep.subr.bf16.mxu1 %v2285_v58  ;;  %v425_v57 = vld [vmem:[%s2611_s17 + $0x4] sm:$0xc]  ;;  %v2348_v58 = vld [vmem:[%s3069_s1 + $0x3d4] ss:$8 sps:$4 sm:$0xff]  }
  0x52   : > { %1655 = vmatprep.subr.bf16.mxu0 %v2288_v59  ;;  %v426_v59 = vld [vmem:[%s2611_s17 + $0x8] sm:$0xf]  ;;  %v1915_v61 = vrot.slane %v425_v57, 10  ;;  %v366_v47 = vrot.slane %v364_v56, 4 }
  0x53   : > { %v2337_v57 = vld [vmem:[%s3069_s1 + $0x1c0] ss:$8 sps:$4 sm:$0xff]  }
  0x54   : > { %1554 = vmatpush1.bf16.msra.mxu1 %v2283_v60  ;;  %v2881_v60 = vld [vmem:[%s2611_s17 + $0xc] sm:$0xf] }
  0x55   : > { %1656 = vmatpush1.bf16.msra.mxu0 %v2286_v62  ;;  %1555 = vmatprep.subr.bf16.mxu1 %v2291_v63  ;;  %v338_v62 = vsel %vm2807_vm8, %v336_v54, %v337_v43  ;;  %v362_v63 = vsel %vm2849_vm13, %v1913_v49, %v361_v55  ;;  %v367_v49 = vrot.slane %v351_v35, 7 }
  0x56   : > { %1657 = vmatprep.subr.bf16.mxu0 %v2294_v0  ;;  %v363_v0 = vrot.slane %v361_v55, 4  ;;  %346 = vst [vmem:[#allocation2 + $0x2c] sm:$0xf] %v338_v62  ;;  %372 = vst [vmem:[#allocation2 + $0xc] sm:$0xf] %v362_v63  ;;  %v489_v55 = vshrl.u32 %v455_v42, 16 }
  0x57   : > { %v368_v48 = vsel %vm2849_vm13, %v366_v47, %v367_v49  ;;  %v2340_v62 = vld [vmem:[%s3069_s1 + $0x3c0] ss:$8 sps:$4 sm:$0xff]   ;;  %v2384_v47 = vld [vmem:[%s3069_s1 + $0x430] ss:$8 sps:$4 sm:$0xff]   ;;  %v2389_v49 = vld [vmem:[%s3069_s1 + $0x444] ss:$8 sps:$4 sm:$0xff]  }
  0x58   : > { %1556 = vmatpush1.bf16.msra.mxu1 %v2289_v53  ;;  %v438_v53 = vrot.slane %v426_v59, 6  ;;  %374 = vst [vmem:[#allocation2 + $0x54] sm:$0xf] %v368_v48  ;;  %v2398_v48 = vld [vmem:[%s3069_s1 + $0x474] ss:$8 sps:$4 sm:$0xff]  }
  0x59   : > { %1658 = vmatpush1.bf16.msra.mxu0 %v2292_v2  ;;  %1557 = vmatprep.subr.bf16.mxu1 %v2297_v3  ;;  %v453_v2 = vld [vmem:[%s2611_s17 + $0x8] sm:$0xf] }
  0x5a   : > { %1659 = vmatprep.subr.bf16.mxu0 %v2300_v5  ;;  %v537_v3 = vld [vmem:[#allocation2 + $0x48] sm:$0xff]  ;;  %v441_v5 = vrot.slane %v2881_v60, 6  ;;  %v440_v17 = vrot.slane %v438_v53, 4  ;;  %v469_v20 = vshrl.u32 %v453_v2, 16 }
  0x5b   : > { %v1926_v12 = vcombine.low %v537_v3, %v537_v3 }
  0x5c   : > { %1558 = vmatpush1.bf16.msra.mxu1 %v2295_v6  ;;  %v454_v6 = vld [vmem:[%s2611_s17 + $0xc] sm:$0xf] }
  0x5d   : > { %1660 = vmatpush1.bf16.msra.mxu0 %v2298_v8  ;;  %1559 = vmatprep.subr.bf16.mxu1 %v2303_v9  ;;  %v463_v8 = vshll.u32 %v452_v1, 16  ;;  %v2325_v9 = vld [vmem:[%s3069_s1 + $0x1a0] ss:$8 sps:$4 sm:$0xff]   ;;  %v479_v28 = vshrl.u32 %v454_v6, 16  ;;  %v482_v34 = vshll.u32 %v454_v6, 16 }
  0x5e   : > { %1661 = vmatprep.subr.bf16.mxu0 %v2306_v10  ;;  %v2328_v10 = vld [vmem:[%s3069_s1 + $0x3a0] ss:$8 sps:$4 sm:$0xff]   ;;  %v2345_v1 = vld [vmem:[%s3069_s1 + $0x1d4] ss:$8 sps:$4 sm:$0xff]   ;;  %v2346_v6 = vld [vmem:[%s3069_s1 + $0x3d0] ss:$8 sps:$4 sm:$0xff]  }
  0x5f   : > { %v465_v19 = vrot.slane %v463_v8, 7  ;;  %v481_v13 = vrot.slane %v479_v28, 6  ;;  %v2354_v8 = vld [vmem:[%s3069_s1 + $0x1e4] ss:$8 sps:$4 sm:$0xff]  }
  0x60   : > { %1560 = vmatpush1.bf16.msra.mxu1 %v2301_v4  ;;  %v2333_v4 = vld [vmem:[%s3069_s1 + $0x1b4] ss:$8 sps:$4 sm:$0xff]  }
  0x61   : > { %1662 = vmatpush1.bf16.msra.mxu0 %v2304_v11  ;;  %1561 = vmatprep.subr.bf16.mxu1 %v2309_v14  ;;  %v1927_v11 = vcombine.high %v537_v3, %v537_v3  ;;  %v365_v14 = vsel %vm2849_vm13, %v363_v0, %v364_v56  ;;  %v492_v56 = vshll.u32 %v455_v42, 16  ;;  %v491_v0 = vrot.slane %v489_v55, 6  ;;  %v2396_v55 = vld [vmem:[%s3069_s1 + $0x470] ss:$8 sps:$4 sm:$0xff]  }
  0x62   : > { %1663 = vmatprep.subr.bf16.mxu0 %v2312_v15  ;;  %v439_v15 = vsel %vm2875_vm0, %v1915_v61, %v438_v53  ;;  %373 = vst [vmem:[#allocation2 + $0x30] sm:$0xf] %v365_v14  ;;  %v505_v14 = vld [vmem:[%s2611_s17 + $0xc] sm:$0xf] }
  0x63   : > { %449 = vst [vmem:[#allocation2 + $0x18] sm:$0xf] %v439_v15  ;;  %1538 = vmatprep.mubr.bf16.mxu1 %v1927_v11  ;;  %v494_v53 = vrot.slane %v492_v56, 7  ;;  %v503_v11 = vld [vmem:[%s2611_s17 + $0x4] sm:$0x8] }
  0x64   : > { %1562 = vmatpush1.bf16.msra.mxu1 %v2307_v26  ;;  %v1930_v26 = vcombine.low %v539_v16, %v539_v16  ;;  %v1916_v15 = vrot.slane %v503_v11, 11 }
  0x65   : > { %1664 = vmatpush1.bf16.msra.mxu0 %v2310_v27  ;;  %1563 = vmatprep.subr.bf16.mxu1 %v2315_v29  ;;  %v472_v27 = vshll.u32 %v453_v2, 16  ;;  %v324_v29 = vld [vmem:[%s2611_s17 + $0xc] sm:$0x1]  ;;  %v495_v3 = vor.u32 %v494_v53, %v491_v0  ;;  %v686_v53 = vld [vmem:[%s3070_s2] sm:$0x3] }
  0x66   : > { %1665 = vmatprep.subr.bf16.mxu0 %v2318_v32  ;;  %v442_v32 = vsel %vm2875_vm0, %v440_v17, %v441_v5  ;;  %1539 = vmatmul.mubr.bf16.gmra.mrb[4].mxu1 %v1926_v12  ;;  %v340_v41 = vrot.slane %v324_v29, 5  ;;  %v504_v12 = vld [vmem:[%s2611_s17 + $0x8] sm:$0xf]  ;;  %v2361_v17 = vld [vmem:[%s3069_s1 + $0x1f4] ss:$8 sps:$4 sm:$0xff]  }
  0x67   : > { %450 = vst [vmem:[#allocation2 + $0x3c] sm:$0xf] %v442_v32  ;;  %v474_v38 = vrot.slane %v472_v27, 7  ;;  %1641 = vmatmul.mubr.bf16.gmra.mrb[4].mxu0 %v1930_v26  ;;  %v513_v16 = vrot.slane %v504_v12, 7 }
  0x68   : > { %1564 = vmatpush1.bf16.msra.mxu1 %v2313_v24  ;;  %v466_v24 = vor.u32 %v465_v19, %v462_v18  ;;  %v516_v18 = vrot.slane %v505_v14, 7  ;;  %v506_v19 = vld [vmem:[%s2611_s17 + $0x10] sm:$0x7] }
  0x69   : > { %1666 = vmatpush1.bf16.msra.mxu0 %v2316_v33  ;;  %1565 = vmatprep.subr.bf16.mxu1 %v2321_v36  ;;  %v471_v33 = vrot.slane %v469_v20, 6  ;;  %v428_v36 = vld [vmem:[%s2611_s17 + $0x10] sm:$0x3]  ;;  %v2364_v20 = vld [vmem:[%s3069_s1 + $0x3f4] ss:$8 sps:$4 sm:$0xff]   ;;  %v514_v22 = vsel %vm2849_vm13, %v1916_v15, %v513_v16  ;;  %v515_v26 = vrot.slane %v513_v16, 4 }
  0x6a   : > { %1667 = vmatprep.subr.bf16.mxu0 %v2324_v37  ;;  %v2339_v37 = vld [vmem:[%s3069_s1 + $0x1c4] ss:$8 sps:$4 sm:$0xff]   ;;  %v444_v52 = vrot.slane %v428_v36, 6  ;;  %524 = vst [vmem:[#allocation2 + $0x20] sm:$0xf] %v514_v22  ;;  %v518_v27 = vrot.slane %v516_v18, 4 }
  0x6b   : > { %v475_v43 = vor.u32 %v474_v38, %v471_v33  ;;  %v2367_v59 = vld [vmem:[#allocation2 + $0xc] ss:$36 sps:$4 sm:$0xff]   ;;  %v519_v28 = vrot.slane %v506_v19, 7  ;;  %v517_v29 = vsel %vm2849_vm13, %v515_v26, %v516_v18 }
  0x6c   : > { %1566 = vmatpush1.bf16.msra.mxu1 %v2319_v45  ;;  %v467_v45 = vrot.slane %v466_v24, 4  ;;  %1579 = vmatprep.mubr.bf16.mxu1 %v2367_v59  ;;  %525 = vst [vmem:[#allocation2 + $0x44] sm:$0xf] %v517_v29  ;;  %v2373_v24 = vld [vmem:[%s3069_s1 + $0x404] ss:$8 sps:$4 sm:$0xff]   ;;  %v688_v59 = vlaneseq }
  0x6d   : > { %1668 = vmatpush1.bf16.msra.mxu0 %v2322_v46  ;;  %1567 = vmatprep.subr.bf16.mxu1 %v2327_v50  ;;  %v484_v46 = vrot.slane %v482_v34, 7  ;;  %v341_v50 = vsel %vm2807_vm8, %v339_v39, %v340_v41  ;;  %v477_v25 = vrot.slane %v475_v43, 4  ;;  %v520_v32 = vsel %vm2849_vm13, %v518_v27, %v519_v28  ;;  %v2365_v33 = vld [vmem:[#allocation2 + $0x8] ss:$36 sps:$4 sm:$0xff]   ;;  %v2374_v39 = vld [vmem:[%s3069_s1 + $0x410] ss:$8 sps:$4 sm:$0xff]  }
  0x6e   : > { %1669 = vmatprep.subr.bf16.mxu0 %v2330_v51  ;;  %v443_v51 = vrot.slane %v441_v5, 4  ;;  %347 = vst [vmem:[#allocation2 + $0x50] sm:$0xf] %v341_v50  ;;  %v476_v60 = vsel %vm2930_vm1, %v467_v45, %v475_v43  ;;  %v2343_v5 = vld [vmem:[%s3069_s1 + $0x1d0] ss:$8 sps:$4 sm:$0xff]  }
  0x6f   : > { %v485_v54 = vor.u32 %v484_v46, %v481_v13  ;;  %500 = vst [vmem:[#allocation2 + $0x1c] sm:$0xf] %v476_v60  ;;  %526 = vst [vmem:[#allocation2 + $0x68] sm:$0xf] %v520_v32  ;;  %v2368_v34 = vld [vmem:[#allocation2 + $0x18] ss:$36 sps:$4 sm:$0xff]  }
  0x70   : > { %1568 = vmatpush1.bf16.msra.mxu1 %v2325_v9  ;;  %v445_v61 = vsel %vm2875_vm0, %v443_v51, %v444_v52  ;;  %v2358_v9 = vld [vmem:[%s3069_s1 + $0x3e4] ss:$8 sps:$4 sm:$0xff]   ;;  %v2381_v45 = vld [vmem:[%s3069_s1 + $0x420] ss:$8 sps:$4 sm:$0xff]   ;;  %v2386_v46 = vld [vmem:[%s3069_s1 + $0x434] ss:$8 sps:$4 sm:$0xff]  }
  0x71   : > { %1670 = vmatpush1.bf16.msra.mxu0 %v2328_v10  ;;  %1569 = vmatprep.subr.bf16.mxu1 %v2333_v4  ;;  %451 = vst [vmem:[#allocation2 + $0x60] sm:$0xf] %v445_v61  ;;  %v487_v63 = vrot.slane %v485_v54, 4  ;;  %v486_v2 = vsel %vm2930_vm1, %v477_v25, %v485_v54  ;;  %v2352_v10 = vld [vmem:[%s3069_s1 + $0x1e0] ss:$8 sps:$4 sm:$0xff]   ;;  %v689_v60 = vshrl.u32 %v688_v59, 7 }
  0x72   : > { %1671 = vmatprep.subr.bf16.mxu0 %v2336_v21  ;;  %501 = vst [vmem:[#allocation2 + $0x40] sm:$0xf] %v486_v2  ;;  %v2356_v4 = vld [vmem:[%s3069_s1 + $0x3e0] ss:$8 sps:$4 sm:$0xff]   ;;  %v2383_v41 = vld [vmem:[%s3069_s1 + $0x424] ss:$8 sps:$4 sm:$0xff]  }
  0x73   : > { %v496_v7 = vsel %vm2930_vm1, %v487_v63, %v495_v3  ;;  %v2387_v43 = vld [vmem:[%s3069_s1 + $0x440] ss:$8 sps:$4 sm:$0xff]   ;;  %v2392_v50 = vld [vmem:[%s3069_s1 + $0x454] ss:$8 sps:$4 sm:$0xff]   ;;  %v2390_v51 = vld [vmem:[%s3069_s1 + $0x450] ss:$8 sps:$4 sm:$0xff]  }
  0x74   : > { %1570 = vmatpush1.bf16.msra.mxu1 %v2331_v30  ;;  %502 = vst [vmem:[#allocation2 + $0x64] sm:$0xf] %v496_v7  ;;  %v2359_v30 = vld [vmem:[%s3069_s1 + $0x1f0] ss:$8 sps:$4 sm:$0xff]   ;;  %v2395_v52 = vld [vmem:[%s3069_s1 + $0x464] ss:$8 sps:$4 sm:$0xff]  }
  0x75   : > { %1672 = vmatpush1.bf16.msra.mxu0 %v2334_v31  ;;  %1571 = vmatprep.subr.bf16.mxu1 %v2339_v37  ;;  %v2362_v31 = vld [vmem:[%s3069_s1 + $0x3f0] ss:$8 sps:$4 sm:$0xff]   ;;  %v2371_v37 = vld [vmem:[%s3069_s1 + $0x400] ss:$8 sps:$4 sm:$0xff]   ;;  %v690_v63 = vsub.s32 0, %v689_v60 }
  0x76   : > { %1673 = vmatprep.subr.bf16.mxu0 %v2342_v40  ;;  %v538_v35 = vld [vmem:[#allocation2 + $0x50] sm:$0xff]  ;;  %v2425_v40 = vmov 0   ;;  %v2393_v54 = vld [vmem:[%s3069_s1 + $0x460] ss:$8 sps:$4 sm:$0xff]  }
  0x77   : > { %v1929_v38 = vcombine.high %v538_v35, %v538_v35  ;;  %v1928_v42 = vcombine.low %v538_v35, %v538_v35  ;;  %v2399_v56 = vld [vmem:[#allocation2 + $0x20] ss:$36 sps:$4 sm:$0xff]  }
  0x78   : > { %1572 = vmatpush1.bf16.msra.mxu1 %v2337_v57  ;;  %v2400_v57 = vld [vmem:[#allocation2 + $0x68] ss:$0 sps:$4 sm:$0xff]  }
  0x79   : > { %1674 = vmatpush1.bf16.msra.mxu0 %v2340_v62  ;;  %1573 = vmatprep.subr.bf16.mxu1 %v2345_v1  ;;  %v2370_v21 = vld [vmem:[#allocation2 + $0x1c] ss:$36 sps:$4 sm:$0xff]   ;;  %v694_v1 = vsub.s32 1, %v689_v60 }
  0x7a   : > { %1675 = vmatprep.subr.bf16.mxu0 %v2348_v58  ;;  %1681 = vmatprep.mubr.bf16.mxu0 %v2370_v21  ;;  %v691_v58 = vrot.slane %v686_v53, %v690_v63 }
  0x7b   : > { %v540_v36 = vld [vmem:[#allocation2 + $0x60] sm:$0xff]  ;;  %v695_v2 = vrot.slane %v686_v53, %v694_v1 }
  0x7c   : > { %1574 = vmatpush1.bf16.msra.mxu1 %v2343_v5  ;;  %v1933_v13 = vcombine.high %v540_v36, %v540_v36  ;;  %v1932_v44 = vcombine.low %v540_v36, %v540_v36 }
  0x7d   : > { %1676 = vmatpush1.bf16.msra.mxu0 %v2346_v6  ;;  %1575 = vmatprep.subr.bf16.mxu1 %v2354_v8 }
  0x7e   : > { %1677 = vmatprep.subr.bf16.mxu0 %v2358_v9 }
  0x80   : > { %1576 = vmatpush1.bf16.msra.mxu1 %v2352_v10 }
  0x81   : > { %1678 = vmatpush1.bf16.msra.mxu0 %v2356_v4  ;;  %1577 = vmatprep.subr.bf16.mxu1 %v2361_v17 }
  0x82   : > { %1679 = vmatprep.subr.bf16.mxu0 %v2364_v20 }
  0x84   : > { %1578 = vmatpush1.bf16.msra.mxu1 %v2359_v30 }
  0x85   : > { %1680 = vmatpush1.bf16.msra.mxu0 %v2362_v31  ;;  %2087 = vmatprep.subr.bf16.mxu1 %v2373_v24 }
  0x86   : > { %1700 = vmatprep.subr.bf16.mxu0 %v2373_v24 }
  0x87   : > { %1580 = vmatmul.mubr.bf16.vlgmr.msra.gmra.mrb[0].mxu1 %v2365_v33 }
  0x88   : > { %1682 = vmatmul.mubr.bf16.vlgmr.msra.gmra.mrb[0].mxu0 %v2368_v34  ;;  %2095 = vmatpush1.bf16.msra.mxu1 %v2371_v37 }
  0x89   : > { %1701 = vmatpush1.bf16.msra.mxu0 %v2371_v37  ;;  %2088 = vmatprep.subr.bf16.mxu1 %v2376_v23 }
  0x8a   : > { %1702 = vmatprep.subr.bf16.mxu0 %v2376_v23  ;;  %1589 = vmatprep.mubr.bf16.mxu1 %v1929_v38 }
  0x8b   : > { %1691 = vmatprep.mubr.bf16.mxu0 %v1933_v13 }
  0x8c   : > { %2096 = vmatpush1.bf16.msra.mxu1 %v2374_v39 }
  0x8d   : > { %1703 = vmatpush1.bf16.msra.mxu0 %v2374_v39  ;;  %2089 = vmatprep.subr.bf16.mxu1 %v2383_v41 }
  0x8e   : > { %1704 = vmatprep.subr.bf16.mxu0 %v2383_v41 }
  0x8f   : > { %1590 = vmatmul.mubr.bf16.gmra.mrb[4].mxu1 %v1928_v42 }
  0x90   : > { %1692 = vmatmul.mubr.bf16.gmra.mrb[4].mxu0 %v1932_v44  ;;  %2097 = vmatpush1.bf16.msra.mxu1 %v2381_v45 }
  0x91   : > { %1705 = vmatpush1.bf16.msra.mxu0 %v2381_v45  ;;  %2090 = vmatprep.subr.bf16.mxu1 %v2386_v46 }
  0x92   : > { %1706 = vmatprep.subr.bf16.mxu0 %v2386_v46  ;;  %1732 = vmatprep.mubr.bf16.mxu0 %v2425_v40 }
  0x93   : > { %1742 = vmatprep.mubr.bf16.mxu1 %v2425_v40 }
  0x94   : > { %2098 = vmatpush1.bf16.msra.mxu1 %v2384_v47 }
  0x95   : > { %1707 = vmatpush1.bf16.msra.mxu0 %v2384_v47  ;;  %2091 = vmatprep.subr.bf16.mxu1 %v2389_v49 }
  0x96   : > { %1708 = vmatprep.subr.bf16.mxu0 %v2389_v49 }
  0x98   : > { %2099 = vmatpush1.bf16.msra.mxu1 %v2387_v43 }
  0x99   : > { %1709 = vmatpush1.bf16.msra.mxu0 %v2387_v43  ;;  %2092 = vmatprep.subr.bf16.mxu1 %v2392_v50 }
  0x9a   : > { %1710 = vmatprep.subr.bf16.mxu0 %v2392_v50 }
  0x9c   : > { %2100 = vmatpush1.bf16.msra.mxu1 %v2390_v51 }
  0x9d   : > { %1711 = vmatpush1.bf16.msra.mxu0 %v2390_v51  ;;  %2093 = vmatprep.subr.bf16.mxu1 %v2395_v52 }
  0x9e   : > { %1712 = vmatprep.subr.bf16.mxu0 %v2395_v52 }
  0xa0   : > { %2101 = vmatpush1.bf16.msra.mxu1 %v2393_v54 }
  0xa1   : > { %1713 = vmatpush1.bf16.msra.mxu0 %v2393_v54  ;;  %2094 = vmatprep.subr.bf16.mxu1 %v2398_v48 }
  0xa2   : > { %1714 = vmatprep.subr.bf16.mxu0 %v2398_v48 }
  0xa4   : > { %2102 = vmatpush1.bf16.msra.mxu1 %v2396_v55 }
  0xa5   : > { %1715 = vmatpush1.bf16.msra.mxu0 %v2396_v55 }
  0xa7   : > { %1743 = vmatmul.mubr.bf16.vlgmr.msra.gmra.mrb[8].mxu1 %v2400_v57 }
  0xa8   : > { %1733 = vmatmul.mubr.bf16.vlgmr.msra.gmra.mrb[0].mxu0 %v2399_v56 }
 0x15a   : > { %v1581_v25 = vpop.f32.mrb[0].mxu1 }
 0x15b   : > { %v1583_v61 = vpop.f32.mrb[1].mxu1  ;;  %v2103_v16 = vadd.f32 %v1581_v25, %v691_v58 }
 0x15c   : > { %v1585_v62 = vpop.f32.mrb[2].mxu1  ;;  %v2105_v17 = vadd.f32 %v1583_v61, %v695_v2 }
 0x15d   : > { %v1587_v0 = vpop.f32.mrb[3].mxu1  ;;  %v2107_v20 = vadd.f32 %v1585_v62, %v691_v58 }
 0x15e   : > { %v2109_v28 = vadd.f32 %v1587_v0, %v695_v2 }
 0x162   : > { %v1591_v3 = vpop.f32.mrb[4].mxu1 }
 0x163   : > { %v1693_v5 = vpop.f32.mrb[4].mxu0  ;;  %v2111_v6 = vadd.f32 %v1591_v3, %v691_v58  ;;  %v1593_v7 = vpop.f32.mrb[5].mxu1 }
 0x164   : > { %v1695_v8 = vpop.f32.mrb[5].mxu0  ;;  %v2114_v9 = vadd.f32 %v1593_v7, %v695_v2  ;;  %v1595_v10 = vpop.f32.mrb[6].mxu1 }
 0x165   : > { %v1697_v4 = vpop.f32.mrb[6].mxu0  ;;  %v2112_v11 = vadd.f32 %v2111_v6, %v1693_v5  ;;  %v1596_v12 = vpop.f32.mrb[7].mxu1 }
 0x166   : > { %v1698_v14 = vpop.f32.mrb[7].mxu0  ;;  %v2115_v15 = vadd.f32 %v2114_v9, %v1695_v8 }
 0x17a   : > { %v1744_v19 = vpop.f32.mrb[8].mxu1 }
 0x17b   : > { %v1734_v18 = vpop.f32.mrb[0].mxu0  ;;  %v2113_v22 = vadd.f32 %v2112_v11, %v1744_v19  ;;  %v1746_v27 = vpop.f32.mrb[9].mxu1 }
 0x17c   : > { %v2104_v21 = vadd.f32 %v2103_v16, %v1734_v18  ;;  %v1736_v26 = vpop.f32.mrb[1].mxu0  ;;  %v2116_v30 = vadd.f32 %v2115_v15, %v1746_v27  ;;  %v1748_v32 = vpop.f32.mrb[10].mxu1 }
 0x17d   : > { %v2106_v29 = vadd.f32 %v2105_v17, %v1736_v26  ;;  %v1738_v31 = vpop.f32.mrb[2].mxu0  ;;  %v1755_v33 = vmax.f32 %v2113_v22, 0.0  ;;  %v1749_v36 = vpop.f32.mrb[11].mxu1 }
 0x17e   : > { %v1751_v24 = vmax.f32 %v2104_v21, 0.0  ;;  %v2108_v34 = vadd.f32 %v2107_v20, %v1738_v31  ;;  %v1740_v35 = vpop.f32.mrb[3].mxu0  ;;  %v1756_v23 = vmax.f32 %v2116_v30, 0.0 }
 0x17f   : > { %v1752_v37 = vmax.f32 %v2106_v29, 0.0  ;;  %v2110_v38 = vadd.f32 %v2109_v28, %v1740_v35 }
 0x180   : > { %v1753_v13 = vmax.f32 %v2108_v34, 0.0  ;;  %v2086_v41 = vpack.c.bf16 %v1756_v23, %v1755_v33 }
 0x181   : > { %v2084_v39 = vpack.c.bf16 %v1752_v37, %v1751_v24  ;;  %v1754_v42 = vmax.f32 %v2110_v38, 0.0 }
 0x182   : > { %1779 = vst [vmem:[%s265_s30 + $0x10] sm:$0xff] %v2086_v41 }
 0x183   : > { %1777 = vst [vmem:[%s265_s30] sm:$0xff] %v2084_v39  ;;  %v2085_v44 = vpack.c.bf16 %v1754_v42, %v1753_v13 }
 0x185   : > { %1778 = vst [vmem:[%s265_s30 + $0x8] sm:$0xff] %v2085_v44 }
 0x186 PF: > { %s13_s14 = sadd.s32 1, %s2423_s14   ;;  %s3084_s12 = smov %s2419_s13 }
 0x187   : > { %p10_p5 = scmp.ge.s32.totalorder %s13_s14, 6   ;;  %s3085_s13 = smov %s3087_s15 }
 0x189   :  { %12 = sbr.rel (!%p10_p5) target bundleno = 2 (0x2), region = 68 }

// kernel: vgg_distance.23
= control target key start
LH: loop header
LB: loop body
LE: loop exit
PB: predicated region body
PF: predicated region fallthrough
CT: control target
= control target key end

     0   :  { %vm12_vm0 = vcmask 1024   ;;  %v103_v46 = vmov 0.0   ;;  %v67_v47 = vlaneseq  ;;  %vm77_vm1 = vcmask 1041409   ;;  %s144_s0 = inlined_call_operand.vmem [shape: bf16[2,2,8,512], index: 0, kind: input, shape index: {}]   ;;  %s145_s1 = inlined_call_operand.vmem [shape: f32[2,1], index: 1, kind: output, shape index: {}]  }
   0x1   :  { %v14_v0 = vld [vmem:[%s144_s0] sm:$0xff]  ;;  %v15_v1 = vld [vmem:[%s144_s0 + $0x8] sm:$0xff]  ;;  %v16_v8 = vld [vmem:[%s144_s0 + $0x10] sm:$0xff]  ;;  %13 = vst.msk [vmem:[#allocation2] sm:$0x3] %vm12_vm0, %v103_v46  ;;  %vm80_vm2 = vcmask 58368  }
   0x2   :  { %v98_v2 = vld [vmem:[%s144_s0 + $0x20] sm:$0xff]  ;;  %v18_v3 = vunpack.c.l.bf16 %v14_v0  ;;  %v19_v4 = vunpack.c.h.bf16 %v14_v0  ;;  %v20_v5 = vunpack.c.l.bf16 %v15_v1  ;;  %v21_v6 = vunpack.c.h.bf16 %v15_v1  ;;  %v99_v7 = vld [vmem:[%s144_s0 + $0x28] sm:$0xff]  ;;  %v17_v9 = vld [vmem:[%s144_s0 + $0x18] sm:$0xff] }
   0x3   :  { %v31_v10 = vunpack.c.l.bf16 %v98_v2  ;;  %v32_v11 = vunpack.c.h.bf16 %v98_v2  ;;  %v33_v12 = vunpack.c.l.bf16 %v99_v7  ;;  %v34_v13 = vunpack.c.h.bf16 %v99_v7  ;;  %v100_v14 = vld [vmem:[%s144_s0 + $0x30] sm:$0xff]  ;;  %v101_v15 = vld [vmem:[%s144_s0 + $0x38] sm:$0xff] }
   0x4   :  { %v22_v16 = vunpack.c.l.bf16 %v16_v8  ;;  %v23_v17 = vunpack.c.h.bf16 %v16_v8  ;;  %v24_v18 = vunpack.c.l.bf16 %v17_v9  ;;  %v25_v19 = vunpack.c.h.bf16 %v17_v9 }
   0x5   :  { %v39_v20 = vsub.f32 %v18_v3, %v31_v10  ;;  %v40_v21 = vsub.f32 %v19_v4, %v32_v11  ;;  %v41_v22 = vsub.f32 %v20_v5, %v33_v12  ;;  %v42_v23 = vsub.f32 %v21_v6, %v34_v13 }
   0x6   :  { %v35_v24 = vunpack.c.l.bf16 %v100_v14  ;;  %v36_v25 = vunpack.c.h.bf16 %v100_v14  ;;  %v37_v26 = vunpack.c.l.bf16 %v101_v15  ;;  %v38_v27 = vunpack.c.h.bf16 %v101_v15 }
   0x7   :  { %v47_v28 = vand.u32 2147483647, %v39_v20  ;;  %v48_v29 = vand.u32 2147483647, %v40_v21  ;;  %v49_v30 = vand.u32 2147483647, %v41_v22 }
   0x8   :  { %v43_v31 = vsub.f32 %v22_v16, %v35_v24  ;;  %v44_v32 = vsub.f32 %v23_v17, %v36_v25  ;;  %v45_v33 = vsub.f32 %v24_v18, %v37_v26  ;;  %v50_v34 = vand.u32 2147483647, %v42_v23  ;;  %v84_v57 = vld [vmem:[#allocation2] sm:$0x3] }
   0x9   :  { %v55_v35 = vadd.f32 %v48_v29, %v47_v28  ;;  %v46_v36 = vsub.f32 %v25_v19, %v38_v27  ;;  %v68_v48 = vand.u32 127, %v67_v47  ;;  %v70_v49 = vshrl.u32 %v67_v47, 7 }
   0xa   :  { %v51_v37 = vand.u32 2147483647, %v43_v31  ;;  %v52_v38 = vand.u32 2147483647, %v44_v32  ;;  %v53_v39 = vand.u32 2147483647, %v45_v33 }
   0xb   :  { %v56_v40 = vadd.f32 %v55_v35, %v49_v30  ;;  %v54_v41 = vand.u32 2147483647, %v46_v36  ;;  %v71_v51 = vsub.s32 %v68_v48, %v70_v49 }
   0xc   :  { %v60_v42 = vadd.f32 %v52_v38, %v51_v37 }
   0xd   :  { %v57_v43 = vadd.f32 %v56_v40, %v50_v34 }
   0xe   :  { %v61_v44 = vadd.f32 %v60_v42, %v53_v39 }
   0xf   :  { %58 = vadd.xlane.f32.xlu0 %v57_v43 }
  0x10   :  { %v62_v45 = vadd.f32 %v61_v44, %v54_v41 }
  0x13   :  { %63 = vadd.xlane.f32.xlu0 %v62_v45 }
  0x9c   :  { %v59_v50 = vpop.xlane.xlu0 %58 }
  0x9d   :  { %v72_v53 = vrot.slane %v59_v50, %v71_v51 }
  0xa0   :  { %v64_v52 = vpop.xlane.xlu0 %63 }
  0xa1   :  { %v76_v54 = vrot.slane %v64_v52, %v71_v51 }
  0xa3   :  { %v78_v55 = vsel %vm77_vm1, %v76_v54, %v72_v53 }
  0xa4   :  { %v81_v56 = vsel %vm80_vm2, %v78_v55, 0.0 }
  0xa5   :  { %82 = vadd.xlane.f32.xlu1 %v81_v56 }
 0x132   :  { %v83_v58 = vpop.xlane.xlu1 %82 }
 0x133   :  { %v85_v59 = vadd.f32 %v84_v57, %v83_v58 }
 0x135   :  { %87 = vst.msk [vmem:[#allocation2] sm:$0x3] %vm12_vm0, %v85_v59 }
 0x13c   :  { %v91_v60 = vld [vmem:[#allocation2] sm:$0x3] }
 0x13d   :  { %v92_v61 = vmul.f32 0.00024414063, %v91_v60 }
 0x13f   :  { %93 = vst.msk [vmem:[%s145_s1] sm:$0x3] %vm12_vm0, %v92_v61 }

// kernel: vgg_distance.19
= control target key start
LH: loop header
LB: loop body
LE: loop exit
PB: predicated region body
PF: predicated region fallthrough
CT: control target
= control target key end

     0   :  { %s4010_s12 = smov 0   ;;  %s4012_s13 = smov 0   ;;  %s5169_s0 = inlined_call_operand.vmem [shape: bf16[4,42,256], index: 0, kind: input, shape index: {}]   ;;  %s5170_s1 = inlined_call_operand.vmem [shape: bf16[1,2304,256], index: 1, kind: input, shape index: {}]   ;;  %s5171_s2 = inlined_call_operand.vmem [shape: f32[1,256], index: 2, kind: input, shape index: {}]   ;;  %s5172_s3 = inlined_call_operand.vmem [shape: bf16[4,24,256], index: 3, kind: output, shape index: {}]  }
   0x1   :  { %s4014_s14 = smov 0  }
   0x2 LB: > { %s32_s15 = sadd.s32 1, %s3984_s13  ;;  %p3062_p0 = scmp.ge.s32.totalorder %s3988_s14, 1  ;;  %s3988_s14 = sphi %s4014_s14, %s13_s14   ;;  %s3984_s13 = sphi %s4012_s13, %s5186_s13   ;;  %s3980_s12 = sphi %s4010_s12, %s5185_s12  }
   0x3   : > { %p34_p1 = scmp.ge.s32.totalorder %s32_s15, 4  ;;  %p192_p2 = scmp.lt.s32.totalorder %s3988_s14, 5 }
   0x5   : > { %s5188_s15 = smov (%p34_p1, %s32_s15), 0  ;;  %p193_p3 = pnand %p3062_p0, %p192_p2 }
   0x6   : > { %v3526_v0 = vld [vmem:[%s5170_s1 + $0x4] ss:$8 sps:$4 sm:$0xff] (!%p193_p3)   ;;  %v3530_v2 = vld [vmem:[%s5170_s1] ss:$8 sps:$4 sm:$0xff] (!%p193_p3)   ;;  %v3532_v4 = vld [vmem:[%s5170_s1 + $0x14] ss:$8 sps:$4 sm:$0xff] (!%p193_p3)  }
   0x7   : > { %196 = sbr.rel (%p193_p3) target bundleno = 548 (0x224), region = 32  ;;  %v3528_v1 = vld [vmem:[%s5170_s1 + $0x404] ss:$8 sps:$4 sm:$0xff] (!%p193_p3)   ;;  %2451 = vmatprep.subr.bf16.mxu1 (!%p193_p3), %v3526_v0  ;;  %v3531_v3 = vld [vmem:[%s5170_s1 + $0x400] ss:$8 sps:$4 sm:$0xff] (!%p193_p3)   ;;  %p238_p4 = scmp.lt.s32.totalorder (!%p193_p3), %s3980_s12, 3 }
   0x8   : > { %2655 = vmatprep.subr.bf16.mxu0 (!%p193_p3), %v3528_v1  ;;  %2452 = vmatpush1.bf16.msra.mxu1 (!%p193_p3), %v3530_v2  ;;  %v3534_v5 = vld [vmem:[%s5170_s1 + $0x414] ss:$8 sps:$4 sm:$0xff] (!%p193_p3)   ;;  %v3536_v6 = vld [vmem:[%s5170_s1 + $0x10] ss:$8 sps:$4 sm:$0xff] (!%p193_p3)   ;;  %v3538_v8 = vld [vmem:[%s5170_s1 + $0x24] ss:$8 sps:$4 sm:$0xff] (!%p193_p3)  }
   0x9   : > { %2656 = vmatpush1.bf16.msra.mxu0 (!%p193_p3), %v3531_v3  ;;  %2453 = vmatprep.subr.bf16.mxu1 (!%p193_p3), %v3532_v4  ;;  %v3537_v7 = vld [vmem:[%s5170_s1 + $0x410] ss:$8 sps:$4 sm:$0xff] (!%p193_p3)   ;;  %v3540_v9 = vld [vmem:[%s5170_s1 + $0x424] ss:$8 sps:$4 sm:$0xff] (!%p193_p3)   ;;  %v3542_v10 = vld [vmem:[%s5170_s1 + $0x20] ss:$8 sps:$4 sm:$0xff] (!%p193_p3)  }
   0xa   : > { %2657 = vmatprep.subr.bf16.mxu0 (!%p193_p3), %v3534_v5  ;;  %v3543_v11 = vld [vmem:[%s5170_s1 + $0x420] ss:$8 sps:$4 sm:$0xff] (!%p193_p3)   ;;  %v3544_v12 = vld [vmem:[%s5170_s1 + $0x34] ss:$8 sps:$4 sm:$0xff] (!%p193_p3)   ;;  %v3548_v14 = vld [vmem:[%s5170_s1 + $0x30] ss:$8 sps:$4 sm:$0xff] (!%p193_p3)  }
   0xb   : > { %v3546_v13 = vld [vmem:[%s5170_s1 + $0x434] ss:$8 sps:$4 sm:$0xff] (!%p193_p3)   ;;  %v3549_v15 = vld [vmem:[%s5170_s1 + $0x430] ss:$8 sps:$4 sm:$0xff] (!%p193_p3)   ;;  %v3550_v16 = vld [vmem:[%s5170_s1 + $0x44] ss:$8 sps:$4 sm:$0xff] (!%p193_p3)  }
   0xc   : > { %2454 = vmatpush1.bf16.msra.mxu1 (!%p193_p3), %v3536_v6  ;;  %v3552_v17 = vld [vmem:[%s5170_s1 + $0x444] ss:$8 sps:$4 sm:$0xff] (!%p193_p3)   ;;  %v3554_v18 = vld [vmem:[%s5170_s1 + $0x40] ss:$8 sps:$4 sm:$0xff] (!%p193_p3)   ;;  %v3556_v20 = vld [vmem:[%s5170_s1 + $0x54] ss:$8 sps:$4 sm:$0xff] (!%p193_p3)  }
   0xd   : > { %2658 = vmatpush1.bf16.msra.mxu0 (!%p193_p3), %v3537_v7  ;;  %2455 = vmatprep.subr.bf16.mxu1 (!%p193_p3), %v3538_v8  ;;  %v3555_v19 = vld [vmem:[%s5170_s1 + $0x440] ss:$8 sps:$4 sm:$0xff] (!%p193_p3)   ;;  %v3558_v21 = vld [vmem:[%s5170_s1 + $0x454] ss:$8 sps:$4 sm:$0xff] (!%p193_p3)   ;;  %v3560_v22 = vld [vmem:[%s5170_s1 + $0x50] ss:$8 sps:$4 sm:$0xff] (!%p193_p3)  }
   0xe   : > { %2659 = vmatprep.subr.bf16.mxu0 %v3540_v9  ;;  %v3561_v23 = vld [vmem:[%s5170_s1 + $0x450] ss:$8 sps:$4 sm:$0xff]   ;;  %v3562_v24 = vld [vmem:[%s5170_s1 + $0x64] ss:$8 sps:$4 sm:$0xff]   ;;  %v3566_v26 = vld [vmem:[%s5170_s1 + $0x60] ss:$8 sps:$4 sm:$0xff]  }
   0xf   : > { %v3564_v25 = vld [vmem:[%s5170_s1 + $0x464] ss:$8 sps:$4 sm:$0xff]   ;;  %v3567_v27 = vld [vmem:[%s5170_s1 + $0x460] ss:$8 sps:$4 sm:$0xff]   ;;  %v3568_v28 = vld [vmem:[%s5170_s1 + $0x74] ss:$8 sps:$4 sm:$0xff]  }
  0x10   : > { %2456 = vmatpush1.bf16.msra.mxu1 %v3542_v10  ;;  %v3570_v29 = vld [vmem:[%s5170_s1 + $0x474] ss:$8 sps:$4 sm:$0xff]   ;;  %v3572_v30 = vld [vmem:[%s5170_s1 + $0x70] ss:$8 sps:$4 sm:$0xff]   ;;  %v3574_v32 = vld [vmem:[%s5170_s1 + $0x84] ss:$8 sps:$4 sm:$0xff]  }
  0x11   : > { %2660 = vmatpush1.bf16.msra.mxu0 %v3543_v11  ;;  %2457 = vmatprep.subr.bf16.mxu1 %v3544_v12  ;;  %v3573_v31 = vld [vmem:[%s5170_s1 + $0x470] ss:$8 sps:$4 sm:$0xff]   ;;  %v3576_v33 = vld [vmem:[%s5170_s1 + $0x484] ss:$8 sps:$4 sm:$0xff]   ;;  %v3578_v34 = vld [vmem:[%s5170_s1 + $0x80] ss:$8 sps:$4 sm:$0xff]  }
  0x12   : > { %2661 = vmatprep.subr.bf16.mxu0 %v3546_v13  ;;  %v3579_v35 = vld [vmem:[%s5170_s1 + $0x480] ss:$8 sps:$4 sm:$0xff]   ;;  %v3580_v36 = vld [vmem:[%s5170_s1 + $0x94] ss:$8 sps:$4 sm:$0xff]   ;;  %s5190_s12 = smov (!%p238_p4, %s3980_s12), 3  ;;  %vm333_vm6 = vcmask 1042432  }
  0x13   : > { %v3582_v37 = vld [vmem:[%s5170_s1 + $0x494] ss:$8 sps:$4 sm:$0xff]   ;;  %v3584_v38 = vld [vmem:[%s5170_s1 + $0x90] ss:$8 sps:$4 sm:$0xff]   ;;  %v3586_v40 = vld [vmem:[%s5170_s1 + $0xa4] ss:$8 sps:$4 sm:$0xff]  }
  0x14   : > { %2458 = vmatpush1.bf16.msra.mxu1 %v3548_v14  ;;  %v3585_v39 = vld [vmem:[%s5170_s1 + $0x490] ss:$8 sps:$4 sm:$0xff]   ;;  %s3500_s29 = smul.u32 48, %s5190_s12  ;;  %v3588_v41 = vld [vmem:[%s5170_s1 + $0x4a4] ss:$8 sps:$4 sm:$0xff]   ;;  %vm334_vm7 = vcmask 1046532  }
  0x15   : > { %2662 = vmatpush1.bf16.msra.mxu0 %v3549_v15  ;;  %2459 = vmatprep.subr.bf16.mxu1 %v3550_v16  ;;  %v3590_v42 = vld [vmem:[%s5170_s1 + $0xa0] ss:$8 sps:$4 sm:$0xff]   ;;  %v3592_v44 = vld [vmem:[%s5170_s1 + $0xb4] ss:$8 sps:$4 sm:$0xff]   ;;  %vm383_vm0 = vsmask.f32 256  ;;  %vm4549_vm10 = vmor %vm333_vm6, %vm334_vm7 }
  0x16   : > { %2663 = vmatprep.subr.bf16.mxu0 %v3552_v17  ;;  %v3591_v43 = vld [vmem:[%s5170_s1 + $0x4a0] ss:$8 sps:$4 sm:$0xff]   ;;  %s4173_s17 = scalar_lea.vmem %s5169_s0, %s3500_s29  ;;  %v3594_v45 = vld [vmem:[%s5170_s1 + $0x4b4] ss:$8 sps:$4 sm:$0xff]   ;;  %v3596_v46 = vld [vmem:[%s5170_s1 + $0xb0] ss:$8 sps:$4 sm:$0xff]  }
  0x17   : > { %v3597_v47 = vld [vmem:[%s5170_s1 + $0x4b0] ss:$8 sps:$4 sm:$0xff]   ;;  %v4185_v48 = vld [vmem:[%s4173_s17] sm:$0xff]  ;;  %v4188_v49 = vld [vmem:[%s4173_s17 + $0x8] sm:$0xff]  ;;  %vm384_vm1 = vsmask.f32 4368 }
  0x18   : > { %2460 = vmatpush1.bf16.msra.mxu1 %v3554_v18  ;;  %v3598_v50 = vld [vmem:[%s5170_s1 + $0xc4] ss:$8 sps:$4 sm:$0xff]   ;;  %v3071_v52 = vcombine.high %v4185_v48, %v4188_v49  ;;  %v4200_v54 = vld [vmem:[%s4173_s17 + $0x10] sm:$0xff]  ;;  %v392_v56 = vshrl.u32 %v4188_v49, 16  ;;  %v395_v57 = vshll.u32 %v4188_v49, 16  ;;  %vm4218_vm2 = vmor %vm383_vm0, %vm384_vm1  ;;  %vm437_vm8 = vcmask 1041408  }
  0x19   : > { %2664 = vmatpush1.bf16.msra.mxu0 %v3555_v19  ;;  %2461 = vmatprep.subr.bf16.mxu1 %v3556_v20  ;;  %v3600_v51 = vld [vmem:[%s5170_s1 + $0x4c4] ss:$8 sps:$4 sm:$0xff]   ;;  %v401_v58 = vshrl.u32 %v4200_v54, 16  ;;  %v404_v59 = vshll.u32 %v4200_v54, 16  ;;  %v3602_v60 = vld [vmem:[%s5170_s1 + $0xc0] ss:$8 sps:$4 sm:$0xff]   ;;  %v3080_v63 = vcombine.low %v4188_v49, %v4200_v54 }
  0x1a   : > { %2665 = vmatprep.subr.bf16.mxu0 %v3558_v21  ;;  %v379_v53 = vld [vmem:[%s4173_s17] sm:$0x88]  ;;  %2483 = vmatprep.mubr.bf16.mxu1 %v3071_v52  ;;  %v394_v62 = vrot.slane %v392_v56, 7  ;;  %v3604_v3 = vld [vmem:[%s5170_s1 + $0xd4] ss:$8 sps:$4 sm:$0xff]   ;;  %vm438_vm9 = vcmask 1045508  }
  0x1b   : > { %v387_v55 = vshrl.u32 %v379_v53, 16  ;;  %v3603_v0 = vld [vmem:[%s5170_s1 + $0x4c0] ss:$8 sps:$4 sm:$0xff]   ;;  %v4224_v2 = vrot.slane %v401_v58, 7  ;;  %v3606_v4 = vld [vmem:[%s5170_s1 + $0x4d4] ss:$8 sps:$4 sm:$0xff]   ;;  %vm4573_vm11 = vmor %vm437_vm8, %vm438_vm9 }
  0x1c   : > { %2462 = vmatpush1.bf16.msra.mxu1 %v3560_v22  ;;  %v397_v5 = vor.u32 %v395_v57, %v394_v62  ;;  %v399_v6 = vrot.slane %v394_v62, 4  ;;  %v3608_v8 = vld [vmem:[%s5170_s1 + $0xd0] ss:$8 sps:$4 sm:$0xff]   ;;  %v3610_v12 = vld [vmem:[%s5170_s1 + $0xe4] ss:$8 sps:$4 sm:$0xff]   ;;  %vm360_vm12 = vcmask 1040384  }
  0x1d   : > { %2666 = vmatpush1.bf16.msra.mxu0 %v3561_v23  ;;  %2463 = vmatprep.subr.bf16.mxu1 %v3562_v24  ;;  %v3067_v61 = vrot.slane %v387_v55, 11  ;;  %v406_v7 = vor.u32 %v404_v59, %v4224_v2  ;;  %v3609_v10 = vld [vmem:[%s5170_s1 + $0x4d0] ss:$8 sps:$4 sm:$0xff]   ;;  %v3612_v13 = vld [vmem:[%s5170_s1 + $0x4e4] ss:$8 sps:$4 sm:$0xff]   ;;  %v3070_v23 = vcombine.low %v4185_v48, %v4188_v49  ;;  %vm361_vm13 = vcmask 1044484  }
  0x1e   : > { %2667 = vmatprep.subr.bf16.mxu0 %v3564_v25  ;;  %v3614_v15 = vld [vmem:[%s5170_s1 + $0xe0] ss:$8 sps:$4 sm:$0xff]   ;;  %v3616_v17 = vld [vmem:[%s5170_s1 + $0xf4] ss:$8 sps:$4 sm:$0xff]   ;;  %v3620_v19 = vld [vmem:[%s5170_s1 + $0xf0] ss:$8 sps:$4 sm:$0xff]  }
  0x1f   : > { %v398_v9 = vsel %vm4218_vm2, %v3067_v61, %v397_v5  ;;  %v407_v11 = vsel %vm4218_vm2, %v399_v6, %v406_v7  ;;  %v3615_v16 = vld [vmem:[%s5170_s1 + $0x4e0] ss:$8 sps:$4 sm:$0xff]   ;;  %v3618_v18 = vld [vmem:[%s5170_s1 + $0x4f4] ss:$8 sps:$4 sm:$0xff]   ;;  %v3621_v20 = vld [vmem:[%s5170_s1 + $0x4f0] ss:$8 sps:$4 sm:$0xff]  }
  0x20   : > { %2464 = vmatpush1.bf16.msra.mxu1 %v3566_v26  ;;  %v3079_v14 = vcombine.high %v398_v9, %v407_v11  ;;  %v3626_v21 = vld [vmem:[%s5170_s1 + $0x104] ss:$8 sps:$4 sm:$0xff]   ;;  %v3624_v24 = vld [vmem:[%s5170_s1 + $0x100] ss:$8 sps:$4 sm:$0xff]   ;;  %v3078_v25 = vcombine.low %v398_v9, %v407_v11  ;;  %vm282_vm3 = vsmask.f32 3328  ;;  %vm4789_vm15 = vmor %vm360_vm12, %vm361_vm13 }
  0x21   : > { %2668 = vmatpush1.bf16.msra.mxu0 %v3567_v27  ;;  %2465 = vmatprep.subr.bf16.mxu1 %v3568_v28  ;;  %v3629_v22 = vld [vmem:[%s5170_s1 + $0x504] ss:$8 sps:$4 sm:$0xff]   ;;  %v3627_v26 = vld [vmem:[%s5170_s1 + $0x500] ss:$8 sps:$4 sm:$0xff]   ;;  %v3632_v27 = vld [vmem:[%s5170_s1 + $0x114] ss:$8 sps:$4 sm:$0xff]  }
  0x22   : > { %2669 = vmatprep.subr.bf16.mxu0 %v3570_v29  ;;  %2687 = vmatprep.mubr.bf16.mxu0 %v3079_v14  ;;  %v3635_v28 = vld [vmem:[%s5170_s1 + $0x514] ss:$8 sps:$4 sm:$0xff]   ;;  %v3089_v29 = vcombine.high %v4200_v54, %v4200_v54  ;;  %v3648_v52 = vld [vmem:[%s5170_s1 + $0x140] ss:$8 sps:$4 sm:$0xff]   ;;  %vm283_vm4 = vsmask.f32 7440 }
  0x23   : > { %v3651_v53 = vld [vmem:[%s5170_s1 + $0x540] ss:$8 sps:$4 sm:$0xff]   ;;  %v3654_v62 = vld [vmem:[%s5170_s1 + $0x150] ss:$8 sps:$4 sm:$0xff]   ;;  %vm4369_vm5 = vmor %vm282_vm3, %vm283_vm4  ;;  %vm460_vm14 = vsmask.f32 1280 }
  0x24   : > { %2466 = vmatpush1.bf16.msra.mxu1 %v3572_v30  ;;  %v3630_v30 = vld [vmem:[%s5170_s1 + $0x110] ss:$8 sps:$4 sm:$0xff]   ;;  %v3665_v7 = vld [vmem:[%s5170_s1 + $0x564] ss:$8 sps:$4 sm:$0xff]   ;;  %v3663_v14 = vld [vmem:[%s5170_s1 + $0x560] ss:$8 sps:$4 sm:$0xff]  }
  0x25   : > { %2670 = vmatpush1.bf16.msra.mxu0 %v3573_v31  ;;  %2467 = vmatprep.subr.bf16.mxu1 %v3574_v32  ;;  %v286_v31 = vshrl.u32 %v4185_v48, 16  ;;  %v3633_v32 = vld [vmem:[%s5170_s1 + $0x510] ss:$8 sps:$4 sm:$0xff]   ;;  %v3677_v1 = vld [vmem:[%s5170_s1 + $0x584] ss:$8 sps:$4 sm:$0xff]   ;;  %s3501_s19 = smul.u32 24, %s5190_s12 }
  0x26   : > { %2671 = vmatprep.subr.bf16.mxu0 %v3576_v33  ;;  %v289_v33 = vshll.u32 %v4185_v48, 16  ;;  %v3650_v48 = vld [vmem:[%s5170_s1 + $0x144] ss:$8 sps:$4 sm:$0xff]   ;;  %vm461_vm0 = vsmask.f32 5392 }
  0x27   : > { %vm4828_vm1 = vmor %vm460_vm14, %vm461_vm0  ;;  %s270_s21 = scalar_lea.vmem %s5172_s3, %s3501_s19 }
  0x28   : > { %2468 = vmatpush1.bf16.msra.mxu1 %v3578_v34  ;;  %v3638_v34 = vld [vmem:[%s5170_s1 + $0x124] ss:$8 sps:$4 sm:$0xff]  }
  0x29   : > { %2672 = vmatpush1.bf16.msra.mxu0 %v3579_v35  ;;  %2469 = vmatprep.subr.bf16.mxu1 %v3580_v36  ;;  %v3641_v35 = vld [vmem:[%s5170_s1 + $0x524] ss:$8 sps:$4 sm:$0xff]   ;;  %v3636_v36 = vld [vmem:[%s5170_s1 + $0x120] ss:$8 sps:$4 sm:$0xff]  }
  0x2a   : > { %2673 = vmatprep.subr.bf16.mxu0 %v3582_v37  ;;  %v3088_v37 = vcombine.low %v4200_v54, %v4200_v54 }
  0x2c   : > { %2470 = vmatpush1.bf16.msra.mxu1 %v3584_v38  ;;  %v288_v38 = vrot.slane %v286_v31, 4  ;;  %v3689_v31 = vld [vmem:[%s5170_s1 + $0x5a4] ss:$8 sps:$4 sm:$0xff]  }
  0x2d   : > { %2674 = vmatpush1.bf16.msra.mxu0 %v3585_v39  ;;  %2471 = vmatprep.subr.bf16.mxu1 %v3586_v40  ;;  %v3639_v39 = vld [vmem:[%s5170_s1 + $0x520] ss:$8 sps:$4 sm:$0xff]   ;;  %v291_v40 = vrot.slane %v289_v33, 5 }
  0x2e   : > { %2675 = vmatprep.subr.bf16.mxu0 %v3588_v41  ;;  %v297_v41 = vrot.slane %v395_v57, 5  ;;  %v3656_v57 = vld [vmem:[%s5170_s1 + $0x154] ss:$8 sps:$4 sm:$0xff]   ;;  %v3687_v33 = vld [vmem:[%s5170_s1 + $0x5a0] ss:$8 sps:$4 sm:$0xff]  }
  0x30   : > { %2472 = vmatpush1.bf16.msra.mxu1 %v3590_v42  ;;  %v3644_v42 = vld [vmem:[%s5170_s1 + $0x134] ss:$8 sps:$4 sm:$0xff]  }
  0x31   : > { %2676 = vmatpush1.bf16.msra.mxu0 %v3591_v43  ;;  %2473 = vmatprep.subr.bf16.mxu1 %v3592_v44  ;;  %v3647_v43 = vld [vmem:[%s5170_s1 + $0x534] ss:$8 sps:$4 sm:$0xff]   ;;  %v301_v44 = vrot.slane %v392_v56, 4  ;;  %v4345_v56 = vrot.slane %v404_v59, 5  ;;  %v3657_v59 = vld [vmem:[%s5170_s1 + $0x550] ss:$8 sps:$4 sm:$0xff]  }
  0x32   : > { %2677 = vmatprep.subr.bf16.mxu0 %v3594_v45  ;;  %v3642_v45 = vld [vmem:[%s5170_s1 + $0x130] ss:$8 sps:$4 sm:$0xff]  }
  0x34   : > { %2474 = vmatpush1.bf16.msra.mxu1 %v3596_v46  ;;  %v3645_v46 = vld [vmem:[%s5170_s1 + $0x530] ss:$8 sps:$4 sm:$0xff]  }
  0x35   : > { %2678 = vmatpush1.bf16.msra.mxu0 %v3597_v47  ;;  %2475 = vmatprep.subr.bf16.mxu1 %v3598_v50  ;;  %v292_v47 = vor.u32 %v291_v40, %v288_v38  ;;  %v3653_v50 = vld [vmem:[%s5170_s1 + $0x544] ss:$8 sps:$4 sm:$0xff]   ;;  %v3696_v40 = vld [vmem:[%s5170_s1 + $0x1c0] ss:$8 sps:$4 sm:$0xff]  }
  0x36   : > { %2679 = vmatprep.subr.bf16.mxu0 %v3600_v51  ;;  %v302_v51 = vor.u32 %v301_v44, %v297_v41  ;;  %v3698_v38 = vld [vmem:[%s5170_s1 + $0x1c4] ss:$8 sps:$4 sm:$0xff]   ;;  %v3702_v44 = vld [vmem:[%s5170_s1 + $0x1d0] ss:$8 sps:$4 sm:$0xff]  }
  0x37   : > { %v293_v55 = vrot.slane %v292_v47, 4  ;;  %v3714_v47 = vld [vmem:[%s5170_s1 + $0x5e4] ss:$8 sps:$4 sm:$0xff]  }
  0x38   : > { %2476 = vmatpush1.bf16.msra.mxu1 %v3602_v60  ;;  %v3659_v60 = vld [vmem:[%s5170_s1 + $0x554] ss:$8 sps:$4 sm:$0xff]   ;;  %v303_v61 = vrot.slane %v302_v51, 4  ;;  %v3712_v51 = vld [vmem:[%s5170_s1 + $0x5e0] ss:$8 sps:$4 sm:$0xff]  }
  0x39   : > { %2680 = vmatpush1.bf16.msra.mxu0 %v3603_v0  ;;  %2477 = vmatprep.subr.bf16.mxu1 %v3604_v3  ;;  %v4357_v0 = vld [vmem:[%s4173_s17 + $0x18] sm:$0xff]  ;;  %v3662_v3 = vld [vmem:[%s5170_s1 + $0x164] ss:$8 sps:$4 sm:$0xff]  }
  0x3a   : > { %2681 = vmatprep.subr.bf16.mxu0 %v3606_v4  ;;  %v410_v4 = vshrl.u32 %v4357_v0, 16  ;;  %v413_v5 = vshll.u32 %v4357_v0, 16  ;;  %v4383_v9 = vsel %vm4369_vm5, %v303_v61, %v4345_v56  ;;  %v3724_v61 = vld [vmem:[%s5170_s1 + $0x204] ss:$8 sps:$4 sm:$0xff]  }
  0x3c   : > { %2478 = vmatpush1.bf16.msra.mxu1 %v3608_v8  ;;  %v4378_v8 = vsel %vm4369_vm5, %v293_v55, %v297_v41  ;;  %v412_v11 = vrot.slane %v410_v4, 7  ;;  %v3699_v41 = vld [vmem:[%s5170_s1 + $0x5c0] ss:$8 sps:$4 sm:$0xff]   ;;  %v3716_v55 = vld [vmem:[%s5170_s1 + $0x1f0] ss:$8 sps:$4 sm:$0xff]   ;;  %v442_v4 = vrot.slane %v4200_v54, 6 }
  0x3d   : > { %2682 = vmatpush1.bf16.msra.mxu0 %v3609_v10  ;;  %2479 = vmatprep.subr.bf16.mxu1 %v3610_v12  ;;  %v408_v10 = vrot.slane %v4224_v2, 4  ;;  %v3073_v12 = vcombine.high %v4378_v8, %v4383_v9  ;;  %v3671_v2 = vld [vmem:[%s5170_s1 + $0x574] ss:$8 sps:$4 sm:$0xff]  }
  0x3e   : > { %2683 = vmatprep.subr.bf16.mxu0 %v3612_v13  ;;  %v3660_v13 = vld [vmem:[%s5170_s1 + $0x160] ss:$8 sps:$4 sm:$0xff]   ;;  %v444_v6 = vrot.slane %v442_v4, 4 }
  0x40   : > { %2480 = vmatpush1.bf16.msra.mxu1 %v3614_v15  ;;  %v3668_v15 = vld [vmem:[%s5170_s1 + $0x174] ss:$8 sps:$4 sm:$0xff]  }
  0x41   : > { %2684 = vmatpush1.bf16.msra.mxu0 %v3615_v16  ;;  %2481 = vmatprep.subr.bf16.mxu1 %v3616_v17  ;;  %v415_v16 = vor.u32 %v413_v5, %v412_v11  ;;  %v3072_v5 = vcombine.low %v4378_v8, %v4383_v9  ;;  %v3735_v8 = vld [vmem:[%s5170_s1 + $0x614] ss:$8 sps:$4 sm:$0xff]   ;;  %v3730_v9 = vld [vmem:[%s5170_s1 + $0x210] ss:$8 sps:$4 sm:$0xff]  }
  0x42   : > { %2685 = vmatprep.subr.bf16.mxu0 %v3618_v18  ;;  %v3666_v18 = vld [vmem:[%s5170_s1 + $0x170] ss:$8 sps:$4 sm:$0xff]  }
  0x43   : > { %v416_v17 = vsel %vm4218_vm2, %v408_v10, %v415_v16  ;;  %v3727_v10 = vld [vmem:[%s5170_s1 + $0x600] ss:$8 sps:$4 sm:$0xff]  }
  0x44   : > { %2482 = vmatpush1.bf16.msra.mxu1 %v3620_v19  ;;  %v3097_v19 = vcombine.high %v416_v17, %v416_v17 }
  0x45   : > { %2686 = vmatpush1.bf16.msra.mxu0 %v3621_v20  ;;  %2502 = vmatprep.subr.bf16.mxu1 %v3626_v21  ;;  %v3096_v20 = vcombine.low %v416_v17, %v416_v17  ;;  %v3669_v21 = vld [vmem:[%s5170_s1 + $0x570] ss:$8 sps:$4 sm:$0xff]   ;;  %v325_v17 = vld [vmem:[%s4173_s17] sm:$0xee] }
  0x46   : > { %2706 = vmatprep.subr.bf16.mxu0 %v3629_v22  ;;  %v3674_v22 = vld [vmem:[%s5170_s1 + $0x184] ss:$8 sps:$4 sm:$0xff]  }
  0x47   : > { %2484 = vmatmul.mubr.bf16.vlgmr.msra.gmra.mrb[0].mxu1 %v3070_v23  ;;  %v3081_v23 = vcombine.high %v4188_v49, %v4200_v54 }
  0x48   : > { %2688 = vmatmul.mubr.bf16.vlgmr.msra.gmra.mrb[0].mxu0 %v3078_v25  ;;  %2503 = vmatpush1.bf16.msra.mxu1 %v3624_v24  ;;  %v3672_v24 = vld [vmem:[%s5170_s1 + $0x180] ss:$8 sps:$4 sm:$0xff]  }
  0x49   : > { %2707 = vmatpush1.bf16.msra.mxu0 %v3627_v26  ;;  %2504 = vmatprep.subr.bf16.mxu1 %v3632_v27  ;;  %v3675_v25 = vld [vmem:[%s5170_s1 + $0x580] ss:$8 sps:$4 sm:$0xff]   ;;  %v3680_v26 = vld [vmem:[%s5170_s1 + $0x194] ss:$8 sps:$4 sm:$0xff]  }
  0x4a   : > { %2708 = vmatprep.subr.bf16.mxu0 %v3635_v28  ;;  %2493 = vmatprep.mubr.bf16.mxu1 %v3089_v29  ;;  %v3683_v27 = vld [vmem:[%s5170_s1 + $0x594] ss:$8 sps:$4 sm:$0xff]   ;;  %v3678_v28 = vld [vmem:[%s5170_s1 + $0x190] ss:$8 sps:$4 sm:$0xff]  }
  0x4b   : > { %2697 = vmatprep.mubr.bf16.mxu0 %v3097_v19  ;;  %v3681_v29 = vld [vmem:[%s5170_s1 + $0x590] ss:$8 sps:$4 sm:$0xff]  }
  0x4c   : > { %2505 = vmatpush1.bf16.msra.mxu1 %v3630_v30  ;;  %v3686_v30 = vld [vmem:[%s5170_s1 + $0x1a4] ss:$8 sps:$4 sm:$0xff]  }
  0x4d   : > { %2709 = vmatpush1.bf16.msra.mxu0 %v3633_v32  ;;  %2506 = vmatprep.subr.bf16.mxu1 %v3638_v34  ;;  %v3684_v32 = vld [vmem:[%s5170_s1 + $0x1a0] ss:$8 sps:$4 sm:$0xff]   ;;  %v3692_v34 = vld [vmem:[%s5170_s1 + $0x1b4] ss:$8 sps:$4 sm:$0xff]  }
  0x4e   : > { %2710 = vmatprep.subr.bf16.mxu0 %v3641_v35  ;;  %v3695_v35 = vld [vmem:[%s5170_s1 + $0x5b4] ss:$8 sps:$4 sm:$0xff]  }
  0x4f   : > { %2494 = vmatmul.mubr.bf16.gmra.mrb[4].mxu1 %v3088_v37  ;;  %v3693_v37 = vld [vmem:[%s5170_s1 + $0x5b0] ss:$8 sps:$4 sm:$0xff]  }
  0x50   : > { %2507 = vmatpush1.bf16.msra.mxu1 %v3636_v36  ;;  %2534 = vmatprep.mubr.bf16.mxu1 %v3073_v12  ;;  %v3690_v36 = vld [vmem:[%s5170_s1 + $0x1b0] ss:$8 sps:$4 sm:$0xff]   ;;  %v3732_v12 = vld [vmem:[%s5170_s1 + $0x214] ss:$8 sps:$4 sm:$0xff]  }
  0x51   : > { %2711 = vmatpush1.bf16.msra.mxu0 %v3639_v39  ;;  %2508 = vmatprep.subr.bf16.mxu1 %v3644_v42  ;;  %v3701_v39 = vld [vmem:[%s5170_s1 + $0x5c4] ss:$8 sps:$4 sm:$0xff]   ;;  %v3704_v42 = vld [vmem:[%s5170_s1 + $0x1d4] ss:$8 sps:$4 sm:$0xff]  }
  0x52   : > { %2712 = vmatprep.subr.bf16.mxu0 %v3647_v43  ;;  %2698 = vmatmul.mubr.bf16.gmra.mrb[4].mxu0 %v3096_v20  ;;  %v3707_v43 = vld [vmem:[%s5170_s1 + $0x5d4] ss:$8 sps:$4 sm:$0xff]   ;;  %v3065_v20 = vrot.slane %v325_v17, 9  ;;  %v3799_v17 = vld [vmem:[%s5170_s1 + $0x6c0] ss:$8 sps:$4 sm:$0xff]  }
  0x53   : > { %2738 = vmatprep.mubr.bf16.mxu0 %v3081_v23 }
  0x54   : > { %2509 = vmatpush1.bf16.msra.mxu1 %v3642_v45  ;;  %v3705_v45 = vld [vmem:[%s5170_s1 + $0x5d0] ss:$8 sps:$4 sm:$0xff]  }
  0x55   : > { %2713 = vmatpush1.bf16.msra.mxu0 %v3645_v46  ;;  %2510 = vmatprep.subr.bf16.mxu1 %v3650_v48  ;;  %v3711_v46 = vld [vmem:[%s5170_s1 + $0x1e4] ss:$8 sps:$4 sm:$0xff]   ;;  %v311_v48 = vrot.slane %v401_v58, 4  ;;  %v3721_v58 = vld [vmem:[%s5170_s1 + $0x5f4] ss:$8 sps:$4 sm:$0xff]  }
  0x56   : > { %2714 = vmatprep.subr.bf16.mxu0 %v3653_v50  ;;  %v3709_v50 = vld [vmem:[%s5170_s1 + $0x1e0] ss:$8 sps:$4 sm:$0xff]  }
  0x58   : > { %2511 = vmatpush1.bf16.msra.mxu1 %v3648_v52  ;;  %v3718_v52 = vld [vmem:[%s5170_s1 + $0x1f4] ss:$8 sps:$4 sm:$0xff]  }
  0x59   : > { %2715 = vmatpush1.bf16.msra.mxu0 %v3651_v53  ;;  %2512 = vmatprep.subr.bf16.mxu1 %v3656_v57  ;;  %v312_v53 = vor.u32 %v311_v48, %v4345_v56  ;;  %v3719_v57 = vld [vmem:[%s5170_s1 + $0x5f0] ss:$8 sps:$4 sm:$0xff]   ;;  %v3729_v56 = vld [vmem:[%s5170_s1 + $0x604] ss:$8 sps:$4 sm:$0xff]  }
  0x5a   : > { %2716 = vmatprep.subr.bf16.mxu0 %v3659_v60  ;;  %v338_v60 = vrot.slane %v4188_v49, 5  ;;  %v3741_v49 = vld [vmem:[%s5170_s1 + $0x624] ss:$8 sps:$4 sm:$0xff]  }
  0x5b   : > { %v3765_v48 = vld [vmem:[%s5170_s1 + $0x664] ss:$8 sps:$4 sm:$0xff]  }
  0x5c   : > { %2513 = vmatpush1.bf16.msra.mxu1 %v3654_v62  ;;  %v281_v62 = vld [vmem:[%s4173_s17 + $0x18] sm:$0x11]  ;;  %v340_v11 = vrot.slane %v338_v60, 4  ;;  %v4569_v23 = vsel %vm4549_vm10, %v3065_v20, %v338_v60  ;;  %v3777_v60 = vld [vmem:[%s5170_s1 + $0x684] ss:$8 sps:$4 sm:$0xff]  }
  0x5d   : > { %2717 = vmatpush1.bf16.msra.mxu0 %v3657_v59  ;;  %2514 = vmatprep.subr.bf16.mxu1 %v3662_v3  ;;  %v313_v59 = vrot.slane %v312_v53, 4  ;;  %v315_v3 = vshll.u32 %v281_v62, 16  ;;  %v3766_v53 = vld [vmem:[%s5170_s1 + $0x270] ss:$8 sps:$4 sm:$0xff]   ;;  %v3780_v62 = vld [vmem:[%s5170_s1 + $0x294] ss:$8 sps:$4 sm:$0xff]  }
  0x5e   : > { %2718 = vmatprep.subr.bf16.mxu0 %v3665_v7  ;;  %v3722_v7 = vld [vmem:[%s5170_s1 + $0x200] ss:$8 sps:$4 sm:$0xff]   ;;  %v3807_v20 = vld [vmem:[%s5170_s1 + $0x6d4] ss:$8 sps:$4 sm:$0xff]  }
  0x60   : > { %2515 = vmatpush1.bf16.msra.mxu1 %v3660_v13  ;;  %v317_v13 = vrot.slane %v315_v3, 5  ;;  %v3778_v3 = vld [vmem:[%s5170_s1 + $0x290] ss:$8 sps:$4 sm:$0xff]  }
  0x61   : > { %2719 = vmatpush1.bf16.msra.mxu0 %v3663_v14  ;;  %2516 = vmatprep.subr.bf16.mxu1 %v3668_v15  ;;  %v341_v14 = vrot.slane %v4200_v54, 5  ;;  %v3733_v15 = vld [vmem:[%s5170_s1 + $0x610] ss:$8 sps:$4 sm:$0xff]   ;;  %v3818_v54 = vld [vmem:[%s5170_s1 + $0x2f4] ss:$8 sps:$4 sm:$0xff]  }
  0x62   : > { %2720 = vmatprep.subr.bf16.mxu0 %v3671_v2  ;;  %v318_v16 = vsel %vm4369_vm5, %v313_v59, %v317_v13  ;;  %v3099_v2 = vcombine.high %v4357_v0, %v4357_v0  ;;  %v3783_v59 = vld [vmem:[%s5170_s1 + $0x694] ss:$8 sps:$4 sm:$0xff]  }
  0x63   : > { %v3795_v13 = vld [vmem:[%s5170_s1 + $0x6b4] ss:$8 sps:$4 sm:$0xff]  }
  0x64   : > { %2517 = vmatpush1.bf16.msra.mxu1 %v3666_v18  ;;  %v3091_v18 = vcombine.high %v318_v16, %v318_v16 }
  0x65   : > { %2721 = vmatpush1.bf16.msra.mxu0 %v3669_v21  ;;  %2518 = vmatprep.subr.bf16.mxu1 %v3674_v22  ;;  %v445_v21 = vrot.slane %v4357_v0, 6  ;;  %v3738_v22 = vld [vmem:[%s5170_s1 + $0x224] ss:$8 sps:$4 sm:$0xff]  }
  0x66   : > { %2722 = vmatprep.subr.bf16.mxu0 %v3677_v1  ;;  %v429_v1 = vld [vmem:[%s4173_s17 + $0x8] sm:$0xcc] }
  0x68   : > { %2519 = vmatpush1.bf16.msra.mxu1 %v3672_v24 }
  0x69   : > { %2723 = vmatpush1.bf16.msra.mxu0 %v3675_v25  ;;  %2520 = vmatprep.subr.bf16.mxu1 %v3680_v26  ;;  %v3068_v25 = vrot.slane %v429_v1, 10  ;;  %v456_v1 = vld [vmem:[%s4173_s17 + $0x8] sm:$0xcc] }
  0x6a   : > { %2724 = vmatprep.subr.bf16.mxu0 %v3683_v27 }
  0x6c   : > { %2521 = vmatpush1.bf16.msra.mxu1 %v3678_v28  ;;  %v3736_v28 = vld [vmem:[%s5170_s1 + $0x220] ss:$8 sps:$4 sm:$0xff]  }
  0x6d   : > { %2725 = vmatpush1.bf16.msra.mxu0 %v3681_v29  ;;  %2522 = vmatprep.subr.bf16.mxu1 %v3686_v30  ;;  %v3739_v29 = vld [vmem:[%s5170_s1 + $0x620] ss:$8 sps:$4 sm:$0xff]   ;;  %v3090_v30 = vcombine.low %v318_v16, %v318_v16  ;;  %v3801_v16 = vld [vmem:[%s5170_s1 + $0x6c4] ss:$8 sps:$4 sm:$0xff]  }
  0x6e   : > { %2726 = vmatprep.subr.bf16.mxu0 %v3689_v31  ;;  %v3098_v31 = vcombine.low %v4357_v0, %v4357_v0  ;;  %v3821_v0 = vld [vmem:[%s5170_s1 + $0x6f4] ss:$8 sps:$4 sm:$0xff]  }
  0x70   : > { %2523 = vmatpush1.bf16.msra.mxu1 %v3684_v32  ;;  %v4591_v32 = vsel %vm4573_vm11, %v3068_v25, %v442_v4  ;;  %v3781_v4 = vld [vmem:[%s5170_s1 + $0x690] ss:$8 sps:$4 sm:$0xff]  }
  0x71   : > { %2727 = vmatpush1.bf16.msra.mxu0 %v3687_v33  ;;  %2524 = vmatprep.subr.bf16.mxu1 %v3692_v34  ;;  %v4597_v33 = vsel %vm4573_vm11, %v444_v6, %v445_v21  ;;  %v3744_v34 = vld [vmem:[%s5170_s1 + $0x234] ss:$8 sps:$4 sm:$0xff]   ;;  %v3802_v6 = vld [vmem:[%s5170_s1 + $0x2d0] ss:$8 sps:$4 sm:$0xff]  }
  0x72   : > { %2728 = vmatprep.subr.bf16.mxu0 %v3695_v35  ;;  %v3747_v35 = vld [vmem:[%s5170_s1 + $0x634] ss:$8 sps:$4 sm:$0xff]  }
  0x73   : > { %v354_v25 = vld [vmem:[%s4173_s17 + $0x10] sm:$0xff] }
  0x74   : > { %2525 = vmatpush1.bf16.msra.mxu1 %v3690_v36  ;;  %v3083_v36 = vcombine.high %v4591_v32, %v4597_v33 }
  0x75   : > { %2729 = vmatpush1.bf16.msra.mxu0 %v3693_v37  ;;  %2526 = vmatprep.subr.bf16.mxu1 %v3698_v38  ;;  %v3742_v37 = vld [vmem:[%s5170_s1 + $0x230] ss:$8 sps:$4 sm:$0xff]  }
  0x76   : > { %2730 = vmatprep.subr.bf16.mxu0 %v3701_v39  ;;  %v3745_v38 = vld [vmem:[%s5170_s1 + $0x630] ss:$8 sps:$4 sm:$0xff]   ;;  %v3750_v39 = vld [vmem:[%s5170_s1 + $0x244] ss:$8 sps:$4 sm:$0xff]  }
  0x78   : > { %2527 = vmatpush1.bf16.msra.mxu1 %v3696_v40  ;;  %v3753_v40 = vld [vmem:[%s5170_s1 + $0x644] ss:$8 sps:$4 sm:$0xff]  }
  0x79   : > { %2731 = vmatpush1.bf16.msra.mxu0 %v3699_v41  ;;  %2528 = vmatprep.subr.bf16.mxu1 %v3704_v42  ;;  %v3748_v41 = vld [vmem:[%s5170_s1 + $0x240] ss:$8 sps:$4 sm:$0xff]  }
  0x7a   : > { %2732 = vmatprep.subr.bf16.mxu0 %v3707_v43  ;;  %v3751_v42 = vld [vmem:[%s5170_s1 + $0x640] ss:$8 sps:$4 sm:$0xff]   ;;  %v3756_v43 = vld [vmem:[%s5170_s1 + $0x254] ss:$8 sps:$4 sm:$0xff]  }
  0x7c   : > { %2529 = vmatpush1.bf16.msra.mxu1 %v3702_v44  ;;  %v3759_v44 = vld [vmem:[%s5170_s1 + $0x654] ss:$8 sps:$4 sm:$0xff]  }
  0x7d   : > { %2733 = vmatpush1.bf16.msra.mxu0 %v3705_v45  ;;  %2530 = vmatprep.subr.bf16.mxu1 %v3711_v46  ;;  %v3754_v45 = vld [vmem:[%s5170_s1 + $0x250] ss:$8 sps:$4 sm:$0xff]  }
  0x7e   : > { %2734 = vmatprep.subr.bf16.mxu0 %v3714_v47  ;;  %v3757_v46 = vld [vmem:[%s5170_s1 + $0x650] ss:$8 sps:$4 sm:$0xff]   ;;  %v3762_v47 = vld [vmem:[%s5170_s1 + $0x264] ss:$8 sps:$4 sm:$0xff]  }
  0x80   : > { %2531 = vmatpush1.bf16.msra.mxu1 %v3709_v50  ;;  %v3760_v50 = vld [vmem:[%s5170_s1 + $0x260] ss:$8 sps:$4 sm:$0xff]  }
  0x81   : > { %2735 = vmatpush1.bf16.msra.mxu0 %v3712_v51  ;;  %2532 = vmatprep.subr.bf16.mxu1 %v3718_v52  ;;  %v3763_v51 = vld [vmem:[%s5170_s1 + $0x660] ss:$8 sps:$4 sm:$0xff]   ;;  %v3768_v52 = vld [vmem:[%s5170_s1 + $0x274] ss:$8 sps:$4 sm:$0xff]  }
  0x82   : > { %2736 = vmatprep.subr.bf16.mxu0 %v3721_v58  ;;  %v3771_v58 = vld [vmem:[%s5170_s1 + $0x674] ss:$8 sps:$4 sm:$0xff]  }
  0x84   : > { %2533 = vmatpush1.bf16.msra.mxu1 %v3716_v55  ;;  %v3769_v55 = vld [vmem:[%s5170_s1 + $0x670] ss:$8 sps:$4 sm:$0xff]  }
  0x85   : > { %2737 = vmatpush1.bf16.msra.mxu0 %v3719_v57  ;;  %2553 = vmatprep.subr.bf16.mxu1 %v3724_v61  ;;  %v3774_v57 = vld [vmem:[%s5170_s1 + $0x284] ss:$8 sps:$4 sm:$0xff]   ;;  %v3772_v61 = vld [vmem:[%s5170_s1 + $0x280] ss:$8 sps:$4 sm:$0xff]  }
  0x86   : > { %2757 = vmatprep.subr.bf16.mxu0 %v3729_v56  ;;  %v3775_v56 = vld [vmem:[%s5170_s1 + $0x680] ss:$8 sps:$4 sm:$0xff]  }
  0x87   : > { %2535 = vmatmul.mubr.bf16.vlgmr.msra.gmra.mrb[0].mxu1 %v3072_v5  ;;  %v3786_v5 = vld [vmem:[%s5170_s1 + $0x2a4] ss:$8 sps:$4 sm:$0xff]  }
  0x88   : > { %2739 = vmatmul.mubr.bf16.vlgmr.msra.gmra.mrb[0].mxu0 %v3080_v63  ;;  %2554 = vmatpush1.bf16.msra.mxu1 %v3722_v7  ;;  %v4564_v63 = vsel %vm4549_vm10, %v340_v11, %v341_v14  ;;  %v3789_v7 = vld [vmem:[%s5170_s1 + $0x6a4] ss:$8 sps:$4 sm:$0xff]   ;;  %v3787_v11 = vld [vmem:[%s5170_s1 + $0x6a0] ss:$8 sps:$4 sm:$0xff]  }
  0x89   : > { %2758 = vmatpush1.bf16.msra.mxu0 %v3727_v10  ;;  %2555 = vmatprep.subr.bf16.mxu1 %v3732_v12  ;;  %v3074_v26 = vcombine.low %v4569_v23, %v4564_v63  ;;  %v3075_v27 = vcombine.high %v4569_v23, %v4564_v63  ;;  %v3784_v10 = vld [vmem:[%s5170_s1 + $0x2a0] ss:$8 sps:$4 sm:$0xff]   ;;  %v3792_v12 = vld [vmem:[%s5170_s1 + $0x2b4] ss:$8 sps:$4 sm:$0xff]   ;;  %v3839_v23 = vld [vmem:[%s5170_s1 + $0x724] ss:$8 sps:$4 sm:$0xff]  }
  0x8a   : > { %2759 = vmatprep.subr.bf16.mxu0 %v3735_v8  ;;  %2544 = vmatprep.mubr.bf16.mxu1 %v3091_v18  ;;  %v3790_v8 = vld [vmem:[%s5170_s1 + $0x2b0] ss:$8 sps:$4 sm:$0xff]   ;;  %v3804_v18 = vld [vmem:[%s5170_s1 + $0x2d4] ss:$8 sps:$4 sm:$0xff]  }
  0x8b   : > { %2748 = vmatprep.mubr.bf16.mxu0 %v3099_v2  ;;  %v3796_v2 = vld [vmem:[%s5170_s1 + $0x2c0] ss:$8 sps:$4 sm:$0xff]  }
  0x8c   : > { %2556 = vmatpush1.bf16.msra.mxu1 %v3730_v9  ;;  %v3793_v9 = vld [vmem:[%s5170_s1 + $0x6b0] ss:$8 sps:$4 sm:$0xff]  }
  0x8d   : > { %2760 = vmatpush1.bf16.msra.mxu0 %v3733_v15  ;;  %2557 = vmatprep.subr.bf16.mxu1 %v3738_v22  ;;  %v3798_v15 = vld [vmem:[%s5170_s1 + $0x2c4] ss:$8 sps:$4 sm:$0xff]   ;;  %v3805_v22 = vld [vmem:[%s5170_s1 + $0x6d0] ss:$8 sps:$4 sm:$0xff]  }
  0x8e   : > { %2761 = vmatprep.subr.bf16.mxu0 %v3741_v49  ;;  %v3810_v49 = vld [vmem:[%s5170_s1 + $0x2e4] ss:$8 sps:$4 sm:$0xff]  }
  0x8f   : > { %2545 = vmatmul.mubr.bf16.gmra.mrb[4].mxu1 %v3090_v30  ;;  %v343_v30 = vrot.slane %v341_v14, 4 }
  0x90   : > { %2749 = vmatmul.mubr.bf16.gmra.mrb[4].mxu0 %v3098_v31  ;;  %2558 = vmatpush1.bf16.msra.mxu1 %v3736_v28  ;;  %v328_v28 = vld [vmem:[%s4173_s17 + $0x18] sm:$0x11]  ;;  %v432_v31 = vld [vmem:[%s4173_s17 + $0x20] sm:$0x33] }
  0x91   : > { %2762 = vmatpush1.bf16.msra.mxu0 %v3739_v29  ;;  %2559 = vmatprep.subr.bf16.mxu1 %v3744_v34  ;;  %v3808_v29 = vld [vmem:[%s5170_s1 + $0x2e0] ss:$8 sps:$4 sm:$0xff]   ;;  %v464_v34 = vshrl.u32 %v456_v1, 16  ;;  %v344_v14 = vrot.slane %v328_v28, 5  ;;  %v3842_v28 = vld [vmem:[%s5170_s1 + $0x334] ss:$8 sps:$4 sm:$0xff]  }
  0x92   : > { %2763 = vmatprep.subr.bf16.mxu0 %v3747_v35  ;;  %2585 = vmatprep.mubr.bf16.mxu1 %v3075_v27  ;;  %v3814_v27 = vld [vmem:[%s5170_s1 + $0x6e4] ss:$8 sps:$4 sm:$0xff]   ;;  %v447_v35 = vrot.slane %v445_v21, 4  ;;  %v3816_v21 = vld [vmem:[%s5170_s1 + $0x2f0] ss:$8 sps:$4 sm:$0xff]  }
  0x93   : > { %2789 = vmatprep.mubr.bf16.mxu0 %v3083_v36  ;;  %v4751_v36 = vld [vmem:[%s4173_s17 + $0x18] sm:$0xff] }
  0x94   : > { %2560 = vmatpush1.bf16.msra.mxu1 %v3742_v37  ;;  %v467_v37 = vshll.u32 %v456_v1, 16 }
  0x95   : > { %2764 = vmatpush1.bf16.msra.mxu0 %v3745_v38  ;;  %2561 = vmatprep.subr.bf16.mxu1 %v3750_v39  ;;  %v473_v38 = vshrl.u32 %v354_v25, 16  ;;  %v476_v39 = vshll.u32 %v354_v25, 16 }
  0x96   : > { %2765 = vmatprep.subr.bf16.mxu0 %v3753_v40  ;;  %v3812_v40 = vld [vmem:[%s5170_s1 + $0x6e0] ss:$8 sps:$4 sm:$0xff]  }
  0x98   : > { %2562 = vmatpush1.bf16.msra.mxu1 %v3748_v41  ;;  %v448_v41 = vrot.slane %v432_v31, 6  ;;  %v507_v31 = vld [vmem:[%s4173_s17 + $0x8] sm:$0x88] }
  0x99   : > { %2766 = vmatpush1.bf16.msra.mxu0 %v3751_v42  ;;  %2563 = vmatprep.subr.bf16.mxu1 %v3756_v43  ;;  %v4765_v42 = vrot.slane %v354_v25, 7  ;;  %v466_v43 = vrot.slane %v464_v34, 6  ;;  %v510_v34 = vld [vmem:[%s4173_s17 + $0x20] sm:$0x77] }
  0x9a   : > { %2767 = vmatprep.subr.bf16.mxu0 %v3759_v44  ;;  %v483_v44 = vshrl.u32 %v4751_v36, 16 }
  0x9c   : > { %2564 = vmatpush1.bf16.msra.mxu1 %v3754_v45  ;;  %v353_v45 = vld [vmem:[%s4173_s17 + $0x8] sm:$0xff] }
  0x9d   : > { %2768 = vmatpush1.bf16.msra.mxu0 %v3757_v46  ;;  %2565 = vmatprep.subr.bf16.mxu1 %v3762_v47  ;;  %v469_v46 = vrot.slane %v467_v37, 7  ;;  %v475_v47 = vrot.slane %v473_v38, 6  ;;  %v3069_v37 = vrot.slane %v507_v31, 11  ;;  %v523_v38 = vrot.slane %v510_v34, 7  ;;  %v3903_v31 = vld [vmem:[%s5170_s1 + $0x7d0] ss:$8 sps:$4 sm:$0xff]  }
  0x9e   : > { %2769 = vmatprep.subr.bf16.mxu0 %v3765_v48  ;;  %v478_v48 = vrot.slane %v476_v39, 7  ;;  %v3840_v39 = vld [vmem:[%s5170_s1 + $0x330] ss:$8 sps:$4 sm:$0xff]   ;;  %v3908_v34 = vld [vmem:[%s5170_s1 + $0x3e4] ss:$8 sps:$4 sm:$0xff]  }
  0xa0   : > { %2566 = vmatpush1.bf16.msra.mxu1 %v3760_v50  ;;  %v486_v50 = vshll.u32 %v4751_v36, 16 }
  0xa1   : > { %2770 = vmatpush1.bf16.msra.mxu0 %v3763_v51  ;;  %2567 = vmatprep.subr.bf16.mxu1 %v3768_v52  ;;  %v3819_v51 = vld [vmem:[%s5170_s1 + $0x6f0] ss:$8 sps:$4 sm:$0xff]   ;;  %v3824_v52 = vld [vmem:[%s5170_s1 + $0x304] ss:$8 sps:$4 sm:$0xff]  }
  0xa2   : > { %2771 = vmatprep.subr.bf16.mxu0 %v3771_v58  ;;  %v3082_v58 = vcombine.low %v4591_v32, %v4597_v33  ;;  %v365_v32 = vrot.slane %v353_v45, 7  ;;  %v485_v33 = vrot.slane %v483_v44, 6  ;;  %v488_v19 = vrot.slane %v486_v50, 7  ;;  %v3846_v44 = vld [vmem:[%s5170_s1 + $0x340] ss:$8 sps:$4 sm:$0xff]  }
  0xa3   : > { %v3849_v45 = vld [vmem:[%s5170_s1 + $0x740] ss:$8 sps:$4 sm:$0xff]   ;;  %v3855_v50 = vld [vmem:[%s5170_s1 + $0x750] ss:$8 sps:$4 sm:$0xff]  }
  0xa4   : > { %2568 = vmatpush1.bf16.msra.mxu1 %v3766_v53  ;;  %v3827_v53 = vld [vmem:[%s5170_s1 + $0x704] ss:$8 sps:$4 sm:$0xff]  }
  0xa5   : > { %2772 = vmatpush1.bf16.msra.mxu0 %v3769_v55  ;;  %2569 = vmatprep.subr.bf16.mxu1 %v3774_v57  ;;  %v370_v55 = vrot.slane %v4765_v42, 4  ;;  %v520_v57 = vrot.slane %v4751_v36, 7 }
  0xa6   : > { %2773 = vmatprep.subr.bf16.mxu0 %v3777_v60  ;;  %v345_v60 = vsel %vm4549_vm10, %v343_v30, %v344_v14  ;;  %v3845_v30 = vld [vmem:[%s5170_s1 + $0x734] ss:$8 sps:$4 sm:$0xff]   ;;  %v3848_v14 = vld [vmem:[%s5170_s1 + $0x344] ss:$8 sps:$4 sm:$0xff]  }
  0xa7   : > { %v4801_v24 = vsel %vm4789_vm15, %v370_v55, %v520_v57 }
  0xa8   : > { %2570 = vmatpush1.bf16.msra.mxu1 %v3772_v61  ;;  %v449_v61 = vsel %vm4573_vm11, %v447_v35, %v448_v41 }
  0xa9   : > { %2774 = vmatpush1.bf16.msra.mxu0 %v3775_v56  ;;  %2571 = vmatprep.subr.bf16.mxu1 %v3780_v62  ;;  %v3822_v62 = vld [vmem:[%s5170_s1 + $0x300] ss:$8 sps:$4 sm:$0xff]   ;;  %v3926_v56 = vld [vmem:[%s5170_s1 + $0x824] ss:$8 sps:$4 sm:$0xff]  }
  0xaa   : > { %2775 = vmatprep.subr.bf16.mxu0 %v3783_v59  ;;  %v352_v59 = vld [vmem:[%s4173_s17] sm:$0x88] }
  0xac   : > { %2572 = vmatpush1.bf16.msra.mxu1 %v3778_v3  ;;  %v470_v3 = vor.u32 %v469_v46, %v466_v43  ;;  %v3854_v46 = vld [vmem:[%s5170_s1 + $0x354] ss:$8 sps:$4 sm:$0xff]  }
  0xad   : > { %2776 = vmatpush1.bf16.msra.mxu0 %v3781_v4  ;;  %2573 = vmatprep.subr.bf16.mxu1 %v3786_v5  ;;  %v479_v4 = vor.u32 %v478_v48, %v475_v47  ;;  %v3825_v5 = vld [vmem:[%s5170_s1 + $0x700] ss:$8 sps:$4 sm:$0xff]   ;;  %v3857_v47 = vld [vmem:[%s5170_s1 + $0x754] ss:$8 sps:$4 sm:$0xff]   ;;  %v3852_v48 = vld [vmem:[%s5170_s1 + $0x350] ss:$8 sps:$4 sm:$0xff]  }
  0xae   : > { %2777 = vmatprep.subr.bf16.mxu0 %v3789_v7  ;;  %v3830_v7 = vld [vmem:[%s5170_s1 + $0x314] ss:$8 sps:$4 sm:$0xff]  }
  0xb0   : > { %2574 = vmatpush1.bf16.msra.mxu1 %v3784_v10  ;;  %v3833_v10 = vld [vmem:[%s5170_s1 + $0x714] ss:$8 sps:$4 sm:$0xff]  }
  0xb1   : > { %2778 = vmatpush1.bf16.msra.mxu0 %v3787_v11  ;;  %2575 = vmatprep.subr.bf16.mxu1 %v3792_v12  ;;  %v3828_v11 = vld [vmem:[%s5170_s1 + $0x310] ss:$8 sps:$4 sm:$0xff]   ;;  %v3093_v12 = vcombine.high %v345_v60, %v345_v60 }
  0xb2   : > { %2779 = vmatprep.subr.bf16.mxu0 %v3795_v13  ;;  %v3101_v13 = vcombine.high %v449_v61, %v449_v61 }
  0xb4   : > { %2576 = vmatpush1.bf16.msra.mxu1 %v3790_v8  ;;  %v3066_v8 = vrot.slane %v352_v59, 11  ;;  %v3870_v59 = vld [vmem:[%s5170_s1 + $0x380] ss:$8 sps:$4 sm:$0xff]  }
  0xb5   : > { %2780 = vmatpush1.bf16.msra.mxu0 %v3793_v9  ;;  %2577 = vmatprep.subr.bf16.mxu1 %v3798_v15  ;;  %v3831_v9 = vld [vmem:[%s5170_s1 + $0x710] ss:$8 sps:$4 sm:$0xff]   ;;  %v367_v15 = vrot.slane %v365_v32, 4 }
  0xb6   : > { %2781 = vmatprep.subr.bf16.mxu0 %v3801_v16  ;;  %v471_v16 = vrot.slane %v470_v3, 4  ;;  %v3873_v3 = vld [vmem:[%s5170_s1 + $0x780] ss:$8 sps:$4 sm:$0xff]  }
  0xb8   : > { %2578 = vmatpush1.bf16.msra.mxu1 %v3796_v2  ;;  %v481_v2 = vrot.slane %v479_v4, 4  ;;  %v4849_v1 = vsel %vm4828_vm1, %v471_v16, %v479_v4  ;;  %v3878_v4 = vld [vmem:[%s5170_s1 + $0x394] ss:$8 sps:$4 sm:$0xff]   ;;  %v3891_v16 = vld [vmem:[%s5170_s1 + $0x7b0] ss:$8 sps:$4 sm:$0xff]  }
  0xb9   : > { %2782 = vmatpush1.bf16.msra.mxu0 %v3799_v17  ;;  %2579 = vmatprep.subr.bf16.mxu1 %v3804_v18  ;;  %v4821_v17 = vor.u32 %v488_v19, %v485_v33  ;;  %v3836_v18 = vld [vmem:[%s5170_s1 + $0x324] ss:$8 sps:$4 sm:$0xff]   ;;  %v3881_v19 = vld [vmem:[%s5170_s1 + $0x794] ss:$8 sps:$4 sm:$0xff]  }
  0xba   : > { %2783 = vmatprep.subr.bf16.mxu0 %v3807_v20  ;;  %v3100_v20 = vcombine.low %v449_v61, %v449_v61  ;;  %v3864_v61 = vld [vmem:[%s5170_s1 + $0x370] ss:$8 sps:$4 sm:$0xff]   ;;  %v3872_v33 = vld [vmem:[%s5170_s1 + $0x384] ss:$8 sps:$4 sm:$0xff]  }
  0xbb   : > { %v4854_v25 = vsel %vm4828_vm1, %v481_v2, %v4821_v17  ;;  %v3896_v2 = vld [vmem:[%s5170_s1 + $0x3c4] ss:$8 sps:$4 sm:$0xff]  }
  0xbc   : > { %2580 = vmatpush1.bf16.msra.mxu1 %v3802_v6  ;;  %v3834_v6 = vld [vmem:[%s5170_s1 + $0x320] ss:$8 sps:$4 sm:$0xff]   ;;  %v3085_v36 = vcombine.high %v4849_v1, %v4854_v25 }
  0xbd   : > { %2784 = vmatpush1.bf16.msra.mxu0 %v3805_v22  ;;  %2581 = vmatprep.subr.bf16.mxu1 %v3810_v49  ;;  %v4840_v22 = vsel %vm4789_vm15, %v3066_v8, %v365_v32  ;;  %v4845_v49 = vsel %vm4789_vm15, %v367_v15, %v4765_v42  ;;  %v3867_v32 = vld [vmem:[%s5170_s1 + $0x770] ss:$8 sps:$4 sm:$0xff]   ;;  %v3890_v8 = vld [vmem:[%s5170_s1 + $0x3b4] ss:$8 sps:$4 sm:$0xff]  }
  0xbe   : > { %2785 = vmatprep.subr.bf16.mxu0 %v3814_v27  ;;  %v3837_v27 = vld [vmem:[%s5170_s1 + $0x720] ss:$8 sps:$4 sm:$0xff]   ;;  %v3077_v35 = vcombine.high %v4840_v22, %v4845_v49  ;;  %v3888_v15 = vld [vmem:[%s5170_s1 + $0x3b0] ss:$8 sps:$4 sm:$0xff]  }
  0xc0   : > { %2582 = vmatpush1.bf16.msra.mxu1 %v3808_v29  ;;  %v522_v29 = vrot.slane %v520_v57, 4  ;;  %v3866_v57 = vld [vmem:[%s5170_s1 + $0x374] ss:$8 sps:$4 sm:$0xff]  }
  0xc1   : > { %2786 = vmatpush1.bf16.msra.mxu0 %v3812_v40  ;;  %2583 = vmatprep.subr.bf16.mxu1 %v3818_v54  ;;  %v3843_v40 = vld [vmem:[%s5170_s1 + $0x730] ss:$8 sps:$4 sm:$0xff]   ;;  %v4880_v54 = vsel %vm4789_vm15, %v3069_v37, %v4765_v42 }
  0xc2   : > { %2787 = vmatprep.subr.bf16.mxu0 %v3821_v0  ;;  %v4884_v0 = vsel %vm4789_vm15, %v522_v29, %v523_v38  ;;  %v3086_v41 = vcombine.low %v4880_v54, %v4801_v24  ;;  %v3087_v43 = vcombine.high %v4880_v54, %v4801_v24  ;;  %v3906_v38 = vld [vmem:[%s5170_s1 + $0x3e0] ss:$8 sps:$4 sm:$0xff]  }
  0xc4   : > { %2584 = vmatpush1.bf16.msra.mxu1 %v3816_v21  ;;  %v3851_v21 = vld [vmem:[%s5170_s1 + $0x744] ss:$8 sps:$4 sm:$0xff]  }
  0xc5   : > { %2788 = vmatpush1.bf16.msra.mxu0 %v3819_v51  ;;  %2604 = vmatprep.subr.bf16.mxu1 %v3824_v52  ;;  %v3860_v51 = vld [vmem:[%s5170_s1 + $0x364] ss:$8 sps:$4 sm:$0xff]  }
  0xc6   : > { %2808 = vmatprep.subr.bf16.mxu0 %v3827_v53  ;;  %v3863_v52 = vld [vmem:[%s5170_s1 + $0x764] ss:$8 sps:$4 sm:$0xff]   ;;  %v3861_v53 = vld [vmem:[%s5170_s1 + $0x760] ss:$8 sps:$4 sm:$0xff]  }
  0xc7   : > { %2586 = vmatmul.mubr.bf16.vlgmr.msra.gmra.mrb[0].mxu1 %v3074_v26  ;;  %v3092_v26 = vcombine.low %v345_v60, %v345_v60  ;;  %v3869_v60 = vld [vmem:[%s5170_s1 + $0x774] ss:$8 sps:$4 sm:$0xff]  }
  0xc8   : > { %2790 = vmatmul.mubr.bf16.vlgmr.msra.gmra.mrb[0].mxu0 %v3082_v58  ;;  %2605 = vmatpush1.bf16.msra.mxu1 %v3822_v62  ;;  %v3858_v58 = vld [vmem:[%s5170_s1 + $0x360] ss:$8 sps:$4 sm:$0xff]   ;;  %v3875_v62 = vld [vmem:[%s5170_s1 + $0x784] ss:$8 sps:$4 sm:$0xff]  }
  0xc9   : > { %2809 = vmatpush1.bf16.msra.mxu0 %v3825_v5  ;;  %2606 = vmatprep.subr.bf16.mxu1 %v3830_v7  ;;  %v3876_v5 = vld [vmem:[%s5170_s1 + $0x390] ss:$8 sps:$4 sm:$0xff]  }
  0xca   : > { %2810 = vmatprep.subr.bf16.mxu0 %v3833_v10  ;;  %2595 = vmatprep.mubr.bf16.mxu1 %v3093_v12  ;;  %v3879_v7 = vld [vmem:[%s5170_s1 + $0x790] ss:$8 sps:$4 sm:$0xff]   ;;  %v3884_v10 = vld [vmem:[%s5170_s1 + $0x3a4] ss:$8 sps:$4 sm:$0xff]   ;;  %v3882_v12 = vld [vmem:[%s5170_s1 + $0x3a0] ss:$8 sps:$4 sm:$0xff]  }
  0xcb   : > { %2799 = vmatprep.mubr.bf16.mxu0 %v3101_v13  ;;  %v3885_v13 = vld [vmem:[%s5170_s1 + $0x7a0] ss:$8 sps:$4 sm:$0xff]  }
  0xcc   : > { %2607 = vmatpush1.bf16.msra.mxu1 %v3828_v11  ;;  %v3887_v11 = vld [vmem:[%s5170_s1 + $0x7a4] ss:$8 sps:$4 sm:$0xff]  }
  0xcd   : > { %2811 = vmatpush1.bf16.msra.mxu0 %v3831_v9  ;;  %2608 = vmatprep.subr.bf16.mxu1 %v3836_v18  ;;  %v3893_v9 = vld [vmem:[%s5170_s1 + $0x7b4] ss:$8 sps:$4 sm:$0xff]   ;;  %v3899_v18 = vld [vmem:[%s5170_s1 + $0x7c4] ss:$8 sps:$4 sm:$0xff]  }
  0xce   : > { %2812 = vmatprep.subr.bf16.mxu0 %v3839_v23  ;;  %v3894_v23 = vld [vmem:[%s5170_s1 + $0x3c0] ss:$8 sps:$4 sm:$0xff]  }
  0xcf   : > { %2596 = vmatmul.mubr.bf16.gmra.mrb[4].mxu1 %v3092_v26  ;;  %v3897_v26 = vld [vmem:[%s5170_s1 + $0x7c0] ss:$8 sps:$4 sm:$0xff]  }
  0xd0   : > { %2800 = vmatmul.mubr.bf16.gmra.mrb[4].mxu0 %v3100_v20  ;;  %2609 = vmatpush1.bf16.msra.mxu1 %v3834_v6  ;;  %v459_v20 = vld [vmem:[%s4173_s17 + $0x20] sm:$0x77]  ;;  %v3902_v6 = vld [vmem:[%s5170_s1 + $0x3d4] ss:$8 sps:$4 sm:$0xff]  }
  0xd1   : > { %2813 = vmatpush1.bf16.msra.mxu0 %v3837_v27  ;;  %2610 = vmatprep.subr.bf16.mxu1 %v3842_v28  ;;  %v3905_v27 = vld [vmem:[%s5170_s1 + $0x7d4] ss:$8 sps:$4 sm:$0xff]   ;;  %v493_v28 = vshrl.u32 %v459_v20, 16  ;;  %v496_v29 = vshll.u32 %v459_v20, 16 }
  0xd2   : > { %2814 = vmatprep.subr.bf16.mxu0 %v3845_v30  ;;  %2636 = vmatprep.mubr.bf16.mxu1 %v3077_v35  ;;  %v3900_v30 = vld [vmem:[%s5170_s1 + $0x3d0] ss:$8 sps:$4 sm:$0xff]   ;;  %v3911_v35 = vld [vmem:[%s5170_s1 + $0x7e4] ss:$8 sps:$4 sm:$0xff]   ;;  %v3965_v20 = vld [vmem:[%s5170_s1 + $0x8f4] ss:$8 sps:$4 sm:$0xff]  }
  0xd3   : > { %2840 = vmatprep.mubr.bf16.mxu0 %v3085_v36  ;;  %v495_v36 = vrot.slane %v493_v28, 6  ;;  %v498_v37 = vrot.slane %v496_v29, 7  ;;  %v848_v28 = vlaneseq }
  0xd4   : > { %2611 = vmatpush1.bf16.msra.mxu1 %v3840_v39  ;;  %v3909_v39 = vld [vmem:[%s5170_s1 + $0x7e0] ss:$8 sps:$4 sm:$0xff]  }
  0xd5   : > { %2815 = vmatpush1.bf16.msra.mxu0 %v3843_v40  ;;  %2612 = vmatprep.subr.bf16.mxu1 %v3848_v14  ;;  %v355_v40 = vld [vmem:[%s4173_s17 + $0x18] sm:$0x77]  ;;  %v849_v29 = vshrl.u32 %v848_v28, 7 }
  0xd6   : > { %2816 = vmatprep.subr.bf16.mxu0 %v3851_v21  ;;  %v3914_v14 = vld [vmem:[%s5170_s1 + $0x3f4] ss:$8 sps:$4 sm:$0xff]  }
  0xd7   : > { %v3917_v21 = vld [vmem:[%s5170_s1 + $0x7f4] ss:$8 sps:$4 sm:$0xff]  }
  0xd8   : > { %2613 = vmatpush1.bf16.msra.mxu1 %v3846_v44  ;;  %v371_v44 = vrot.slane %v355_v40, 7 }
  0xd9   : > { %2817 = vmatpush1.bf16.msra.mxu0 %v3849_v45  ;;  %2614 = vmatprep.subr.bf16.mxu1 %v3854_v46  ;;  %v491_v45 = vrot.slane %v4821_v17, 4  ;;  %v499_v46 = vor.u32 %v498_v37, %v495_v36  ;;  %v3076_v17 = vcombine.low %v4840_v22, %v4845_v49  ;;  %v3923_v22 = vld [vmem:[%s5170_s1 + $0x814] ss:$8 sps:$4 sm:$0xff]   ;;  %v846_v37 = vld [vmem:[%s5171_s2] sm:$0x3] }
  0xda   : > { %2818 = vmatprep.subr.bf16.mxu0 %v3857_v47  ;;  %v3912_v47 = vld [vmem:[%s5170_s1 + $0x3f0] ss:$8 sps:$4 sm:$0xff]  }
  0xdc   : > { %2615 = vmatpush1.bf16.msra.mxu1 %v3852_v48  ;;  %v3915_v48 = vld [vmem:[%s5170_s1 + $0x7f0] ss:$8 sps:$4 sm:$0xff]  }
  0xdd   : > { %2819 = vmatpush1.bf16.msra.mxu0 %v3855_v50  ;;  %2616 = vmatprep.subr.bf16.mxu1 %v3860_v51  ;;  %v3920_v50 = vld [vmem:[%s5170_s1 + $0x804] ss:$8 sps:$4 sm:$0xff]   ;;  %v3084_v51 = vcombine.low %v4849_v1, %v4854_v25  ;;  %v3924_v25 = vld [vmem:[%s5170_s1 + $0x820] ss:$8 sps:$4 sm:$0xff]  }
  0xde   : > { %2820 = vmatprep.subr.bf16.mxu0 %v3863_v52  ;;  %v372_v52 = vsel %vm4789_vm15, %v370_v55, %v371_v44  ;;  %v3921_v55 = vld [vmem:[%s5170_s1 + $0x810] ss:$8 sps:$4 sm:$0xff]  }
  0xdf   : > { %v3095_v49 = vcombine.high %v372_v52, %v372_v52  ;;  %v3094_v63 = vcombine.low %v372_v52, %v372_v52 }
  0xe0   : > { %2617 = vmatpush1.bf16.msra.mxu1 %v3858_v58  ;;  %v500_v58 = vsel %vm4828_vm1, %v491_v45, %v499_v46 }
  0xe1   : > { %2821 = vmatpush1.bf16.msra.mxu0 %v3861_v53  ;;  %2618 = vmatprep.subr.bf16.mxu1 %v3866_v57  ;;  %v3918_v53 = vld [vmem:[%s5170_s1 + $0x800] ss:$8 sps:$4 sm:$0xff]   ;;  %v3103_v42 = vcombine.high %v500_v58, %v500_v58  ;;  %v3102_v1 = vcombine.low %v500_v58, %v500_v58  ;;  %v3929_v57 = vld [vmem:[%s5170_s1 + $0x834] ss:$8 sps:$4 sm:$0xff]  }
  0xe2   : > { %2822 = vmatprep.subr.bf16.mxu0 %v3869_v60  ;;  %v3105_v60 = vcombine.high %v4884_v0, %v4884_v0 }
  0xe4   : > { %2619 = vmatpush1.bf16.msra.mxu1 %v3864_v61  ;;  %v3927_v61 = vld [vmem:[%s5170_s1 + $0x830] ss:$8 sps:$4 sm:$0xff]  }
  0xe5   : > { %2823 = vmatpush1.bf16.msra.mxu0 %v3867_v32  ;;  %2620 = vmatprep.subr.bf16.mxu1 %v3872_v33  ;;  %v3932_v32 = vld [vmem:[%s5170_s1 + $0x844] ss:$8 sps:$4 sm:$0xff]   ;;  %v3930_v33 = vld [vmem:[%s5170_s1 + $0x840] ss:$8 sps:$4 sm:$0xff]  }
  0xe6   : > { %2824 = vmatprep.subr.bf16.mxu0 %v3875_v62  ;;  %v3935_v62 = vld [vmem:[%s5170_s1 + $0x854] ss:$8 sps:$4 sm:$0xff]  }
  0xe8   : > { %2621 = vmatpush1.bf16.msra.mxu1 %v3870_v59  ;;  %v3933_v59 = vld [vmem:[%s5170_s1 + $0x850] ss:$8 sps:$4 sm:$0xff]  }
  0xe9   : > { %2825 = vmatpush1.bf16.msra.mxu0 %v3873_v3  ;;  %2622 = vmatprep.subr.bf16.mxu1 %v3878_v4  ;;  %v3936_v3 = vld [vmem:[%s5170_s1 + $0x860] ss:$8 sps:$4 sm:$0xff]   ;;  %v3941_v4 = vld [vmem:[%s5170_s1 + $0x874] ss:$8 sps:$4 sm:$0xff]  }
  0xea   : > { %2826 = vmatprep.subr.bf16.mxu0 %v3881_v19  ;;  %v3939_v19 = vld [vmem:[%s5170_s1 + $0x870] ss:$8 sps:$4 sm:$0xff]  }
  0xec   : > { %2623 = vmatpush1.bf16.msra.mxu1 %v3876_v5  ;;  %v3944_v5 = vld [vmem:[%s5170_s1 + $0x884] ss:$8 sps:$4 sm:$0xff]  }
  0xed   : > { %2827 = vmatpush1.bf16.msra.mxu0 %v3879_v7  ;;  %2624 = vmatprep.subr.bf16.mxu1 %v3884_v10  ;;  %v3942_v7 = vld [vmem:[%s5170_s1 + $0x880] ss:$8 sps:$4 sm:$0xff]   ;;  %v3947_v10 = vld [vmem:[%s5170_s1 + $0x894] ss:$8 sps:$4 sm:$0xff]  }
  0xee   : > { %2828 = vmatprep.subr.bf16.mxu0 %v3887_v11  ;;  %v3945_v11 = vld [vmem:[%s5170_s1 + $0x890] ss:$8 sps:$4 sm:$0xff]  }
  0xf0   : > { %2625 = vmatpush1.bf16.msra.mxu1 %v3882_v12  ;;  %v3950_v12 = vld [vmem:[%s5170_s1 + $0x8a4] ss:$8 sps:$4 sm:$0xff]  }
  0xf1   : > { %2829 = vmatpush1.bf16.msra.mxu0 %v3885_v13  ;;  %2626 = vmatprep.subr.bf16.mxu1 %v3890_v8  ;;  %v3948_v13 = vld [vmem:[%s5170_s1 + $0x8a0] ss:$8 sps:$4 sm:$0xff]   ;;  %v3953_v8 = vld [vmem:[%s5170_s1 + $0x8b4] ss:$8 sps:$4 sm:$0xff]  }
  0xf2   : > { %2830 = vmatprep.subr.bf16.mxu0 %v3893_v9  ;;  %v3951_v9 = vld [vmem:[%s5170_s1 + $0x8b0] ss:$8 sps:$4 sm:$0xff]  }
  0xf4   : > { %2627 = vmatpush1.bf16.msra.mxu1 %v3888_v15  ;;  %v3956_v15 = vld [vmem:[%s5170_s1 + $0x8c4] ss:$8 sps:$4 sm:$0xff]  }
  0xf5   : > { %2831 = vmatpush1.bf16.msra.mxu0 %v3891_v16  ;;  %2628 = vmatprep.subr.bf16.mxu1 %v3896_v2  ;;  %v3954_v16 = vld [vmem:[%s5170_s1 + $0x8c0] ss:$8 sps:$4 sm:$0xff]   ;;  %v3959_v2 = vld [vmem:[%s5170_s1 + $0x8d4] ss:$8 sps:$4 sm:$0xff]  }
  0xf6   : > { %2832 = vmatprep.subr.bf16.mxu0 %v3899_v18  ;;  %v3957_v18 = vld [vmem:[%s5170_s1 + $0x8d0] ss:$8 sps:$4 sm:$0xff]  }
  0xf8   : > { %2629 = vmatpush1.bf16.msra.mxu1 %v3894_v23  ;;  %v3962_v23 = vld [vmem:[%s5170_s1 + $0x8e4] ss:$8 sps:$4 sm:$0xff]  }
  0xf9   : > { %2833 = vmatpush1.bf16.msra.mxu0 %v3897_v26  ;;  %2630 = vmatprep.subr.bf16.mxu1 %v3902_v6  ;;  %v3960_v26 = vld [vmem:[%s5170_s1 + $0x8e0] ss:$8 sps:$4 sm:$0xff]   ;;  %v3963_v6 = vld [vmem:[%s5170_s1 + $0x8f0] ss:$8 sps:$4 sm:$0xff]  }
  0xfa   : > { %2834 = vmatprep.subr.bf16.mxu0 %v3905_v27  ;;  %v3104_v27 = vcombine.low %v4884_v0, %v4884_v0 }
  0xfc   : > { %2631 = vmatpush1.bf16.msra.mxu1 %v3900_v30 }
  0xfd   : > { %2835 = vmatpush1.bf16.msra.mxu0 %v3903_v31  ;;  %2632 = vmatprep.subr.bf16.mxu1 %v3908_v34 }
  0xfe   : > { %2836 = vmatprep.subr.bf16.mxu0 %v3911_v35  ;;  %v850_v35 = vsub.s32 0, %v849_v29 }
 0x100   : > { %2633 = vmatpush1.bf16.msra.mxu1 %v3906_v38  ;;  %v854_v38 = vsub.s32 1, %v849_v29  ;;  %v851_v0 = vrot.slane %v846_v37, %v850_v35 }
 0x101   : > { %2837 = vmatpush1.bf16.msra.mxu0 %v3909_v39  ;;  %2634 = vmatprep.subr.bf16.mxu1 %v3914_v14 }
 0x102   : > { %2838 = vmatprep.subr.bf16.mxu0 %v3917_v21  ;;  %v855_v39 = vrot.slane %v846_v37, %v854_v38 }
 0x104   : > { %2635 = vmatpush1.bf16.msra.mxu1 %v3912_v47 }
 0x105   : > { %2839 = vmatpush1.bf16.msra.mxu0 %v3915_v48  ;;  %3402 = vmatprep.subr.bf16.mxu1 %v3920_v50 }
 0x106   : > { %2859 = vmatprep.subr.bf16.mxu0 %v3920_v50 }
 0x107   : > { %2637 = vmatmul.mubr.bf16.vlgmr.msra.gmra.mrb[0].mxu1 %v3076_v17 }
 0x108   : > { %2841 = vmatmul.mubr.bf16.vlgmr.msra.gmra.mrb[0].mxu0 %v3084_v51  ;;  %3418 = vmatpush1.bf16.msra.mxu1 %v3918_v53 }
 0x109   : > { %2860 = vmatpush1.bf16.msra.mxu0 %v3918_v53  ;;  %3403 = vmatprep.subr.bf16.mxu1 %v3923_v22 }
 0x10a   : > { %2861 = vmatprep.subr.bf16.mxu0 %v3923_v22  ;;  %2646 = vmatprep.mubr.bf16.mxu1 %v3095_v49 }
 0x10b   : > { %2850 = vmatprep.mubr.bf16.mxu0 %v3103_v42 }
 0x10c   : > { %3419 = vmatpush1.bf16.msra.mxu1 %v3921_v55 }
 0x10d   : > { %2862 = vmatpush1.bf16.msra.mxu0 %v3921_v55  ;;  %3404 = vmatprep.subr.bf16.mxu1 %v3926_v56 }
 0x10e   : > { %2863 = vmatprep.subr.bf16.mxu0 %v3926_v56 }
 0x10f   : > { %2647 = vmatmul.mubr.bf16.gmra.mrb[4].mxu1 %v3094_v63 }
 0x110   : > { %2851 = vmatmul.mubr.bf16.gmra.mrb[4].mxu0 %v3102_v1  ;;  %3420 = vmatpush1.bf16.msra.mxu1 %v3924_v25 }
 0x111   : > { %2864 = vmatpush1.bf16.msra.mxu0 %v3924_v25  ;;  %3405 = vmatprep.subr.bf16.mxu1 %v3929_v57 }
 0x112   : > { %2865 = vmatprep.subr.bf16.mxu0 %v3929_v57  ;;  %2891 = vmatprep.mubr.bf16.mxu0 %v3087_v43  ;;  %v3938_v43 = vld [vmem:[%s5170_s1 + $0x864] ss:$8 sps:$4 sm:$0xff]  }
 0x113   : > { %2901 = vmatprep.mubr.bf16.mxu1 %v3105_v60 }
 0x114   : > { %3421 = vmatpush1.bf16.msra.mxu1 %v3927_v61 }
 0x115   : > { %2866 = vmatpush1.bf16.msra.mxu0 %v3927_v61  ;;  %3406 = vmatprep.subr.bf16.mxu1 %v3932_v32 }
 0x116   : > { %2867 = vmatprep.subr.bf16.mxu0 %v3932_v32 }
 0x118   : > { %3422 = vmatpush1.bf16.msra.mxu1 %v3930_v33 }
 0x119   : > { %2868 = vmatpush1.bf16.msra.mxu0 %v3930_v33  ;;  %3407 = vmatprep.subr.bf16.mxu1 %v3935_v62 }
 0x11a   : > { %2869 = vmatprep.subr.bf16.mxu0 %v3935_v62 }
 0x11c   : > { %3423 = vmatpush1.bf16.msra.mxu1 %v3933_v59 }
 0x11d   : > { %2870 = vmatpush1.bf16.msra.mxu0 %v3933_v59  ;;  %3408 = vmatprep.subr.bf16.mxu1 %v3938_v43 }
 0x11e   : > { %2871 = vmatprep.subr.bf16.mxu0 %v3938_v43 }
 0x120   : > { %3424 = vmatpush1.bf16.msra.mxu1 %v3936_v3 }
 0x121   : > { %2872 = vmatpush1.bf16.msra.mxu0 %v3936_v3  ;;  %3409 = vmatprep.subr.bf16.mxu1 %v3941_v4 }
 0x122   : > { %2873 = vmatprep.subr.bf16.mxu0 %v3941_v4 }
 0x124   : > { %3425 = vmatpush1.bf16.msra.mxu1 %v3939_v19 }
 0x125   : > { %2874 = vmatpush1.bf16.msra.mxu0 %v3939_v19  ;;  %3410 = vmatprep.subr.bf16.mxu1 %v3944_v5 }
 0x126   : > { %2875 = vmatprep.subr.bf16.mxu0 %v3944_v5 }
 0x128   : > { %3426 = vmatpush1.bf16.msra.mxu1 %v3942_v7 }
 0x129   : > { %2876 = vmatpush1.bf16.msra.mxu0 %v3942_v7  ;;  %3411 = vmatprep.subr.bf16.mxu1 %v3947_v10 }
 0x12a   : > { %2877 = vmatprep.subr.bf16.mxu0 %v3947_v10 }
 0x12c   : > { %3427 = vmatpush1.bf16.msra.mxu1 %v3945_v11 }
 0x12d   : > { %2878 = vmatpush1.bf16.msra.mxu0 %v3945_v11  ;;  %3412 = vmatprep.subr.bf16.mxu1 %v3950_v12 }
 0x12e   : > { %2879 = vmatprep.subr.bf16.mxu0 %v3950_v12 }
 0x130   : > { %3428 = vmatpush1.bf16.msra.mxu1 %v3948_v13 }
 0x131   : > { %2880 = vmatpush1.bf16.msra.mxu0 %v3948_v13  ;;  %3413 = vmatprep.subr.bf16.mxu1 %v3953_v8 }
 0x132   : > { %2881 = vmatprep.subr.bf16.mxu0 %v3953_v8 }
 0x134   : > { %3429 = vmatpush1.bf16.msra.mxu1 %v3951_v9 }
 0x135   : > { %2882 = vmatpush1.bf16.msra.mxu0 %v3951_v9  ;;  %3414 = vmatprep.subr.bf16.mxu1 %v3956_v15 }
 0x136   : > { %2883 = vmatprep.subr.bf16.mxu0 %v3956_v15 }
 0x138   : > { %3430 = vmatpush1.bf16.msra.mxu1 %v3954_v16 }
 0x139   : > { %2884 = vmatpush1.bf16.msra.mxu0 %v3954_v16  ;;  %3415 = vmatprep.subr.bf16.mxu1 %v3959_v2 }
 0x13a   : > { %2885 = vmatprep.subr.bf16.mxu0 %v3959_v2 }
 0x13c   : > { %3431 = vmatpush1.bf16.msra.mxu1 %v3957_v18 }
 0x13d   : > { %2886 = vmatpush1.bf16.msra.mxu0 %v3957_v18  ;;  %3416 = vmatprep.subr.bf16.mxu1 %v3962_v23 }
 0x13e   : > { %2887 = vmatprep.subr.bf16.mxu0 %v3962_v23 }
 0x140   : > { %3432 = vmatpush1.bf16.msra.mxu1 %v3960_v26 }
 0x141   : > { %2888 = vmatpush1.bf16.msra.mxu0 %v3960_v26  ;;  %3417 = vmatprep.subr.bf16.mxu1 %v3965_v20 }
 0x142   : > { %2889 = vmatprep.subr.bf16.mxu0 %v3965_v20 }
 0x144   : > { %3433 = vmatpush1.bf16.msra.mxu1 %v3963_v6 }
 0x145   : > { %2890 = vmatpush1.bf16.msra.mxu0 %v3963_v6 }
 0x147   : > { %2902 = vmatmul.mubr.bf16.vlgmr.msra.gmra.mrb[8].mxu1 %v3104_v27 }
 0x148   : > { %2892 = vmatmul.mubr.bf16.vlgmr.msra.gmra.mrb[0].mxu0 %v3086_v41 }
 0x1da   : > { %v2638_v30 = vpop.f32.mrb[0].mxu1 }
 0x1db   : > { %v2640_v31 = vpop.f32.mrb[1].mxu1  ;;  %v3434_v17 = vadd.f32 %v2638_v30, %v851_v0 }
 0x1dc   : > { %v2642_v34 = vpop.f32.mrb[2].mxu1  ;;  %v3436_v51 = vadd.f32 %v2640_v31, %v855_v39 }
 0x1dd   : > { %v2644_v36 = vpop.f32.mrb[3].mxu1  ;;  %v3438_v53 = vadd.f32 %v2642_v34, %v851_v0 }
 0x1de   : > { %v3440_v56 = vadd.f32 %v2644_v36, %v855_v39 }
 0x1e2   : > { %v2648_v40 = vpop.f32.mrb[4].mxu1 }
 0x1e3   : > { %v2852_v14 = vpop.f32.mrb[4].mxu0  ;;  %v3442_v24 = vadd.f32 %v2648_v40, %v851_v0  ;;  %v2650_v54 = vpop.f32.mrb[5].mxu1 }
 0x1e4   : > { %v2854_v41 = vpop.f32.mrb[5].mxu0  ;;  %v3445_v21 = vadd.f32 %v2650_v54, %v855_v39  ;;  %v2652_v44 = vpop.f32.mrb[6].mxu1 }
 0x1e5   : > { %v2856_v45 = vpop.f32.mrb[6].mxu0  ;;  %v3443_v46 = vadd.f32 %v3442_v24, %v2852_v14  ;;  %v2653_v47 = vpop.f32.mrb[7].mxu1 }
 0x1e6   : > { %v2857_v48 = vpop.f32.mrb[7].mxu0  ;;  %v3446_v50 = vadd.f32 %v3445_v21, %v2854_v41 }
 0x21a   : > { %v2903_v58 = vpop.f32.mrb[8].mxu1 }
 0x21b   : > { %v2893_v52 = vpop.f32.mrb[0].mxu0  ;;  %v3444_v49 = vadd.f32 %v3443_v46, %v2903_v58  ;;  %v2905_v55 = vpop.f32.mrb[9].mxu1 }
 0x21c   : > { %v3435_v22 = vadd.f32 %v3434_v17, %v2893_v52  ;;  %v2895_v42 = vpop.f32.mrb[1].mxu0  ;;  %v3447_v1 = vadd.f32 %v3446_v50, %v2905_v55  ;;  %v2907_v57 = vpop.f32.mrb[10].mxu1 }
 0x21d   : > { %v3437_v63 = vadd.f32 %v3436_v51, %v2895_v42  ;;  %v2897_v25 = vpop.f32.mrb[2].mxu0  ;;  %v2908_v32 = vpop.f32.mrb[11].mxu1 }
 0x21e   : > { %v3439_v60 = vadd.f32 %v3438_v53, %v2897_v25  ;;  %v2899_v61 = vpop.f32.mrb[3].mxu0  ;;  %v3401_v62 = vpack.c.bf16 %v3447_v1, %v3444_v49 }
 0x21f   : > { %v3399_v33 = vpack.c.bf16 %v3437_v63, %v3435_v22  ;;  %v3441_v59 = vadd.f32 %v3440_v56, %v2899_v61 }
 0x220   : > { %2932 = vst [vmem:[%s270_s21 + $0x10] sm:$0xff] %v3401_v62 }
 0x221   : > { %2930 = vst [vmem:[%s270_s21] sm:$0xff] %v3399_v33  ;;  %v3400_v43 = vpack.c.bf16 %v3441_v59, %v3439_v60 }
 0x223   : > { %2931 = vst [vmem:[%s270_s21 + $0x8] sm:$0xff] %v3400_v43 }
 0x224 PF: > { %s13_s14 = sadd.s32 1, %s3988_s14   ;;  %s5185_s12 = smov %s3984_s13 }
 0x225   : > { %p10_p5 = scmp.ge.s32.totalorder %s13_s14, 6   ;;  %s5186_s13 = smov %s5188_s15 }
 0x227   :  { %12 = sbr.rel (!%p10_p5) target bundleno = 2 (0x2), region = 68 }

</bundles_post_ra>
